<compile_context>
chip_gen: v5e
topology: v5e:2x2
jax: 0.10.0
libtpu: 0.0.40
codegen_flags: <defaults>
</compile_context>

<pallas_src>
import functools

import jax
import jax.numpy as jnp
from jax.experimental import pallas as pl
from jax.experimental.pallas import tpu as pltpu


# ----------------------------------------------------------------------------
# Fused all-levels head kernel (one grid step = one level x one image)
# ----------------------------------------------------------------------------
def _fused_head_kernel(x0_ref, mask_ref, w0_ref, wr_ref, gb_ref, wf_ref,
                       bf_ref, out_ref, h_ref, col_ref, *, Wp, C2, S, gsize):
    """Stacked (conv3x3 -> GN -> ReLU) x S for both branches + final conv+bias.

    x0_ref : (Npad, 9*C0)  bf16 layer-0 im2col of the padded level canvas
    mask_ref: (Npad, 1)    f32, 1.0 at rows that are true conv outputs (G x G)
    w0_ref : (9*C0, 2F)    bf16 layer-0 weight (cate cols ignore coord chans)
    wr_ref : (max(S-1,1), 9*2F, 2F) bf16 block-diag weights for layers >= 1
    gb_ref : (S, 2, 2F)    f32 GN gamma (row 0) / beta (row 1) per layer
    wf_ref : (9*2F, Cfp)   bf16 final conv weight (lane-padded outputs)
    bf_ref : (1, Cfp)      f32 final conv bias
    out_ref: (Npad, Cfp)   f32
    h_ref  : (Next, 2F)    bf16 scratch: flattened zero-padded canvas + tail
    col_ref: (Npad, 9*2F)  bf16 scratch: im2col slab (one MXU dot per conv)
    """
    Npad = Wp * Wp
    Next = Npad + 2 * Wp + 2
    ng = C2 // gsize

    mask = mask_ref[...]                                       # (Npad, 1) f32
    # Per-level GroupNorm element count = G*G*gsize (interior pixels only).
    inv_cnt = 1.0 / (jnp.sum(mask, axis=0, keepdims=True) * gsize)   # (1, 1)

    # Zero only the border/tail rows of the canvas; the interior window is
    # fully overwritten with already-masked activations every layer.  Done
    # every grid step on purpose (scratch is per-core under the parallel grid).
    zeros_border = jnp.zeros((Wp + 1, C2), h_ref.dtype)
    h_ref[0:Wp + 1, :] = zeros_border
    h_ref[Wp + 1 + Npad:Next, :] = zeros_border

    gb = gb_ref[...]                                           # (S, 2, C2) f32

    def group_reduce(v):
        # (1, C2) per-channel sums -> per-channel group sums.
        if gsize == 1:
            return v
        g = v.reshape(ng, gsize).sum(axis=1, keepdims=True)
        return jnp.broadcast_to(g, (ng, gsize)).reshape(1, C2)

    def gn_relu(acc, gamma, beta):
        # acc: (Npad, C2) f32 conv output (garbage at masked-out rows).
        mean = group_reduce(jnp.sum(acc * mask, axis=0, keepdims=True)) * inv_cnt
        dm = (acc - mean) * mask                               # masked & centered
        var = group_reduce(jnp.sum(dm * dm, axis=0, keepdims=True)) * inv_cnt
        ig = jax.lax.rsqrt(var + 1e-5) * gamma
        # masked beta keeps exterior rows at exactly 0 (= conv zero padding).
        return jnp.maximum(dm * ig + beta * mask, 0.0)

    def store_h(y):
        # Offset Wp+1 re-pads the image: output (r, c) -> canvas (r+1, c+1).
        h_ref[Wp + 1:Wp + 1 + Npad, :] = y.astype(h_ref.dtype)

    def build_im2col():
        # 9 row-shifted views of the canvas -> (Npad, 9*C2) slab so each conv
        # is one K=9*C2 MXU matmul instead of nine K=C2 dots.
        for t in range(9):
            d = (t // 3) * Wp + (t % 3)
            col_ref[:, t * C2:(t + 1) * C2] = h_ref[d:d + Npad, :]

    # ---- layer 0 (im2col built host-side; branches fused along lanes) ----
    acc = jnp.dot(x0_ref[...], w0_ref[...], preferred_element_type=jnp.float32)
    store_h(gn_relu(acc, gb[0, 0:1, :], gb[0, 1:2, :]))

    # ---- layers 1 .. S-1 (block-diagonal weights keep branches separate) ----
    for i in range(1, S):
        build_im2col()
        acc = jnp.dot(col_ref[...], wr_ref[i - 1],
                      preferred_element_type=jnp.float32)
        store_h(gn_relu(acc, gb[i, 0:1, :], gb[i, 1:2, :]))

    # ---- final 3x3 conv + bias for both heads (lane-padded output) ----
    build_im2col()
    out = jnp.dot(col_ref[...], wf_ref[...],
                  preferred_element_type=jnp.float32) + bf_ref[...]
    out_ref[...] = out


# ----------------------------------------------------------------------------
# Plain-JAX glue (matches torch semantics)
# ----------------------------------------------------------------------------
def _bilinear_resize_nchw(x, out_h, out_w):
    """F.interpolate(..., mode='bilinear', align_corners=False) equivalent."""
    N, C, H, W = x.shape

    def src_idx(out_size, in_size):
        scale = in_size / out_size
        s = (jnp.arange(out_size, dtype=jnp.float32) + 0.5) * scale - 0.5
        s = jnp.maximum(s, 0.0)
        i0 = jnp.floor(s).astype(jnp.int32)
        i0 = jnp.minimum(i0, in_size - 1)
        i1 = jnp.minimum(i0 + 1, in_size - 1)
        frac = s - i0.astype(jnp.float32)
        return i0, i1, frac

    y0, y1, wy = src_idx(out_h, H)
    x0, x1, wx = src_idx(out_w, W)
    wy = wy[:, None]
    wx = wx[None, :]
    top = x[:, :, y0, :][..., x0] * (1 - wx) + x[:, :, y0, :][..., x1] * wx
    bot = x[:, :, y1, :][..., x0] * (1 - wx) + x[:, :, y1, :][..., x1] * wx
    return top * (1 - wy) + bot * wy


def points_nms(heat, kernel=2):
    hmax = jax.lax.reduce_window(
        heat, -jnp.inf, jax.lax.max,
        window_dimensions=(1, 1, kernel, kernel),
        window_strides=(1, 1, 1, 1),
        padding=((0, 0), (0, 0), (1, 1), (1, 1)))
    keep = (hmax[:, :, :-1, :-1] == heat).astype(heat.dtype)
    return heat * keep


# ----------------------------------------------------------------------------
# Whole-forward path: coord concat + resize + layer-0 im2col (XLA) feeding one
# fused Pallas head kernel over all levels.
# ----------------------------------------------------------------------------
@functools.partial(jax.jit,
                   static_argnames=("grids", "F", "S", "gsize", "Kout", "Cate"))
def _forward_all(feats, w0, w_rest, gb_all, w_fin, b_fin, *,
                 grids, F, S, gsize, Kout, Cate):
    L = len(grids)
    N, C, _, _ = feats[0].shape
    C0 = C + 2
    Gmax = max(grids)
    Wp = Gmax + 2                 # padded canvas width (shared by all levels)
    Npad = Wp * Wp
    Next = Npad + 2 * Wp + 2
    C2 = 2 * F
    Cfin = Kout + Cate
    Cfp = b_fin.shape[-1]

    rows = jnp.arange(Npad)
    x0_levels, mask_levels = [], []
    for G, x in zip(grids, feats):
        xf = x.astype(jnp.float32)
        _, _, H, W = x.shape
        # Coord features: channel C is x (varies along W), channel C+1 is y.
        x_range = jnp.linspace(-1.0, 1.0, W, dtype=jnp.float32)
        y_range = jnp.linspace(-1.0, 1.0, H, dtype=jnp.float32)
        xx, yy = jnp.meshgrid(x_range, y_range)                 # 'xy' -> (H, W)
        coord = jnp.broadcast_to(jnp.stack([xx, yy], 0)[None], (N, 2, H, W))
        kernel_feat = jnp.concatenate([xf, coord], axis=1)      # (N, C0, H, W)
        kf = _bilinear_resize_nchw(kernel_feat, G, G)           # (N, C0, G, G)
        kf = jnp.transpose(kf, (0, 2, 3, 1))                    # (N, G, G, C0)
        # GxG image placed at rows/cols 1..G of a (Wp+2)x(Wp+2) zero canvas.
        kf = jnp.pad(kf, ((0, 0), (1, Wp + 1 - G), (1, Wp + 1 - G), (0, 0)))
        # Layer-0 im2col over the Wp x Wp output grid (tiny; done in XLA).
        taps = [kf[:, ky:ky + Wp, kx:kx + Wp, :].reshape(N, Npad, C0)
                for ky in range(3) for kx in range(3)]
        x0_levels.append(jnp.concatenate(taps, axis=-1))        # (N, Npad, 9*C0)
        m = (((rows % Wp) < G) & ((rows // Wp) < G)).astype(jnp.float32)
        mask_levels.append(m.reshape(Npad, 1))
    x0_all = jnp.stack(x0_levels, 0).astype(jnp.bfloat16)       # (L, N, Npad, 9*C0)
    mask_all = jnp.stack(mask_levels, 0)                        # (L, Npad, 1)

    kern = functools.partial(_fused_head_kernel, Wp=Wp, C2=C2, S=S, gsize=gsize)
    out = pl.pallas_call(
        kern,
        out_shape=jax.ShapeDtypeStruct((L, N, Npad, Cfp), jnp.float32),
        grid=(L, N),
        in_specs=[
            pl.BlockSpec((None, None, Npad, 9 * C0), lambda l, n: (l, n, 0, 0)),
            pl.BlockSpec((None, Npad, 1), lambda l, n: (l, 0, 0)),
            pl.BlockSpec((9 * C0, C2), lambda l, n: (0, 0)),
            pl.BlockSpec(w_rest.shape, lambda l, n: (0, 0, 0)),
            pl.BlockSpec(gb_all.shape, lambda l, n: (0, 0, 0)),
            pl.BlockSpec((9 * C2, Cfp), lambda l, n: (0, 0)),
            pl.BlockSpec((1, Cfp), lambda l, n: (0, 0)),
        ],
        out_specs=pl.BlockSpec((None, None, Npad, Cfp),
                               lambda l, n: (l, n, 0, 0)),
        scratch_shapes=[pltpu.VMEM((Next, C2), jnp.bfloat16),
                        pltpu.VMEM((Npad, 9 * C2), jnp.bfloat16)],
        compiler_params=pltpu.CompilerParams(
            dimension_semantics=("parallel", "parallel")),
    )(x0_all, mask_all, w0, w_rest, gb_all, w_fin, b_fin)

    # True conv outputs sit at the top-left GxG corner of the padded grid.
    out = out.reshape(L, N, Wp, Wp, Cfp)
    cate_preds, kernel_preds = [], []
    for li, G in enumerate(grids):
        o = out[li, :, :G, :G, :]                               # (N, G, G, Cfp)
        kernel_preds.append(jnp.transpose(o[..., :Kout], (0, 3, 1, 2)))   # NCHW
        cate_preds.append(jnp.transpose(o[..., Kout:Cfin], (0, 3, 1, 2)))  # NCHW
    return tuple(cate_preds), tuple(kernel_preds)


# ----------------------------------------------------------------------------
# Head
# ----------------------------------------------------------------------------
class SOLOPv1HeadPallas:
    def __init__(self, num_classes, in_channels, seg_feat_channels=32,
                 stacked_convs=2, num_grids=(12, 10, 8), ins_out_channels=16,
                 key=None):
        self.num_classes = num_classes
        self.cate_out_channels = num_classes
        self.in_channels = in_channels
        self.seg_feat_channels = seg_feat_channels
        self.stacked_convs = stacked_convs
        self.seg_num_grids = tuple(num_grids)
        self.ins_out_channels = ins_out_channels
        self.kernel_out_channels = ins_out_channels  # * 1 * 1
        self.num_groups = 32
        assert seg_feat_channels % self.num_groups == 0
        self.gsize = seg_feat_channels // self.num_groups
        assert stacked_convs >= 1

        if key is None:
            key = jax.random.PRNGKey(0)
        keys = jax.random.split(key, 2 * stacked_convs + 2)

        def conv_w(k, cout, cin):
            # init_weights(): nn.init.normal_(weight, 0, 0.01)
            return 0.01 * jax.random.normal(k, (cout, cin, 3, 3), jnp.float32)

        self.kernel_convs = []
        self.cate_convs = []
        for i in range(stacked_convs):
            chn_k = in_channels + 2 if i == 0 else seg_feat_channels
            chn_c = in_channels if i == 0 else seg_feat_channels
            wk = conv_w(keys[2 * i], seg_feat_channels, chn_k)
            wc = conv_w(keys[2 * i + 1], seg_feat_channels, chn_c)
            ones = jnp.ones((seg_feat_channels,), jnp.float32)
            zeros = jnp.zeros((seg_feat_channels,), jnp.float32)
            self.kernel_convs.append((wk, ones, zeros))  # (weight, gamma, beta)
            self.cate_convs.append((wc, ones, zeros))
        self.solo_cate_w = conv_w(keys[-2], self.cate_out_channels,
                                  seg_feat_channels)
        self.solo_cate_b = jnp.zeros((self.cate_out_channels,), jnp.float32)
        self.solo_kernel_w = conv_w(keys[-1], self.kernel_out_channels,
                                    seg_feat_channels)
        self.solo_kernel_b = jnp.zeros((self.kernel_out_channels,), jnp.float32)

        self._pack_params()

    # -- pack per-layer weights into the fused-kernel layout (done once) ------
    def _pack_params(self):
        F = self.seg_feat_channels
        cin = self.in_channels
        C0 = cin + 2
        S = self.stacked_convs
        C2 = 2 * F
        Kout = self.kernel_out_channels
        Cate = self.cate_out_channels
        Cfin = Kout + Cate
        Cfp = ((Cfin + 31) // 32) * 32      # lane-pad the final output channels

        def khwio(w):  # OIHW -> (3, 3, cin, cout)
            return jnp.transpose(w, (2, 3, 1, 0)).astype(jnp.float32)

        # layer 0: cate columns only see the first `cin` input channels (the
        # coord channels are zeroed), exactly matching kernel_feat[:, :-2].
        wk0 = khwio(self.kernel_convs[0][0])                    # (3,3,C0,F)
        wc0 = jnp.zeros((3, 3, C0, F), jnp.float32)
        wc0 = wc0.at[:, :, :cin, :].set(khwio(self.cate_convs[0][0]))
        self.w0 = jnp.concatenate([wk0, wc0], axis=-1).reshape(
            9 * C0, C2).astype(jnp.bfloat16)

        rest = []
        for i in range(1, S):
            blk = jnp.zeros((3, 3, C2, C2), jnp.float32)
            blk = blk.at[:, :, :F, :F].set(khwio(self.kernel_convs[i][0]))
            blk = blk.at[:, :, F:, F:].set(khwio(self.cate_convs[i][0]))
            rest.append(blk.reshape(9 * C2, C2))
        self.w_rest = (jnp.stack(rest, axis=0) if rest
                       else jnp.zeros((1, 9 * C2, C2),
                                      jnp.float32)).astype(jnp.bfloat16)

        gb = []
        for i in range(S):
            _, gk, bk = self.kernel_convs[i]
            _, gc, bc = self.cate_convs[i]
            gb.append(jnp.stack([jnp.concatenate([gk, gc]),
                                 jnp.concatenate([bk, bc])], axis=0))
        self.gb_all = jnp.stack(gb, axis=0)                     # (S, 2, C2) f32

        wfin = jnp.zeros((3, 3, C2, Cfp), jnp.float32)
        wfin = wfin.at[:, :, :F, :Kout].set(khwio(self.solo_kernel_w))
        wfin = wfin.at[:, :, F:, Kout:Cfin].set(khwio(self.solo_cate_w))
        self.w_fin = wfin.reshape(9 * C2, Cfp).astype(jnp.bfloat16)
        bfin = jnp.zeros((Cfp,), jnp.float32)
        bfin = bfin.at[:Kout].set(self.solo_kernel_b)
        bfin = bfin.at[Kout:Cfin].set(self.solo_cate_b)
        self.b_fin = bfin.reshape(1, Cfp)

    # -------------------------------------------------------------------------
    def split_feats(self, feats):
        # use_same_feats=True path
        return (feats[0], feats[1], feats[2])

    def forward(self, feats, eval=False):
        new_feats = self.split_feats(feats)
        cate_preds, kernel_preds = _forward_all(
            tuple(new_feats), self.w0, self.w_rest, self.gb_all, self.w_fin,
            self.b_fin, grids=self.seg_num_grids, F=self.seg_feat_channels,
            S=self.stacked_convs, gsize=self.gsize,
            Kout=self.kernel_out_channels, Cate=self.cate_out_channels)
        cate_preds = list(cate_preds)
        kernel_preds = list(kernel_preds)
        if eval:
            cate_preds = [jnp.transpose(points_nms(jax.nn.sigmoid(c), kernel=2),
                                        (0, 2, 3, 1)) for c in cate_preds]
        return cate_preds, kernel_preds

    def forward_single(self, x, idx, eval=False):
        cate_preds, kernel_preds = _forward_all(
            (x,), self.w0, self.w_rest, self.gb_all, self.w_fin, self.b_fin,
            grids=(self.seg_num_grids[idx],), F=self.seg_feat_channels,
            S=self.stacked_convs, gsize=self.gsize,
            Kout=self.kernel_out_channels, Cate=self.cate_out_channels)
        cate_pred, kernel_pred = cate_preds[0], kernel_preds[0]
        if eval:
            cate_pred = jnp.transpose(
                points_nms(jax.nn.sigmoid(cate_pred), kernel=2), (0, 2, 3, 1))
        return cate_pred, kernel_pred


# TODO(synk): loss()/get_seg()/solov2_target_single() use scipy.ndimage and
# data-dependent python control flow (target assignment, matrix NMS); they are
# not part of the forward pass and are not translated to Pallas.

if __name__ == "__main__":
    root = jax.random.PRNGKey(0)
    k_params, k0, k1, k2 = jax.random.split(root, 4)

    num_classes = 4
    in_channels = 8
    head = SOLOPv1HeadPallas(num_classes=num_classes,
                             in_channels=in_channels,
                             seg_feat_channels=32,
                             stacked_convs=2,
                             num_grids=(12, 10, 8),
                             ins_out_channels=16,
                             key=k_params)

    feats = (
        jax.random.normal(k0, (2, in_channels, 16, 16), jnp.float32),
        jax.random.normal(k1, (2, in_channels, 8, 8), jnp.float32),
        jax.random.normal(k2, (2, in_channels, 4, 4), jnp.float32),
    )

    cate_preds, kernel_preds = head.forward(feats, eval=False)
    for c, k in zip(cate_preds, kernel_preds):
        jax.block_until_ready(c)
        jax.block_until_ready(k)

    # sanity on shapes: cate (N, num_classes, G, G), kernel (N, ins_out, G, G)
    assert cate_preds[0].shape == (2, num_classes, 12, 12)
    assert kernel_preds[0].shape == (2, 16, 12, 12)
    assert cate_preds[1].shape == (2, num_classes, 10, 10)
    assert kernel_preds[2].shape == (2, 16, 8, 8)

    print("KERNEL_OK")
</pallas_src>

<mosaic_0001>
module attributes {stable_mosaic.version = 11 : i64} {
  func.func @_fused_head_kernel(%arg0: i32, %arg1: i32, %arg2: memref<1x1x196x90xbf16, #tpu.memory_space<vmem>>, %arg3: memref<1x196x1xf32, #tpu.memory_space<vmem>>, %arg4: memref<90x64xbf16, #tpu.memory_space<vmem>>, %arg5: memref<1x576x64xbf16, #tpu.memory_space<vmem>>, %arg6: memref<2x2x64xf32, #tpu.memory_space<vmem>>, %arg7: memref<576x32xbf16, #tpu.memory_space<vmem>>, %arg8: memref<1x32xf32, #tpu.memory_space<vmem>>, %arg9: memref<1x1x196x32xf32, #tpu.memory_space<vmem>>, %arg10: memref<226x64xbf16, #tpu.memory_space<vmem>>, %arg11: memref<196x576xbf16, #tpu.memory_space<vmem>>) attributes {dimension_semantics = [#tpu.dimension_semantics<parallel>, #tpu.dimension_semantics<parallel>], iteration_bounds = array<i64: 3, 2>, scalar_prefetch = 0 : i64, scratch_operands = 2 : i64, tpu.core_type = #tpu.core_type<tc>, window_params = [{transform_indices = @transform_0, window_bounds = array<i64: 1, 1, 196, 90>}, {transform_indices = @transform_1, window_bounds = array<i64: 1, 196, 1>}, {pipeline_mode = #tpu.pipeline_mode<synchronous>, transform_indices = @transform_2, window_bounds = array<i64: 90, 64>}, {pipeline_mode = #tpu.pipeline_mode<synchronous>, transform_indices = @transform_3, window_bounds = array<i64: 1, 576, 64>}, {pipeline_mode = #tpu.pipeline_mode<synchronous>, transform_indices = @transform_4, window_bounds = array<i64: 2, 2, 64>}, {pipeline_mode = #tpu.pipeline_mode<synchronous>, transform_indices = @transform_5, window_bounds = array<i64: 576, 32>}, {pipeline_mode = #tpu.pipeline_mode<synchronous>, transform_indices = @transform_6, window_bounds = array<i64: 1, 32>}, {transform_indices = @transform_7, window_bounds = array<i64: 1, 1, 196, 32>}]} {
    %c0 = arith.constant 0 : index
    %c0_0 = arith.constant 0 : index
    %c0_1 = arith.constant 0 : index
    %0 = vector.load %arg3[%c0, %c0_0, %c0_1] : memref<1x196x1xf32, #tpu.memory_space<vmem>>, vector<1x196x1xf32>
    %1 = vector.shape_cast %0 : vector<1x196x1xf32> to vector<196x1xf32>
    %cst = arith.constant dense<0.000000e+00> : vector<1xf32>
    %2 = vector.multi_reduction <add>, %1, %cst [0] : vector<196x1xf32> to vector<1xf32>
    %3 = vector.shape_cast %2 : vector<1xf32> to vector<1x1xf32>
    %cst_2 = arith.constant 1.000000e+00 : f32
    %4 = vector.broadcast %cst_2 : f32 to vector<1x1xf32>
    %5 = arith.mulf %3, %4 : vector<1x1xf32>
    %cst_3 = arith.constant 1.000000e+00 : f32
    %6 = vector.broadcast %cst_3 : f32 to vector<1x1xf32>
    %7 = arith.divf %6, %5 : vector<1x1xf32>
    %cst_4 = arith.constant 0.000000e+00 : bf16
    %8 = vector.broadcast %cst_4 : bf16 to vector<15x64xbf16>
    %c0_5 = arith.constant 0 : index
    %c0_6 = arith.constant 0 : index
    %9 = vector.load %arg10[%c0_5, %c0_6] : memref<226x64xbf16, #tpu.memory_space<vmem>>, vector<15x64xbf16>
    tpu.vector_store %arg10[%c0_5, %c0_6], %8 {strides = array<i32>} : memref<226x64xbf16, #tpu.memory_space<vmem>>, vector<15x64xbf16>,
    %c211 = arith.constant 211 : index
    %c0_7 = arith.constant 0 : index
    %10 = vector.load %arg10[%c211, %c0_7] : memref<226x64xbf16, #tpu.memory_space<vmem>>, vector<15x64xbf16>
    tpu.vector_store %arg10[%c211, %c0_7], %8 {strides = array<i32>} : memref<226x64xbf16, #tpu.memory_space<vmem>>, vector<15x64xbf16>,
    %c0_8 = arith.constant 0 : index
    %c0_9 = arith.constant 0 : index
    %c0_10 = arith.constant 0 : index
    %11 = vector.load %arg6[%c0_8, %c0_9, %c0_10] : memref<2x2x64xf32, #tpu.memory_space<vmem>>, vector<2x2x64xf32>
    %c0_11 = arith.constant 0 : index
    %c0_12 = arith.constant 0 : index
    %c0_13 = arith.constant 0 : index
    %c0_14 = arith.constant 0 : index
    %12 = vector.load %arg2[%c0_11, %c0_12, %c0_13, %c0_14] : memref<1x1x196x90xbf16, #tpu.memory_space<vmem>>, vector<1x1x196x90xbf16>
    %13 = vector.shape_cast %12 : vector<1x1x196x90xbf16> to vector<196x90xbf16>
    %c0_15 = arith.constant 0 : index
    %c0_16 = arith.constant 0 : index
    %14 = vector.load %arg4[%c0_15, %c0_16] : memref<90x64xbf16, #tpu.memory_space<vmem>>, vector<90x64xbf16>
    %cst_17 = arith.constant dense<0.000000e+00> : vector<196x64xf32>
    %15 = tpu.matmul %13, %14, %cst_17 {dimension_numbers = #tpu.dot_dimension_numbers<[1], [0], [0], [1], [0, 0, 1, 1], [], []>} : vector<196x90xbf16>, vector<90x64xbf16>, vector<196x64xf32> -> vector<196x64xf32>
    %16 = vector.extract_strided_slice %11 {offsets = [0, 0, 0], sizes = [1, 1, 64], strides = [1, 1, 1]} : vector<2x2x64xf32> to vector<1x1x64xf32>
    %17 = vector.shape_cast %16 : vector<1x1x64xf32> to vector<1x64xf32>
    %18 = vector.extract_strided_slice %11 {offsets = [0, 1, 0], sizes = [1, 1, 64], strides = [1, 1, 1]} : vector<2x2x64xf32> to vector<1x1x64xf32>
    %19 = vector.shape_cast %18 : vector<1x1x64xf32> to vector<1x64xf32>
    %20 = vector.broadcast %1 : vector<196x1xf32> to vector<196x64xf32>
    %21 = arith.mulf %15, %20 : vector<196x64xf32>
    %cst_18 = arith.constant dense<0.000000e+00> : vector<64xf32>
    %22 = vector.multi_reduction <add>, %21, %cst_18 [0] : vector<196x64xf32> to vector<64xf32>
    %23 = vector.shape_cast %22 : vector<64xf32> to vector<1x64xf32>
    %24 = vector.broadcast %7 : vector<1x1xf32> to vector<1x64xf32>
    %25 = arith.mulf %23, %24 : vector<1x64xf32>
    %26 = vector.broadcast %25 : vector<1x64xf32> to vector<196x64xf32>
    %27 = arith.subf %15, %26 : vector<196x64xf32>
    %28 = vector.broadcast %1 : vector<196x1xf32> to vector<196x64xf32>
    %29 = arith.mulf %27, %28 : vector<196x64xf32>
    %30 = arith.mulf %29, %29 : vector<196x64xf32>
    %cst_19 = arith.constant dense<0.000000e+00> : vector<64xf32>
    %31 = vector.multi_reduction <add>, %30, %cst_19 [0] : vector<196x64xf32> to vector<64xf32>
    %32 = vector.shape_cast %31 : vector<64xf32> to vector<1x64xf32>
    %33 = vector.broadcast %7 : vector<1x1xf32> to vector<1x64xf32>
    %34 = arith.mulf %32, %33 : vector<1x64xf32>
    %cst_20 = arith.constant 9.99999974E-6 : f32
    %35 = vector.broadcast %cst_20 : f32 to vector<1x64xf32>
    %36 = arith.addf %34, %35 : vector<1x64xf32>
    %37 = math.rsqrt %36 : vector<1x64xf32>
    %38 = arith.mulf %37, %17 : vector<1x64xf32>
    %39 = vector.broadcast %38 : vector<1x64xf32> to vector<196x64xf32>
    %40 = arith.mulf %29, %39 : vector<196x64xf32>
    %41 = vector.broadcast %19 : vector<1x64xf32> to vector<196x64xf32>
    %42 = vector.broadcast %1 : vector<196x1xf32> to vector<196x64xf32>
    %43 = arith.mulf %41, %42 : vector<196x64xf32>
    %44 = arith.addf %40, %43 : vector<196x64xf32>
    %cst_21 = arith.constant 0.000000e+00 : f32
    %45 = vector.broadcast %cst_21 : f32 to vector<196x64xf32>
    %46 = arith.maximumf %44, %45 : vector<196x64xf32>
    %47 = arith.truncf %46 : vector<196x64xf32> to vector<196x64xbf16>
    %c15 = arith.constant 15 : index
    %c0_22 = arith.constant 0 : index
    %48 = vector.load %arg10[%c15, %c0_22] : memref<226x64xbf16, #tpu.memory_space<vmem>>, vector<196x64xbf16>
    tpu.vector_store %arg10[%c15, %c0_22], %47 {strides = array<i32>} : memref<226x64xbf16, #tpu.memory_space<vmem>>, vector<196x64xbf16>,
    %c0_23 = arith.constant 0 : index
    %c0_24 = arith.constant 0 : index
    %49 = vector.load %arg10[%c0_23, %c0_24] : memref<226x64xbf16, #tpu.memory_space<vmem>>, vector<196x64xbf16>
    %c0_25 = arith.constant 0 : index
    %c0_26 = arith.constant 0 : index
    %50 = vector.load %arg11[%c0_25, %c0_26] : memref<196x576xbf16, #tpu.memory_space<vmem>>, vector<196x64xbf16>
    tpu.vector_store %arg11[%c0_25, %c0_26], %49 {strides = array<i32>} : memref<196x576xbf16, #tpu.memory_space<vmem>>, vector<196x64xbf16>,
    %c1 = arith.constant 1 : index
    %c0_27 = arith.constant 0 : index
    %51 = vector.load %arg10[%c1, %c0_27] : memref<226x64xbf16, #tpu.memory_space<vmem>>, vector<196x64xbf16>
    %c0_28 = arith.constant 0 : index
    %c64 = arith.constant 64 : index
    %52 = vector.load %arg11[%c0_28, %c64] : memref<196x576xbf16, #tpu.memory_space<vmem>>, vector<196x64xbf16>
    tpu.vector_store %arg11[%c0_28, %c64], %51 {strides = array<i32>} : memref<196x576xbf16, #tpu.memory_space<vmem>>, vector<196x64xbf16>,
    %c2 = arith.constant 2 : index
    %c0_29 = arith.constant 0 : index
    %53 = vector.load %arg10[%c2, %c0_29] : memref<226x64xbf16, #tpu.memory_space<vmem>>, vector<196x64xbf16>
    %c0_30 = arith.constant 0 : index
    %c128 = arith.constant 128 : index
    %54 = vector.load %arg11[%c0_30, %c128] : memref<196x576xbf16, #tpu.memory_space<vmem>>, vector<196x64xbf16>
    tpu.vector_store %arg11[%c0_30, %c128], %53 {strides = array<i32>} : memref<196x576xbf16, #tpu.memory_space<vmem>>, vector<196x64xbf16>,
    %c14 = arith.constant 14 : index
    %c0_31 = arith.constant 0 : index
    %55 = vector.load %arg10[%c14, %c0_31] : memref<226x64xbf16, #tpu.memory_space<vmem>>, vector<196x64xbf16>
    %c0_32 = arith.constant 0 : index
    %c192 = arith.constant 192 : index
    %56 = vector.load %arg11[%c0_32, %c192] : memref<196x576xbf16, #tpu.memory_space<vmem>>, vector<196x64xbf16>
    tpu.vector_store %arg11[%c0_32, %c192], %55 {strides = array<i32>} : memref<196x576xbf16, #tpu.memory_space<vmem>>, vector<196x64xbf16>,
    %c15_33 = arith.constant 15 : index
    %c0_34 = arith.constant 0 : index
    %57 = vector.load %arg10[%c15_33, %c0_34] : memref<226x64xbf16, #tpu.memory_space<vmem>>, vector<196x64xbf16>
    %c0_35 = arith.constant 0 : index
    %c256 = arith.constant 256 : index
    %58 = vector.load %arg11[%c0_35, %c256] : memref<196x576xbf16, #tpu.memory_space<vmem>>, vector<196x64xbf16>
    tpu.vector_store %arg11[%c0_35, %c256], %57 {strides = array<i32>} : memref<196x576xbf16, #tpu.memory_space<vmem>>, vector<196x64xbf16>,
    %c16 = arith.constant 16 : index
    %c0_36 = arith.constant 0 : index
    %59 = vector.load %arg10[%c16, %c0_36] : memref<226x64xbf16, #tpu.memory_space<vmem>>, vector<196x64xbf16>
    %c0_37 = arith.constant 0 : index
    %c320 = arith.constant 320 : index
    %60 = vector.load %arg11[%c0_37, %c320] : memref<196x576xbf16, #tpu.memory_space<vmem>>, vector<196x64xbf16>
    tpu.vector_store %arg11[%c0_37, %c320], %59 {strides = array<i32>} : memref<196x576xbf16, #tpu.memory_space<vmem>>, vector<196x64xbf16>,
    %c28 = arith.constant 28 : index
    %c0_38 = arith.constant 0 : index
    %61 = vector.load %arg10[%c28, %c0_38] : memref<226x64xbf16, #tpu.memory_space<vmem>>, vector<196x64xbf16>
    %c0_39 = arith.constant 0 : index
    %c384 = arith.constant 384 : index
    %62 = vector.load %arg11[%c0_39, %c384] : memref<196x576xbf16, #tpu.memory_space<vmem>>, vector<196x64xbf16>
    tpu.vector_store %arg11[%c0_39, %c384], %61 {strides = array<i32>} : memref<196x576xbf16, #tpu.memory_space<vmem>>, vector<196x64xbf16>,
    %c29 = arith.constant 29 : index
    %c0_40 = arith.constant 0 : index
    %63 = vector.load %arg10[%c29, %c0_40] : memref<226x64xbf16, #tpu.memory_space<vmem>>, vector<196x64xbf16>
    %c0_41 = arith.constant 0 : index
    %c448 = arith.constant 448 : index
    %64 = vector.load %arg11[%c0_41, %c448] : memref<196x576xbf16, #tpu.memory_space<vmem>>, vector<196x64xbf16>
    tpu.vector_store %arg11[%c0_41, %c448], %63 {strides = array<i32>} : memref<196x576xbf16, #tpu.memory_space<vmem>>, vector<196x64xbf16>,
    %c30 = arith.constant 30 : index
    %c0_42 = arith.constant 0 : index
    %65 = vector.load %arg10[%c30, %c0_42] : memref<226x64xbf16, #tpu.memory_space<vmem>>, vector<196x64xbf16>
    %c0_43 = arith.constant 0 : index
    %c512 = arith.constant 512 : index
    %66 = vector.load %arg11[%c0_43, %c512] : memref<196x576xbf16, #tpu.memory_space<vmem>>, vector<196x64xbf16>
    tpu.vector_store %arg11[%c0_43, %c512], %65 {strides = array<i32>} : memref<196x576xbf16, #tpu.memory_space<vmem>>, vector<196x64xbf16>,
    %c0_44 = arith.constant 0 : index
    %c0_45 = arith.constant 0 : index
    %67 = vector.load %arg11[%c0_44, %c0_45] : memref<196x576xbf16, #tpu.memory_space<vmem>>, vector<196x576xbf16>
    %c0_46 = arith.constant 0 : index
    %c0_47 = arith.constant 0 : index
    %c0_48 = arith.constant 0 : index
    %68 = vector.load %arg5[%c0_46, %c0_47, %c0_48] : memref<1x576x64xbf16, #tpu.memory_space<vmem>>, vector<1x576x64xbf16>
    %69 = vector.shape_cast %68 : vector<1x576x64xbf16> to vector<576x64xbf16>
    %cst_49 = arith.constant dense<0.000000e+00> : vector<196x64xf32>
    %70 = tpu.matmul %67, %69, %cst_49 {dimension_numbers = #tpu.dot_dimension_numbers<[1], [0], [0], [1], [0, 0, 1, 1], [], []>} : vector<196x576xbf16>, vector<576x64xbf16>, vector<196x64xf32> -> vector<196x64xf32>
    %71 = vector.extract_strided_slice %11 {offsets = [1, 0, 0], sizes = [1, 1, 64], strides = [1, 1, 1]} : vector<2x2x64xf32> to vector<1x1x64xf32>
    %72 = vector.shape_cast %71 : vector<1x1x64xf32> to vector<1x64xf32>
    %73 = vector.extract_strided_slice %11 {offsets = [1, 1, 0], sizes = [1, 1, 64], strides = [1, 1, 1]} : vector<2x2x64xf32> to vector<1x1x64xf32>
    %74 = vector.shape_cast %73 : vector<1x1x64xf32> to vector<1x64xf32>
    %75 = vector.broadcast %1 : vector<196x1xf32> to vector<196x64xf32>
    %76 = arith.mulf %70, %75 : vector<196x64xf32>
    %cst_50 = arith.constant dense<0.000000e+00> : vector<64xf32>
    %77 = vector.multi_reduction <add>, %76, %cst_50 [0] : vector<196x64xf32> to vector<64xf32>
    %78 = vector.shape_cast %77 : vector<64xf32> to vector<1x64xf32>
    %79 = vector.broadcast %7 : vector<1x1xf32> to vector<1x64xf32>
    %80 = arith.mulf %78, %79 : vector<1x64xf32>
    %81 = vector.broadcast %80 : vector<1x64xf32> to vector<196x64xf32>
    %82 = arith.subf %70, %81 : vector<196x64xf32>
    %83 = vector.broadcast %1 : vector<196x1xf32> to vector<196x64xf32>
    %84 = arith.mulf %82, %83 : vector<196x64xf32>
    %85 = arith.mulf %84, %84 : vector<196x64xf32>
    %cst_51 = arith.constant dense<0.000000e+00> : vector<64xf32>
    %86 = vector.multi_reduction <add>, %85, %cst_51 [0] : vector<196x64xf32> to vector<64xf32>
    %87 = vector.shape_cast %86 : vector<64xf32> to vector<1x64xf32>
    %88 = vector.broadcast %7 : vector<1x1xf32> to vector<1x64xf32>
    %89 = arith.mulf %87, %88 : vector<1x64xf32>
    %cst_52 = arith.constant 9.99999974E-6 : f32
    %90 = vector.broadcast %cst_52 : f32 to vector<1x64xf32>
    %91 = arith.addf %89, %90 : vector<1x64xf32>
    %92 = math.rsqrt %91 : vector<1x64xf32>
    %93 = arith.mulf %92, %72 : vector<1x64xf32>
    %94 = vector.broadcast %93 : vector<1x64xf32> to vector<196x64xf32>
    %95 = arith.mulf %84, %94 : vector<196x64xf32>
    %96 = vector.broadcast %74 : vector<1x64xf32> to vector<196x64xf32>
    %97 = vector.broadcast %1 : vector<196x1xf32> to vector<196x64xf32>
    %98 = arith.mulf %96, %97 : vector<196x64xf32>
    %99 = arith.addf %95, %98 : vector<196x64xf32>
    %cst_53 = arith.constant 0.000000e+00 : f32
    %100 = vector.broadcast %cst_53 : f32 to vector<196x64xf32>
    %101 = arith.maximumf %99, %100 : vector<196x64xf32>
    %102 = arith.truncf %101 : vector<196x64xf32> to vector<196x64xbf16>
    %c15_54 = arith.constant 15 : index
    %c0_55 = arith.constant 0 : index
    %103 = vector.load %arg10[%c15_54, %c0_55] : memref<226x64xbf16, #tpu.memory_space<vmem>>, vector<196x64xbf16>
    tpu.vector_store %arg10[%c15_54, %c0_55], %102 {strides = array<i32>} : memref<226x64xbf16, #tpu.memory_space<vmem>>, vector<196x64xbf16>,
    %c0_56 = arith.constant 0 : index
    %c0_57 = arith.constant 0 : index
    %104 = vector.load %arg10[%c0_56, %c0_57] : memref<226x64xbf16, #tpu.memory_space<vmem>>, vector<196x64xbf16>
    %c0_58 = arith.constant 0 : index
    %c0_59 = arith.constant 0 : index
    %105 = vector.load %arg11[%c0_58, %c0_59] : memref<196x576xbf16, #tpu.memory_space<vmem>>, vector<196x64xbf16>
    tpu.vector_store %arg11[%c0_58, %c0_59], %104 {strides = array<i32>} : memref<196x576xbf16, #tpu.memory_space<vmem>>, vector<196x64xbf16>,
    %c1_60 = arith.constant 1 : index
    %c0_61 = arith.constant 0 : index
    %106 = vector.load %arg10[%c1_60, %c0_61] : memref<226x64xbf16, #tpu.memory_space<vmem>>, vector<196x64xbf16>
    %c0_62 = arith.constant 0 : index
    %c64_63 = arith.constant 64 : index
    %107 = vector.load %arg11[%c0_62, %c64_63] : memref<196x576xbf16, #tpu.memory_space<vmem>>, vector<196x64xbf16>
    tpu.vector_store %arg11[%c0_62, %c64_63], %106 {strides = array<i32>} : memref<196x576xbf16, #tpu.memory_space<vmem>>, vector<196x64xbf16>,
    %c2_64 = arith.constant 2 : index
    %c0_65 = arith.constant 0 : index
    %108 = vector.load %arg10[%c2_64, %c0_65] : memref<226x64xbf16, #tpu.memory_space<vmem>>, vector<196x64xbf16>
    %c0_66 = arith.constant 0 : index
    %c128_67 = arith.constant 128 : index
    %109 = vector.load %arg11[%c0_66, %c128_67] : memref<196x576xbf16, #tpu.memory_space<vmem>>, vector<196x64xbf16>
    tpu.vector_store %arg11[%c0_66, %c128_67], %108 {strides = array<i32>} : memref<196x576xbf16, #tpu.memory_space<vmem>>, vector<196x64xbf16>,
    %c14_68 = arith.constant 14 : index
    %c0_69 = arith.constant 0 : index
    %110 = vector.load %arg10[%c14_68, %c0_69] : memref<226x64xbf16, #tpu.memory_space<vmem>>, vector<196x64xbf16>
    %c0_70 = arith.constant 0 : index
    %c192_71 = arith.constant 192 : index
    %111 = vector.load %arg11[%c0_70, %c192_71] : memref<196x576xbf16, #tpu.memory_space<vmem>>, vector<196x64xbf16>
    tpu.vector_store %arg11[%c0_70, %c192_71], %110 {strides = array<i32>} : memref<196x576xbf16, #tpu.memory_space<vmem>>, vector<196x64xbf16>,
    %c15_72 = arith.constant 15 : index
    %c0_73 = arith.constant 0 : index
    %112 = vector.load %arg10[%c15_72, %c0_73] : memref<226x64xbf16, #tpu.memory_space<vmem>>, vector<196x64xbf16>
    %c0_74 = arith.constant 0 : index
    %c256_75 = arith.constant 256 : index
    %113 = vector.load %arg11[%c0_74, %c256_75] : memref<196x576xbf16, #tpu.memory_space<vmem>>, vector<196x64xbf16>
    tpu.vector_store %arg11[%c0_74, %c256_75], %112 {strides = array<i32>} : memref<196x576xbf16, #tpu.memory_space<vmem>>, vector<196x64xbf16>,
    %c16_76 = arith.constant 16 : index
    %c0_77 = arith.constant 0 : index
    %114 = vector.load %arg10[%c16_76, %c0_77] : memref<226x64xbf16, #tpu.memory_space<vmem>>, vector<196x64xbf16>
    %c0_78 = arith.constant 0 : index
    %c320_79 = arith.constant 320 : index
    %115 = vector.load %arg11[%c0_78, %c320_79] : memref<196x576xbf16, #tpu.memory_space<vmem>>, vector<196x64xbf16>
    tpu.vector_store %arg11[%c0_78, %c320_79], %114 {strides = array<i32>} : memref<196x576xbf16, #tpu.memory_space<vmem>>, vector<196x64xbf16>,
    %c28_80 = arith.constant 28 : index
    %c0_81 = arith.constant 0 : index
    %116 = vector.load %arg10[%c28_80, %c0_81] : memref<226x64xbf16, #tpu.memory_space<vmem>>, vector<196x64xbf16>
    %c0_82 = arith.constant 0 : index
    %c384_83 = arith.constant 384 : index
    %117 = vector.load %arg11[%c0_82, %c384_83] : memref<196x576xbf16, #tpu.memory_space<vmem>>, vector<196x64xbf16>
    tpu.vector_store %arg11[%c0_82, %c384_83], %116 {strides = array<i32>} : memref<196x576xbf16, #tpu.memory_space<vmem>>, vector<196x64xbf16>,
    %c29_84 = arith.constant 29 : index
    %c0_85 = arith.constant 0 : index
    %118 = vector.load %arg10[%c29_84, %c0_85] : memref<226x64xbf16, #tpu.memory_space<vmem>>, vector<196x64xbf16>
    %c0_86 = arith.constant 0 : index
    %c448_87 = arith.constant 448 : index
    %119 = vector.load %arg11[%c0_86, %c448_87] : memref<196x576xbf16, #tpu.memory_space<vmem>>, vector<196x64xbf16>
    tpu.vector_store %arg11[%c0_86, %c448_87], %118 {strides = array<i32>} : memref<196x576xbf16, #tpu.memory_space<vmem>>, vector<196x64xbf16>,
    %c30_88 = arith.constant 30 : index
    %c0_89 = arith.constant 0 : index
    %120 = vector.load %arg10[%c30_88, %c0_89] : memref<226x64xbf16, #tpu.memory_space<vmem>>, vector<196x64xbf16>
    %c0_90 = arith.constant 0 : index
    %c512_91 = arith.constant 512 : index
    %121 = vector.load %arg11[%c0_90, %c512_91] : memref<196x576xbf16, #tpu.memory_space<vmem>>, vector<196x64xbf16>
    tpu.vector_store %arg11[%c0_90, %c512_91], %120 {strides = array<i32>} : memref<196x576xbf16, #tpu.memory_space<vmem>>, vector<196x64xbf16>,
    %c0_92 = arith.constant 0 : index
    %c0_93 = arith.constant 0 : index
    %122 = vector.load %arg11[%c0_92, %c0_93] : memref<196x576xbf16, #tpu.memory_space<vmem>>, vector<196x576xbf16>
    %c0_94 = arith.constant 0 : index
    %c0_95 = arith.constant 0 : index
    %123 = vector.load %arg7[%c0_94, %c0_95] : memref<576x32xbf16, #tpu.memory_space<vmem>>, vector<576x32xbf16>
    %cst_96 = arith.constant dense<0.000000e+00> : vector<196x32xf32>
    %124 = tpu.matmul %122, %123, %cst_96 {dimension_numbers = #tpu.dot_dimension_numbers<[1], [0], [0], [1], [0, 0, 1, 1], [], []>} : vector<196x576xbf16>, vector<576x32xbf16>, vector<196x32xf32> -> vector<196x32xf32>
    %c0_97 = arith.constant 0 : index
    %c0_98 = arith.constant 0 : index
    %125 = vector.load %arg8[%c0_97, %c0_98] : memref<1x32xf32, #tpu.memory_space<vmem>>, vector<1x32xf32>
    %126 = vector.broadcast %125 : vector<1x32xf32> to vector<196x32xf32>
    %127 = arith.addf %124, %126 : vector<196x32xf32>
    %c0_99 = arith.constant 0 : index
    %c0_100 = arith.constant 0 : index
    %c0_101 = arith.constant 0 : index
    %c0_102 = arith.constant 0 : index
    %128 = vector.load %arg9[%c0_99, %c0_100, %c0_101, %c0_102] : memref<1x1x196x32xf32, #tpu.memory_space<vmem>>, vector<1x1x196x32xf32>
    %129 = vector.shape_cast %128 : vector<1x1x196x32xf32> to vector<196x32xf32>
    %130 = vector.shape_cast %127 : vector<196x32xf32> to vector<1x1x196x32xf32>
    tpu.vector_store %arg9[%c0_99, %c0_100, %c0_101, %c0_102], %130 {strides = array<i32>} : memref<1x1x196x32xf32, #tpu.memory_space<vmem>>, vector<1x1x196x32xf32>,
    return
  }
  func.func @transform_0(%arg0: i32, %arg1: i32) -> (i32, i32, i32, i32) {
    %c0_i32 = arith.constant 0 : i32
    %c0_i32_0 = arith.constant 0 : i32
    %c0_i32_1 = arith.constant 0 : i32
    return %arg0, %arg1, %c0_i32, %c0_i32_0 : i32, i32, i32, i32
  }
  func.func @transform_1(%arg0: i32, %arg1: i32) -> (i32, i32, i32) {
    %c0_i32 = arith.constant 0 : i32
    %c0_i32_0 = arith.constant 0 : i32
    %c0_i32_1 = arith.constant 0 : i32
    return %arg0, %c0_i32, %c0_i32_0 : i32, i32, i32
  }
  func.func @transform_2(%arg0: i32, %arg1: i32) -> (i32, i32) {
    %c0_i32 = arith.constant 0 : i32
    %c0_i32_0 = arith.constant 0 : i32
    %c0_i32_1 = arith.constant 0 : i32
    return %c0_i32, %c0_i32_0 : i32, i32
  }
  func.func @transform_3(%arg0: i32, %arg1: i32) -> (i32, i32, i32) {
    %c0_i32 = arith.constant 0 : i32
    %c0_i32_0 = arith.constant 0 : i32
    %c0_i32_1 = arith.constant 0 : i32
    %c0_i32_2 = arith.constant 0 : i32
    return %c0_i32, %c0_i32_0, %c0_i32_1 : i32, i32, i32
  }
  func.func @transform_4(%arg0: i32, %arg1: i32) -> (i32, i32, i32) {
    %c0_i32 = arith.constant 0 : i32
    %c0_i32_0 = arith.constant 0 : i32
    %c0_i32_1 = arith.constant 0 : i32
    %c0_i32_2 = arith.constant 0 : i32
    return %c0_i32, %c0_i32_0, %c0_i32_1 : i32, i32, i32
  }
  func.func @transform_5(%arg0: i32, %arg1: i32) -> (i32, i32) {
    %c0_i32 = arith.constant 0 : i32
    %c0_i32_0 = arith.constant 0 : i32
    %c0_i32_1 = arith.constant 0 : i32
    return %c0_i32, %c0_i32_0 : i32, i32
  }
  func.func @transform_6(%arg0: i32, %arg1: i32) -> (i32, i32) {
    %c0_i32 = arith.constant 0 : i32
    %c0_i32_0 = arith.constant 0 : i32
    %c0_i32_1 = arith.constant 0 : i32
    return %c0_i32, %c0_i32_0 : i32, i32
  }
  func.func @transform_7(%arg0: i32, %arg1: i32) -> (i32, i32, i32, i32) {
    %c0_i32 = arith.constant 0 : i32
    %c0_i32_0 = arith.constant 0 : i32
    %c0_i32_1 = arith.constant 0 : i32
    return %arg0, %arg1, %c0_i32, %c0_i32_0 : i32, i32, i32, i32
  }
}

</mosaic_0001>

<bundles_post_ra>
// kernel: _forward_all.1
= control target key start
LH: loop header
LB: loop body
LE: loop exit
PB: predicated region body
PF: predicated region fallthrough
CT: control target
= control target key end

     0   :  { %s9772_s24 = smov 0   ;;  %s9774_s25 = smov 0   ;;  %s14515_s0 = inlined_call_operand.vmem [shape: bf16[3,2,196,90], index: 0, kind: input, shape index: {}]   ;;  %s14516_s1 = inlined_call_operand.vmem [shape: f32[3,196,1], index: 1, kind: input, shape index: {}]   ;;  %s14517_s2 = inlined_call_operand.vmem [shape: bf16[90,64], index: 2, kind: input, shape index: {}]   ;;  %s14518_s3 = inlined_call_operand.vmem [shape: bf16[1,576,64], index: 3, kind: input, shape index: {}]   ;;  %s14519_s4 = inlined_call_operand.vmem [shape: f32[2,2,64], index: 4, kind: input, shape index: {}]   ;;  %s14520_s5 = inlined_call_operand.vmem [shape: bf16[576,32], index: 5, kind: input, shape index: {}]   ;;  %s14521_s6 = inlined_call_operand.vmem [shape: f32[1,32], index: 6, kind: input, shape index: {}]   ;;  %s14522_s7 = inlined_call_operand.vmem [shape: f32[3,2,196,32], index: 7, kind: output, shape index: {}]  }
   0x1   :  { %s9776_s26 = smov 0   ;;  %s9778_s27 = smov 0  }
   0x2   :  { %s9780_s28 = smov 0  }
   0x3 LB: > { %s26_s29 = sadd.s32 1, %s9720_s26  ;;  %s29_s30 = sadd.s32 1, %s9724_s27  ;;  %s9728_s28 = sphi %s9780_s28, %s17_s28   ;;  %s9724_s27 = sphi %s9778_s27, %s14836_s27   ;;  %s9720_s26 = sphi %s9776_s26, %s14835_s26   ;;  %s9716_s25 = sphi %s9774_s25, %s14834_s25   ;;  %s9712_s24 = sphi %s9772_s24, %s14833_s24  }
   0x4   : > { %p27_p0 = scmp.ge.s32.totalorder %s26_s29, 2  ;;  %p8508_p1 = scmp.ge.s32.totalorder %s9728_s28, 1 }
   0x5   : > { %p267_p2 = scmp.lt.s32.totalorder %s9728_s28, 7 }
   0x6   : > { %s14838_s29 = smov (%p27_p0, %s26_s29), 0  ;;  %s14840_s30 = smov (!%p27_p0, %s29_s30), %s9724_s27 }
   0x7   : > { %p268_p3 = pnand %p8508_p1, %p267_p2  ;;  %p31_p4 = scmp.ge.s32.totalorder %s14840_s30, 3 }
   0x9   : > { %s14842_s30 = smov (%p31_p4, %s14840_s30), 0  ;;  %271 = sbr.rel (%p268_p3) target bundleno = 1997 (0x7cd), region = 48 }
   0xe   : > { %v8582_v0 = vld [vmem:[%s14517_s2 + $0x28] sm:$0xf]  ;;  %v9420_v1 = vld [vmem:[%s14517_s2 + $0x28] sm:$0x10]  ;;  %vm627_vm0 = vcmask 1044480   ;;  %p312_p5 = scmp.lt.s32.totalorder %s9716_s25, 2 }
   0xf   : > { %v8583_v2 = vor.u32 %v9420_v1, %v8582_v0  ;;  %p314_p6 = scmp.lt.s32.totalorder %s9712_s24, 1  ;;  %vm448_vm1 = vcmask 516096   ;;  %vm433_vm2 = vcmask 519168   ;;  %v9730_v4 = vmov 0   ;;  %v9419_v5 = vld [vmem:[%s14517_s2 + $0x20] sm:$0xff]  ;;  %v9418_v6 = vld [vmem:[%s14517_s2 + $0x18] sm:$0xff] }
  0x10   : > { %9680 = vset.pattern.permute.xlu0 %v9730_v4  ;;  %434 = vst.msk [vmem:[#allocation2] sm:$0xf] %vm433_vm2, %v9730_v4  ;;  %9681 = vset.pattern.permute.xlu1 %v9730_v4  ;;  %s14844_s25 = smov (!%p312_p5, %s9716_s25), 2  ;;  %v9417_v8 = vld [vmem:[%s14517_s2 + $0x10] sm:$0xff]  ;;  %v9416_v10 = vld [vmem:[%s14517_s2 + $0x8] sm:$0xff]  ;;  %vm361_vm3 = vcmask 7168  }
  0x11   : > { %v629_v3 = vsel %vm627_vm0, %v8583_v2, 0  ;;  %447 = vst.msk [vmem:[#allocation2 + $0x6c] sm:$0xf] %vm433_vm2, %v9730_v4  ;;  %9682 = vset.pattern.permute.xlu2 %v9730_v4  ;;  %s14846_s24 = smov (!%p314_p6, %s9712_s24), 1  ;;  %s9637_s14 = smul.u32 200, %s14844_s25  ;;  %v9415_v12 = vld [vmem:[%s14517_s2] sm:$0xff] }
  0x12   : > { %633 = vmatpush.bf16.msra.mxu0 %v629_v3  ;;  %9613 = vmatpush.bf16.msra.mxu3 %v629_v3  ;;  %449 = vst.msk [vmem:[#allocation2 + $0x70] sm:$0x1] %vm448_vm1, %v9730_v4  ;;  %s9636_s17 = smul.u32 50, %s14844_s25  ;;  %vm587_vm4 = vcmask 736256   ;;  %vm409_vm5 = vcmask 3072   ;;  %vm854_vm10 = vcmask 523264  }
  0x13   : > { %s9829_s20 = scalar_lea.vmem %s14516_s1, %s9637_s14  ;;  %s9635_s21 = smul.u32 25, %s14846_s24  ;;  %vm441_vm11 = vcmask 519169   ;;  %vm442_vm12 = vsmask.f32 7942  ;;  %vm1186_vm1 = vsmask.f32 7440 }
  0x14   : > { %v336_v7 = vld [vmem:[%s9829_s20] sm:$0xff]  ;;  %v338_v9 = vld [vmem:[%s9829_s20 + $0x10] sm:$0xff]  ;;  %v337_v11 = vld [vmem:[%s9829_s20 + $0x8] sm:$0xff] }
  0x15   : > { %706 = vperm.xlu0 %9680, %v336_v7   ;;  %716 = vperm.xlu1 %9681, %v338_v9   ;;  %s9836_s25 = sadd.s32 %s9636_s17, %s9635_s21  ;;  %v362_v13 = vsel %vm361_vm3, %v336_v7, 0.0  ;;  %v363_v14 = vsel %vm361_vm3, %v337_v11, 0.0  ;;  %v365_v17 = vsel %vm361_vm3, %v338_v9, 0.0  ;;  %v339_v18 = vld [vmem:[%s9829_s20 + $0x18] sm:$0xff]  ;;  %v340_v22 = vld [vmem:[%s9829_s20 + $0x20] sm:$0xff]  ;;  %v341_v25 = vld [vmem:[%s9829_s20 + $0x28] sm:$0xff] }
  0x16   : > { %634 = vmatpush.bf16.msra.mxu0 %v9419_v5  ;;  %9614 = vmatpush.bf16.msra.mxu3 %v9419_v5  ;;  %s8509_s24 = sshll.u32 %s9836_s25, 2  ;;  %v364_v16 = vadd.f32 %v363_v14, %v362_v13  ;;  %v367_v20 = vsel %vm361_vm3, %v339_v18, 0.0  ;;  %v369_v23 = vsel %vm361_vm3, %v340_v22, 0.0  ;;  %v371_v26 = vsel %vm361_vm3, %v341_v25, 0.0  ;;  %v342_v28 = vld [vmem:[%s9829_s20 + $0x30] sm:$0xff]  ;;  %v343_v31 = vld [vmem:[%s9829_s20 + $0x38] sm:$0xff]  ;;  %vm443_vm13 = vmand %vm441_vm11, %vm442_vm12 }
  0x17   : > { %s9849_s14 = scalar_lea.vmem %s14515_s0, %s8509_s24  ;;  %726 = vperm.xlu2 %9682, %v340_v22   ;;  %v373_v30 = vsel %vm361_vm3, %v342_v28, 0.0  ;;  %v375_v33 = vsel %vm361_vm3, %v343_v31, 0.0  ;;  %v344_v35 = vld [vmem:[%s9829_s20 + $0x40] sm:$0xff]  ;;  %v345_v38 = vld [vmem:[%s9829_s20 + $0x48] sm:$0xff]  ;;  %v346_v41 = vld [vmem:[%s9829_s20 + $0x50] sm:$0xff]  ;;  %s9731_s17 = smov 64  }
  0x18   : > { %v9403_v15 = vld [vmem:[%s9849_s14] sm:$0xff]  ;;  %v366_v19 = vadd.f32 %v365_v17, %v364_v16  ;;  %v9404_v27 = vld [vmem:[%s9849_s14 + $0x8] sm:$0xff]  ;;  %v9413_v34 = vld [vmem:[%s9849_s14 + $0x50] sm:$0xff]  ;;  %v377_v37 = vsel %vm361_vm3, %v344_v35, 0.0  ;;  %v379_v40 = vsel %vm361_vm3, %v345_v38, 0.0  ;;  %v381_v43 = vsel %vm361_vm3, %v346_v41, 0.0 }
  0x19   : > { %v347_v44 = vld [vmem:[%s9829_s20 + $0x58] sm:$0xff]  ;;  %v348_v47 = vld [vmem:[%s9829_s20 + $0x60] sm:$0xff]  ;;  %v349_v50 = vld [vmem:[%s9829_s20 + $0x68] sm:$0xff]  ;;  %vm1464_vm11 = vsmask.f32 7950  ;;  %s8511_s21 = sshll.u32 %s9836_s25, 3 }
  0x1a   : > { %635 = vmatpush.bf16.msra.mxu0 %v9418_v6  ;;  %9615 = vmatpush.bf16.msra.mxu3 %v9418_v6  ;;  %v368_v21 = vadd.f32 %v367_v20, %v366_v19  ;;  %v383_v46 = vsel %vm361_vm3, %v347_v44, 0.0  ;;  %v385_v49 = vsel %vm361_vm3, %v348_v47, 0.0  ;;  %v387_v52 = vsel %vm361_vm3, %v349_v50, 0.0  ;;  %v9405_v53 = vld [vmem:[%s9849_s14 + $0x10] sm:$0xff]  ;;  %v351_v57 = vld [vmem:[%s9829_s20 + $0x78] sm:$0xff]  ;;  %v352_v61 = vld [vmem:[%s9829_s20 + $0x80] sm:$0xff]  ;;  %s14396_s8 = scalar_lea.vmem %s14522_s7, %s8511_s21 }
  0x1b   : > { %v350_v54 = vld [vmem:[%s9829_s20 + $0x70] sm:$0xff]  ;;  %v391_v59 = vsel %vm361_vm3, %v351_v57, 0.0  ;;  %v9414_v60 = vld [vmem:[%s9849_s14 + $0x58] sm:$0xff]  ;;  %v393_v63 = vsel %vm361_vm3, %v352_v61, 0.0  ;;  %v353_v0 = vld [vmem:[%s9829_s20 + $0x88] sm:$0xff] }
  0x1c   : > { %v370_v24 = vadd.f32 %v369_v23, %v368_v21  ;;  %v389_v56 = vsel %vm361_vm3, %v350_v54, 0.0  ;;  %v395_v2 = vsel %vm361_vm3, %v353_v0, 0.0  ;;  %v354_v3 = vld [vmem:[%s9829_s20 + $0x90] sm:$0xff]  ;;  %v355_v6 = vld [vmem:[%s9829_s20 + $0x98] sm:$0xff]  ;;  %v356_v9 = vld [vmem:[%s9829_s20 + $0xa0] sm:$0xff] }
  0x1d   : > { %711 = vperm.xlu0 %9680, %v337_v11   ;;  %721 = vperm.xlu1 %9681, %v339_v18   ;;  %v397_v5 = vsel %vm361_vm3, %v354_v3, 0.0  ;;  %v401_v11 = vsel %vm361_vm3, %v356_v9, 0.0  ;;  %v358_v16 = vld [vmem:[%s9829_s20 + $0xb0] sm:$0xff]  ;;  %v359_v19 = vld [vmem:[%s9829_s20 + $0xb8] sm:$0xff]  ;;  %v476_v22 = vld [vmem:[%s9849_s14 + $0x60] sm:$0x3] }
  0x1e   : > { %636 = vmatpush.bf16.msra.mxu0 %v9417_v8  ;;  %9616 = vmatpush.bf16.msra.mxu3 %v9417_v8  ;;  %v372_v29 = vadd.f32 %v371_v26, %v370_v24  ;;  %v399_v8 = vsel %vm361_vm3, %v355_v6, 0.0  ;;  %v405_v18 = vsel %vm361_vm3, %v358_v16, 0.0  ;;  %v407_v21 = vsel %vm361_vm3, %v359_v19, 0.0  ;;  %v360_v23 = vld [vmem:[%s9829_s20 + $0xc0] sm:$0xf] }
  0x1f   : > { %731 = vperm.xlu2 %9682, %v341_v25   ;;  %v538_v25 = vunpack.c.l.b16 %v476_v22  ;;  %v410_v26 = vsel %vm409_vm5, %v360_v23, 0.0 }
  0x20   : > { %v374_v32 = vadd.f32 %v373_v30, %v372_v29 }
  0x22   : > { %637 = vmatpush.bf16.msra.mxu0 %v9416_v10  ;;  %9617 = vmatpush.bf16.msra.mxu3 %v9416_v10  ;;  %v376_v36 = vadd.f32 %v375_v33, %v374_v32  ;;  %v9407_v33 = vld [vmem:[%s9849_s14 + $0x20] sm:$0xff] }
  0x24   : > { %v378_v39 = vadd.f32 %v377_v37, %v376_v36 }
  0x25   : > { %736 = vperm.xlu0 %9680, %v342_v28   ;;  %741 = vperm.xlu1 %9681, %v343_v31   ;;  %v551_v28 = vpack.c.b16 %v538_v25, %v538_v25  ;;  %v444_v25 = vld [vmem:[#allocation2 + $0x68] sm:$0xe] }
  0x26   : > { %638 = vmatpush.bf16.msra.mxu0 %v9415_v12  ;;  %9618 = vmatpush.bf16.msra.mxu3 %v9415_v12  ;;  %v380_v42 = vadd.f32 %v379_v40, %v378_v39  ;;  %v357_v12 = vld [vmem:[%s9829_s20 + $0xa8] sm:$0xff] }
  0x27   : > { %746 = vperm.xlu2 %9682, %v344_v35   ;;  %v403_v14 = vsel %vm361_vm3, %v357_v12, 0.0  ;;  %v9408_v40 = vld [vmem:[%s9849_s14 + $0x28] sm:$0xff]  ;;  %vm436_vm3 = vsmask.f32 3328 }
  0x28   : > { %v382_v45 = vadd.f32 %v381_v43, %v380_v42  ;;  %vm10487_vm5 = vmand %vm433_vm2, %vm436_vm3 }
  0x29   : > { %8584 = vmatmul.msk.bf16.vlgmr.msra.gmra.mxu0 %vm587_vm4, %v9403_v15  ;;  %8594 = vmatmul.msk.bf16.vlgmr.msra.gmra.mxu3 %vm587_vm4, %v9413_v34  ;;  %v9406_v15 = vld [vmem:[%s9849_s14 + $0x18] sm:$0xff] }
  0x2a   : > { %v384_v48 = vadd.f32 %v383_v46, %v382_v45 }
  0x2c   : > { %v386_v51 = vadd.f32 %v385_v49, %v384_v48  ;;  %v9410_v48 = vld [vmem:[%s9849_s14 + $0x38] sm:$0xff]  ;;  %v9411_v49 = vld [vmem:[%s9849_s14 + $0x40] sm:$0xff] }
  0x2d   : > { %751 = vperm.xlu0 %9680, %v345_v38   ;;  %756 = vperm.xlu1 %9681, %v346_v41  }
  0x2e   : > { %v388_v55 = vadd.f32 %v387_v52, %v386_v51  ;;  %v9412_v52 = vld [vmem:[%s9849_s14 + $0x48] sm:$0xff] }
  0x2f   : > { %761 = vperm.xlu2 %9682, %v347_v44  }
  0x30   : > { %v390_v58 = vadd.f32 %v389_v56, %v388_v55 }
  0x32   : > { %v392_v62 = vadd.f32 %v391_v59, %v390_v58 }
  0x34   : > { %v394_v1 = vadd.f32 %v393_v63, %v392_v62 }
  0x35   : > { %766 = vperm.xlu0 %9680, %v348_v47   ;;  %771 = vperm.xlu1 %9681, %v349_v50   ;;  %v9409_v47 = vld [vmem:[%s9849_s14 + $0x30] sm:$0xff] }
  0x36   : > { %v396_v4 = vadd.f32 %v395_v2, %v394_v1 }
  0x37   : > { %776 = vperm.xlu2 %9682, %v350_v54  }
  0x38   : > { %v398_v7 = vadd.f32 %v397_v5, %v396_v4 }
  0x39   : > { %8585 = vmatmul.msk.bf16.gmra.mxu0 %vm587_vm4, %v9404_v27  ;;  %8595 = vmatmul.msk.bf16.gmra.mxu3 %vm587_vm4, %v9414_v60 }
  0x3a   : > { %v400_v10 = vadd.f32 %v399_v8, %v398_v7 }
  0x3c   : > { %v402_v13 = vadd.f32 %v401_v11, %v400_v10 }
  0x3d   : > { %781 = vperm.xlu0 %9680, %v351_v57   ;;  %786 = vperm.xlu1 %9681, %v352_v61  }
  0x3e   : > { %v404_v17 = vadd.f32 %v403_v14, %v402_v13 }
  0x3f   : > { %791 = vperm.xlu2 %9682, %v353_v0  }
  0x40   : > { %v406_v20 = vadd.f32 %v405_v18, %v404_v17 }
  0x42   : > { %v408_v24 = vadd.f32 %v407_v21, %v406_v20 }
  0x44   : > { %v411_v27 = vadd.f32 %v410_v26, %v408_v24 }
  0x45   : > { %796 = vperm.xlu0 %9680, %v354_v3   ;;  %801 = vperm.xlu1 %9681, %v355_v6  }
  0x46   : > { %v412_v29 = vrot.slane %v411_v27, 4 }
  0x47   : > { %806 = vperm.xlu2 %9682, %v356_v9  }
  0x48   : > { %v413_v30 = vadd.f32 %v412_v29, %v411_v27  ;;  %v445_v27 = vsel %vm443_vm13, 0, %v444_v25  ;;  %vm2155_vm13 = vcmask 1040384  }
  0x49   : > { %8586 = vmatmul.msk.bf16.gmra.mxu0 %vm587_vm4, %v9405_v53  ;;  %8596 = vmatmul.msk.bf16.gmra.mxu3 %vm587_vm4, %v551_v28  ;;  %446 = vst [vmem:[#allocation2 + $0x68] sm:$0xe] %v445_v27 }
  0x4a   : > { %v414_v31 = vrot.slane %v413_v30, 2 }
  0x4c   : > { %v415_v32 = vadd.f32 %v414_v31, %v413_v30 }
  0x4d   : > { %811 = vperm.xlu0 %9680, %v357_v12   ;;  %816 = vperm.xlu1 %9681, %v358_v16  }
  0x4e   : > { %v416_v34 = vrot.slane %v415_v32, 1 }
  0x4f   : > { %821 = vperm.xlu2 %9682, %v359_v19  }
  0x50   : > { %v417_v35 = vadd.f32 %v416_v34, %v415_v32 }
  0x52   : > { %9684 = vrcp.f32 %v417_v35  ;;  %v429_v41 = vand.u32 2147483648, %v417_v35  ;;  %vm423_vm6 = vweird.f32 %v417_v35  ;;  %v427_v43 = vand.u32 2147483647, %v417_v35 }
  0x54   : > { %v430_v44 = vor.u32 1.1754944e-38, %v429_v41  ;;  %vm428_vm9 = vcmp.eq.f32.partialorder %v427_v43, 8.507059e+37 }
  0x55   : > { %826 = vperm.xlu0 %9680, %v360_v23  }
  0x58   : > { %v9685_v36 = vpop.eup %9684 }
  0x59   : > { %8587 = vmatmul.msk.bf16.gmra.mxu0 %vm587_vm4, %v9406_v15  ;;  %v419_v37 = vmul.f32 %v9685_v36, %v417_v35  ;;  %vm424_vm7 = vweird.f32 %v9685_v36 }
  0x5a   : > { %vm425_vm8 = vmor %vm423_vm6, %vm424_vm7  ;;  %vm1493_vm6 = vcmask 517120   ;;  %vm1494_vm7 = vsmask.f32 1280 }
  0x5b   : > { %v420_v38 = vsub.f32 1.0, %v419_v37 }
  0x5d   : > { %v421_v39 = vmul.f32 %v9685_v36, %v420_v38 }
  0x5f   : > { %v422_v42 = vadd.f32 %v9685_v36, %v421_v39 }
  0x61   : > { %v426_v45 = vsel %vm425_vm8, %v9685_v36, %v422_v42  ;;  %vm1463_vm8 = vcmask 519171  }
  0x62   : > { %v431_v46 = vsel %vm428_vm9, %v430_v44, %v426_v45  ;;  %vm10506_vm9 = vmand %vm1493_vm6, %vm1494_vm7 }
  0x63   : > { %912 = vperm.xlu1 %9681, %v431_v46   ;;  %vm10530_vm12 = vmand %vm1463_vm8, %vm1464_vm11  ;;  %vm2360_vm8 = vsmask.f32 256  ;;  %vm2361_vm11 = vsmask.f32 4368 }
  0x69   : > { %8588 = vmatmul.msk.bf16.gmra.mxu0 %vm587_vm4, %v9407_v33 }
  0x71   : > { %v9959_v6 = vpop.permute.xlu2 %726 }
  0x72   : > { %14637 = vst [vmem:[#allocation7_spill] sm:$0xff] %v9959_v6 }
  0x79   : > { %8589 = vmatmul.msk.bf16.gmra.mxu0 %vm587_vm4, %v9408_v40  ;;  %v9969_v11 = vpop.permute.xlu2 %731 }
  0x7a   : > { %14640 = vst [vmem:[#allocation10_spill] sm:$0xff] %v9969_v11 }
  0x81   : > { %v9977_v15 = vpop.permute.xlu2 %746 }
  0x82   : > { %14643 = vst [vmem:[#allocation13_spill] sm:$0xff] %v9977_v15 }
  0x87   : > { %v9955_v4 = vpop.permute.xlu0 %706  ;;  %v9957_v5 = vpop.permute.xlu1 %716 }
  0x88   : > { %14635 = vst [vmem:[#allocation5_spill] sm:$0xff] %v9955_v4 }
  0x89   : > { %8590 = vmatmul.msk.bf16.gmra.mxu0 %vm587_vm4, %v9409_v47  ;;  %14636 = vst [vmem:[#allocation6_spill] sm:$0xff] %v9957_v5  ;;  %v9991_v22 = vpop.permute.xlu2 %761 }
  0x8a   : > { %14646 = vst [vmem:[#allocation16_spill] sm:$0xff] %v9991_v22 }
  0x8f   : > { %v9963_v8 = vpop.permute.xlu0 %711  ;;  %v9967_v10 = vpop.permute.xlu1 %721 }
  0x90   : > { %14638 = vst [vmem:[#allocation8_spill] sm:$0xff] %v9963_v8 }
  0x91   : > { %14639 = vst [vmem:[#allocation9_spill] sm:$0xff] %v9967_v10  ;;  %v10015_v43 = vpop.permute.xlu2 %776 }
  0x92   : > { %14649 = vst [vmem:[#allocation19_spill] sm:$0xff] %v10015_v43 }
  0x97   : > { %v9971_v12 = vpop.permute.xlu0 %736  ;;  %v9975_v14 = vpop.permute.xlu1 %741 }
  0x98   : > { %14641 = vst [vmem:[#allocation11_spill] sm:$0xff] %v9971_v12 }
  0x99   : > { %8591 = vmatmul.msk.bf16.gmra.mxu0 %vm587_vm4, %v9410_v48  ;;  %14642 = vst [vmem:[#allocation12_spill] sm:$0xff] %v9975_v14 }
  0x9f   : > { %v9979_v16 = vpop.permute.xlu0 %751  ;;  %v9989_v21 = vpop.permute.xlu1 %756 }
  0xa0   : > { %14644 = vst [vmem:[#allocation14_spill] sm:$0xff] %v9979_v16 }
  0xa1   : > { %14645 = vst [vmem:[#allocation15_spill] sm:$0xff] %v9989_v21 }
  0xa6   : > { %v9920_v50 = vpop.f32.mrf.mxu0 }
  0xa7   : > { %v829_v19 = vmul.f32 %v9955_v4, %v9920_v50  ;;  %v9996_v26 = vpop.permute.xlu0 %766  ;;  %v10013_v41 = vpop.permute.xlu1 %771 }
  0xa8   : > { %14647 = vst [vmem:[#allocation17_spill] sm:$0xff] %v9996_v26 }
  0xa9   : > { %8592 = vmatmul.msk.bf16.gmra.mxu0 %vm587_vm4, %v9411_v49  ;;  %v855_v28 = vsel %vm854_vm10, %v829_v19, 0.0  ;;  %14648 = vst [vmem:[#allocation18_spill] sm:$0xff] %v10013_v41 }
  0xac   : > { %v9933_v56 = vpop.f32.mrf.mxu3 }
  0xae   : > { %v9923_v51 = vpop.f32.mrf.mxu0 }
  0xaf   : > { %v830_v18 = vmul.f32 %v9963_v8, %v9923_v51  ;;  %v10020_v47 = vpop.permute.xlu0 %781  ;;  %v10033_v27 = vpop.permute.xlu1 %786 }
  0xb0   : > { %14650 = vst [vmem:[#allocation20_spill] sm:$0xff] %v10020_v47 }
  0xb1   : > { %v856_v23 = vsel %vm854_vm10, %v830_v18, 0.0  ;;  %14651 = vst [vmem:[#allocation21_spill] sm:$0xff] %v10033_v27 }
  0xb2   : > { %v857_v31 = vadd.f32 %v856_v23, %v855_v28 }
  0xb4   : > { %v9937_v58 = vpop.f32.mrf.mxu3 }
  0xb6   : > { %v9926_v53 = vpop.f32.mrf.mxu0 }
  0xb7   : > { %v831_v20 = vmul.f32 %v9957_v5, %v9926_v53 }
  0xb9   : > { %8593 = vmatmul.msk.bf16.gmra.mxu0 %vm587_vm4, %v9412_v52  ;;  %v858_v29 = vsel %vm854_vm10, %v831_v20, 0.0  ;;  %vm10438_vm4 = vmor %vm436_vm3, %vm1186_vm1  ;;  %vm1977_vm1 = vcmask 1046532  }
  0xba   : > { %v859_v35 = vadd.f32 %v858_v29, %v857_v31  ;;  %v10038_v31 = vpop.permute.xlu2 %791 }
  0xbb   : > { %14652 = vst [vmem:[#allocation22_spill] sm:$0xff] %v10038_v31 }
  0xbc   : > { %v9941_v60 = vpop.f32.mrf.mxu3 }
  0xbe   : > { %v9929_v54 = vpop.f32.mrf.mxu0 }
  0xbf   : > { %v832_v24 = vmul.f32 %v9967_v10, %v9929_v54 }
  0xc1   : > { %v860_v33 = vsel %vm854_vm10, %v832_v24, 0.0 }
  0xc2   : > { %v861_v38 = vadd.f32 %v860_v33, %v859_v35 }
  0xc4   : > { %v9945_v62 = vpop.f32.mrf.mxu3 }
  0xc5   : > { %14634 = vst [vmem:[#allocation4_spill] sm:$0xff] %v9945_v62 }
  0xc6   : > { %v9931_v55 = vpop.f32.mrf.mxu0 }
  0xc7   : > { %v833_v30 = vmul.f32 %v9959_v6, %v9931_v55 }
  0xc9   : > { %v862_v36 = vsel %vm854_vm10, %v833_v30, 0.0 }
  0xca   : > { %v863_v42 = vadd.f32 %v862_v36, %v861_v38 }
  0xcc   : > { %v9949_v0 = vpop.f32.mrf.mxu3 }
  0xce   : > { %v9935_v57 = vpop.f32.mrf.mxu0 }
  0xcf   : > { %v834_v34 = vmul.f32 %v9969_v11, %v9935_v57 }
  0xd1   : > { %v864_v39 = vsel %vm854_vm10, %v834_v34, 0.0 }
  0xd2   : > { %v865_v46 = vadd.f32 %v864_v39, %v863_v42 }
  0xd4   : > { %v702_v2 = vpop.f32.mrf.mxu3 }
  0xd6   : > { %v9939_v59 = vpop.f32.mrf.mxu0 }
  0xd7   : > { %v835_v37 = vmul.f32 %v9971_v12, %v9939_v59 }
  0xd9   : > { %v866_v44 = vsel %vm854_vm10, %v835_v37, 0.0  ;;  %v10045_v37 = vpop.permute.xlu0 %796 }
  0xda   : > { %v867_v2 = vadd.f32 %v866_v44, %v865_v46  ;;  %14653 = vst [vmem:[#allocation23_spill] sm:$0xff] %v10045_v37 }
  0xde   : > { %v9943_v61 = vpop.f32.mrf.mxu0 }
  0xdf   : > { %v836_v40 = vmul.f32 %v9975_v14, %v9943_v61 }
  0xe1   : > { %v868_v49 = vsel %vm854_vm10, %v836_v40, 0.0 }
  0xe2   : > { %v869_v20 = vadd.f32 %v868_v49, %v867_v2 }
  0xe6   : > { %v9947_v63 = vpop.f32.mrf.mxu0 }
  0xe7   : > { %v837_v45 = vmul.f32 %v9977_v15, %v9947_v63 }
  0xe9   : > { %v870_v18 = vsel %vm854_vm10, %v837_v45, 0.0 }
  0xea   : > { %v871_v25 = vadd.f32 %v870_v18, %v869_v20  ;;  %v10061_v20 = vpop.permute.xlu1 %801 }
  0xeb   : > { %14654 = vst [vmem:[#allocation24_spill] sm:$0xff] %v10061_v20 }
  0xee   : > { %v9951_v1 = vpop.f32.mrf.mxu0 }
  0xef   : > { %v838_v52 = vmul.f32 %v9979_v16, %v9951_v1 }
  0xf1   : > { %v872_v23 = vsel %vm854_vm10, %v838_v52, 0.0 }
  0xf2   : > { %v873_v30 = vadd.f32 %v872_v23, %v871_v25  ;;  %v10063_v23 = vpop.permute.xlu2 %806 }
  0xf3   : > { %14655 = vst [vmem:[#allocation25_spill] sm:$0xff] %v10063_v23 }
  0xf6   : > { %v9953_v3 = vpop.f32.mrf.mxu0 }
  0xf7   : > { %v839_v19 = vmul.f32 %v9989_v21, %v9953_v3 }
  0xf9   : > { %v874_v28 = vsel %vm854_vm10, %v839_v19, 0.0 }
  0xfa   : > { %v875_v36 = vadd.f32 %v874_v28, %v873_v30 }
  0xfe   : > { %v9961_v7 = vpop.f32.mrf.mxu0 }
  0xff   : > { %v840_v24 = vmul.f32 %v9991_v22, %v9961_v7 }
 0x101   : > { %v876_v34 = vsel %vm854_vm10, %v840_v24, 0.0 }
 0x102   : > { %v877_v40 = vadd.f32 %v876_v34, %v875_v36 }
 0x106   : > { %v9965_v9 = vpop.f32.mrf.mxu0 }
 0x107   : > { %v841_v29 = vmul.f32 %v9996_v26, %v9965_v9 }
 0x109   : > { %v878_v38 = vsel %vm854_vm10, %v841_v29, 0.0  ;;  %v10068_v29 = vpop.permute.xlu0 %811 }
 0x10a   : > { %v879_v45 = vadd.f32 %v878_v38, %v877_v40  ;;  %14656 = vst [vmem:[#allocation26_spill] sm:$0xff] %v10068_v29 }
 0x10e   : > { %v9973_v13 = vpop.f32.mrf.mxu0 }
 0x10f   : > { %v842_v35 = vmul.f32 %v10013_v41, %v9973_v13 }
 0x111   : > { %v880_v42 = vsel %vm854_vm10, %v842_v35, 0.0 }
 0x112   : > { %v881_v52 = vadd.f32 %v880_v42, %v879_v45  ;;  %v849_v42 = vmul.f32 %v10063_v23, %v9933_v56  ;;  %v850_v45 = vmul.f32 %v10068_v29, %v9937_v58 }
 0x116   : > { %v9981_v17 = vpop.f32.mrf.mxu0 }
 0x117   : > { %v843_v39 = vmul.f32 %v10015_v43, %v9981_v17 }
 0x119   : > { %v882_v46 = vsel %vm854_vm10, %v843_v39, 0.0 }
 0x11a   : > { %v883_v24 = vadd.f32 %v882_v46, %v881_v52  ;;  %v10083_v52 = vpop.permute.xlu2 %821 }
 0x11b   : > { %14658 = vst [vmem:[#allocation28_spill] sm:$0xff] %v10083_v52 }
 0x11e   : > { %v10002_v32 = vpop.f32.mrf.mxu0 }
 0x11f   : > { %v844_v44 = vmul.f32 %v10020_v47, %v10002_v32 }
 0x121   : > { %v884_v18 = vsel %vm854_vm10, %v844_v44, 0.0 }
 0x122   : > { %v885_v30 = vadd.f32 %v884_v18, %v883_v24  ;;  %v894_v24 = vsel %vm854_vm10, %v849_v42, 0.0 }
 0x126   : > { %v10022_v48 = vpop.f32.mrf.mxu0 }
 0x127   : > { %v845_v49 = vmul.f32 %v10033_v27, %v10022_v48 }
 0x129   : > { %v886_v25 = vsel %vm854_vm10, %v845_v49, 0.0  ;;  %v10081_v49 = vpop.permute.xlu1 %816 }
 0x12a   : > { %v887_v35 = vadd.f32 %v886_v25, %v885_v30  ;;  %14657 = vst [vmem:[#allocation27_spill] sm:$0xff] %v10081_v49  ;;  %v10088_v25 = vpop.permute.xlu0 %826  ;;  %v852_v30 = vmul.f32 %v10083_v52, %v9945_v62 }
 0x12b   : > { %14659 = vst [vmem:[#allocation29_spill] sm:$0xff] %v10088_v25 }
 0x12e   : > { %v10040_v33 = vpop.f32.mrf.mxu0 }
 0x12f   : > { %v846_v19 = vmul.f32 %v10038_v31, %v10040_v33 }
 0x131   : > { %v888_v34 = vsel %vm854_vm10, %v846_v19, 0.0  ;;  %v851_v19 = vmul.f32 %v10081_v49, %v9941_v60 }
 0x132   : > { %v889_v38 = vadd.f32 %v888_v34, %v887_v35  ;;  %v896_v34 = vsel %vm854_vm10, %v850_v45, 0.0  ;;  %v10098_v45 = vpop.permute.xlu1 %912 }
 0x133   : > { %14660 = vst [vmem:[#allocation30_spill] sm:$0xff] %v10098_v45 }
 0x136   : > { %v10056_v2 = vpop.f32.mrf.mxu0 }
 0x137   : > { %v847_v28 = vmul.f32 %v10045_v37, %v10056_v2 }
 0x139   : > { %v890_v36 = vsel %vm854_vm10, %v847_v28, 0.0 }
 0x13a   : > { %v891_v44 = vadd.f32 %v890_v36, %v889_v38  ;;  %v853_v36 = vmul.f32 %v10088_v25, %v9949_v0  ;;  %v898_v38 = vsel %vm854_vm10, %v851_v19, 0.0 }
 0x13c   : > { %v902_v42 = vsel %vm433_vm2, %v853_v36, 0.0 }
 0x13e   : > { %v10072_v39 = vpop.f32.mrf.mxu0 }
 0x13f   : > { %v848_v40 = vmul.f32 %v10061_v20, %v10072_v39 }
 0x141   : > { %v892_v46 = vsel %vm854_vm10, %v848_v40, 0.0 }
 0x142   : > { %v893_v18 = vadd.f32 %v892_v46, %v891_v44  ;;  %v900_v44 = vsel %vm854_vm10, %v852_v30, 0.0 }
 0x144   : > { %v895_v28 = vadd.f32 %v894_v24, %v893_v18 }
 0x146   : > { %v897_v35 = vadd.f32 %v896_v34, %v895_v28 }
 0x148   : > { %v899_v40 = vadd.f32 %v898_v38, %v897_v35 }
 0x14a   : > { %v901_v46 = vadd.f32 %v900_v44, %v899_v40 }
 0x14c   : > { %v903_v49 = vadd.f32 %v902_v42, %v901_v46 }
 0x14e   : > { %v904_v29 = vrot.slane %v903_v49, 4 }
 0x150   : > { %v905_v18 = vadd.f32 %v904_v29, %v903_v49 }
 0x152   : > { %v906_v24 = vrot.slane %v905_v18, 2 }
 0x154   : > { %v907_v23 = vadd.f32 %v906_v24, %v905_v18 }
 0x156   : > { %v908_v52 = vrot.slane %v907_v23, 1 }
 0x158   : > { %v909_v62 = vadd.f32 %v908_v52, %v907_v23 }
 0x15a   : > { %v10101_v28 = vmul.f32 %v10098_v45, %v909_v62 }
 0x15c   : > { %v916_v19 = vsub.f32 %v9920_v50, %v10101_v28  ;;  %v917_v30 = vsub.f32 %v9923_v51, %v10101_v28  ;;  %v918_v34 = vsub.f32 %v9926_v53, %v10101_v28  ;;  %v919_v23 = vsub.f32 %v9929_v54, %v10101_v28 }
 0x15d   : > { %v920_v62 = vsub.f32 %v9931_v55, %v10101_v28  ;;  %v921_v53 = vsub.f32 %v9935_v57, %v10101_v28  ;;  %v922_v35 = vsub.f32 %v9939_v59, %v10101_v28  ;;  %v923_v57 = vsub.f32 %v9943_v61, %v10101_v28 }
 0x15e   : > { %v10110_v29 = vmul.f32 %v916_v19, %v9955_v4  ;;  %v10115_v49 = vmul.f32 %v917_v30, %v9963_v8  ;;  %v10120_v50 = vmul.f32 %v918_v34, %v9957_v5  ;;  %v10127_v52 = vmul.f32 %v919_v23, %v9967_v10 }
 0x15f   : > { %v10134_v55 = vmul.f32 %v920_v62, %v9959_v6  ;;  %v10142_v40 = vmul.f32 %v921_v53, %v9969_v11  ;;  %v924_v42 = vsub.f32 %v9947_v63, %v10101_v28  ;;  %v10150_v18 = vmul.f32 %v922_v35, %v9971_v12 }
 0x160   : > { %14661 = vst [vmem:[#allocation31_spill] sm:$0xff] %v10115_v49  ;;  %v966_v51 = vmul.f32 %v10110_v29, %v10110_v29  ;;  %v967_v54 = vmul.f32 %v10115_v49, %v10115_v49  ;;  %v968_v36 = vmul.f32 %v10120_v50, %v10120_v50  ;;  %v969_v44 = vmul.f32 %v10127_v52, %v10127_v52 }
 0x161   : > { %v970_v24 = vmul.f32 %v10134_v55, %v10134_v55  ;;  %v925_v30 = vsub.f32 %v9951_v1, %v10101_v28  ;;  %v10158_v34 = vmul.f32 %v923_v57, %v9975_v14  ;;  %v971_v23 = vmul.f32 %v10142_v40, %v10142_v40 }
 0x162   : > { %v991_v38 = vsel %vm854_vm10, %v966_v51, 0.0  ;;  %v992_v46 = vsel %vm854_vm10, %v967_v54, 0.0  ;;  %v994_v61 = vsel %vm854_vm10, %v968_v36, 0.0  ;;  %v996_v63 = vsel %vm854_vm10, %v969_v44, 0.0 }
 0x163   : > { %v993_v59 = vadd.f32 %v992_v46, %v991_v38  ;;  %v926_v51 = vsub.f32 %v9953_v3, %v10101_v28  ;;  %v10166_v53 = vmul.f32 %v924_v42, %v9977_v15  ;;  %v972_v54 = vmul.f32 %v10150_v18, %v10150_v18 }
 0x164   : > { %v998_v1 = vsel %vm854_vm10, %v970_v24, 0.0  ;;  %v927_v36 = vsub.f32 %v9961_v7, %v10101_v28  ;;  %v10174_v38 = vmul.f32 %v925_v30, %v9979_v16  ;;  %v973_v57 = vmul.f32 %v10158_v34, %v10158_v34 }
 0x165   : > { %v995_v19 = vadd.f32 %v994_v61, %v993_v59  ;;  %v1000_v3 = vsel %vm854_vm10, %v971_v23, 0.0  ;;  %v928_v46 = vsub.f32 %v9965_v9, %v10101_v28  ;;  %v10182_v59 = vmul.f32 %v926_v51, %v9989_v21 }
 0x166   : > { %v974_v42 = vmul.f32 %v10166_v53, %v10166_v53  ;;  %v1002_v7 = vsel %vm854_vm10, %v972_v54, 0.0  ;;  %v929_v61 = vsub.f32 %v9973_v13, %v10101_v28  ;;  %v975_v30 = vmul.f32 %v10174_v38, %v10174_v38 }
 0x167   : > { %v997_v62 = vadd.f32 %v996_v63, %v995_v19  ;;  %v10190_v19 = vmul.f32 %v927_v36, %v9991_v22  ;;  %v1004_v9 = vsel %vm854_vm10, %v973_v57, 0.0  ;;  %v930_v63 = vsub.f32 %v9981_v17, %v10101_v28 }
 0x168   : > { %v976_v51 = vmul.f32 %v10182_v59, %v10182_v59  ;;  %v1006_v13 = vsel %vm854_vm10, %v974_v42, 0.0  ;;  %v1008_v17 = vsel %vm854_vm10, %v975_v30, 0.0 }
 0x169   : > { %v999_v35 = vadd.f32 %v998_v1, %v997_v62  ;;  %v10198_v62 = vmul.f32 %v928_v46, %v9996_v26  ;;  %v931_v1 = vsub.f32 %v10002_v32, %v10101_v28  ;;  %v977_v36 = vmul.f32 %v10190_v19, %v10190_v19 }
 0x16a   : > { %v1010_v32 = vsel %vm854_vm10, %v976_v51, 0.0 }
 0x16b   : > { %v1001_v44 = vadd.f32 %v1000_v3, %v999_v35  ;;  %v10206_v35 = vmul.f32 %v929_v61, %v10013_v41  ;;  %v932_v3 = vsub.f32 %v10022_v48, %v10101_v28  ;;  %v978_v46 = vmul.f32 %v10198_v62, %v10198_v62 }
 0x16c   : > { %v1012_v48 = vsel %vm854_vm10, %v977_v36, 0.0 }
 0x16d   : > { %v1003_v24 = vadd.f32 %v1002_v7, %v1001_v44  ;;  %v10214_v44 = vmul.f32 %v930_v63, %v10015_v43  ;;  %v933_v7 = vsub.f32 %v10040_v33, %v10101_v28  ;;  %v979_v61 = vmul.f32 %v10206_v35, %v10206_v35 }
 0x16e   : > { %v1014_v33 = vsel %vm854_vm10, %v978_v46, 0.0 }
 0x16f   : > { %v1005_v23 = vadd.f32 %v1004_v9, %v1003_v24  ;;  %v10222_v24 = vmul.f32 %v931_v1, %v10020_v47  ;;  %v934_v9 = vsub.f32 %v10056_v2, %v10101_v28  ;;  %v980_v63 = vmul.f32 %v10214_v44, %v10214_v44 }
 0x170   : > { %v1016_v2 = vsel %vm854_vm10, %v979_v61, 0.0 }
 0x171   : > { %v1007_v54 = vadd.f32 %v1006_v13, %v1005_v23  ;;  %v10230_v23 = vmul.f32 %v932_v3, %v10033_v27  ;;  %v935_v13 = vsub.f32 %v10072_v39, %v10101_v28  ;;  %v981_v1 = vmul.f32 %v10222_v24, %v10222_v24 }
 0x172   : > { %v1018_v39 = vsel %vm854_vm10, %v980_v63, 0.0 }
 0x173   : > { %v1009_v57 = vadd.f32 %v1008_v17, %v1007_v54  ;;  %v10238_v54 = vmul.f32 %v933_v7, %v10038_v31  ;;  %v936_v17 = vsub.f32 %v9933_v56, %v10101_v28  ;;  %v982_v3 = vmul.f32 %v10230_v23, %v10230_v23 }
 0x174   : > { %v1020_v56 = vsel %vm854_vm10, %v981_v1, 0.0 }
 0x175   : > { %v1011_v42 = vadd.f32 %v1010_v32, %v1009_v57  ;;  %v10246_v57 = vmul.f32 %v934_v9, %v10045_v37  ;;  %v937_v32 = vsub.f32 %v9937_v58, %v10101_v28  ;;  %v983_v7 = vmul.f32 %v10238_v54, %v10238_v54 }
 0x176   : > { %v1022_v58 = vsel %vm854_vm10, %v982_v3, 0.0 }
 0x177   : > { %v1013_v30 = vadd.f32 %v1012_v48, %v1011_v42  ;;  %v10254_v42 = vmul.f32 %v935_v13, %v10061_v20  ;;  %v938_v48 = vsub.f32 %v9941_v60, %v10101_v28  ;;  %v984_v63 = vmul.f32 %v10246_v57, %v10246_v57 }
 0x178   : > { %v1024_v60 = vsel %vm854_vm10, %v983_v7, 0.0 }
 0x179   : > { %v1015_v51 = vadd.f32 %v1014_v33, %v1013_v30  ;;  %14662 = vst [vmem:[#allocation32_spill] sm:$0xff] %v10254_v42  ;;  %v14663_v30 = vld [vmem:[#allocation25_spill] sm:$0xff]  ;;  %v985_v1 = vmul.f32 %v10254_v42, %v10254_v42 }
 0x17a   : > { %v10262_v9 = vmul.f32 %v936_v17, %v14663_v30  ;;  %v940_v17 = vsub.f32 %v9949_v0, %v10101_v28 }
 0x17b   : > { %v1017_v36 = vadd.f32 %v1016_v2, %v1015_v51  ;;  %v14665_v51 = vld [vmem:[#allocation4_spill] sm:$0xff]  ;;  %v14666_v2 = vld [vmem:[#allocation26_spill] sm:$0xff]  ;;  %v1028_v7 = vsel %vm854_vm10, %v985_v1, 0.0 }
 0x17c   : > { %14664 = vst [vmem:[#allocation33_spill] sm:$0xff] %v10262_v9  ;;  %v939_v13 = vsub.f32 %v14665_v51, %v10101_v28  ;;  %v986_v3 = vmul.f32 %v10262_v9, %v10262_v9  ;;  %v10290_v0 = vmul.f32 %v940_v17, %v10088_v25 }
 0x17d   : > { %v1019_v46 = vadd.f32 %v1018_v39, %v1017_v36  ;;  %v10270_v36 = vmul.f32 %v937_v32, %v14666_v2  ;;  %v14670_v32 = vld [vmem:[#allocation28_spill] sm:$0xff] }
 0x17e   : > { %v10284_v51 = vmul.f32 %v939_v13, %v14670_v32  ;;  %14672 = vst [vmem:[#allocation36_spill] sm:$0xff] %v10290_v0 }
 0x17f   : > { %v1021_v61 = vadd.f32 %v1020_v56, %v1019_v46  ;;  %14667 = vst [vmem:[#allocation4_spill] sm:$0xff] %v10270_v36  ;;  %v14668_v46 = vld [vmem:[#allocation27_spill] sm:$0xff]  ;;  %v987_v49 = vmul.f32 %v10270_v36, %v10270_v36 }
 0x180   : > { %v10278_v56 = vmul.f32 %v938_v48, %v14668_v46  ;;  %14671 = vst [vmem:[#allocation35_spill] sm:$0xff] %v10284_v51  ;;  %v1030_v48 = vsel %vm854_vm10, %v986_v3, 0.0 }
 0x181   : > { %v1023_v33 = vadd.f32 %v1022_v58, %v1021_v61  ;;  %v1026_v61 = vsel %vm854_vm10, %v984_v63, 0.0  ;;  %v989_v63 = vmul.f32 %v10284_v51, %v10284_v51  ;;  %v1032_v13 = vsel %vm854_vm10, %v987_v49, 0.0 }
 0x182   : > { %14669 = vst [vmem:[#allocation34_spill] sm:$0xff] %v10278_v56  ;;  %v988_v28 = vmul.f32 %v10278_v56, %v10278_v56 }
 0x183   : > { %v1025_v39 = vadd.f32 %v1024_v60, %v1023_v33  ;;  %v1036_v17 = vsel %vm854_vm10, %v989_v63, 0.0  ;;  %v450_v63 = vld [vmem:[%s14519_s4] sm:$0x3] }
 0x184   : > { %v1034_v1 = vsel %vm854_vm10, %v988_v28, 0.0 }
 0x185   : > { %v1027_v58 = vadd.f32 %v1026_v61, %v1025_v39  ;;  %v990_v61 = vmul.f32 %v10290_v0, %v10290_v0 }
 0x187   : > { %v1029_v33 = vadd.f32 %v1028_v7, %v1027_v58  ;;  %v1038_v56 = vsel %vm433_vm2, %v990_v61, 0.0 }
 0x189   : > { %v1031_v60 = vadd.f32 %v1030_v48, %v1029_v33 }
 0x18b   : > { %v1033_v39 = vadd.f32 %v1032_v13, %v1031_v60 }
 0x18d   : > { %v1035_v58 = vadd.f32 %v1034_v1, %v1033_v39 }
 0x18f   : > { %v1037_v7 = vadd.f32 %v1036_v17, %v1035_v58 }
 0x191   : > { %v1039_v36 = vadd.f32 %v1038_v56, %v1037_v7  ;;  %v1085_v56 = vperm.slane %v450_v63, 1 }
 0x193   : > { %v1040_v3 = vrot.slane %v1039_v36, 4  ;;  %v10317_v58 = vmul.f32 %v1085_v56, %v9967_v10  ;;  %v1090_v17 = vmul.f32 %v1085_v56, %v9959_v6  ;;  %v1091_v7 = vmul.f32 %v1085_v56, %v9969_v11 }
 0x195   : > { %v1041_v33 = vadd.f32 %v1040_v3, %v1039_v36  ;;  %14675 = vst [vmem:[#allocation39_spill] sm:$0xff] %v10317_v58  ;;  %v1092_v3 = vmul.f32 %v1085_v56, %v9971_v12 }
 0x197   : > { %v1042_v48 = vrot.slane %v1041_v33, 2 }
 0x199   : > { %v1043_v9 = vadd.f32 %v1042_v48, %v1041_v33  ;;  %v1093_v33 = vmul.f32 %v1085_v56, %v9975_v14  ;;  %v1095_v48 = vmul.f32 %v1085_v56, %v9979_v16  ;;  %v1107_v16 = vmul.f32 %v1085_v56, %v14666_v2  ;;  %v14683_v14 = vld [vmem:[#allocation36_spill] sm:$0xff] }
 0x19b   : > { %v1044_v51 = vrot.slane %v1043_v9, 1 }
 0x19d   : > { %v1045_v42 = vadd.f32 %v1044_v51, %v1043_v9  ;;  %v10308_v9 = vmul.f32 %v1085_v56, %v9955_v4  ;;  %v10311_v51 = vmul.f32 %v1085_v56, %v9963_v8 }
 0x19f   : > { %v1046_v49 = vmul.f32 %v1045_v42, %v10098_v45  ;;  %14673 = vst [vmem:[#allocation37_spill] sm:$0xff] %v10311_v51  ;;  %v1104_v45 = vmul.f32 %v1085_v56, %v10045_v37 }
 0x1a1   : > { %v1047_v60 = vadd.f32 1e-05, %v1046_v49  ;;  %v1096_v49 = vmul.f32 %v1085_v56, %v9989_v21  ;;  %v1103_v21 = vmul.f32 %v1085_v56, %v10038_v31  ;;  %v14680_v31 = vld [vmem:[#allocation4_spill] sm:$0xff] }
 0x1a3   : > { %9686 = vrsqrt.f32 %v1047_v60  ;;  %vm1054_vm15 = vweird.f32 %v1047_v60 }
 0x1a9   : > { %v9687_v13 = vpop.eup %9686 }
 0x1aa   : > { %v1049_v0 = vmul.f32 %v9687_v13, %v1047_v60  ;;  %vm1055_vm14 = vweird.f32 %v9687_v13  ;;  %v1094_v60 = vmul.f32 %v1085_v56, %v9977_v15  ;;  %v14682_v15 = vld [vmem:[#allocation35_spill] sm:$0xff] }
 0x1ab   : > { %vm1056_vm0 = vmor %vm1054_vm15, %vm1055_vm14  ;;  %vm2156_vm14 = vcmask 1044484  }
 0x1ac   : > { %v1050_v28 = vmul.f32 %v9687_v13, %v1049_v0  ;;  %v10314_v0 = vmul.f32 %v1085_v56, %v9957_v5  ;;  %vm10695_vm15 = vmor %vm2155_vm13, %vm2156_vm14  ;;  %vm2842_vm14 = vcmask 1041408  }
 0x1ae   : > { %v1051_v39 = vmul.f32 0.5, %v1050_v28  ;;  %14674 = vst [vmem:[#allocation38_spill] sm:$0xff] %v10314_v0 }
 0x1b0   : > { %v1052_v61 = vsub.f32 1.5, %v1051_v39  ;;  %v1097_v39 = vmul.f32 %v1085_v56, %v9991_v22  ;;  %v1109_v22 = vmul.f32 %v1085_v56, %v14670_v32 }
 0x1b2   : > { %v1053_v36 = vmul.f32 %v9687_v13, %v1052_v61  ;;  %v1101_v61 = vmul.f32 %v1085_v56, %v10020_v47 }
 0x1b4   : > { %v1057_v1 = vsel %vm1056_vm0, %v9687_v13, %v1053_v36  ;;  %v1098_v13 = vmul.f32 %v1085_v56, %v9996_v26  ;;  %v1102_v36 = vmul.f32 %v1085_v56, %v10033_v27  ;;  %v1108_v26 = vmul.f32 %v1085_v56, %v14668_v46 }
 0x1b5   : > { %v1058_v42 = vmul.f32 %v1057_v1, %v450_v63  ;;  %v1099_v63 = vmul.f32 %v1085_v56, %v10013_v41  ;;  %v1100_v1 = vmul.f32 %v1085_v56, %v10015_v43  ;;  %v1110_v41 = vmul.f32 %v1085_v56, %v10088_v25  ;;  %v14681_v43 = vld [vmem:[#allocation34_spill] sm:$0xff] }
 0x1b6   : > { %v1105_v46 = vmul.f32 %v1085_v56, %v10061_v20  ;;  %v14679_v20 = vld [vmem:[#allocation33_spill] sm:$0xff]  ;;  %vm1976_vm0 = vcmask 1042432  }
 0x1b7   : > { %v10327_v28 = vperm.slane %v1058_v42, 0  ;;  %v1106_v42 = vmul.f32 %v1085_v56, %v14663_v30  ;;  %v14678_v30 = vld [vmem:[#allocation32_spill] sm:$0xff]  ;;  %vm10755_vm3 = vmor %vm1976_vm0, %vm1977_vm1  ;;  %vm2843_vm0 = vcmask 1045508   ;;  %vm1899_vm1 = vcmask 1043968  }
 0x1b9   : > { %v10343_v47 = vmul.f32 %v10327_v28, %v10110_v29  ;;  %v10347_v27 = vmul.f32 %v10327_v28, %v10120_v50  ;;  %v10351_v37 = vmul.f32 %v10327_v28, %v10127_v52  ;;  %v1064_v2 = vmul.f32 %v10327_v28, %v10134_v55 }
 0x1ba   : > { %v1065_v25 = vmul.f32 %v10327_v28, %v10142_v40  ;;  %v1066_v29 = vmul.f32 %v10327_v28, %v10150_v18  ;;  %v1067_v32 = vmul.f32 %v10327_v28, %v10158_v34  ;;  %v1068_v50 = vmul.f32 %v10327_v28, %v10166_v53 }
 0x1bb   : > { %14676 = vst [vmem:[#allocation40_spill] sm:$0xff] %v10347_v27  ;;  %v1069_v52 = vmul.f32 %v10327_v28, %v10174_v38  ;;  %v1070_v56 = vmul.f32 %v10327_v28, %v10182_v59  ;;  %v1071_v55 = vmul.f32 %v10327_v28, %v10190_v19  ;;  %v1072_v40 = vmul.f32 %v10327_v28, %v10198_v62 }
 0x1bc   : > { %14677 = vst [vmem:[#allocation41_spill] sm:$0xff] %v10351_v37  ;;  %v1073_v18 = vmul.f32 %v10327_v28, %v10206_v35  ;;  %v1074_v34 = vmul.f32 %v10327_v28, %v10214_v44  ;;  %v1075_v53 = vmul.f32 %v10327_v28, %v10222_v24  ;;  %v1076_v38 = vmul.f32 %v10327_v28, %v10230_v23 }
 0x1bd   : > { %v1077_v59 = vmul.f32 %v10327_v28, %v10238_v54  ;;  %v1078_v19 = vmul.f32 %v10327_v28, %v10246_v57  ;;  %v1079_v62 = vmul.f32 %v10327_v28, %v14678_v30  ;;  %v1080_v35 = vmul.f32 %v10327_v28, %v14679_v20 }
 0x1be   : > { %v1081_v44 = vmul.f32 %v10327_v28, %v14680_v31  ;;  %v1082_v24 = vmul.f32 %v10327_v28, %v14681_v43  ;;  %v1083_v23 = vmul.f32 %v10327_v28, %v14682_v15  ;;  %v1084_v54 = vmul.f32 %v10327_v28, %v14683_v14 }
 0x1bf   : > { %v10396_v12 = vadd.f32 %v1090_v17, %v1064_v2  ;;  %v1116_v57 = vadd.f32 %v1091_v7, %v1065_v25  ;;  %v1117_v11 = vadd.f32 %v1092_v3, %v1066_v29  ;;  %v1118_v30 = vadd.f32 %v1093_v33, %v1067_v32 }
 0x1c0   : > { %v1119_v6 = vadd.f32 %v1094_v60, %v1068_v50  ;;  %v1120_v10 = vadd.f32 %v1095_v48, %v1069_v52  ;;  %v1121_v20 = vadd.f32 %v1096_v49, %v1070_v56  ;;  %v1122_v5 = vadd.f32 %v1097_v39, %v1071_v55 }
 0x1c1   : > { %v1123_v4 = vadd.f32 %v1098_v13, %v1072_v40  ;;  %v1124_v31 = vadd.f32 %v1099_v63, %v1073_v18  ;;  %v1125_v8 = vadd.f32 %v1100_v1, %v1074_v34  ;;  %v1126_v51 = vadd.f32 %v1101_v61, %v1075_v53 }
 0x1c2   : > { %v1127_v43 = vadd.f32 %v1102_v36, %v1076_v38  ;;  %v1128_v58 = vadd.f32 %v1103_v21, %v1077_v59  ;;  %v1129_v37 = vadd.f32 %v1104_v45, %v1078_v19  ;;  %v1130_v15 = vadd.f32 %v1105_v46, %v1079_v62 }
 0x1c3   : > { %v1131_v0 = vadd.f32 %v1106_v42, %v1080_v35  ;;  %v1132_v27 = vadd.f32 %v1107_v16, %v1081_v44  ;;  %v1133_v14 = vadd.f32 %v1108_v26, %v1082_v24  ;;  %v1134_v2 = vadd.f32 %v1109_v22, %v1083_v23 }
 0x1c4   : > { %v1135_v17 = vadd.f32 %v1110_v41, %v1084_v54  ;;  %v1141_v25 = vmax.f32 %v1116_v57, 0.0  ;;  %v1142_v7 = vmax.f32 %v1117_v11, 0.0  ;;  %v1143_v32 = vmax.f32 %v1118_v30, 0.0 }
 0x1c5   : > { %v1144_v3 = vmax.f32 %v1119_v6, 0.0  ;;  %v1145_v33 = vmax.f32 %v1120_v10, 0.0  ;;  %v1147_v48 = vmax.f32 %v1122_v5, 0.0  ;;  %v1146_v49 = vmax.f32 %v1121_v20, 0.0 }
 0x1c6   : > { %v1148_v60 = vmax.f32 %v1123_v4, 0.0  ;;  %v1149_v13 = vmax.f32 %v1124_v31, 0.0  ;;  %v1150_v63 = vmax.f32 %v1125_v8, 0.0  ;;  %v1151_v39 = vmax.f32 %v1126_v51, 0.0 }
 0x1c7   : > { %v1152_v61 = vmax.f32 %v1127_v43, 0.0  ;;  %v1153_v21 = vmax.f32 %v1128_v58, 0.0  ;;  %v1154_v45 = vmax.f32 %v1129_v37, 0.0  ;;  %v1155_v46 = vmax.f32 %v1130_v15, 0.0 }
 0x1c8   : > { %v1156_v36 = vmax.f32 %v1131_v0, 0.0  ;;  %v1157_v16 = vmax.f32 %v1132_v27, 0.0  ;;  %v1158_v26 = vmax.f32 %v1133_v14, 0.0  ;;  %v1159_v22 = vmax.f32 %v1134_v2, 0.0 }
 0x1c9   : > { %v1160_v41 = vmax.f32 %v1135_v17, 0.0  ;;  %v10398_v1 = vpack.c.bf16 %v1141_v25, %v1141_v25  ;;  %v1172_v11 = vpack.c.bf16 %v1147_v48, %v1147_v48  ;;  %v10400_v6 = vpack.c.bf16 %v1142_v7, %v1142_v7 }
 0x1ca   : > { %v10402_v5 = vpack.c.bf16 %v1143_v32, %v1143_v32  ;;  %v10404_v4 = vpack.c.bf16 %v1144_v3, %v1144_v3  ;;  %v10406_v8 = vpack.c.bf16 %v1145_v33, %v1145_v33  ;;  %v10408_v10 = vpack.c.bf16 %v1146_v49, %v1146_v49 }
 0x1cb   : > { %v1173_v37 = vpack.c.bf16 %v1148_v60, %v1148_v60  ;;  %v1174_v27 = vpack.c.bf16 %v1149_v13, %v1149_v13  ;;  %v1175_v51 = vpack.c.bf16 %v1150_v63, %v1150_v63  ;;  %v1176_v0 = vpack.c.bf16 %v1151_v39, %v1151_v39 }
 0x1cc   : > { %v1177_v58 = vpack.c.bf16 %v1152_v61, %v1152_v61  ;;  %v10410_v42 = vpack.c.bf16 %v1153_v21, %v1153_v21  ;;  %v10412_v29 = vpack.c.bf16 %v1154_v45, %v1154_v45  ;;  %v10414_v50 = vpack.c.bf16 %v1155_v46, %v1155_v46 }
 0x1cd   : > { %v10416_v52 = vpack.c.bf16 %v1156_v36, %v1156_v36  ;;  %v10418_v56 = vpack.c.bf16 %v1157_v16, %v1157_v16  ;;  %v1298_v55 = vshll.u32 %v1172_v11, 16  ;;  %v10420_v40 = vpack.c.bf16 %v1158_v26, %v1158_v26 }
 0x1ce   : > { %v10422_v18 = vpack.c.bf16 %v1159_v22, %v1159_v22  ;;  %v10424_v34 = vpack.c.bf16 %v1160_v41, %v1160_v41  ;;  %v1252_v53 = vshrl.u32 %v10400_v6, 16  ;;  %v1258_v38 = vshll.u32 %v10402_v5, 16 }
 0x1cf   : > { %v1262_v59 = vshrl.u32 %v10402_v5, 16  ;;  %v10429_v19 = vrot.slane %v1298_v55, 5  ;;  %v1302_v62 = vshrl.u32 %v1172_v11, 16  ;;  %v1268_v35 = vshll.u32 %v10404_v4, 16 }
 0x1d0   : > { %v1308_v44 = vshll.u32 %v1173_v37, 16  ;;  %v1312_v24 = vshrl.u32 %v1173_v37, 16  ;;  %v1318_v23 = vshll.u32 %v1174_v27, 16  ;;  %v1272_v54 = vshrl.u32 %v10404_v4, 16 }
 0x1d1   : > { %v1304_v57 = vrot.slane %v1302_v62, 4  ;;  %v1322_v30 = vshrl.u32 %v1174_v27, 16  ;;  %v1328_v20 = vshll.u32 %v1175_v51, 16  ;;  %v1278_v31 = vshll.u32 %v10406_v8, 16 }
 0x1d2   : > { %v1310_v43 = vrot.slane %v1308_v44, 5  ;;  %v1314_v15 = vrot.slane %v1312_v24, 4  ;;  %v1320_v14 = vrot.slane %v1318_v23, 5  ;;  %v1282_v2 = vshrl.u32 %v10406_v8, 16 }
 0x1d3   : > { %v1305_v17 = vor.u32 %v1304_v57, %v10429_v19  ;;  %v1324_v25 = vrot.slane %v1322_v30, 4  ;;  %v1330_v7 = vrot.slane %v1328_v20, 5  ;;  %v14684_v32 = vmov 0 }
 0x1d4   : > { %v14685_v32 = vsel %vm10438_vm4, 4294967295, %v14684_v32  ;;  %v1315_v3 = vor.u32 %v1314_v15, %v1310_v43  ;;  %v1332_v33 = vshrl.u32 %v1175_v51, 16  ;;  %v1338_v48 = vshll.u32 %v1176_v0, 16 }
 0x1d5   : > { %14686 = vst [vmem:[#allocation32_spill] sm:$0xff] %v14685_v32  ;;  %v1342_v49 = vshrl.u32 %v1176_v0, 16  ;;  %v1306_v60 = vrot.slane %v1305_v17, 4  ;;  %v1325_v13 = vor.u32 %v1324_v25, %v1320_v14  ;;  %v1348_v63 = vshll.u32 %v1177_v58, 16 }
 0x1d6   : > { %v1352_v39 = vshrl.u32 %v1177_v58, 16  ;;  %v1316_v61 = vrot.slane %v1315_v3, 4  ;;  %v1334_v21 = vrot.slane %v1332_v33, 4  ;;  %v1340_v45 = vrot.slane %v1338_v48, 5 }
 0x1d7   : > { %v1344_v46 = vrot.slane %v1342_v49, 4  ;;  %v1311_v36 = vsel %vm10438_vm4, %v1306_v60, %v1310_v43  ;;  %v1326_v16 = vrot.slane %v1325_v13, 4  ;;  %v1350_v26 = vrot.slane %v1348_v63, 5 }
 0x1d8   : > { %v1354_v22 = vrot.slane %v1352_v39, 4  ;;  %v1321_v41 = vsel %vm10438_vm4, %v1316_v61, %v1320_v14  ;;  %v1335_v11 = vor.u32 %v1334_v21, %v1330_v7  ;;  %v1358_v27 = vshll.u32 %v10410_v42, 16  ;;  %1480 = vst.msk [vmem:[#allocation2 + $0x34] sm:$0xf] %vm433_vm2, %v1311_v36 }
 0x1d9   : > { %v1345_v37 = vor.u32 %v1344_v46, %v1340_v45  ;;  %v1331_v51 = vsel %vm10438_vm4, %v1326_v16, %v1330_v7  ;;  %v1362_v58 = vshrl.u32 %v10410_v42, 16  ;;  %v1368_v55 = vshll.u32 %v10412_v29, 16  ;;  %1481 = vst.msk [vmem:[#allocation2 + $0x38] sm:$0xf] %vm433_vm2, %v1321_v41 }
 0x1da   : > { %v1355_v0 = vor.u32 %v1354_v22, %v1350_v26  ;;  %v1336_v62 = vrot.slane %v1335_v11, 4  ;;  %v1360_v24 = vrot.slane %v1358_v27, 5  ;;  %v1372_v23 = vshrl.u32 %v10412_v29, 16  ;;  %1482 = vst.msk [vmem:[#allocation2 + $0x3c] sm:$0xf] %vm433_vm2, %v1331_v51 }
 0x1db   : > { %v1346_v44 = vrot.slane %v1345_v37, 4  ;;  %v1364_v30 = vrot.slane %v1362_v58, 4  ;;  %v1370_v20 = vrot.slane %v1368_v55, 5  ;;  %v1378_v43 = vshll.u32 %v10414_v50, 16 }
 0x1dc   : > { %v1356_v57 = vrot.slane %v1355_v0, 4  ;;  %v1341_v15 = vsel %vm10438_vm4, %v1336_v62, %v1340_v45  ;;  %v1374_v14 = vrot.slane %v1372_v23, 4  ;;  %v1382_v17 = vshrl.u32 %v10414_v50, 16 }
 0x1dd   : > { %v1351_v42 = vsel %vm10438_vm4, %v1346_v44, %v1350_v26  ;;  %v1365_v29 = vor.u32 %v1364_v30, %v1360_v24  ;;  %v1380_v7 = vrot.slane %v1378_v43, 5  ;;  %v1388_v3 = vshll.u32 %v10416_v52, 16  ;;  %1483 = vst.msk [vmem:[#allocation2 + $0x40] sm:$0xf] %vm433_vm2, %v1341_v15  ;;  %v438_v44 = vld [vmem:[#allocation2 + $0x4] sm:$0xf] }
 0x1de   : > { %v1361_v25 = vsel %vm10438_vm4, %v1356_v57, %v1360_v24  ;;  %v1375_v33 = vor.u32 %v1374_v14, %v1370_v20  ;;  %v1384_v48 = vrot.slane %v1382_v17, 4  ;;  %v1392_v49 = vshrl.u32 %v10416_v52, 16  ;;  %1484 = vst.msk [vmem:[#allocation2 + $0x44] sm:$0xf] %vm433_vm2, %v1351_v42 }
 0x1df   : > { %v1398_v60 = vshll.u32 %v10418_v56, 16  ;;  %v1366_v13 = vrot.slane %v1365_v29, 4  ;;  %v1390_v63 = vrot.slane %v1388_v3, 5  ;;  %v1402_v50 = vshrl.u32 %v10418_v56, 16  ;;  %1485 = vst.msk [vmem:[#allocation2 + $0x48] sm:$0xf] %vm433_vm2, %v1361_v25 }
 0x1e0   : > { %v1408_v39 = vshll.u32 %v10420_v40, 16  ;;  %v1376_v61 = vrot.slane %v1375_v33, 4  ;;  %v1385_v21 = vor.u32 %v1384_v48, %v1380_v7  ;;  %v1394_v45 = vrot.slane %v1392_v49, 4  ;;  %v1496_v29 = vld [vmem:[#allocation2 + $0x68] sm:$0x3] }
 0x1e1   : > { %v1400_v46 = vrot.slane %v1398_v60, 5  ;;  %v1371_v36 = vsel %vm10438_vm4, %v1366_v13, %v1370_v20  ;;  %v1404_v52 = vrot.slane %v1402_v50, 4  ;;  %v1412_v26 = vshrl.u32 %v10420_v40, 16 }
 0x1e2   : > { %v1410_v16 = vrot.slane %v1408_v39, 5  ;;  %v1381_v22 = vsel %vm10438_vm4, %v1376_v61, %v1380_v7  ;;  %v1386_v41 = vrot.slane %v1385_v21, 4  ;;  %v1395_v56 = vor.u32 %v1394_v45, %v1390_v63  ;;  %1486 = vst.msk [vmem:[#allocation2 + $0x4c] sm:$0xf] %vm433_vm2, %v1371_v36  ;;  %v14693_v21 = vld [vmem:[#allocation40_spill] sm:$0xff]  ;;  %v14694_v45 = vld [vmem:[#allocation38_spill] sm:$0xff] }
 0x1e3   : > { %v1418_v11 = vshll.u32 %v10422_v18, 16  ;;  %v1405_v37 = vor.u32 %v1404_v52, %v1400_v46  ;;  %v1414_v27 = vrot.slane %v1412_v26, 4  ;;  %v1422_v51 = vshrl.u32 %v10422_v18, 16  ;;  %1487 = vst.msk [vmem:[#allocation2 + $0x50] sm:$0xf] %vm433_vm2, %v1381_v22  ;;  %v14695_v36 = vld [vmem:[#allocation41_spill] sm:$0xff] }
 0x1e4   : > { %v1428_v0 = vshll.u32 %v10424_v34, 16  ;;  %v1391_v40 = vsel %vm10438_vm4, %v1386_v41, %v1390_v63  ;;  %v1396_v58 = vrot.slane %v1395_v56, 4  ;;  %v1432_v62 = vshrl.u32 %v10424_v34, 16  ;;  %v1550_v34 = vld [vmem:[#allocation2] sm:$0xf]  ;;  %v14697_v56 = vld [vmem:[#allocation37_spill] sm:$0xff] }
 0x1e5   : > { %v1420_v55 = vrot.slane %v1418_v11, 5  ;;  %v1406_v24 = vrot.slane %v1405_v37, 4  ;;  %v1415_v23 = vor.u32 %v1414_v27, %v1410_v16  ;;  %v1424_v57 = vrot.slane %v1422_v51, 4  ;;  %1488 = vst.msk [vmem:[#allocation2 + $0x54] sm:$0xf] %vm433_vm2, %v1391_v40  ;;  %v14696_v52 = vld [vmem:[#allocation39_spill] sm:$0xff] }
 0x1e6   : > { %v1430_v30 = vrot.slane %v1428_v0, 5  ;;  %v1401_v20 = vsel %vm10438_vm4, %v1396_v58, %v1400_v46  ;;  %v1434_v43 = vrot.slane %v1432_v62, 4  ;;  %v1288_v15 = vshll.u32 %v10408_v10, 16 }
 0x1e7   : > { %v1411_v42 = vsel %vm10438_vm4, %v1406_v24, %v1410_v16  ;;  %v1416_v14 = vrot.slane %v1415_v23, 4  ;;  %v1425_v17 = vor.u32 %v1424_v57, %v1420_v55  ;;  %1489 = vst.msk [vmem:[#allocation2 + $0x58] sm:$0xf] %vm433_vm2, %v1401_v20  ;;  %v439_v7 = vsel %vm10487_vm5, 0, %v438_v44 }
 0x1e8   : > { %v1435_v25 = vor.u32 %v1434_v43, %v1430_v30  ;;  %1490 = vst.msk [vmem:[#allocation2 + $0x5c] sm:$0xf] %vm433_vm2, %v1411_v42  ;;  %v1111_v3 = vadd.f32 %v10308_v9, %v10343_v47  ;;  %v14689_v49 = vmov 0  ;;  %v1576_v60 = vshrl.u32 %v1550_v34, 16  ;;  %v14692_v47 = vld [vmem:[#allocation31_spill] sm:$0xff] }
 0x1e9   : > { %v1421_v33 = vsel %vm10438_vm4, %v1416_v14, %v1420_v55  ;;  %v1426_v48 = vrot.slane %v1425_v17, 4  ;;  %v14690_v49 = vsel %vm10506_vm9, 4294967295, %v14689_v49  ;;  %440 = vst [vmem:[#allocation2 + $0x4] sm:$0xf] %v439_v7  ;;  %v1579_v50 = vshll.u32 %v1550_v34, 16 }
 0x1ea   : > { %14691 = vst [vmem:[#allocation33_spill] sm:$0xff] %v14690_v49  ;;  %v1436_v13 = vrot.slane %v1435_v25, 4  ;;  %v1136_v63 = vmax.f32 %v1111_v3, 0.0  ;;  %v1061_v9 = vmul.f32 %v10327_v28, %v14692_v47  ;;  %v10515_v61 = vrot.slane %v1576_v60, 4  ;;  %v1570_v5 = vld [vmem:[#allocation2 + $0x50] sm:$0xf] }
 0x1eb   : > { %1491 = vst.msk [vmem:[#allocation2 + $0x60] sm:$0xf] %vm433_vm2, %v1421_v33  ;;  %v1431_v39 = vsel %vm10438_vm4, %v1426_v48, %v1430_v30  ;;  %v1113_v46 = vadd.f32 %v14694_v45, %v14693_v21  ;;  %v1114_v16 = vadd.f32 %v14696_v52, %v14695_v36  ;;  %v1581_v41 = vrot.slane %v1579_v50, 5 }
 0x1ec   : > { %1492 = vst.msk [vmem:[#allocation2 + $0x64] sm:$0xf] %vm433_vm2, %v1431_v39  ;;  %v1497_v26 = vsel %vm10506_vm9, %v1436_v13, %v1496_v29  ;;  %v1161_v22 = vpack.c.bf16 %v1136_v63, %v1136_v63  ;;  %v1112_v28 = vadd.f32 %v14697_v56, %v1061_v9  ;;  %v1140_v27 = vmax.f32 %v10396_v12, 0.0 }
 0x1ed   : > { %1498 = vst [vmem:[#allocation2 + $0x68] sm:$0x3] %v1497_v26  ;;  %v1138_v11 = vmax.f32 %v1113_v46, 0.0  ;;  %v1139_v37 = vmax.f32 %v1114_v16, 0.0  ;;  %v1238_v51 = vshll.u32 %v10398_v1, 16  ;;  %v1292_v0 = vshrl.u32 %v10408_v10, 16 }
 0x1ee   : > { %v1189_v40 = vshll.u32 %v1161_v22, 16  ;;  %v1137_v58 = vmax.f32 %v1112_v28, 0.0  ;;  %v1192_v55 = vshrl.u32 %v1161_v22, 16  ;;  %v14698_v62 = vmov 0 }
 0x1ef   : > { %v14699_v62 = vsel %vm10530_vm12, 4294967295, %v14698_v62  ;;  %v1582_v44 = vor.u32 %v1581_v41, %v10515_v61  ;;  %v1163_v24 = vpack.c.bf16 %v1138_v11, %v1138_v11  ;;  %v1164_v23 = vpack.c.bf16 %v1139_v37, %v1139_v37 }
 0x1f0   : > { %14700 = vst [vmem:[#allocation4_spill] sm:$0xff] %v14699_v62  ;;  %v1165_v57 = vpack.c.bf16 %v1140_v27, %v1140_v27  ;;  %v1191_v30 = vrot.slane %v1189_v40, 5  ;;  %v1466_v12 = vld [vmem:[#allocation2 + $0x4] sm:$0x8]  ;;  %v1162_v18 = vpack.c.bf16 %v1137_v58, %v1137_v58  ;;  %v1194_v20 = vrot.slane %v1192_v55, 4 }
 0x1f1   : > { %v10535_v43 = vrot.slane %v1238_v51, 5  ;;  %v1208_v34 = vshll.u32 %v1163_v24, 16  ;;  %v1212_v42 = vshrl.u32 %v1163_v24, 16  ;;  %v1218_v14 = vshll.u32 %v1164_v23, 16 }
 0x1f2   : > { %v1222_v17 = vshrl.u32 %v1164_v23, 16  ;;  %v1467_v25 = vsel %vm10530_vm12, %v1191_v30, %v1466_v12  ;;  %v1195_v29 = vor.u32 %v1194_v20, %v1191_v30  ;;  %v1198_v7 = vshll.u32 %v1162_v18, 16 }
 0x1f3   : > { %v1202_v3 = vshrl.u32 %v1162_v18, 16  ;;  %1468 = vst [vmem:[#allocation2 + $0x4] sm:$0x8] %v1467_v25  ;;  %v1210_v33 = vrot.slane %v1208_v34, 5  ;;  %v1214_v48 = vrot.slane %v1212_v42, 4  ;;  %v1220_v60 = vrot.slane %v1218_v14, 5 }
 0x1f4   : > { %v1224_v13 = vrot.slane %v1222_v17, 4  ;;  %v1196_v63 = vrot.slane %v1195_v29, 4  ;;  %v1200_v50 = vrot.slane %v1198_v7, 5  ;;  %v1228_v9 = vshll.u32 %v1165_v57, 16  ;;  %v10581_v14 = vld [vmem:[#allocation2 + $0x54] sm:$0xf] }
 0x1f5   : > { %v1204_v47 = vrot.slane %v1202_v3, 4  ;;  %v1215_v39 = vor.u32 %v1214_v48, %v1210_v33  ;;  %v1232_v21 = vshrl.u32 %v1165_v57, 16  ;;  %v1242_v45 = vshrl.u32 %v10398_v1, 16 }
 0x1f6   : > { %v1225_v61 = vor.u32 %v1224_v13, %v1220_v60  ;;  %v1201_v46 = vsel %vm10438_vm4, %v1196_v63, %v1200_v50  ;;  %v1230_v52 = vrot.slane %v1228_v9, 5  ;;  %v1248_v16 = vshll.u32 %v10400_v6, 16 }
 0x1f7   : > { %v1205_v36 = vor.u32 %v1204_v47, %v1200_v50  ;;  %1469 = vst.msk [vmem:[#allocation2 + $0x8] sm:$0xf] %vm433_vm2, %v1201_v46  ;;  %v1216_v26 = vrot.slane %v1215_v39, 4  ;;  %v1234_v41 = vrot.slane %v1232_v21, 4  ;;  %v1244_v56 = vrot.slane %v1242_v45, 4 }
 0x1f8   : > { %v1226_v22 = vrot.slane %v1225_v61, 4  ;;  %v10546_v28 = vrot.slane %v1278_v31, 5  ;;  %v1250_v37 = vrot.slane %v1248_v16, 5  ;;  %v1254_v1 = vrot.slane %v1252_v53, 4 }
 0x1f9   : > { %v1206_v11 = vrot.slane %v1205_v36, 4  ;;  %v1221_v27 = vsel %vm10438_vm4, %v1216_v26, %v1220_v60  ;;  %v1235_v40 = vor.u32 %v1234_v41, %v1230_v52  ;;  %v1245_v58 = vor.u32 %v1244_v56, %v10535_v43 }
 0x1fa   : > { %v1231_v51 = vsel %vm10438_vm4, %v1226_v22, %v1230_v52  ;;  %v10557_v55 = vrot.slane %v1282_v2, 4  ;;  %v1551_v31 = vld [vmem:[#allocation2 + $0x4] sm:$0xf]  ;;  %v1583_v24 = vrot.slane %v1582_v44, 4  ;;  %1471 = vst.msk [vmem:[#allocation2 + $0x10] sm:$0xf] %vm433_vm2, %v1221_v27  ;;  %v1255_v6 = vor.u32 %v1254_v1, %v1250_v37 }
 0x1fb   : > { %v1211_v23 = vsel %vm10438_vm4, %v1206_v11, %v1210_v33  ;;  %v1585_v53 = vshll.u32 %v1551_v31, 16  ;;  %v1589_v57 = vshrl.u32 %v1551_v31, 16  ;;  %v1236_v30 = vrot.slane %v1235_v40, 4  ;;  %1472 = vst.msk [vmem:[#allocation2 + $0x14] sm:$0xf] %vm433_vm2, %v1231_v51 }
 0x1fc   : > { %1470 = vst.msk [vmem:[#allocation2 + $0xc] sm:$0xf] %vm433_vm2, %v1211_v23  ;;  %v1246_v12 = vrot.slane %v1245_v58, 4  ;;  %v10565_v18 = vrot.slane %v1288_v15, 5  ;;  %v10569_v8 = vrot.slane %v1292_v0, 4  ;;  %v1256_v2 = vrot.slane %v1255_v6, 4 }
 0x1fd   : > { %v10574_v44 = vrot.slane %v1258_v38, 5  ;;  %v1587_v20 = vrot.slane %v1585_v53, 5  ;;  %v1591_v34 = vrot.slane %v1589_v57, 4  ;;  %v1241_v42 = vsel %vm10438_vm4, %v1236_v30, %v10535_v43 }
 0x1fe   : > { %v1251_v15 = vsel %vm10438_vm4, %v1246_v12, %v1250_v37  ;;  %v10585_v10 = vrot.slane %v1262_v59, 4  ;;  %v10589_v0 = vrot.slane %v1268_v35, 5  ;;  %v1552_v38 = vld [vmem:[#allocation2 + $0x8] sm:$0xf]  ;;  %1473 = vst.msk [vmem:[#allocation2 + $0x18] sm:$0xf] %vm433_vm2, %v1241_v42  ;;  %v1285_v35 = vor.u32 %v10557_v55, %v10546_v28 }
 0x1ff   : > { %v1261_v43 = vsel %vm10438_vm4, %v1256_v2, %v10574_v44  ;;  %v1588_v17 = vsel %vm10438_vm4, %v1583_v24, %v1587_v20  ;;  %v1592_v25 = vor.u32 %v1591_v34, %v1587_v20  ;;  %v1595_v29 = vshll.u32 %v1552_v38, 16  ;;  %1474 = vst.msk [vmem:[#allocation2 + $0x1c] sm:$0xf] %vm433_vm2, %v1251_v15 }
 0x200   : > { %v1599_v7 = vshrl.u32 %v1552_v38, 16  ;;  %v10600_v59 = vrot.slane %v1272_v54, 4  ;;  %v1295_v3 = vor.u32 %v10569_v8, %v10565_v18  ;;  %1824 = vrot.lane.b32.xlu2 %v1588_v17, %s9731_s17  ;;  %1475 = vst.msk [vmem:[#allocation2 + $0x20] sm:$0xf] %vm433_vm2, %v1261_v43  ;;  %v1785_v33 = vshll.u32 %v10581_v14, 16 }
 0x201   : > { %v1593_v48 = vrot.slane %v1592_v25, 4  ;;  %v1597_v60 = vrot.slane %v1595_v29, 5  ;;  %v1554_v13 = vld [vmem:[#allocation2 + $0x10] sm:$0xf]  ;;  %v1789_v4 = vshrl.u32 %v10581_v14, 16  ;;  %v1775_v9 = vshll.u32 %v1570_v5, 16 }
 0x202   : > { %v1601_v63 = vrot.slane %v1599_v7, 4  ;;  %v1615_v50 = vshll.u32 %v1554_v13, 16  ;;  %v1619_v47 = vshrl.u32 %v1554_v13, 16  ;;  %v1779_v39 = vshrl.u32 %v1570_v5, 16  ;;  %v1555_v36 = vld [vmem:[#allocation2 + $0x14] sm:$0xf] }
 0x203   : > { %v1553_v54 = vld [vmem:[#allocation2 + $0xc] sm:$0xf]  ;;  %v1598_v61 = vsel %vm10438_vm4, %v1593_v48, %v1597_v60  ;;  %v1625_v26 = vshll.u32 %v1555_v36, 16  ;;  %v1629_v22 = vshrl.u32 %v1555_v36, 16  ;;  %v1265_v1 = vor.u32 %v10585_v10, %v10574_v44 }
 0x204   : > { %v1605_v21 = vshll.u32 %v1553_v54, 16  ;;  %v1609_v45 = vshrl.u32 %v1553_v54, 16  ;;  %v1602_v46 = vor.u32 %v1601_v63, %v1597_v60  ;;  %1826 = vrot.lane.b32.xlu0 %v1598_v61, %s9731_s17  ;;  %v1617_v52 = vrot.slane %v1615_v50, 5  ;;  %v1572_v50 = vld [vmem:[#allocation2 + $0x58] sm:$0xf] }
 0x205   : > { %v1621_v16 = vrot.slane %v1619_v47, 4  ;;  %v1556_v37 = vld [vmem:[#allocation2 + $0x18] sm:$0xf]  ;;  %v1627_v51 = vrot.slane %v1625_v26, 5  ;;  %v1631_v6 = vrot.slane %v1629_v22, 4  ;;  %v10618_v34 = vrot.slane %v1775_v9, 5 }
 0x206   : > { %v1607_v41 = vrot.slane %v1605_v21, 5  ;;  %v1611_v56 = vrot.slane %v1609_v45, 4  ;;  %v1603_v11 = vrot.slane %v1602_v46, 4  ;;  %v1557_v40 = vld [vmem:[#allocation2 + $0x1c] sm:$0xf]  ;;  %v1635_v58 = vshll.u32 %v1556_v37, 16 }
 0x207   : > { %v1622_v27 = vor.u32 %v1621_v16, %v1617_v52  ;;  %v1639_v55 = vshrl.u32 %v1556_v37, 16  ;;  %v1645_v23 = vshll.u32 %v1557_v40, 16  ;;  %v1558_v53 = vld [vmem:[#allocation2 + $0x20] sm:$0xf]  ;;  %v1649_v8 = vshrl.u32 %v1557_v40, 16 }
 0x208   : > { %v1612_v31 = vor.u32 %v1611_v56, %v1607_v41  ;;  %v1608_v24 = vsel %vm10438_vm4, %v1603_v11, %v1607_v41  ;;  %v1637_v30 = vrot.slane %v1635_v58, 5  ;;  %v1632_v20 = vor.u32 %v1631_v6, %v1627_v51 }
 0x209   : > { %1828 = vrot.lane.b32.xlu1 %v1608_v24, %s9731_s17  ;;  %v1623_v57 = vrot.slane %v1622_v27, 4  ;;  %v1641_v12 = vrot.slane %v1639_v55, 4  ;;  %v1647_v44 = vrot.slane %v1645_v23, 5  ;;  %v1651_v15 = vrot.slane %v1649_v8, 4  ;;  %v1502_v55 = vld [vmem:[#allocation2 + $0xc] sm:$0xf] }
 0x20a   : > { %v1613_v2 = vrot.slane %v1612_v31, 4  ;;  %v1655_v14 = vshll.u32 %v1558_v53, 16  ;;  %v1781_v10 = vrot.slane %v1779_v39, 4  ;;  %v1633_v17 = vrot.slane %v1632_v20, 4  ;;  %1527 = vst.msk [vmem:[#allocation3 + $0x3c] sm:$0xf] %vm433_vm2, %v1502_v55 }
 0x20b   : > { %v1628_v42 = vsel %vm10438_vm4, %v1623_v57, %v1627_v51  ;;  %v1642_v43 = vor.u32 %v1641_v12, %v1637_v30  ;;  %v1266_v25 = vrot.slane %v1265_v1, 4  ;;  %v1286_v29 = vrot.slane %v1285_v35, 4 }
 0x20c   : > { %v1618_v38 = vsel %vm10438_vm4, %v1613_v2, %v1617_v52  ;;  %1832 = vrot.lane.b32.xlu0 %v1628_v42, %s9731_s17  ;;  %v1652_v7 = vor.u32 %v1651_v15, %v1647_v44  ;;  %v1659_v5 = vshrl.u32 %v1558_v53, 16  ;;  %v1296_v48 = vrot.slane %v1295_v3, 4  ;;  %v1574_v53 = vld [vmem:[#allocation2 + $0x60] sm:$0x7] }
 0x20d   : > { %1830 = vrot.lane.b32.xlu2 %v1618_v38, %s9731_s17  ;;  %v1787_v60 = vrot.slane %v1785_v33, 5  ;;  %v1791_v13 = vrot.slane %v1789_v4, 4  ;;  %v1271_v63 = vsel %vm10438_vm4, %v1266_v25, %v10589_v0  ;;  %v1657_v54 = vrot.slane %v1655_v14, 5  ;;  %v1573_v4 = vld [vmem:[#allocation2 + $0x5c] sm:$0xf] }
 0x20e   : > { %v1782_v47 = vor.u32 %v1781_v10, %v10618_v34  ;;  %1476 = vst.msk [vmem:[#allocation2 + $0x24] sm:$0xf] %vm433_vm2, %v1271_v63  ;;  %v1275_v35 = vor.u32 %v10600_v59, %v10589_v0  ;;  %v1643_v9 = vrot.slane %v1642_v43, 4  ;;  %v1638_v39 = vsel %vm10438_vm4, %v1633_v17, %v1637_v30  ;;  %v1563_v17 = vld [vmem:[#allocation2 + $0x34] sm:$0xf] }
 0x20f   : > { %v1653_v3 = vrot.slane %v1652_v7, 4  ;;  %v1661_v33 = vrot.slane %v1659_v5, 4  ;;  %v1291_v21 = vsel %vm10438_vm4, %v1286_v29, %v10565_v18  ;;  %v1792_v45 = vor.u32 %v1791_v13, %v1787_v60  ;;  %v1505_v5 = vld [vmem:[#allocation2 + $0x18] sm:$0xf] }
 0x210   : > { %v1276_v61 = vrot.slane %v1275_v35, 4  ;;  %v1795_v46 = vshll.u32 %v1572_v50, 16  ;;  %v1799_v36 = vshrl.u32 %v1572_v50, 16  ;;  %v1301_v0 = vsel %vm10438_vm4, %v1296_v48, %v10429_v19  ;;  %1478 = vst.msk [vmem:[#allocation2 + $0x2c] sm:$0xf] %vm433_vm2, %v1291_v21 }
 0x211   : > { %1834 = vrot.lane.b32.xlu1 %v1638_v39, %s9731_s17  ;;  %v1805_v59 = vshll.u32 %v1573_v4, 16  ;;  %v1809_v16 = vshrl.u32 %v1573_v4, 16  ;;  %1479 = vst.msk [vmem:[#allocation2 + $0x30] sm:$0xf] %vm433_vm2, %v1301_v0  ;;  %v1648_v18 = vsel %vm10438_vm4, %v1643_v9, %v1647_v44  ;;  %v1658_v26 = vsel %vm10438_vm4, %v1653_v3, %v1657_v54  ;;  %v1520_v35 = vld [vmem:[#allocation2 + $0x54] sm:$0xf] }
 0x212   : > { %v1281_v52 = vsel %vm10438_vm4, %v1276_v61, %v10546_v28  ;;  %v1783_v22 = vrot.slane %v1782_v47, 4  ;;  %v1662_v41 = vor.u32 %v1661_v33, %v1657_v54  ;;  %v1793_v19 = vrot.slane %v1792_v45, 4  ;;  %1530 = vst.msk [vmem:[#allocation3 + $0x78] sm:$0xf] %vm433_vm2, %v1505_v5  ;;  %v10672_v33 = vld [vmem:[#allocation2 + $0x64] sm:$0xf] }
 0x213   : > { %1477 = vst.msk [vmem:[#allocation2 + $0x28] sm:$0xf] %vm433_vm2, %v1281_v52  ;;  %v1797_v56 = vrot.slane %v1795_v46, 5  ;;  %v1801_v11 = vrot.slane %v1799_v36, 4  ;;  %v1807_v1 = vrot.slane %v1805_v59, 5  ;;  %v1811_v51 = vrot.slane %v1809_v16, 4 }
 0x214   : > { %1838 = vrot.lane.b32.xlu0 %v1658_v26, %s9731_s17  ;;  %v1788_v40 = vsel %vm10438_vm4, %v1783_v22, %v1787_v60  ;;  %v1663_v58 = vrot.slane %v1662_v41, 4  ;;  %v1815_v10 = vshll.u32 %v1574_v53, 16  ;;  %v1819_v7 = vshrl.u32 %v1574_v53, 16  ;;  %1545 = vst.msk [vmem:[#allocation3 + $0x1a4] sm:$0xf] %vm433_vm2, %v1520_v35 }
 0x215   : > { %1836 = vrot.lane.b32.xlu2 %v1648_v18, %s9731_s17  ;;  %v1559_v28 = vld [vmem:[#allocation2 + $0x24] sm:$0xf]  ;;  %v1798_v6 = vsel %vm10438_vm4, %v1793_v19, %v1797_v56  ;;  %v1802_v57 = vor.u32 %v1801_v11, %v1797_v56  ;;  %v1812_v8 = vor.u32 %v1811_v51, %v1807_v1  ;;  %v1705_v47 = vshll.u32 %v1563_v17, 16  ;;  %v1564_v59 = vld [vmem:[#allocation2 + $0x38] sm:$0xf] }
 0x216   : > { %v1665_v37 = vshll.u32 %v1559_v28, 16  ;;  %v1669_v27 = vshrl.u32 %v1559_v28, 16  ;;  %v1817_v54 = vrot.slane %v1815_v10, 5  ;;  %v1821_v3 = vrot.slane %v1819_v7, 4  ;;  %v1500_v36 = vld [vmem:[#allocation2 + $0x4] sm:$0xf] }
 0x217   : > { %v1561_v23 = vld [vmem:[#allocation2 + $0x2c] sm:$0xf]  ;;  %v1803_v25 = vrot.slane %v1802_v57, 4  ;;  %v1813_v29 = vrot.slane %v1812_v8, 4  ;;  %v1709_v4 = vshrl.u32 %v1563_v17, 16  ;;  %v1707_v0 = vrot.slane %v1705_v47, 5 }
 0x218   : > { %v1667_v31 = vrot.slane %v1665_v37, 5  ;;  %v1671_v24 = vrot.slane %v1669_v27, 4  ;;  %v1685_v2 = vshll.u32 %v1561_v23, 16  ;;  %v1689_v42 = vshrl.u32 %v1561_v23, 16  ;;  %v1562_v50 = vld [vmem:[#allocation2 + $0x30] sm:$0xf] }
 0x219   : > { %1864 = vrot.lane.b32.xlu1 %v1788_v40, %s9731_s17  ;;  %v1808_v9 = vsel %vm10438_vm4, %v1803_v25, %v1807_v1  ;;  %v1818_v39 = vsel %vm10438_vm4, %v1813_v29, %v1817_v54  ;;  %v1695_v21 = vshll.u32 %v1562_v50, 16  ;;  %v1699_v46 = vshrl.u32 %v1562_v50, 16  ;;  %1525 = vst.msk [vmem:[#allocation3 + $0x14] sm:$0xf] %vm433_vm2, %v1500_v36  ;;  %v1521_v26 = vld [vmem:[#allocation2 + $0x58] sm:$0xf] }
 0x21a   : > { %v1560_v30 = vld [vmem:[#allocation2 + $0x28] sm:$0xf]  ;;  %v1672_v12 = vor.u32 %v1671_v24, %v1667_v31  ;;  %v1668_v44 = vsel %vm10438_vm4, %v1663_v58, %v1667_v31  ;;  %v1687_v60 = vrot.slane %v1685_v2, 5  ;;  %v1691_v13 = vrot.slane %v1689_v42, 4  ;;  %1546 = vst.msk [vmem:[#allocation3 + $0x1b8] sm:$0xf] %vm433_vm2, %v1521_v26 }
 0x21b   : > { %v1675_v20 = vshll.u32 %v1560_v30, 16  ;;  %v1679_v15 = vshrl.u32 %v1560_v30, 16  ;;  %v1822_v52 = vor.u32 %v1821_v3, %v1817_v54  ;;  %v2229_v16 = vrot.slane %v10672_v33, 7  ;;  %v1501_v22 = vld [vmem:[#allocation2 + $0x8] sm:$0xf]  ;;  %v9488_v33 = vld [vmem:[%s14518_s3 + $0x38] sm:$0xff] }
 0x21c   : > { %1840 = vrot.lane.b32.xlu0 %v1668_v44, %s9731_s17  ;;  %v1673_v14 = vrot.slane %v1672_v12, 4  ;;  %v1692_v61 = vor.u32 %v1691_v13, %v1687_v60  ;;  %v1711_v18 = vrot.slane %v1709_v4, 4  ;;  %v1697_v19 = vrot.slane %v1695_v21, 5  ;;  %1526 = vst.msk [vmem:[#allocation3 + $0x28] sm:$0xf] %vm433_vm2, %v1501_v22  ;;  %4248 = vmatpush.bf16.msra.mxu1 %v9488_v33 }
 0x21d   : > { %1866 = vrot.lane.b32.xlu2 %v1798_v6, %s9731_s17  ;;  %v1677_v38 = vrot.slane %v1675_v20, 5  ;;  %v1681_v43 = vrot.slane %v1679_v15, 4  ;;  %v1701_v28 = vrot.slane %v1699_v46, 4  ;;  %v2128_v11 = vld [vmem:[#allocation2 + $0x68] sm:$0x1]  ;;  %v1823_v37 = vrot.slane %v1822_v52, 4  ;;  %9619 = vmatpush.bf16.msrb.mxu3 %v9488_v33 }
 0x21e   : > { %v1693_v41 = vrot.slane %v1692_v61, 4  ;;  %v2231_v1 = vrot.slane %v2229_v16, 4  ;;  %v1712_v27 = vor.u32 %v1711_v18, %v1707_v0  ;;  %v1715_v51 = vshll.u32 %v1564_v59, 16  ;;  %v1503_v40 = vld [vmem:[#allocation2 + $0x10] sm:$0xf] }
 0x21f   : > { %v1678_v48 = vsel %vm10438_vm4, %v1673_v14, %v1677_v38  ;;  %v1682_v63 = vor.u32 %v1681_v43, %v1677_v38  ;;  %v1702_v55 = vor.u32 %v1701_v28, %v1697_v19  ;;  %v10688_v31 = vld [vmem:[#allocation2 + $0x54] sm:$0xf]  ;;  %v1719_v24 = vshrl.u32 %v1564_v59, 16  ;;  %1528 = vst.msk [vmem:[#allocation3 + $0x50] sm:$0xf] %vm433_vm2, %v1503_v40 }
 0x220   : > { %v1698_v58 = vsel %vm10438_vm4, %v1693_v41, %v1697_v19  ;;  %v2232_v23 = vrot.slane %v2128_v11, 7  ;;  %v1565_v6 = vld [vmem:[#allocation2 + $0x3c] sm:$0xf]  ;;  %v14701_v53 = vmov 0  ;;  %v2124_v57 = vld [vmem:[#allocation2 + $0x58] sm:$0xf] }
 0x221   : > { %1842 = vrot.lane.b32.xlu1 %v1678_v48, %s9731_s17  ;;  %v1683_v45 = vrot.slane %v1682_v63, 4  ;;  %v14702_v53 = vsel %vm10695_vm15, 4294967295, %v14701_v53  ;;  %v1510_v30 = vld [vmem:[#allocation2 + $0x2c] sm:$0xf]  ;;  %v1504_v12 = vld [vmem:[#allocation2 + $0x14] sm:$0xf] }
 0x222   : > { %14703 = vst [vmem:[#allocation34_spill] sm:$0xff] %v14702_v53  ;;  %v2233_v8 = vsel %vm10695_vm15, %v2231_v1, %v2232_v23  ;;  %v1713_v2 = vrot.slane %v1712_v27, 4  ;;  %v1717_v44 = vrot.slane %v1715_v51, 5  ;;  %v14587_v20 = vrot.slane %v10688_v31, 7  ;;  %v1506_v38 = vld [vmem:[#allocation2 + $0x1c] sm:$0xf] }
 0x223   : > { %v1688_v56 = vsel %vm10438_vm4, %v1683_v45, %v1687_v60  ;;  %1535 = vst.msk [vmem:[#allocation3 + $0xdc] sm:$0xf] %vm433_vm2, %v1510_v30  ;;  %v1703_v42 = vrot.slane %v1702_v55, 4  ;;  %v1721_v15 = vrot.slane %v1719_v24, 4  ;;  %v1725_v14 = vshll.u32 %v1565_v6, 16 }
 0x224   : > { %1870 = vrot.lane.b32.xlu0 %v1818_v39, %s9731_s17  ;;  %v1729_v10 = vshrl.u32 %v1565_v6, 16  ;;  %1529 = vst.msk [vmem:[#allocation3 + $0x64] sm:$0xf] %vm433_vm2, %v1504_v12  ;;  %v1718_v43 = vsel %vm10438_vm4, %v1713_v2, %v1717_v44  ;;  %v2220_v17 = vrot.slane %v2124_v57, 7  ;;  %v2219_v25 = vrot.slane %v14587_v20, 4 }
 0x225   : > { %1868 = vrot.lane.b32.xlu2 %v1808_v9, %s9731_s17  ;;  %1531 = vst.msk [vmem:[#allocation3 + $0x8c] sm:$0xf] %vm433_vm2, %v1506_v38  ;;  %v1708_v29 = vsel %vm10438_vm4, %v1703_v42, %v1707_v0  ;;  %v1722_v7 = vor.u32 %v1721_v15, %v1717_v44  ;;  %v1727_v5 = vrot.slane %v1725_v14, 5  ;;  %v1566_v48 = vld [vmem:[#allocation2 + $0x40] sm:$0xf] }
 0x226   : > { %v1731_v60 = vrot.slane %v1729_v10, 4  ;;  %v1511_v13 = vld [vmem:[#allocation2 + $0x30] sm:$0xf]  ;;  %v2125_v63 = vld [vmem:[#allocation2 + $0x5c] sm:$0xf]  ;;  %v2222_v35 = vrot.slane %v2220_v17, 4  ;;  %v2221_v3 = vsel %vm10695_vm15, %v2219_v25, %v2220_v17 }
 0x227   : > { %1536 = vst.msk [vmem:[#allocation3 + $0xf0] sm:$0xf] %vm433_vm2, %v1511_v13  ;;  %v2126_v54 = vld [vmem:[#allocation2 + $0x60] sm:$0xf]  ;;  %v1567_v50 = vld [vmem:[#allocation2 + $0x44] sm:$0xf] }
 0x228   : > { %v1519_v47 = vld [vmem:[#allocation2 + $0x50] sm:$0xf]  ;;  %v1735_v9 = vshll.u32 %v1566_v48, 16  ;;  %v1507_v39 = vld [vmem:[#allocation2 + $0x20] sm:$0xf]  ;;  %v1723_v4 = vrot.slane %v1722_v7, 4  ;;  %v1732_v61 = vor.u32 %v1731_v60, %v1727_v5 }
 0x229   : > { %1844 = vrot.lane.b32.xlu1 %v1688_v56, %s9731_s17  ;;  %1544 = vst.msk [vmem:[#allocation3 + $0x190] sm:$0xf] %vm433_vm2, %v1519_v47  ;;  %v1568_v21 = vld [vmem:[#allocation2 + $0x48] sm:$0xf]  ;;  %v1739_v45 = vshrl.u32 %v1566_v48, 16  ;;  %v2223_v46 = vrot.slane %v2125_v63, 7 }
 0x22a   : > { %1532 = vst.msk [vmem:[#allocation3 + $0xa0] sm:$0xf] %vm433_vm2, %v1507_v39  ;;  %v2226_v36 = vrot.slane %v2126_v54, 7  ;;  %v1745_v0 = vshll.u32 %v1567_v50, 16  ;;  %v1749_v59 = vshrl.u32 %v1567_v50, 16  ;;  %v1737_v18 = vrot.slane %v1735_v9, 5 }
 0x22b   : > { %v2224_v52 = vsel %vm10695_vm15, %v2222_v35, %v2223_v46  ;;  %v1755_v26 = vshll.u32 %v1568_v21, 16  ;;  %v1569_v22 = vld [vmem:[#allocation2 + $0x4c] sm:$0xf]  ;;  %v1728_v41 = vsel %vm10438_vm4, %v1723_v4, %v1727_v5  ;;  %v1733_v19 = vrot.slane %v1732_v61, 4  ;;  %v1508_v11 = vld [vmem:[#allocation2 + $0x24] sm:$0xf] }
 0x22c   : > { %1872 = vrot.lane.b32.xlu0 %v1823_v37, %s9731_s17  ;;  %v1741_v56 = vrot.slane %v1739_v45, 4  ;;  %v1759_v28 = vshrl.u32 %v1568_v21, 16  ;;  %v1499_v37 = vld [vmem:[#allocation2] sm:$0xf]  ;;  %v2225_v1 = vrot.slane %v2223_v46, 4  ;;  %v2228_v27 = vrot.slane %v2226_v36, 4 }
 0x22d   : > { %1846 = vrot.lane.b32.xlu2 %v1698_v58, %s9731_s17  ;;  %v1747_v51 = vrot.slane %v1745_v0, 5  ;;  %v1751_v40 = vrot.slane %v1749_v59, 4  ;;  %1524 = vst.msk [vmem:[#allocation3] sm:$0xf] %vm433_vm2, %v1499_v37  ;;  %v1765_v58 = vshll.u32 %v1569_v22, 16  ;;  %v1769_v55 = vshrl.u32 %v1569_v22, 16 }
 0x22e   : > { %v10727_v24 = vld [vmem:[#allocation2 + $0x54] sm:$0xf]  ;;  %1533 = vst.msk [vmem:[#allocation3 + $0xb4] sm:$0xf] %vm433_vm2, %v1508_v11  ;;  %v1738_v23 = vsel %vm10438_vm4, %v1733_v19, %v1737_v18  ;;  %v10732_v6 = vrot.slane %v1755_v26, 5  ;;  %v1742_v57 = vor.u32 %v1741_v56, %v1737_v18  ;;  %v1761_v30 = vrot.slane %v1759_v28, 4 }
 0x22f   : > { %v1948_v12 = vld [vmem:[#allocation2 + $0x58] sm:$0xf]  ;;  %v2227_v2 = vsel %vm10695_vm15, %v2225_v1, %v2226_v36  ;;  %v2970_v44 = vld [vmem:[#allocation2 + $0x10] sm:$0xf]  ;;  %v2041_v42 = vrot.slane %v10727_v24, 5  ;;  %v1752_v15 = vor.u32 %v1751_v40, %v1747_v51  ;;  %v1767_v14 = vrot.slane %v1765_v58, 5 }
 0x230   : > { %v1771_v10 = vrot.slane %v1769_v55, 4  ;;  %v2044_v38 = vrot.slane %v1948_v12, 5  ;;  %v1743_v17 = vrot.slane %v1742_v57, 4  ;;  %v1762_v25 = vor.u32 %v1761_v30, %v10732_v6  ;;  %v10746_v7 = vld [vmem:[#allocation2 + $0x5c] sm:$0xf]  ;;  %v9487_v45 = vld [vmem:[%s14518_s3 + $0x30] sm:$0xff] }
 0x231   : > { %2282 = vrot.lane.b32.xlu1 %v2233_v8, %s9731_s17  ;;  %v1522_v8 = vld [vmem:[#allocation2 + $0x5c] sm:$0xf]  ;;  %v1509_v5 = vld [vmem:[#allocation2 + $0x28] sm:$0xf]  ;;  %v3007_v48 = vshrl.u32 %v2970_v44, 16  ;;  %v3010_v60 = vshll.u32 %v2970_v44, 16  ;;  %4249 = vmatpush.bf16.msra.mxu1 %v9487_v45 }
 0x232   : > { %1547 = vst.msk [vmem:[#allocation3 + $0x1cc] sm:$0xf] %vm433_vm2, %v1522_v8  ;;  %v2969_v13 = vld [vmem:[#allocation2 + $0xc] sm:$0xc]  ;;  %v2046_v63 = vrot.slane %v2044_v38, 4  ;;  %v1753_v47 = vrot.slane %v1752_v15, 4  ;;  %v1772_v35 = vor.u32 %v1771_v10, %v1767_v14  ;;  %9620 = vmatpush.bf16.msrb.mxu3 %v9487_v45 }
 0x233   : > { %v2971_v54 = vld [vmem:[#allocation2 + $0x14] sm:$0xf]  ;;  %1534 = vst.msk [vmem:[#allocation3 + $0xc8] sm:$0xf] %vm433_vm2, %v1509_v5  ;;  %v2047_v9 = vrot.slane %v10746_v7, 5  ;;  %v1763_v4 = vrot.slane %v1762_v25, 4 }
 0x234   : > { %1850 = vrot.lane.b32.xlu0 %v1718_v43, %s9731_s17  ;;  %v2230_v43 = vsel %vm10695_vm15, %v2228_v27, %v2229_v16  ;;  %v14704_v16 = vmov 0  ;;  %v1523_v39 = vld [vmem:[#allocation2 + $0x60] sm:$0x3]  ;;  %v2998_v61 = vshrl.u32 %v2969_v13, 16  ;;  %v3001_v21 = vshll.u32 %v2969_v13, 16  ;;  %v9486_v27 = vld [vmem:[%s14518_s3 + $0x28] sm:$0xff] }
 0x235   : > { %1848 = vrot.lane.b32.xlu2 %v1708_v29, %s9731_s17  ;;  %v2043_v29 = vrot.slane %v2041_v42, 4  ;;  %v14705_v16 = vsel %vm10755_vm3, 4294967295, %v14704_v16  ;;  %1549 = vst.msk [vmem:[#allocation3 + $0x1e0] sm:$0x3] %vm1493_vm6, %v1523_v39  ;;  %v3009_v46 = vrot.slane %v3007_v48, 6  ;;  %v3012_v36 = vrot.slane %v3010_v60, 7  ;;  %4250 = vmatpush.bf16.msra.mxu1 %v9486_v27 }
 0x236   : > { %14706 = vst [vmem:[#allocation35_spill] sm:$0xff] %v14705_v16  ;;  %v2048_v0 = vsel %vm10755_vm3, %v2046_v63, %v2047_v9  ;;  %v1516_v59 = vld [vmem:[#allocation2 + $0x44] sm:$0xf]  ;;  %v1758_v18 = vsel %vm10438_vm4, %v1753_v47, %v10732_v6  ;;  %v3017_v26 = vshrl.u32 %v2971_v54, 16  ;;  %v1773_v19 = vrot.slane %v1772_v35, 4  ;;  %9621 = vmatpush.bf16.msrb.mxu3 %v9486_v27  ;;  %v9483_v7 = vld [vmem:[%s14518_s3 + $0x10] sm:$0xff] }
 0x237   : > { %v2045_v50 = vsel %vm10755_vm3, %v2043_v29, %v2044_v38  ;;  %2100 = vst.msk [vmem:[#allocation3 + $0x1bc] sm:$0xf] %vm433_vm2, %v2048_v0  ;;  %v3000_v56 = vrot.slane %v2998_v61, 6  ;;  %v3003_v28 = vrot.slane %v3001_v21, 7  ;;  %v1512_v11 = vld [vmem:[#allocation2 + $0x34] sm:$0xf]  ;;  %v10787_v37 = vor.u32 %v3012_v36, %v3009_v46 }
 0x238   : > { %2099 = vst.msk [vmem:[#allocation3 + $0x1a8] sm:$0xf] %vm433_vm2, %v2045_v50  ;;  %v3020_v1 = vshll.u32 %v2971_v54, 16  ;;  %vm2995_vm5 = vsmask.f32 5392  ;;  %v1778_v58 = vsel %vm10438_vm4, %v1773_v19, %v10618_v34  ;;  %v3019_v55 = vrot.slane %v3017_v26, 6 }
 0x239   : > { %2274 = vrot.lane.b32.xlu1 %v2221_v3, %s9731_s17  ;;  %v1748_v3 = vsel %vm10438_vm4, %v1743_v17, %v1747_v51  ;;  %1541 = vst.msk [vmem:[#allocation3 + $0x154] sm:$0xf] %vm433_vm2, %v1516_v59  ;;  %v2334_v40 = vld [vmem:[#allocation2 + $0x4] sm:$0x8]  ;;  %v2972_v6 = vld [vmem:[#allocation2 + $0x18] sm:$0xf]  ;;  %vm10809_vm13 = vmor %vm1494_vm7, %vm2995_vm5 }
 0x23a   : > { %1537 = vst.msk [vmem:[#allocation3 + $0x104] sm:$0xf] %vm433_vm2, %v1512_v11  ;;  %v2973_v57 = vld [vmem:[#allocation2 + $0x1c] sm:$0xf]  ;;  %v9485_v30 = vld [vmem:[%s14518_s3 + $0x20] sm:$0xff]  ;;  %v3015_v12 = vrot.slane %v10787_v37, 4  ;;  %vm10827_vm7 = vmor %vm2360_vm8, %vm2361_vm11 }
 0x23b   : > { %v3022_v8 = vrot.slane %v3020_v1, 7  ;;  %v2642_v44 = vld [vmem:[#allocation2 + $0x8] sm:$0xf]  ;;  %v2643_v15 = vld [vmem:[#allocation2 + $0xc] sm:$0xf]  ;;  %v3027_v38 = vshrl.u32 %v2972_v6, 16  ;;  %4251 = vmatpush.bf16.msra.mxu1 %v9485_v30  ;;  %9622 = vmatpush.bf16.msrb.mxu3 %v9485_v30  ;;  %vm10861_vm5 = vmor %vm2842_vm14, %vm2843_vm0 }
 0x23c   : > { %1852 = vrot.lane.b32.xlu0 %v1728_v41, %s9731_s17  ;;  %v1768_v41 = vsel %vm10438_vm4, %v1763_v4, %v1767_v14  ;;  %v2364_v14 = vshrl.u32 %v2334_v40, 16  ;;  %v10804_v10 = vld [vmem:[#allocation2 + $0x50] sm:$0xf]  ;;  %v3037_v17 = vshrl.u32 %v2973_v57, 16  ;;  %v1513_v29 = vld [vmem:[#allocation2 + $0x38] sm:$0xf] }
 0x23d   : > { %2276 = vrot.lane.b32.xlu2 %v2224_v52, %s9731_s17  ;;  %v10776_v52 = vld [vmem:[#allocation2 + $0x60] sm:$0x7]  ;;  %v14588_v25 = vrot.slane %v10804_v10, 5  ;;  %v14707_v5 = vmov 0  ;;  %v3040_v60 = vshll.u32 %v2973_v57, 16  ;;  %v9484_v50 = vld [vmem:[%s14518_s3 + $0x18] sm:$0xff]  ;;  %v10843_v26 = vor.u32 %v3022_v8, %v3019_v55 }
 0x23e   : > { %v2050_v22 = vrot.slane %v10776_v52, 5  ;;  %v14708_v5 = vsel %vm10809_vm13, 4294967295, %v14707_v5  ;;  %v10813_v13 = vld [vmem:[#allocation2 + $0x8] sm:$0xf]  ;;  %1538 = vst.msk [vmem:[#allocation3 + $0x118] sm:$0xf] %vm433_vm2, %v1513_v29 }
 0x23f   : > { %14709 = vst [vmem:[#allocation36_spill] sm:$0xff] %v14708_v5  ;;  %v10820_v54 = vld [vmem:[#allocation2 + $0x20] sm:$0xf]  ;;  %v14710_v47 = vmov 0  ;;  %v2040_v35 = vrot.slane %v14588_v25, 4  ;;  %v2049_v45 = vrot.slane %v2047_v9, 4  ;;  %4252 = vmatpush.bf16.msra.mxu1 %v9484_v50  ;;  %9623 = vmatpush.bf16.msrb.mxu3 %v9484_v50 }
 0x240   : > { %v2052_v51 = vrot.slane %v2050_v22, 4  ;;  %v14711_v47 = vsel %vm10827_vm7, 4294967295, %v14710_v47  ;;  %v10833_v39 = vld [vmem:[#allocation2 + $0x10] sm:$0xf]  ;;  %v2794_v61 = vld [vmem:[#allocation2 + $0x14] sm:$0xf] }
 0x241   : > { %1854 = vrot.lane.b32.xlu1 %v1738_v23, %s9731_s17  ;;  %v3004_v23 = vor.u32 %v3003_v28, %v3000_v56  ;;  %14712 = vst [vmem:[#allocation31_spill] sm:$0xff] %v14711_v47  ;;  %v2847_v21 = vrot.slane %v10833_v39, 6  ;;  %v3029_v46 = vrot.slane %v3027_v38, 6  ;;  %v2042_v0 = vsel %vm10755_vm3, %v2040_v35, %v2041_v42  ;;  %v2975_v19 = vld [vmem:[#allocation2 + $0x24] sm:$0xf] }
 0x242   : > { %2102 = vst.msk [vmem:[#allocation3 + $0x1e4] sm:$0x3] %vm1493_vm6, %v2052_v51  ;;  %v2850_v59 = vrot.slane %v2794_v61, 6  ;;  %v3039_v42 = vrot.slane %v3037_v17, 6  ;;  %v3042_v56 = vrot.slane %v3040_v60, 7  ;;  %v2160_v28 = vrot.slane %v10813_v13, 7 }
 0x243   : > { %v3005_v48 = vrot.slane %v3004_v23, 4  ;;  %2098 = vst.msk [vmem:[#allocation3 + $0x194] sm:$0xf] %vm433_vm2, %v2042_v0  ;;  %v2849_v24 = vrot.slane %v2847_v21, 4  ;;  %v14713_v11 = vmov 0  ;;  %v3047_v51 = vshrl.u32 %v10820_v54, 16  ;;  %4253 = vmatpush.bf16.msra.mxu1 %v9483_v7  ;;  %9624 = vmatpush.bf16.msrb.mxu3 %v9483_v7 }
 0x244   : > { %2280 = vrot.lane.b32.xlu0 %v2230_v43, %s9731_s17  ;;  %v3030_v43 = vshll.u32 %v2972_v6, 16  ;;  %v14714_v11 = vsel %vm10861_vm5, 4294967295, %v14713_v11  ;;  %v2644_v1 = vld [vmem:[#allocation2 + $0x10] sm:$0xf]  ;;  %v10865_v27 = vld [vmem:[#allocation2 + $0xc] sm:$0xf]  ;;  %v2051_v55 = vsel %vm10755_vm3, %v2049_v45, %v2050_v22 }
 0x245   : > { %2278 = vrot.lane.b32.xlu2 %v2227_v2, %s9731_s17  ;;  %v2335_v2 = vld [vmem:[#allocation2 + $0x8] sm:$0xf]  ;;  %14715 = vst [vmem:[#allocation40_spill] sm:$0xff] %v14714_v11  ;;  %v3050_v40 = vshll.u32 %v10820_v54, 16  ;;  %v3057_v57 = vshrl.u32 %v2975_v19, 16  ;;  %v3060_v30 = vshll.u32 %v2975_v19, 16 }
 0x246   : > { %v2369_v34 = vshrl.u32 %v2335_v2, 16  ;;  %v2372_v63 = vshll.u32 %v2335_v2, 16  ;;  %v3032_v36 = vrot.slane %v3030_v43, 7  ;;  %v2976_v8 = vld [vmem:[#allocation2 + $0x28] sm:$0xf]  ;;  %v2852_v2 = vrot.slane %v2850_v59, 4 }
 0x247   : > { %v10883_v52 = vld [vmem:[#allocation2 + $0x4] sm:$0x8]  ;;  %v10885_v22 = vld [vmem:[#allocation2 + $0x18] sm:$0xf]  ;;  %2101 = vst.msk [vmem:[#allocation3 + $0x1d0] sm:$0xf] %vm433_vm2, %v2051_v55  ;;  %v10897_v43 = vor.u32 %v3042_v56, %v3039_v42 }
 0x248   : > { %v10815_v33 = vrot.slane %v2369_v34, 7  ;;  %v3033_v6 = vor.u32 %v3032_v36, %v3029_v46  ;;  %v2162_v34 = vrot.slane %v2160_v28, 4  ;;  %v2645_v38 = vld [vmem:[#allocation2 + $0x14] sm:$0xf]  ;;  %v3049_v17 = vrot.slane %v3047_v51, 6  ;;  %v9481_v61 = vld [vmem:[%s14518_s3] sm:$0xff] }
 0x249   : > { %1856 = vrot.lane.b32.xlu1 %v1748_v3, %s9731_s17  ;;  %v8599_v3 = vrot.slane %v2364_v14, 11  ;;  %v3025_v14 = vrot.slane %v10843_v26, 4  ;;  %v3052_v29 = vrot.slane %v3050_v40, 7  ;;  %v10901_v60 = vld [vmem:[#allocation2 + $0x14] sm:$0xf]  ;;  %v2163_v50 = vrot.slane %v10865_v27, 7 }
 0x24a   : > { %v2374_v4 = vor.u32 %v2372_v63, %v10815_v33  ;;  %v1517_v63 = vld [vmem:[#allocation2 + $0x48] sm:$0xf]  ;;  %v3035_v54 = vrot.slane %v3033_v6, 4  ;;  %v3059_v35 = vrot.slane %v3057_v57, 6  ;;  %v3067_v45 = vshrl.u32 %v2976_v8, 16  ;;  %v9516_v57 = vld [vmem:[%s14518_s3 + $0x118] sm:$0xff] }
 0x24b   : > { %1542 = vst.msk [vmem:[#allocation3 + $0x168] sm:$0xf] %vm433_vm2, %v1517_v63  ;;  %v3070_v46 = vshll.u32 %v2976_v8, 16  ;;  %v2977_v36 = vld [vmem:[#allocation2 + $0x2c] sm:$0xf]  ;;  %v3045_v19 = vrot.slane %v10897_v43, 4  ;;  %v10926_v7 = vor.u32 %v3052_v29, %v3049_v17  ;;  %v3034_v56 = vsel %vm10809_vm13, %v3025_v14, %v3033_v6 }
 0x24c   : > { %1860 = vrot.lane.b32.xlu0 %v1768_v41, %s9731_s17  ;;  %v3014_v41 = vsel %vm10809_vm13, %v3005_v48, %v10787_v37  ;;  %v2375_v9 = vsel %vm10827_vm7, %v8599_v3, %v2374_v4  ;;  %v9482_v37 = vld [vmem:[%s14518_s3 + $0x8] sm:$0xff]  ;;  %v10899_v48 = vld [vmem:[#allocation2 + $0x10] sm:$0xf]  ;;  %v3062_v4 = vrot.slane %v3060_v30, 7  ;;  %v10913_v0 = vld [vmem:[#allocation2 + $0x18] sm:$0xf] }
 0x24d   : > { %1858 = vrot.lane.b32.xlu2 %v1758_v18, %s9731_s17  ;;  %v1514_v18 = vld [vmem:[#allocation2 + $0x3c] sm:$0xf]  ;;  %2617 = vst.msk [vmem:[#allocation3 + $0x8] sm:$0xf] %vm433_vm2, %v2375_v9  ;;  %4254 = vmatpush.bf16.msra.mxu1 %v9482_v37  ;;  %v1518_v42 = vld [vmem:[#allocation2 + $0x4c] sm:$0xf] }
 0x24e   : > { %1539 = vst.msk [vmem:[#allocation3 + $0x12c] sm:$0xf] %vm433_vm2, %v1514_v18  ;;  %9625 = vmatpush.bf16.msrb.mxu3 %v9482_v37  ;;  %v9512_v18 = vld [vmem:[%s14518_s3 + $0xf8] sm:$0xff]  ;;  %v2166_v27 = vrot.slane %v10899_v48, 7  ;;  %v2169_v51 = vrot.slane %v10901_v60, 7  ;;  %v3069_v55 = vrot.slane %v3067_v45, 6 }
 0x24f   : > { %4467 = vmatpush.bf16.msrb.mxu0 %v9512_v18  ;;  %1543 = vst.msk [vmem:[#allocation3 + $0x17c] sm:$0xf] %vm433_vm2, %v1518_v42  ;;  %v2336_v40 = vld [vmem:[#allocation2 + $0xc] sm:$0xf]  ;;  %v3077_v30 = vshrl.u32 %v2977_v36, 16  ;;  %v3080_v8 = vshll.u32 %v2977_v36, 16 }
 0x250   : > { %v10951_v14 = vrot.slane %v2163_v50, 4  ;;  %v10953_v37 = vld [vmem:[#allocation2 + $0x1c] sm:$0xf]  ;;  %v10975_v45 = vld [vmem:[#allocation2 + $0x20] sm:$0xf]  ;;  %v11008_v39 = vrot.slane %v2169_v51, 4 }
 0x251   : > { %1862 = vrot.lane.b32.xlu1 %v1778_v58, %s9731_s17  ;;  %v2851_v58 = vsel %vm10861_vm5, %v2849_v24, %v2850_v59  ;;  %v8598_v59 = vrot.slane %v10883_v52, 11  ;;  %4255 = vmatpush.bf16.msra.mxu1 %v9481_v61  ;;  %v2164_v52 = vsel %vm10695_vm15, %v2162_v34, %v2163_v50  ;;  %v2796_v29 = vld [vmem:[#allocation2 + $0x1c] sm:$0xf]  ;;  %v2376_v34 = vrot.slane %v10815_v33, 4  ;;  %v2792_v13 = vld [vmem:[#allocation2 + $0xc] sm:$0xc] }
 0x252   : > { %2945 = vst.msk [vmem:[#allocation3 + $0x20] sm:$0xf] %vm433_vm2, %v2851_v58  ;;  %v10938_v58 = vor.u32 %v3062_v4, %v3059_v35  ;;  %9626 = vmatpush.bf16.msrb.mxu3 %v9481_v61  ;;  %v2381_v35 = vshll.u32 %v2336_v40, 16  ;;  %v3079_v36 = vrot.slane %v3077_v30, 6  ;;  %v3082_v33 = vrot.slane %v3080_v8, 7 }
 0x253   : > { %v2339_v25 = vld [vmem:[#allocation2 + $0x18] sm:$0xf]  ;;  %vm1924_vm8 = vcmask 1041920  }
 0x254   : > { %2694 = vrot.lane.b32.xlu0 %v2643_v15, %s9731_s17  ;;  %v1515_v15 = vld [vmem:[#allocation2 + $0x40] sm:$0xf]  ;;  %v3065_v4 = vrot.slane %v10938_v58, 4 }
 0x255   : > { %2692 = vrot.lane.b32.xlu2 %v2642_v44, %s9731_s17  ;;  %v3024_v44 = vsel %vm10809_vm13, %v3015_v12, %v10843_v26  ;;  %v2853_v12 = vrot.slane %v10885_v22, 6  ;;  %1540 = vst.msk [vmem:[#allocation3 + $0x140] sm:$0xf] %vm433_vm2, %v1515_v15  ;;  %v10921_v26 = vld [vmem:[#allocation2 + $0x4] sm:$0xf]  ;;  %v3055_v15 = vrot.slane %v10926_v7, 4  ;;  %4544 = vmatpush.bf16.msrb.mxu1 %v9516_v57 }
 0x256   : > { %v1981_v9 = vrot.slane %v10921_v26, 5  ;;  %v2979_v57 = vld [vmem:[#allocation2 + $0x34] sm:$0xf] }
 0x257   : > { %v2854_v3 = vsel %vm10861_vm5, %v2852_v2, %v2853_v12  ;;  %v2172_v2 = vrot.slane %v10913_v0, 7  ;;  %v9496_v0 = vld [vmem:[%s14518_s3 + $0x78] sm:$0xff] }
 0x258   : > { %2946 = vst.msk [vmem:[#allocation3 + $0x34] sm:$0xf] %vm433_vm2, %v2854_v3  ;;  %v1983_v6 = vrot.slane %v1981_v9, 4  ;;  %v2161_v3 = vsel %vm10695_vm15, %v8598_v59, %v2160_v28  ;;  %v2859_v28 = vrot.slane %v10975_v45, 6  ;;  %v8600_v59 = vrot.slane %v2792_v13, 10  ;;  %9627 = vmatpush.bf16.msra.mxu3 %v9496_v0  ;;  %4321 = vmatpush.bf16.msra.mxu2 %v9496_v0 }
 0x259   : > { %3251 = vrot.lane.b32.xlu1 %v3014_v41, %s9731_s17  ;;  %v10923_v41 = vld [vmem:[#allocation2 + $0x8] sm:$0xf]  ;;  %v10980_v18 = vrot.slane %v2172_v2, 4  ;;  %v11017_v13 = vor.u32 %v3082_v33, %v3079_v36  ;;  %v3100_v33 = vshll.u32 %v2979_v57, 16 }
 0x25a   : > { %v1825_v23 = vpop.permute.xlu2 %1824  ;;  %v1984_v24 = vrot.slane %v10923_v41, 5  ;;  %v2848_v22 = vsel %vm10861_vm5, %v8600_v59, %v2847_v21  ;;  %v11078_v45 = vld [vmem:[#allocation2 + $0x28] sm:$0xf] }
 0x25b   : > { %1900 = vst.msk [vmem:[#allocation3] sm:$0xf] %vm1899_vm1, %v1825_v23  ;;  %v3072_v23 = vrot.slane %v3070_v46, 7  ;;  %v2856_v46 = vrot.slane %v2796_v29, 6  ;;  %v10999_v29 = vld [vmem:[#allocation2 + $0xc] sm:$0xf] }
 0x25c   : > { %2696 = vrot.lane.b32.xlu0 %v2644_v1, %s9731_s17  ;;  %v3044_v1 = vsel %vm10809_vm13, %v3035_v54, %v10897_v43  ;;  %v1985_v17 = vsel %vm10755_vm3, %v1983_v6, %v1984_v24  ;;  %v10963_v54 = vrot.slane %v2166_v27, 4  ;;  %2944 = vst.msk [vmem:[#allocation3 + $0xc] sm:$0xf] %vm433_vm2, %v2848_v22  ;;  %v1987_v21 = vrot.slane %v10999_v29, 5 }
 0x25d   : > { %3253 = vrot.lane.b32.xlu2 %v3024_v44, %s9731_s17  ;;  %v2378_v44 = vshrl.u32 %v2336_v40, 16  ;;  %2079 = vst.msk [vmem:[#allocation3 + $0x18] sm:$0xf] %vm433_vm2, %v1985_v17  ;;  %v10973_v61 = vor.u32 %v3072_v23, %v3069_v55  ;;  %v2337_v40 = vld [vmem:[#allocation2 + $0x10] sm:$0xf]  ;;  %v2855_v55 = vrot.slane %v2853_v12, 4 }
 0x25e   : > { %v2175_v23 = vrot.slane %v10953_v37, 7  ;;  %v2387_v8 = vshrl.u32 %v2337_v40, 16  ;;  %v2170_v26 = vsel %vm10695_vm15, %v10963_v54, %v2169_v51  ;;  %v11106_v54 = vld [vmem:[#allocation2 + $0x18] sm:$0xf] }
 0x25f   : > { %v2380_v50 = vrot.slane %v2378_v44, 7 }
 0x260   : > { %v11102_v60 = vrot.slane %v2175_v23, 4 }
 0x261   : > { %2698 = vrot.lane.b32.xlu1 %v2645_v38, %s9731_s17  ;;  %v10955_v38 = vld [vmem:[#allocation2 + $0x30] sm:$0xf]  ;;  %v2383_v42 = vor.u32 %v2381_v35, %v2380_v50  ;;  %v2385_v12 = vrot.slane %v2380_v50, 4  ;;  %v2647_v35 = vld [vmem:[#allocation2 + $0x1c] sm:$0xf] }
 0x262   : > { %v3087_v6 = vshrl.u32 %v10955_v38, 16  ;;  %v3090_v44 = vshll.u32 %v10955_v38, 16  ;;  %v2389_v38 = vrot.slane %v2387_v8, 7  ;;  %v1989_v8 = vrot.slane %v1987_v21, 4 }
 0x263   : > { %v2384_v30 = vsel %vm10827_vm7, %v2376_v34, %v2383_v42  ;;  %v11004_v34 = vld [vmem:[#allocation2 + $0x10] sm:$0xf]  ;;  %v3075_v42 = vrot.slane %v10973_v61, 4 }
 0x264   : > { %3257 = vrot.lane.b32.xlu0 %v3044_v1, %s9731_s17  ;;  %v2858_v1 = vrot.slane %v2856_v46, 4  ;;  %2618 = vst.msk [vmem:[#allocation3 + $0x1c] sm:$0xf] %vm433_vm2, %v2384_v30  ;;  %v11020_v30 = vrot.slane %v3087_v6, 6  ;;  %v3092_v36 = vrot.slane %v3090_v44, 7 }
 0x265   : > { %3255 = vrot.lane.b32.xlu2 %v3034_v56, %s9731_s17  ;;  %v2646_v56 = vld [vmem:[#allocation2 + $0x18] sm:$0xf] }
 0x266   : > { %v2860_v17 = vsel %vm10861_vm5, %v2858_v1, %v2859_v28  ;;  %v2980_v1 = vld [vmem:[#allocation2 + $0x38] sm:$0xf] }
 0x267   : > { %v1831_v63 = vpop.permute.xlu2 %1830  ;;  %2948 = vst.msk [vmem:[#allocation3 + $0x5c] sm:$0xf] %vm433_vm2, %v2860_v17  ;;  %v14589_v17 = vrot.slane %v11004_v34, 5  ;;  %v3107_v20 = vshrl.u32 %v2980_v1, 16 }
 0x268   : > { %1903 = vst.msk [vmem:[#allocation3 + $0x3c] sm:$0xf] %vm1899_vm1, %v1831_v63  ;;  %v2390_v63 = vshll.u32 %v2337_v40, 16  ;;  %v2338_v40 = vld [vmem:[#allocation2 + $0x14] sm:$0xf] }
 0x269   : > { %2234 = vrot.lane.b32.xlu1 %v2161_v3, %s9731_s17  ;;  %v11010_v3 = vld [vmem:[#allocation2 + $0x20] sm:$0xf]  ;;  %v2396_v22 = vshrl.u32 %v2338_v40, 16  ;;  %v1991_v43 = vsel %vm10755_vm3, %v1989_v8, %v14589_v17  ;;  %v11053_v8 = vld [vmem:[#allocation2 + $0x28] sm:$0xf]  ;;  %v2405_v17 = vshrl.u32 %v2339_v25, 16 }
 0x26a   : > { %v2392_v59 = vor.u32 %v2390_v63, %v2389_v38  ;;  %v2394_v63 = vrot.slane %v2389_v38, 4  ;;  %2081 = vst.msk [vmem:[#allocation3 + $0x40] sm:$0xf] %vm433_vm2, %v1991_v43  ;;  %v3110_v38 = vshll.u32 %v2980_v1, 16  ;;  %v1926_v43 = vld [vmem:[#allocation2] sm:$0xe] }
 0x26b   : > { %v2865_v48 = vrot.slane %v11053_v8, 6 }
 0x26c   : > { %2700 = vrot.lane.b32.xlu0 %v2646_v56, %s9731_s17  ;;  %v3097_v56 = vshrl.u32 %v2979_v57, 16  ;;  %v2393_v6 = vsel %vm10827_vm7, %v2385_v12, %v2392_v59  ;;  %v3064_v12 = vsel %vm10809_vm13, %v3055_v15, %v10938_v58  ;;  %v2982_v15 = vld [vmem:[#allocation2 + $0x40] sm:$0xf]  ;;  %v3109_v57 = vrot.slane %v3107_v20, 6 }
 0x26d   : > { %2236 = vrot.lane.b32.xlu2 %v2164_v52, %s9731_s17  ;;  %v2857_v52 = vsel %vm10861_vm5, %v2855_v55, %v2856_v46  ;;  %v3054_v46 = vsel %vm10809_vm13, %v3045_v19, %v10926_v7  ;;  %v11031_v55 = vld [vmem:[#allocation2 + $0x24] sm:$0xf]  ;;  %2619 = vst.msk [vmem:[#allocation3 + $0x30] sm:$0xf] %vm433_vm2, %v2393_v6  ;;  %v11041_v19 = vrot.slane %v2396_v22, 7  ;;  %v2167_v7 = vsel %vm10695_vm15, %v10951_v14, %v2166_v27  ;;  %v9511_v27 = vld [vmem:[%s14518_s3 + $0xf0] sm:$0xff] }
 0x26e   : > { %2947 = vst.msk [vmem:[#allocation3 + $0x48] sm:$0xf] %vm433_vm2, %v2857_v52  ;;  %v3099_v44 = vrot.slane %v3097_v56, 6  ;;  %v14595_v52 = vrot.slane %v11031_v55, 7  ;;  %v3102_v56 = vrot.slane %v3100_v33, 7  ;;  %v3112_v14 = vrot.slane %v3110_v38, 7  ;;  %4468 = vmatpush.bf16.msrb.mxu0 %v9511_v27 }
 0x26f   : > { %v1837_v50 = vpop.permute.xlu2 %1836  ;;  %v2981_v22 = vld [vmem:[#allocation2 + $0x3c] sm:$0xf]  ;;  %v2403_v38 = vrot.slane %v11041_v19, 4  ;;  %v3084_v58 = vsel %vm10809_vm13, %v3075_v42, %v11017_v13 }
 0x270   : > { %1906 = vst.msk [vmem:[#allocation3 + $0x78] sm:$0xf] %vm1899_vm1, %v1837_v50  ;;  %v14596_v50 = vrot.slane %v11010_v3, 7 }
 0x271   : > { %2702 = vrot.lane.b32.xlu1 %v2647_v35, %s9731_s17  ;;  %v2399_v35 = vshll.u32 %v2338_v40, 16  ;;  %v2798_v40 = vld [vmem:[#allocation2 + $0x24] sm:$0xf] }
 0x272   : > { %v2862_v6 = vrot.slane %v2798_v40, 6 }
 0x273   : > { %v2401_v59 = vor.u32 %v2399_v35, %v11041_v19  ;;  %v8597_v35 = vrot.slane %v1926_v43, 9  ;;  %v11085_v43 = vrot.slane %v2405_v17, 7 }
 0x274   : > { %3261 = vrot.lane.b32.xlu0 %v3064_v12, %s9731_s17  ;;  %v2864_v40 = vrot.slane %v2862_v6, 4 }
 0x275   : > { %3259 = vrot.lane.b32.xlu2 %v3054_v46, %s9731_s17  ;;  %v2402_v1 = vsel %vm10827_vm7, %v2394_v63, %v2401_v59  ;;  %v2861_v46 = vrot.slane %v2859_v28, 4  ;;  %v3117_v63 = vshrl.u32 %v2981_v22, 16  ;;  %v3120_v59 = vshll.u32 %v2981_v22, 16 }
 0x276   : > { %v1827_v33 = vpop.permute.xlu0 %1826  ;;  %2620 = vst.msk [vmem:[#allocation3 + $0x44] sm:$0xf] %vm433_vm2, %v2402_v1  ;;  %v1982_v20 = vsel %vm10755_vm3, %v8597_v35, %v1981_v9  ;;  %v2866_v28 = vsel %vm10861_vm5, %v2864_v40, %v2865_v48  ;;  %v2408_v22 = vshll.u32 %v2339_v25, 16  ;;  %v2648_v9 = vld [vmem:[#allocation2 + $0x20] sm:$0xf]  ;;  %v3130_v1 = vshll.u32 %v2982_v15, 16 }
 0x277   : > { %v1867_v12 = vpop.permute.xlu2 %1866  ;;  %1901 = vst.msk [vmem:[#allocation3 + $0x14] sm:$0xf] %vm1899_vm1, %v1827_v33  ;;  %v11093_v35 = vld [vmem:[#allocation2 + $0x14] sm:$0xf]  ;;  %v2863_v19 = vsel %vm10861_vm5, %v2861_v46, %v2862_v6  ;;  %v11098_v25 = vor.u32 %v3092_v36, %v11020_v30  ;;  %v11112_v6 = vor.u32 %v3112_v14, %v3109_v57  ;;  %v3119_v30 = vrot.slane %v3117_v63, 6 }
 0x278   : > { %1921 = vst.msk [vmem:[#allocation3 + $0x1a4] sm:$0xf] %vm1899_vm1, %v1867_v12  ;;  %v2410_v51 = vor.u32 %v2408_v22, %v11085_v43  ;;  %v11110_v12 = vor.u32 %v3102_v56, %v3099_v44  ;;  %v3122_v36 = vrot.slane %v3120_v59, 7  ;;  %v11114_v46 = vld [vmem:[#allocation2 + $0x2c] sm:$0xf]  ;;  %v14592_v44 = vrot.slane %v11106_v54, 5 }
 0x279   : > { %2238 = vrot.lane.b32.xlu1 %v2167_v7, %s9731_s17  ;;  %v3127_v7 = vshrl.u32 %v2982_v15, 16  ;;  %2950 = vst.msk [vmem:[#allocation3 + $0x84] sm:$0xf] %vm433_vm2, %v2866_v28  ;;  %v14597_v15 = vrot.slane %v11093_v35, 5  ;;  %v2340_v33 = vld [vmem:[#allocation2 + $0x1c] sm:$0xf] }
 0x27a   : > { %2078 = vst.msk [vmem:[#allocation3 + $0x4] sm:$0xf] %vm433_vm2, %v1982_v20  ;;  %v2411_v40 = vsel %vm10827_vm7, %v2403_v38, %v2410_v51  ;;  %v2414_v56 = vshrl.u32 %v2340_v33, 16  ;;  %v14591_v57 = vrot.slane %v11078_v45, 7  ;;  %v3132_v63 = vrot.slane %v3130_v1, 7 }
 0x27b   : > { %v1829_v17 = vpop.permute.xlu1 %1828  ;;  %v1995_v27 = vrot.slane %v14597_v15, 4  ;;  %2949 = vst.msk [vmem:[#allocation3 + $0x70] sm:$0xf] %vm433_vm2, %v2863_v19  ;;  %v3129_v14 = vrot.slane %v3127_v7, 6  ;;  %v2412_v59 = vrot.slane %v11085_v43, 4  ;;  %v1986_v19 = vrot.slane %v1984_v24, 4 }
 0x27c   : > { %1902 = vst.msk [vmem:[#allocation3 + $0x28] sm:$0xf] %vm1899_vm1, %v1829_v17  ;;  %2704 = vrot.lane.b32.xlu0 %v2648_v9, %s9731_s17  ;;  %v2649_v22 = vld [vmem:[#allocation2 + $0x24] sm:$0xf]  ;;  %v2417_v9 = vshll.u32 %v2340_v33, 16  ;;  %v3074_v43 = vsel %vm10809_vm13, %v3065_v4, %v10973_v61  ;;  %v11141_v17 = vor.u32 %v3122_v36, %v3119_v30  ;;  %v3095_v41 = vrot.slane %v11098_v25, 4 }
 0x27d   : > { %2240 = vrot.lane.b32.xlu2 %v2170_v26, %s9731_s17  ;;  %2621 = vst.msk [vmem:[#allocation3 + $0x58] sm:$0xf] %vm433_vm2, %v2411_v40  ;;  %v1997_v38 = vsel %vm10755_vm3, %v1995_v27, %v14592_v44  ;;  %v11131_v26 = vrot.slane %v2414_v56, 7  ;;  %v8604_v7 = vld [vmem:[#allocation3] sm:$0xf]  ;;  %v14590_v24 = vrot.slane %v11114_v46, 7  ;;  %v11161_v36 = vor.u32 %v3132_v63, %v3129_v14 }
 0x27e   : > { %v1833_v28 = vpop.permute.xlu0 %1832  ;;  %v9423_v1 = vld [vmem:[#allocation3 + $0x10] sm:$0xf0]  ;;  %v2983_v33 = vld [vmem:[#allocation2 + $0x44] sm:$0xf]  ;;  %v11155_v4 = vrot.slane %v14596_v50, 4  ;;  %v11159_v30 = vrot.slane %v14595_v52, 4  ;;  %v1988_v14 = vsel %vm10755_vm3, %v1986_v19, %v1987_v21 }
 0x27f   : > { %v1869_v20 = vpop.permute.xlu2 %1868  ;;  %1904 = vst.msk [vmem:[#allocation3 + $0x50] sm:$0xf] %vm1899_vm1, %v1833_v28  ;;  %v8605_v51 = vor.u32 %v9423_v1, %v8604_v7  ;;  %v2419_v40 = vor.u32 %v2417_v9, %v11131_v26  ;;  %v11164_v27 = vld [vmem:[#allocation2 + $0x2c] sm:$0xf]  ;;  %v11170_v28 = vld [vmem:[#allocation2 + $0x30] sm:$0xf] }
 0x280   : > { %1922 = vst.msk [vmem:[#allocation3 + $0x1b8] sm:$0xf] %vm1899_vm1, %v1869_v20  ;;  %v11179_v63 = vrot.slane %v14591_v57, 4  ;;  %v2868_v9 = vrot.slane %v11164_v27, 6  ;;  %v11187_v29 = vrot.slane %v14590_v24, 4  ;;  %v2421_v57 = vrot.slane %v11131_v26, 4 }
 0x281   : > { %2706 = vrot.lane.b32.xlu1 %v2649_v22, %s9731_s17  ;;  %2083 = vst.msk [vmem:[#allocation3 + $0x68] sm:$0xf] %vm433_vm2, %v1997_v38  ;;  %4256 = vmatmul.bf16.vlgmr.msra.gmra.mxu1 %v8605_v51  ;;  %v2420_v20 = vsel %vm10827_vm7, %v2412_v59, %v2419_v40  ;;  %v3137_v38 = vshrl.u32 %v2983_v33, 16  ;;  %v3140_v59 = vshll.u32 %v2983_v33, 16  ;;  %v2341_v21 = vld [vmem:[#allocation2 + $0x20] sm:$0xf]  ;;  %v2176_v26 = vsel %vm10695_vm15, %v10980_v18, %v2175_v23 }
 0x282   : > { %2622 = vst.msk [vmem:[#allocation3 + $0x6c] sm:$0xf] %vm433_vm2, %v2420_v20  ;;  %v11191_v7 = vld [vmem:[#allocation2 + $0x30] sm:$0xf]  ;;  %v2870_v1 = vrot.slane %v2868_v9, 4  ;;  %v14594_v51 = vrot.slane %v11170_v28, 6  ;;  %v2173_v20 = vsel %vm10695_vm15, %v11008_v39, %v2172_v2 }
 0x283   : > { %v1835_v56 = vpop.permute.xlu1 %1834  ;;  %2080 = vst.msk [vmem:[#allocation3 + $0x2c] sm:$0xf] %vm433_vm2, %v1988_v14  ;;  %v11199_v22 = vld [vmem:[#allocation2 + $0x1c] sm:$0xf]  ;;  %v3139_v19 = vrot.slane %v3137_v38, 6  ;;  %v9510_v2 = vld [vmem:[%s14518_s3 + $0xe8] sm:$0xff] }
 0x284   : > { %1905 = vst.msk [vmem:[#allocation3 + $0x64] sm:$0xf] %vm1899_vm1, %v1835_v56  ;;  %3265 = vrot.lane.b32.xlu0 %v3084_v58, %s9731_s17  ;;  %v11197_v58 = vld [vmem:[#allocation2 + $0x34] sm:$0xf]  ;;  %v2984_v56 = vld [vmem:[#allocation2 + $0x48] sm:$0xf]  ;;  %v2872_v14 = vsel %vm10861_vm5, %v2870_v1, %v14594_v51  ;;  %4469 = vmatpush.bf16.msrb.mxu0 %v9510_v2 }
 0x285   : > { %3263 = vrot.lane.b32.xlu2 %v3074_v43, %s9731_s17  ;;  %v2423_v43 = vshrl.u32 %v2341_v21, 16  ;;  %v11207_v24 = vld [vmem:[#allocation2 + $0x4c] sm:$0xf]  ;;  %v2426_v38 = vshll.u32 %v2341_v21, 16  ;;  %v2650_v1 = vld [vmem:[#allocation2 + $0x28] sm:$0xf] }
 0x286   : > { %v1839_v40 = vpop.permute.xlu0 %1838  ;;  %2952 = vst.msk [vmem:[#allocation3 + $0xac] sm:$0xf] %vm433_vm2, %v2872_v14  ;;  %v3147_v37 = vshrl.u32 %v2984_v56, 16  ;;  %v2342_v44 = vld [vmem:[#allocation2 + $0x24] sm:$0xf]  ;;  %v3150_v18 = vshll.u32 %v2984_v56, 16 }
 0x287   : > { %v1847_v33 = vpop.permute.xlu2 %1846  ;;  %1907 = vst.msk [vmem:[#allocation3 + $0x8c] sm:$0xf] %vm1899_vm1, %v1839_v40  ;;  %v11222_v39 = vrot.slane %v2423_v43, 7  ;;  %v11230_v40 = vld [vmem:[#allocation2 + $0x20] sm:$0xf]  ;;  %v2432_v14 = vshrl.u32 %v2342_v44, 16 }
 0x288   : > { %1911 = vst.msk [vmem:[#allocation3 + $0xdc] sm:$0xf] %vm1899_vm1, %v1847_v33  ;;  %v3142_v33 = vrot.slane %v3140_v59, 7  ;;  %v2002_v59 = vrot.slane %v11230_v40, 5  ;;  %v8624_v2 = vld [vmem:[#allocation3 + $0x28] sm:$0xf] }
 0x289   : > { %2242 = vrot.lane.b32.xlu1 %v2173_v20, %s9731_s17  ;;  %v14593_v20 = vrot.slane %v11199_v22, 5  ;;  %v2428_v61 = vor.u32 %v2426_v38, %v11222_v39  ;;  %v9515_v38 = vld [vmem:[%s14518_s3 + $0x110] sm:$0xff]  ;;  %v3157_v56 = vshrl.u32 %v11207_v24, 16  ;;  %v3160_v0 = vshll.u32 %v11207_v24, 16  ;;  %v2651_v51 = vld [vmem:[#allocation2 + $0x2c] sm:$0xf] }
 0x28a   : > { %v11258_v52 = vrot.slane %v2432_v14, 7  ;;  %v2435_v50 = vshll.u32 %v2342_v44, 16  ;;  %v9428_v43 = vld [vmem:[#allocation3 + $0x38] sm:$0xf0]  ;;  %4545 = vmatpush.bf16.msrb.mxu1 %v9515_v38  ;;  %v3149_v24 = vrot.slane %v3147_v37, 6  ;;  %v3152_v44 = vrot.slane %v3150_v18, 7 }
 0x28b   : > { %v1865_v42 = vpop.permute.xlu1 %1864  ;;  %v2001_v23 = vrot.slane %v14593_v20, 4  ;;  %v2429_v20 = vsel %vm10827_vm7, %v2421_v57, %v2428_v61  ;;  %v2867_v57 = vrot.slane %v2865_v48, 4  ;;  %v9494_v61 = vld [vmem:[%s14518_s3 + $0x68] sm:$0xff]  ;;  %v11272_v37 = vld [vmem:[#allocation2 + $0x34] sm:$0xf]  ;;  %v8625_v8 = vor.u32 %v9428_v43, %v8624_v2 }
 0x28c   : > { %1920 = vst.msk [vmem:[#allocation3 + $0x190] sm:$0xf] %vm1899_vm1, %v1865_v42  ;;  %2708 = vrot.lane.b32.xlu0 %v2650_v1, %s9731_s17  ;;  %v9495_v42 = vld [vmem:[%s14518_s3 + $0x70] sm:$0xff]  ;;  %v2430_v1 = vrot.slane %v11222_v39, 4  ;;  %v11267_v39 = vor.u32 %v3142_v33, %v3139_v19  ;;  %v3159_v48 = vrot.slane %v3157_v56, 6  ;;  %v3162_v38 = vrot.slane %v3160_v0, 7 }
 0x28d   : > { %2244 = vrot.lane.b32.xlu2 %v2176_v26, %s9731_s17  ;;  %2623 = vst.msk [vmem:[#allocation3 + $0x80] sm:$0xf] %vm433_vm2, %v2429_v20  ;;  %v2003_v26 = vsel %vm10755_vm3, %v2001_v23, %v2002_v59  ;;  %9628 = vmatpush.bf16.msra.mxu3 %v9495_v42  ;;  %v11269_v20 = vld [vmem:[#allocation2 + $0x38] sm:$0xf]  ;;  %v2437_v23 = vor.u32 %v2435_v50, %v11258_v52  ;;  %v2986_v14 = vld [vmem:[#allocation2 + $0x50] sm:$0xf] }
 0x28e   : > { %v1841_v15 = vpop.permute.xlu0 %1840  ;;  %2085 = vst.msk [vmem:[#allocation3 + $0x90] sm:$0xf] %vm433_vm2, %v2003_v26  ;;  %4322 = vmatpush.bf16.msra.mxu2 %v9495_v42  ;;  %v2869_v19 = vsel %vm10861_vm5, %v2867_v57, %v2868_v9  ;;  %v11282_v33 = vld [vmem:[#allocation2 + $0x38] sm:$0xf]  ;;  %v2874_v50 = vrot.slane %v11272_v37, 6  ;;  %v14717_v27 = vrot.slane %v11017_v13, 4  ;;  %v3104_v42 = vsel %vm10809_vm13, %v3095_v41, %v11110_v12 }
 0x28f   : > { %v1849_v21 = vpop.permute.xlu2 %1848  ;;  %1908 = vst.msk [vmem:[#allocation3 + $0xa0] sm:$0xf] %vm1899_vm1, %v1841_v15  ;;  %v9473_v18 = vld [vmem:[#allocation3 + $0x1a0] sm:$0xf0]  ;;  %v2438_v15 = vsel %vm10827_vm7, %v2430_v1, %v2437_v23  ;;  %v2877_v13 = vrot.slane %v11282_v33, 6  ;;  %v14718_v26 = vrot.slane %v11191_v7, 7 }
 0x290   : > { %1912 = vst.msk [vmem:[#allocation3 + $0xf0] sm:$0xf] %vm1899_vm1, %v1849_v21  ;;  %v11276_v21 = vld [vmem:[#allocation2 + $0x3c] sm:$0xf]  ;;  %v3094_v9 = vsel %vm10809_vm13, %v14717_v27, %v11098_v25  ;;  %v11309_v25 = vor.u32 %v3152_v44, %v3149_v24  ;;  %v14719_v41 = vrot.slane %v11093_v35, 5  ;;  %v14598_v24 = vrot.slane %v11269_v20, 7 }
 0x291   : > { %2710 = vrot.lane.b32.xlu1 %v2651_v51, %s9731_s17  ;;  %2951 = vst.msk [vmem:[#allocation3 + $0x98] sm:$0xf] %vm433_vm2, %v2869_v19  ;;  %v14716_v51 = vrot.slane %v11004_v34, 5  ;;  %4261 = vmatmul.bf16.gmra.mxu1 %v8625_v8  ;;  %v2876_v34 = vrot.slane %v2874_v50, 4  ;;  %v11307_v1 = vrot.slane %v14718_v26, 4  ;;  %v9493_v8 = vld [vmem:[%s14518_s3 + $0x60] sm:$0xff]  ;;  %v11326_v44 = vor.u32 %v3162_v38, %v3159_v48 }
 0x292   : > { %9629 = vmatpush.bf16.msra.mxu3 %v9494_v61  ;;  %2624 = vst.msk [vmem:[#allocation3 + $0x94] sm:$0xf] %vm433_vm2, %v2438_v15  ;;  %4323 = vmatpush.bf16.msra.mxu2 %v9494_v61  ;;  %v2343_v23 = vld [vmem:[#allocation2 + $0x28] sm:$0xf]  ;;  %v3167_v15 = vshrl.u32 %v2986_v14, 16  ;;  %v2439_v48 = vrot.slane %v11258_v52, 4 }
 0x293   : > { %v1992_v43 = vrot.slane %v14716_v51, 4  ;;  %v1843_v2 = vpop.permute.xlu1 %1842  ;;  %v8804_v56 = vld [vmem:[#allocation3 + $0x190] sm:$0xf]  ;;  %v2878_v35 = vsel %vm10861_vm5, %v2876_v34, %v2877_v13  ;;  %v2441_v61 = vshrl.u32 %v2343_v23, 16  ;;  %v3170_v51 = vshll.u32 %v2986_v14, 16  ;;  %v9508_v33 = vld [vmem:[%s14518_s3 + $0xd8] sm:$0xff] }
 0x294   : > { %1909 = vst.msk [vmem:[#allocation3 + $0xb4] sm:$0xf] %vm1899_vm1, %v1843_v2  ;;  %v8805_v0 = vor.u32 %v9473_v18, %v8804_v56  ;;  %3269 = vrot.lane.b32.xlu0 %v3104_v42, %s9731_s17  ;;  %v14599_v18 = vrot.slane %v11276_v21, 7  ;;  %v11334_v42 = vld [vmem:[#allocation2 + $0x54] sm:$0xf]  ;;  %v2444_v56 = vshll.u32 %v2343_v23, 16 }
 0x295   : > { %v1994_v57 = vsel %vm10755_vm3, %v1992_v43, %v14719_v41  ;;  %3267 = vrot.lane.b32.xlu2 %v3094_v9, %s9731_s17  ;;  %2954 = vst.msk [vmem:[#allocation3 + $0xd4] sm:$0xf] %vm433_vm2, %v2878_v35  ;;  %v14720_v9 = vrot.slane %v11197_v58, 7  ;;  %v11338_v38 = vrot.slane %v2441_v61, 7  ;;  %v14721_v14 = vrot.slane %v11010_v3, 7 }
 0x296   : > { %4306 = vmatmul.bf16.vlgmr.msrb.gmra.mxu3 %v8805_v0  ;;  %v1871_v27 = vpop.permute.xlu0 %1870  ;;  %2082 = vst.msk [vmem:[#allocation3 + $0x54] sm:$0xf] %vm433_vm2, %v1994_v57  ;;  %v9492_v0 = vld [vmem:[%s14518_s3 + $0x58] sm:$0xff]  ;;  %4324 = vmatpush.bf16.msra.mxu2 %v9493_v8  ;;  %v11350_v41 = vld [vmem:[#allocation2 + $0x24] sm:$0xf]  ;;  %v11356_v3 = vrot.slane %v14598_v24, 4 }
 0x297   : > { %v2277_v43 = vpop.permute.xlu2 %2276  ;;  %9630 = vmatpush.bf16.msra.mxu3 %v9493_v8  ;;  %v11332_v2 = vrot.slane %v14720_v9, 4  ;;  %v2179_v34 = vsel %vm10695_vm15, %v11102_v60, %v14721_v14  ;;  %1923 = vst.msk [vmem:[#allocation3 + $0x1cc] sm:$0xf] %vm1899_vm1, %v1871_v27  ;;  %v2446_v52 = vor.u32 %v2444_v56, %v11338_v38  ;;  %v11359_v60 = vld [vmem:[#allocation2 + $0x28] sm:$0xf]  ;;  %v2005_v57 = vrot.slane %v11350_v41, 5 }
 0x298   : > { %2330 = vst.msk [vmem:[#allocation3 + $0x1a8] sm:$0xf] %vm1899_vm1, %v2277_v43  ;;  %v2652_v23 = vld [vmem:[#allocation2 + $0x30] sm:$0xf]  ;;  %v3169_v8 = vrot.slane %v3167_v15, 6  ;;  %v3172_v61 = vrot.slane %v3170_v51, 7 }
 0x299   : > { %2246 = vrot.lane.b32.xlu1 %v2179_v34, %s9731_s17  ;;  %v11365_v43 = vrot.slane %v14599_v18, 4  ;;  %v2344_v27 = vld [vmem:[#allocation2 + $0x2c] sm:$0xf]  ;;  %v9433_v14 = vld [vmem:[#allocation3 + $0x60] sm:$0xf0]  ;;  %v2447_v56 = vsel %vm10827_vm7, %v2439_v48, %v2446_v52  ;;  %v2007_v34 = vrot.slane %v2005_v57, 4 }
 0x29a   : > { %v14600_v24 = vrot.slane %v11359_v60, 5  ;;  %v2450_v26 = vshrl.u32 %v2344_v27, 16  ;;  %v14722_v15 = vrot.slane %v11031_v55, 7  ;;  %v3177_v35 = vshrl.u32 %v11334_v42, 16  ;;  %4325 = vmatpush.bf16.msra.mxu2 %v9492_v0  ;;  %v11381_v52 = vld [vmem:[#allocation2 + $0x3c] sm:$0xf] }
 0x29b   : > { %v1845_v9 = vpop.permute.xlu1 %1844  ;;  %9631 = vmatpush.bf16.msra.mxu3 %v9492_v0  ;;  %v14723_v18 = vrot.slane %v11170_v28, 6  ;;  %v9491_v55 = vld [vmem:[%s14518_s3 + $0x50] sm:$0xff]  ;;  %2625 = vst.msk [vmem:[#allocation3 + $0xa8] sm:$0xf] %vm433_vm2, %v2447_v56  ;;  %v2448_v28 = vrot.slane %v11338_v38, 4  ;;  %v2453_v0 = vshll.u32 %v2344_v27, 16 }
 0x29c   : > { %v2182_v51 = vsel %vm10695_vm15, %v11155_v4, %v14722_v15  ;;  %1910 = vst.msk [vmem:[#allocation3 + $0xc8] sm:$0xf] %vm1899_vm1, %v1845_v9  ;;  %2712 = vrot.lane.b32.xlu0 %v2652_v23, %s9731_s17  ;;  %v2009_v4 = vsel %vm10755_vm3, %v2007_v34, %v14600_v24  ;;  %v2653_v9 = vld [vmem:[#allocation2 + $0x34] sm:$0xf]  ;;  %v3180_v23 = vshll.u32 %v11334_v42, 16  ;;  %v14724_v42 = vrot.slane %v11106_v54, 5 }
 0x29d   : > { %v2873_v48 = vrot.slane %v14723_v18, 4  ;;  %2248 = vrot.lane.b32.xlu2 %v2182_v51, %s9731_s17  ;;  %v11394_v18 = vrot.slane %v2450_v26, 7  ;;  %2087 = vst.msk [vmem:[#allocation3 + $0xb8] sm:$0xf] %vm433_vm2, %v2009_v4  ;;  %v11402_v15 = vld [vmem:[#allocation2 + $0x40] sm:$0xf] }
 0x29e   : > { %v1873_v34 = vpop.permute.xlu0 %1872  ;;  %v8644_v19 = vld [vmem:[#allocation3 + $0x50] sm:$0xf]  ;;  %v2880_v26 = vrot.slane %v11381_v52, 6  ;;  %v1998_v27 = vrot.slane %v14724_v42, 4  ;;  %v9478_v4 = vld [vmem:[#allocation3 + $0x1c8] sm:$0xf0]  ;;  %4326 = vmatpush.bf16.msra.mxu2 %v9491_v55 }
 0x29f   : > { %v2875_v56 = vsel %vm10861_vm5, %v2873_v48, %v2874_v50  ;;  %v2279_v51 = vpop.permute.xlu2 %2278  ;;  %9632 = vmatpush.bf16.msra.mxu3 %v9491_v55  ;;  %v2455_v38 = vor.u32 %v2453_v0, %v11394_v18  ;;  %v8645_v37 = vor.u32 %v9433_v14, %v8644_v19  ;;  %v9509_v50 = vld [vmem:[%s14518_s3 + $0xe0] sm:$0xff]  ;;  %v9490_v48 = vld [vmem:[%s14518_s3 + $0x48] sm:$0xff]  ;;  %v11416_v0 = vor.u32 %v3172_v61, %v3169_v8  ;;  %v2345_v61 = vld [vmem:[#allocation2 + $0x30] sm:$0xf] }
 0x2a0   : > { %2953 = vst.msk [vmem:[#allocation3 + $0xc0] sm:$0xf] %vm433_vm2, %v2875_v56  ;;  %v11418_v56 = vld [vmem:[#allocation2 + $0x40] sm:$0xf]  ;;  %v2882_v19 = vrot.slane %v2880_v26, 4  ;;  %v14602_v14 = vrot.slane %v11402_v15, 6  ;;  %4470 = vmatpush.bf16.msrb.mxu0 %v9509_v50 }
 0x2a1   : > { %2331 = vst.msk [vmem:[#allocation3 + $0x1bc] sm:$0xf] %vm1899_vm1, %v2279_v51  ;;  %2714 = vrot.lane.b32.xlu1 %v2653_v9, %s9731_s17  ;;  %v2456_v54 = vsel %vm10827_vm7, %v2448_v28, %v2455_v38  ;;  %v14725_v51 = vrot.slane %v11199_v22, 5  ;;  %v14726_v55 = vrot.slane %v11110_v12, 4  ;;  %v11436_v28 = vrot.slane %v3177_v35, 6  ;;  %4266 = vmatmul.bf16.gmra.mxu1 %v8645_v37 }
 0x2a2   : > { %1925 = vst.msk [vmem:[#allocation3 + $0x1e0] sm:$0x3] %vm1924_vm8, %v1873_v34  ;;  %v8824_v34 = vld [vmem:[#allocation3 + $0x1b8] sm:$0xf]  ;;  %v11438_v38 = vld [vmem:[#allocation2 + $0x44] sm:$0xf]  ;;  %v2884_v35 = vsel %vm10861_vm5, %v2882_v19, %v14602_v14  ;;  %4327 = vmatpush.bf16.msra.mxu2 %v9490_v48 }
 0x2a3   : > { %v2000_v8 = vsel %vm10755_vm3, %v1998_v27, %v14725_v51  ;;  %v3114_v9 = vsel %vm10809_vm13, %v14726_v55, %v11112_v6  ;;  %2626 = vst.msk [vmem:[#allocation3 + $0xbc] sm:$0xf] %vm433_vm2, %v2456_v54  ;;  %v2459_v42 = vshrl.u32 %v2345_v61, 16  ;;  %v2283_v22 = vpop.permute.xlu1 %2282  ;;  %v14727_v27 = vrot.slane %v11112_v6, 4  ;;  %9633 = vmatpush.bf16.msra.mxu3 %v9490_v48  ;;  %v11451_v50 = vld [vmem:[#allocation2 + $0x2c] sm:$0xf] }
 0x2a4   : > { %v8825_v51 = vor.u32 %v9478_v4, %v8824_v34  ;;  %2084 = vst.msk [vmem:[#allocation3 + $0x7c] sm:$0xf] %vm433_vm2, %v2000_v8  ;;  %v11453_v54 = vld [vmem:[#allocation2 + $0x30] sm:$0xf]  ;;  %v2457_v6 = vrot.slane %v11394_v18, 4  ;;  %v2462_v55 = vshll.u32 %v2345_v61, 16  ;;  %4471 = vmatpush.bf16.msrb.mxu0 %v9508_v33 }
 0x2a5   : > { %v3124_v12 = vsel %vm10809_vm13, %v14727_v27, %v11141_v17  ;;  %2333 = vst.msk [vmem:[#allocation3 + $0x1e4] sm:$0x3] %vm1924_vm8, %v2283_v22  ;;  %v2461_v37 = vrot.slane %v2459_v42, 7  ;;  %v14601_v4 = vrot.slane %v11451_v50, 5  ;;  %3271 = vrot.lane.b32.xlu2 %v3114_v9, %s9731_s17  ;;  %v9489_v19 = vld [vmem:[%s14518_s3 + $0x40] sm:$0xff]  ;;  %v11464_v34 = vrot.slane %v3180_v23, 7 }
 0x2a6   : > { %3273 = vrot.lane.b32.xlu0 %v3124_v12, %s9731_s17  ;;  %v14603_v48 = vrot.slane %v11418_v56, 7  ;;  %v2014_v18 = vrot.slane %v11453_v54, 5  ;;  %4311 = vmatmul.bf16.gmra.mxu3 %v8825_v51  ;;  %2956 = vst.msk [vmem:[#allocation3 + $0xfc] sm:$0xf] %vm433_vm2, %v2884_v35  ;;  %v2346_v42 = vld [vmem:[#allocation2 + $0x34] sm:$0xf]  ;;  %v1851_v12 = vpop.permute.xlu0 %1850 }
 0x2a7   : > { %v2464_v61 = vor.u32 %v2462_v55, %v2461_v37  ;;  %v2013_v9 = vrot.slane %v14601_v4, 4  ;;  %v2879_v22 = vrot.slane %v2877_v13, 4  ;;  %v1859_v27 = vpop.permute.xlu2 %1858  ;;  %v14728_v23 = vrot.slane %v11078_v45, 7  ;;  %9634 = vmatpush.bf16.msra.mxu3 %v9489_v19  ;;  %v11479_v55 = vld [vmem:[#allocation2 + $0x44] sm:$0xf]  ;;  %4328 = vmatpush.bf16.msra.mxu2 %v9489_v19 }
 0x2a8   : > { %v2468_v35 = vshrl.u32 %v2346_v42, 16  ;;  %v11481_v24 = vld [vmem:[#allocation2 + $0x48] sm:$0xf]  ;;  %1917 = vst.msk [vmem:[#allocation3 + $0x154] sm:$0xf] %vm1899_vm1, %v1859_v27  ;;  %v2466_v13 = vrot.slane %v2461_v37, 4 }
 0x2a9   : > { %v2185_v8 = vsel %vm10695_vm15, %v11159_v30, %v14728_v23  ;;  %v2465_v45 = vsel %vm10827_vm7, %v2457_v6, %v2464_v61  ;;  %v2015_v30 = vsel %vm10755_vm3, %v2013_v9, %v2014_v18  ;;  %v2886_v23 = vrot.slane %v11479_v55, 6  ;;  %1913 = vst.msk [vmem:[#allocation3 + $0x104] sm:$0xf] %vm1899_vm1, %v1851_v12  ;;  %v2347_v51 = vld [vmem:[#allocation2 + $0x38] sm:$0xf] }
 0x2aa   : > { %2250 = vrot.lane.b32.xlu1 %v2185_v8, %s9731_s17  ;;  %v2470_v27 = vrot.slane %v2468_v35, 7  ;;  %v2471_v4 = vshll.u32 %v2346_v42, 16  ;;  %v2654_v14 = vld [vmem:[#allocation2 + $0x38] sm:$0xf]  ;;  %2627 = vst.msk [vmem:[#allocation3 + $0xd0] sm:$0xf] %vm433_vm2, %v2465_v45  ;;  %v2881_v6 = vsel %vm10861_vm5, %v2879_v22, %v2880_v26 }
 0x2ab   : > { %v2888_v37 = vrot.slane %v2886_v23, 4  ;;  %v2889_v19 = vrot.slane %v11481_v24, 6  ;;  %v2477_v61 = vshrl.u32 %v2347_v51, 16  ;;  %v2275_v9 = vpop.permute.xlu1 %2274  ;;  %2089 = vst.msk [vmem:[#allocation3 + $0xe0] sm:$0xf] %vm433_vm2, %v2015_v30  ;;  %v2004_v12 = vrot.slane %v2002_v59, 4 }
 0x2ac   : > { %v11504_v8 = vld [vmem:[#allocation3 + $0x1e0] sm:$0x33]  ;;  %v2473_v42 = vor.u32 %v2471_v4, %v2470_v27  ;;  %v2480_v35 = vshll.u32 %v2347_v51, 16  ;;  %v14729_v52 = vrot.slane %v11114_v46, 7  ;;  %2329 = vst.msk [vmem:[#allocation3 + $0x194] sm:$0xf] %vm1899_vm1, %v2275_v9 }
 0x2ad   : > { %v11515_v22 = vld [vmem:[#allocation2 + $0x58] sm:$0xf]  ;;  %v2890_v33 = vsel %vm10861_vm5, %v2888_v37, %v2889_v19  ;;  %v2475_v4 = vrot.slane %v2470_v27, 4  ;;  %v11521_v45 = vrot.slane %v2477_v61, 7  ;;  %v3351_v40 = vld [vmem:[#allocation2 + $0xc] sm:$0x8] }
 0x2ae   : > { %v2188_v26 = vsel %vm10695_vm15, %v11179_v63, %v14729_v52  ;;  %2716 = vrot.lane.b32.xlu0 %v2654_v14, %s9731_s17  ;;  %v9507_v46 = vld [vmem:[%s14518_s3 + $0xd0] sm:$0xff]  ;;  %v11530_v63 = vrot.slane %v14603_v48, 4  ;;  %v2474_v59 = vsel %vm10827_vm7, %v2466_v13, %v2473_v42  ;;  %2955 = vst.msk [vmem:[#allocation3 + $0xe8] sm:$0xf] %vm433_vm2, %v2881_v6  ;;  %v2655_v30 = vld [vmem:[#allocation2 + $0x3c] sm:$0xf]  ;;  %v3871_v48 = vunpack.c.l.b16 %v11504_v8 }
 0x2af   : > { %2252 = vrot.lane.b32.xlu2 %v2188_v26, %s9731_s17  ;;  %v3352_v51 = vld [vmem:[#allocation2 + $0x10] sm:$0xf]  ;;  %v8664_v27 = vld [vmem:[#allocation3 + $0x78] sm:$0xf]  ;;  %v9438_v37 = vld [vmem:[#allocation3 + $0x88] sm:$0xf0]  ;;  %v2482_v14 = vor.u32 %v2480_v35, %v11521_v45  ;;  %v2693_v52 = vpop.permute.xlu2 %2692  ;;  %v1853_v26 = vpop.permute.xlu0 %1852  ;;  %4472 = vmatpush.bf16.msrb.mxu0 %v9507_v46  ;;  %v2006_v13 = vsel %vm10755_vm3, %v2004_v12, %v2005_v57  ;;  %v11559_v57 = vor.u32 %v11464_v34, %v11436_v28 }
 0x2b0   : > { %2628 = vst.msk [vmem:[#allocation3 + $0xe4] sm:$0xf] %vm433_vm2, %v2474_v59  ;;  %v8601_v61 = vrot.slane %v3351_v40, 11  ;;  %v3405_v9 = vrot.slane %v3352_v51, 7  ;;  %v11543_v6 = vld [vmem:[#allocation2 + $0x14] sm:$0xf]  ;;  %v8665_v41 = vor.u32 %v9438_v37, %v8664_v27 }
 0x2b1   : > { %2958 = vst.msk [vmem:[#allocation3 + $0x124] sm:$0xf] %vm433_vm2, %v2890_v33  ;;  %v11545_v42 = vld [vmem:[#allocation2 + $0x34] sm:$0xf]  ;;  %v9506_v35 = vld [vmem:[%s14518_s3 + $0xc8] sm:$0xff]  ;;  %v2483_v40 = vsel %vm10827_vm7, %v2475_v4, %v2482_v14  ;;  %v3187_v12 = vshrl.u32 %v11515_v22, 16 }
 0x2b2   : > { %2767 = vst.msk [vmem:[#allocation3 + $0x8] sm:$0xf] %vm1899_vm1, %v2693_v52  ;;  %v3407_v46 = vrot.slane %v3405_v9, 4  ;;  %v11553_v33 = vld [vmem:[#allocation2 + $0x38] sm:$0xf]  ;;  %2718 = vrot.lane.b32.xlu1 %v2655_v30, %s9731_s17  ;;  %v14604_v59 = vrot.slane %v11545_v42, 5  ;;  %4271 = vmatmul.bf16.gmra.mxu1 %v8665_v41 }
 0x2b3   : > { %1914 = vst.msk [vmem:[#allocation3 + $0x118] sm:$0xf] %vm1899_vm1, %v1853_v26  ;;  %v2348_v51 = vld [vmem:[#allocation2 + $0x3c] sm:$0xf]  ;;  %v14730_v4 = vrot.slane %v11141_v17, 4  ;;  %v14731_v52 = vrot.slane %v11161_v36, 4  ;;  %v1855_v37 = vpop.permute.xlu1 %1854  ;;  %v3936_v26 = vpack.c.b16 %v3871_v48, %v3871_v48  ;;  %4473 = vmatpush.bf16.msrb.mxu0 %v9506_v35  ;;  %v3406_v17 = vsel %vm10695_vm15, %v8601_v61, %v3405_v9 }
 0x2b4   : > { %2086 = vst.msk [vmem:[#allocation3 + $0xa4] sm:$0xf] %vm433_vm2, %v2006_v13  ;;  %v3408_v28 = vrot.slane %v11543_v6, 7  ;;  %v2486_v34 = vshrl.u32 %v2348_v51, 16  ;;  %v11575_v27 = vld [vmem:[#allocation2 + $0x4c] sm:$0xf] }
 0x2b5   : > { %v3134_v14 = vsel %vm10809_vm13, %v14730_v4, %v11161_v36  ;;  %v3144_v30 = vsel %vm10809_vm13, %v14731_v52, %v11267_v39  ;;  %2629 = vst.msk [vmem:[#allocation3 + $0xf8] sm:$0xf] %vm433_vm2, %v2483_v40  ;;  %v2019_v36 = vrot.slane %v14604_v59, 4  ;;  %v2892_v4 = vrot.slane %v11575_v27, 6  ;;  %v9514_v61 = vld [vmem:[%s14518_s3 + $0x108] sm:$0xff] }
 0x2b6   : > { %1915 = vst.msk [vmem:[#allocation3 + $0x12c] sm:$0xf] %vm1899_vm1, %v1855_v37  ;;  %v3409_v13 = vsel %vm10695_vm15, %v3407_v46, %v3408_v28  ;;  %v2484_v48 = vrot.slane %v11521_v45, 4  ;;  %v11589_v35 = vrot.slane %v2486_v34, 7  ;;  %v2489_v40 = vshll.u32 %v2348_v51, 16  ;;  %3277 = vrot.lane.b32.xlu0 %v3144_v30, %s9731_s17  ;;  %4316 = vmatmul.bf16.gmra.mxu3 %v3936_v26  ;;  %v9505_v45 = vld [vmem:[%s14518_s3 + $0xc0] sm:$0xff] }
 0x2b7   : > { %3275 = vrot.lane.b32.xlu2 %v3134_v14, %s9731_s17  ;;  %v3190_v41 = vshll.u32 %v11515_v22, 16  ;;  %v14605_v52 = vrot.slane %v11553_v33, 5  ;;  %v11599_v46 = vld [vmem:[#allocation2 + $0x50] sm:$0xf]  ;;  %3504 = vst.msk [vmem:[#allocation3 + $0x10] sm:$0xf] %vm433_vm2, %v3406_v17  ;;  %v3254_v37 = vpop.permute.xlu2 %3253  ;;  %v2281_v9 = vpop.permute.xlu0 %2280  ;;  %4546 = vmatpush.bf16.msrb.mxu1 %v9514_v61 }
 0x2b8   : > { %v2491_v51 = vor.u32 %v2489_v40, %v11589_v35  ;;  %v14732_v14 = vrot.slane %v11402_v15, 6  ;;  %v2349_v34 = vld [vmem:[#allocation2 + $0x40] sm:$0xf]  ;;  %v14733_v22 = vrot.slane %v11191_v7, 7  ;;  %v2989_v59 = vld [vmem:[#allocation2 + $0x5c] sm:$0xf]  ;;  %4474 = vmatpush.bf16.msrb.mxu0 %v9505_v45 }
 0x2b9   : > { %3505 = vst.msk [vmem:[#allocation3 + $0x24] sm:$0xf] %vm433_vm2, %v3409_v13  ;;  %v2021_v17 = vsel %vm10755_vm3, %v2019_v36, %v14605_v52  ;;  %v2894_v15 = vrot.slane %v2892_v4, 4  ;;  %v2495_v40 = vshrl.u32 %v2349_v34, 16  ;;  %v11624_v7 = vrot.slane %v3187_v12, 6  ;;  %v9502_v24 = vld [vmem:[%s14518_s3 + $0xa8] sm:$0xff] }
 0x2ba   : > { %v2885_v30 = vrot.slane %v14732_v14, 4  ;;  %v2191_v26 = vsel %vm10695_vm15, %v11187_v29, %v14733_v22  ;;  %3327 = vst.msk [vmem:[#allocation3 + $0x20] sm:$0xf] %vm1899_vm1, %v3254_v37  ;;  %v9504_v29 = vld [vmem:[%s14518_s3 + $0xb8] sm:$0xff]  ;;  %v2492_v13 = vsel %vm10827_vm7, %v2484_v48, %v2491_v51  ;;  %v14607_v61 = vrot.slane %v11599_v46, 6 }
 0x2bb   : > { %v14734_v36 = vrot.slane %v11359_v60, 5  ;;  %2332 = vst.msk [vmem:[#allocation3 + $0x1d0] sm:$0xf] %vm1899_vm1, %v2281_v9  ;;  %v14735_v22 = vrot.slane %v11197_v58, 7  ;;  %2254 = vrot.lane.b32.xlu1 %v2191_v26, %s9731_s17  ;;  %v11638_v12 = vrot.slane %v2495_v40, 7  ;;  %v2498_v37 = vshll.u32 %v2349_v34, 16  ;;  %4394 = vmatpush.bf16.msrb.mxu3 %v9504_v29  ;;  %v1857_v9 = vpop.permute.xlu1 %1856 }
 0x2bc   : > { %v3354_v52 = vld [vmem:[#allocation2 + $0x18] sm:$0xf]  ;;  %v2656_v48 = vld [vmem:[#allocation2 + $0x40] sm:$0xf]  ;;  %v3197_v51 = vshrl.u32 %v2989_v59, 16  ;;  %v14736_v60 = vrot.slane %v11438_v38, 7  ;;  %v2887_v58 = vsel %vm10861_vm5, %v2885_v30, %v2886_v23  ;;  %v2896_v34 = vsel %vm10861_vm5, %v2894_v15, %v14607_v61 }
 0x2bd   : > { %v2010_v14 = vrot.slane %v14734_v36, 4  ;;  %v2194_v45 = vsel %vm10695_vm15, %v11307_v1, %v14735_v22  ;;  %2091 = vst.msk [vmem:[#allocation3 + $0x108] sm:$0xf] %vm433_vm2, %v2021_v17  ;;  %v3411_v1 = vrot.slane %v3354_v52, 7  ;;  %v3200_v26 = vshll.u32 %v2989_v59, 16 }
 0x2be   : > { %v11642_v36 = vrot.slane %v14736_v60, 4  ;;  %2630 = vst.msk [vmem:[#allocation3 + $0x10c] sm:$0xf] %vm433_vm2, %v2492_v13  ;;  %v2493_v40 = vrot.slane %v11589_v35, 4  ;;  %v2500_v29 = vor.u32 %v2498_v37, %v11638_v12  ;;  %v11656_v17 = vld [vmem:[#allocation2 + $0x3c] sm:$0xf]  ;;  %2720 = vrot.lane.b32.xlu0 %v2656_v48, %s9731_s17 }
 0x2bf   : > { %1916 = vst.msk [vmem:[#allocation3 + $0x140] sm:$0xf] %vm1899_vm1, %v1857_v9  ;;  %v11659_v55 = vrot.slane %v3190_v41, 7  ;;  %v14737_v23 = vrot.slane %v11451_v50, 5  ;;  %v3410_v52 = vrot.slane %v3408_v28, 4  ;;  %v14606_v30 = vrot.slane %v11656_v17, 5  ;;  %2256 = vrot.lane.b32.xlu2 %v2194_v45, %s9731_s17  ;;  %v3256_v28 = vpop.permute.xlu2 %3255  ;;  %v1861_v22 = vpop.permute.xlu0 %1860 }
 0x2c0   : > { %v9443_v35 = vld [vmem:[#allocation3 + $0xb0] sm:$0xf0]  ;;  %2957 = vst.msk [vmem:[#allocation3 + $0x110] sm:$0xf] %vm433_vm2, %v2887_v58  ;;  %v11671_v15 = vld [vmem:[#allocation2 + $0x1c] sm:$0xf]  ;;  %v2501_v48 = vsel %vm10827_vm7, %v2493_v40, %v2500_v29 }
 0x2c1   : > { %v2012_v59 = vsel %vm10755_vm3, %v2010_v14, %v14737_v23  ;;  %v2657_v41 = vld [vmem:[#allocation2 + $0x44] sm:$0xf]  ;;  %v8684_v13 = vld [vmem:[#allocation3 + $0xa0] sm:$0xf]  ;;  %v11673_v50 = vrot.slane %v3197_v51, 6  ;;  %v3413_v14 = vrot.slane %v3411_v1, 4 }
 0x2c2   : > { %2960 = vst.msk [vmem:[#allocation3 + $0x14c] sm:$0xf] %vm433_vm2, %v2896_v34  ;;  %v11676_v6 = vld [vmem:[#allocation2 + $0x40] sm:$0xf]  ;;  %v9471_v37 = vld [vmem:[#allocation3 + $0x194] sm:$0xf]  ;;  %v8685_v29 = vor.u32 %v9443_v35, %v8684_v13 }
 0x2c3   : > { %v11678_v45 = vrot.slane %v3200_v26, 7  ;;  %2088 = vst.msk [vmem:[#allocation3 + $0xcc] sm:$0xf] %vm433_vm2, %v2012_v59  ;;  %v2025_v60 = vrot.slane %v14606_v30, 4  ;;  %v2350_v51 = vld [vmem:[#allocation2 + $0x44] sm:$0xf]  ;;  %v3412_v26 = vsel %vm10695_vm15, %v3410_v52, %v3411_v1  ;;  %2722 = vrot.lane.b32.xlu1 %v2657_v41, %s9731_s17 }
 0x2c4   : > { %3328 = vst.msk [vmem:[#allocation3 + $0x34] sm:$0xf] %vm1899_vm1, %v3256_v28  ;;  %v9503_v58 = vld [vmem:[%s14518_s3 + $0xb0] sm:$0xff]  ;;  %v11689_v9 = vld [vmem:[#allocation2 + $0x60] sm:$0xf]  ;;  %v3414_v34 = vrot.slane %v11671_v15, 7  ;;  %4276 = vmatmul.bf16.gmra.mxu1 %v8685_v29  ;;  %v1863_v15 = vpop.permute.xlu1 %1862 }
 0x2c5   : > { %v2502_v23 = vrot.slane %v11638_v12, 4  ;;  %v2891_v40 = vrot.slane %v2889_v19, 4  ;;  %1918 = vst.msk [vmem:[#allocation3 + $0x168] sm:$0xf] %vm1899_vm1, %v1861_v22  ;;  %v8806_v59 = vld [vmem:[#allocation3 + $0x1a4] sm:$0xf0]  ;;  %4395 = vmatpush.bf16.msrb.mxu3 %v9503_v58 }
 0x2c6   : > { %v14609_v28 = vrot.slane %v11676_v6, 5  ;;  %v2504_v30 = vshrl.u32 %v2350_v51, 16  ;;  %v11700_v61 = vld [vmem:[#allocation2 + $0x54] sm:$0xf]  ;;  %v14738_v1 = vrot.slane %v11267_v39, 4  ;;  %v3415_v19 = vsel %vm10695_vm15, %v3413_v14, %v3414_v34 }
 0x2c7   : > { %2631 = vst.msk [vmem:[#allocation3 + $0x120] sm:$0xf] %vm433_vm2, %v2501_v48  ;;  %v11713_v52 = vld [vmem:[#allocation2 + $0x58] sm:$0xf]  ;;  %v2898_v35 = vrot.slane %v11700_v61, 6  ;;  %v14739_v39 = vrot.slane %v11309_v25, 4  ;;  %v8809_v58 = vor.u32 %v9471_v37, %v8806_v59 }
 0x2c8   : > { %v3154_v12 = vsel %vm10809_vm13, %v14738_v1, %v11309_v25  ;;  %3506 = vst.msk [vmem:[#allocation3 + $0x38] sm:$0xf] %vm433_vm2, %v3412_v26  ;;  %v2027_v13 = vsel %vm10755_vm3, %v2025_v60, %v14609_v28  ;;  %v2506_v14 = vrot.slane %v2504_v30, 7  ;;  %v2507_v22 = vshll.u32 %v2350_v51, 16  ;;  %v2351_v48 = vld [vmem:[#allocation2 + $0x48] sm:$0xf] }
 0x2c9   : > { %v3164_v41 = vsel %vm10809_vm13, %v14739_v39, %v11326_v44  ;;  %1919 = vst.msk [vmem:[#allocation3 + $0x17c] sm:$0xf] %vm1899_vm1, %v1863_v15  ;;  %v11727_v29 = vld [vmem:[#allocation2 + $0x48] sm:$0xf]  ;;  %v2893_v25 = vsel %vm10861_vm5, %v2891_v40, %v2892_v4  ;;  %v2900_v26 = vrot.slane %v2898_v35, 4  ;;  %v2513_v1 = vshrl.u32 %v2351_v48, 16  ;;  %3279 = vrot.lane.b32.xlu2 %v3154_v12, %s9731_s17  ;;  %4379 = vmatmul.bf16.vlgmr.msra.gmra.mxu3 %v8809_v58  ;;  %v2695_v15 = vpop.permute.xlu0 %2694 }
 0x2ca   : > { %3281 = vrot.lane.b32.xlu0 %v3164_v41, %s9731_s17  ;;  %v3207_v30 = vshrl.u32 %v11689_v9, 16  ;;  %3507 = vst.msk [vmem:[#allocation3 + $0x4c] sm:$0xf] %vm433_vm2, %v3415_v19  ;;  %v2509_v37 = vor.u32 %v2507_v22, %v2506_v14  ;;  %v2901_v60 = vrot.slane %v11713_v52, 6  ;;  %v2016_v27 = vrot.slane %v2014_v18, 4  ;;  %v2237_v19 = vpop.permute.xlu2 %2236  ;;  %4396 = vmatpush.bf16.msrb.mxu3 %v9502_v24 }
 0x2cb   : > { %v14740_v4 = vrot.slane %v11269_v20, 7  ;;  %2093 = vst.msk [vmem:[#allocation3 + $0x130] sm:$0xf] %vm433_vm2, %v2027_v13  ;;  %v11748_v40 = vrot.slane %v2513_v1, 7  ;;  %v2516_v59 = vshll.u32 %v2351_v48, 16  ;;  %v2208_v39 = vrot.slane %v11727_v29, 7 }
 0x2cc   : > { %v3356_v12 = vld [vmem:[#allocation2 + $0x20] sm:$0xf]  ;;  %v2510_v54 = vsel %vm10827_vm7, %v2502_v23, %v2509_v37  ;;  %2959 = vst.msk [vmem:[#allocation3 + $0x138] sm:$0xf] %vm433_vm2, %v2893_v25  ;;  %v2511_v20 = vrot.slane %v2506_v14, 4  ;;  %v3210_v41 = vshll.u32 %v11689_v9, 16  ;;  %v2902_v24 = vsel %vm10861_vm5, %v2900_v26, %v2901_v60  ;;  %v3252_v1 = vpop.permute.xlu1 %3251 }
 0x2cd   : > { %v2197_v51 = vsel %vm10695_vm15, %v11332_v2, %v14740_v4  ;;  %v3417_v18 = vrot.slane %v3356_v12, 7  ;;  %2310 = vst.msk [vmem:[#allocation3 + $0x18] sm:$0xf] %vm1899_vm1, %v2237_v19  ;;  %v9501_v2 = vld [vmem:[%s14518_s3 + $0xa0] sm:$0xff]  ;;  %v3416_v13 = vrot.slane %v3414_v34, 4  ;;  %v2518_v23 = vor.u32 %v2516_v59, %v11748_v40  ;;  %v9500_v9 = vld [vmem:[%s14518_s3 + $0x98] sm:$0xff] }
 0x2ce   : > { %2768 = vst.msk [vmem:[#allocation3 + $0x1c] sm:$0xf] %vm1899_vm1, %v2695_v15  ;;  %2258 = vrot.lane.b32.xlu1 %v2197_v51, %s9731_s17  ;;  %v11766_v14 = vld [vmem:[#allocation2 + $0x24] sm:$0xf]  ;;  %v2658_v48 = vld [vmem:[#allocation2 + $0x48] sm:$0xf]  ;;  %4397 = vmatpush.bf16.msrb.mxu3 %v9501_v2  ;;  %v11850_v28 = vor.u32 %v11678_v45, %v11673_v50 }
 0x2cf   : > { %v11768_v22 = vld [vmem:[#allocation2 + $0x44] sm:$0xf]  ;;  %v11773_v34 = vrot.slane %v3207_v30, 6  ;;  %2632 = vst.msk [vmem:[#allocation3 + $0x134] sm:$0xf] %vm433_vm2, %v2510_v54  ;;  %v14741_v58 = vrot.slane %v11545_v42, 5  ;;  %v2519_v37 = vsel %vm10827_vm7, %v2511_v20, %v2518_v23  ;;  %v3418_v12 = vsel %vm10695_vm15, %v3416_v13, %v3417_v18 }
 0x2d0   : > { %v11780_v26 = vld [vmem:[#allocation2 + $0x48] sm:$0xf]  ;;  %2962 = vst.msk [vmem:[#allocation3 + $0x174] sm:$0xf] %vm433_vm2, %v2902_v24  ;;  %v3419_v4 = vrot.slane %v3417_v18, 4  ;;  %v14608_v30 = vrot.slane %v11768_v22, 5 }
 0x2d1   : > { %v2018_v25 = vsel %vm10755_vm3, %v2016_v27, %v14741_v58  ;;  %v2352_v51 = vld [vmem:[#allocation2 + $0x4c] sm:$0xf]  ;;  %v14742_v59 = vrot.slane %v11276_v21, 7  ;;  %3326 = vst.msk [vmem:[#allocation3 + $0xc] sm:$0xf] %vm1899_vm1, %v3252_v1  ;;  %v3420_v19 = vrot.slane %v11766_v14, 7  ;;  %v2697_v58 = vpop.permute.xlu0 %2696 }
 0x2d2   : > { %v8704_v27 = vld [vmem:[#allocation3 + $0xc8] sm:$0xf]  ;;  %v2522_v15 = vshrl.u32 %v2352_v51, 16  ;;  %2724 = vrot.lane.b32.xlu0 %v2658_v48, %s9731_s17  ;;  %2090 = vst.msk [vmem:[#allocation3 + $0xf4] sm:$0xf] %vm433_vm2, %v2018_v25  ;;  %v2031_v21 = vrot.slane %v14608_v30, 4  ;;  %v3260_v48 = vpop.permute.xlu2 %3259  ;;  %4398 = vmatpush.bf16.msrb.mxu3 %v9500_v9  ;;  %v11846_v30 = vor.u32 %v11659_v55, %v11624_v7 }
 0x2d3   : > { %v2200_v42 = vsel %vm10695_vm15, %v11356_v3, %v14742_v59  ;;  %v14610_v3 = vrot.slane %v11780_v26, 5  ;;  %v11801_v54 = vld [vmem:[#allocation2 + $0x5c] sm:$0xf]  ;;  %v2659_v20 = vld [vmem:[#allocation2 + $0x4c] sm:$0xf]  ;;  %v2520_v18 = vrot.slane %v11748_v40, 4  ;;  %v3421_v40 = vsel %vm10695_vm15, %v3419_v4, %v3420_v19 }
 0x2d4   : > { %2260 = vrot.lane.b32.xlu2 %v2200_v42, %s9731_s17  ;;  %v9448_v2 = vld [vmem:[#allocation3 + $0xd8] sm:$0xf0]  ;;  %2633 = vst.msk [vmem:[#allocation3 + $0x148] sm:$0xf] %vm433_vm2, %v2519_v37  ;;  %v11805_v13 = vrot.slane %v2522_v15, 7  ;;  %v2525_v24 = vshll.u32 %v2352_v51, 16  ;;  %v2699_v50 = vpop.permute.xlu1 %2698 }
 0x2d5   : > { %v2904_v23 = vrot.slane %v11801_v54, 6  ;;  %v14743_v25 = vrot.slane %v11326_v44, 4  ;;  %v3212_v59 = vrot.slane %v3210_v41, 7  ;;  %3508 = vst.msk [vmem:[#allocation3 + $0x60] sm:$0xf] %vm433_vm2, %v3418_v12  ;;  %v14744_v37 = vrot.slane %v11599_v46, 6 }
 0x2d6   : > { %v11820_v42 = vld [vmem:[#allocation2 + $0x60] sm:$0xf]  ;;  %3330 = vst.msk [vmem:[#allocation3 + $0x5c] sm:$0xf] %vm1899_vm1, %v3260_v48  ;;  %v14745_v44 = vrot.slane %v11416_v0, 4  ;;  %v9499_v4 = vld [vmem:[%s14518_s3 + $0x90] sm:$0xff]  ;;  %v2033_v12 = vsel %vm10755_vm3, %v2031_v21, %v14610_v3  ;;  %2726 = vrot.lane.b32.xlu1 %v2659_v20, %s9731_s17 }
 0x2d7   : > { %v3174_v1 = vsel %vm10809_vm13, %v14743_v25, %v11416_v0  ;;  %v2897_v51 = vrot.slane %v14744_v37, 4  ;;  %v9476_v9 = vld [vmem:[#allocation3 + $0x1bc] sm:$0xf]  ;;  %v8826_v15 = vld [vmem:[#allocation3 + $0x1cc] sm:$0xf0]  ;;  %v2527_v0 = vor.u32 %v2525_v24, %v11805_v13  ;;  %v2906_v48 = vrot.slane %v2904_v23, 4  ;;  %4399 = vmatpush.bf16.msrb.mxu3 %v9499_v4 }
 0x2d8   : > { %v3184_v41 = vsel %vm10809_vm13, %v14745_v44, %v11559_v57  ;;  %v11828_v25 = vld [vmem:[#allocation2 + $0x4c] sm:$0xf]  ;;  %v11833_v46 = vld [vmem:[#allocation2 + $0x64] sm:$0xf]  ;;  %2769 = vst.msk [vmem:[#allocation3 + $0x30] sm:$0xf] %vm1899_vm1, %v2697_v58  ;;  %v8705_v37 = vor.u32 %v9448_v2, %v8704_v27  ;;  %v8829_v45 = vor.u32 %v9476_v9, %v8826_v15 }
 0x2d9   : > { %v8614_v44 = vld [vmem:[#allocation3 + $0x1c] sm:$0xf0]  ;;  %v2353_v21 = vld [vmem:[#allocation2 + $0x50] sm:$0xf]  ;;  %v3358_v3 = vld [vmem:[#allocation2 + $0x28] sm:$0xf]  ;;  %v2528_v27 = vsel %vm10827_vm7, %v2520_v18, %v2527_v0 }
 0x2da   : > { %v9498_v24 = vld [vmem:[%s14518_s3 + $0x88] sm:$0xff]  ;;  %3509 = vst.msk [vmem:[#allocation3 + $0x74] sm:$0xf] %vm433_vm2, %v3421_v40  ;;  %v2907_v20 = vrot.slane %v11820_v42, 6  ;;  %v14746_v7 = vrot.slane %v11553_v33, 5  ;;  %v2531_v2 = vshrl.u32 %v2353_v21, 16  ;;  %4281 = vmatmul.bf16.gmra.mxu1 %v8705_v37  ;;  %v2899_v40 = vsel %vm10861_vm5, %v2897_v51, %v2898_v35  ;;  %3285 = vrot.lane.b32.xlu0 %v3184_v41, %s9731_s17  ;;  %v2241_v37 = vpop.permute.xlu2 %2240 }
 0x2db   : > { %v9422_v58 = vld [vmem:[#allocation3 + $0xc] sm:$0xf]  ;;  %2095 = vst.msk [vmem:[#allocation3 + $0x158] sm:$0xf] %vm433_vm2, %v2033_v12  ;;  %v2529_v18 = vrot.slane %v11805_v13, 4  ;;  %v3423_v0 = vrot.slane %v3358_v3, 7  ;;  %v11881_v3 = vor.u32 %v3212_v59, %v11773_v34  ;;  %4384 = vmatmul.bf16.gmra.mxu3 %v8829_v45  ;;  %v3258_v34 = vpop.permute.xlu0 %3257 }
 0x2dc   : > { %v2022_v55 = vrot.slane %v14746_v7, 4  ;;  %2770 = vst.msk [vmem:[#allocation3 + $0x44] sm:$0xf] %vm1899_vm1, %v2699_v50  ;;  %v8617_v33 = vor.u32 %v9422_v58, %v8614_v44  ;;  %v2908_v9 = vsel %vm10861_vm5, %v2906_v48, %v2907_v20  ;;  %v11872_v15 = vrot.slane %v2531_v2, 7  ;;  %v11874_v12 = vld [vmem:[#allocation2 + $0x4c] sm:$0xf]  ;;  %3283 = vrot.lane.b32.xlu2 %v3174_v1, %s9731_s17  ;;  %4400 = vmatpush.bf16.msrb.mxu3 %v9498_v24 }
 0x2dd   : > { %v2534_v4 = vshll.u32 %v2353_v21, 16  ;;  %v3195_v61 = vrot.slane %v11846_v30, 4  ;;  %v2211_v35 = vrot.slane %v11828_v25, 7  ;;  %v3217_v13 = vshrl.u32 %v11833_v46, 16  ;;  %2634 = vst.msk [vmem:[#allocation3 + $0x15c] sm:$0xf] %vm433_vm2, %v2528_v27 }
 0x2de   : > { %4475 = vmatmul.bf16.vlgmr.msrb.gmra.mxu0 %v8617_v33  ;;  %2961 = vst.msk [vmem:[#allocation3 + $0x160] sm:$0xf] %vm433_vm2, %v2899_v40  ;;  %v11887_v1 = vld [vmem:[#allocation2 + $0x2c] sm:$0xf]  ;;  %v3422_v41 = vrot.slane %v3420_v19, 4  ;;  %v2035_v48 = vrot.slane %v11874_v12, 5 }
 0x2df   : > { %v2536_v51 = vor.u32 %v2534_v4, %v11872_v15  ;;  %v14747_v59 = vrot.slane %v11418_v56, 7  ;;  %v11899_v21 = vrot.slane %v2208_v39, 4  ;;  %2964 = vst.msk [vmem:[#allocation3 + $0x19c] sm:$0xf] %vm433_vm2, %v2908_v9  ;;  %v14748_v14 = vrot.slane %v11656_v17, 5  ;;  %v2235_v9 = vpop.permute.xlu1 %2234 }
 0x2e0   : > { %v3425_v27 = vrot.slane %v3423_v0, 4  ;;  %v2354_v7 = vld [vmem:[#allocation2 + $0x54] sm:$0xf]  ;;  %2312 = vst.msk [vmem:[#allocation3 + $0x40] sm:$0xf] %vm1899_vm1, %v2241_v37  ;;  %v3205_v56 = vrot.slane %v11850_v28, 4 }
 0x2e1   : > { %v2203_v44 = vsel %vm10695_vm15, %v11365_v43, %v14747_v59  ;;  %v2024_v19 = vsel %vm10755_vm3, %v2022_v55, %v14748_v14  ;;  %v9497_v43 = vld [vmem:[%s14518_s3 + $0x80] sm:$0xff]  ;;  %v3220_v2 = vshll.u32 %v11833_v46, 16  ;;  %v2537_v24 = vsel %vm10827_vm7, %v2529_v18, %v2536_v51  ;;  %3329 = vst.msk [vmem:[#allocation3 + $0x48] sm:$0xf] %vm1899_vm1, %v3258_v34  ;;  %v11919_v50 = vld [vmem:[#allocation2 + $0x50] sm:$0xf] }
 0x2e2   : > { %v2037_v17 = vrot.slane %v2035_v48, 4  ;;  %2262 = vrot.lane.b32.xlu1 %v2203_v44, %s9731_s17  ;;  %v3215_v55 = vrot.slane %v11881_v3, 4  ;;  %v3426_v45 = vrot.slane %v11887_v1, 7  ;;  %v2660_v58 = vld [vmem:[#allocation2 + $0x50] sm:$0xf]  ;;  %v11922_v40 = vrot.slane %v3217_v13, 6  ;;  %4401 = vmatpush.bf16.msrb.mxu3 %v9497_v43  ;;  %v3264_v43 = vpop.permute.xlu2 %3263 }
 0x2e3   : > { %2092 = vst.msk [vmem:[#allocation3 + $0x11c] sm:$0xf] %vm433_vm2, %v2024_v19  ;;  %v3424_v46 = vsel %vm10695_vm15, %v3422_v41, %v3423_v0  ;;  %v2540_v18 = vshrl.u32 %v2354_v7, 16  ;;  %v2903_v33 = vrot.slane %v2901_v60, 4  ;;  %v2538_v13 = vrot.slane %v11872_v15, 4  ;;  %2728 = vrot.lane.b32.xlu0 %v2660_v58, %s9731_s17 }
 0x2e4   : > { %2635 = vst.msk [vmem:[#allocation3 + $0x170] sm:$0xf] %vm433_vm2, %v2537_v24  ;;  %v3427_v4 = vsel %vm10695_vm15, %v3425_v27, %v3426_v45  ;;  %v2543_v51 = vshll.u32 %v2354_v7, 16  ;;  %v11935_v37 = vld [vmem:[#allocation2 + $0x64] sm:$0xf]  ;;  %v14749_v0 = vrot.slane %v11438_v38, 7  ;;  %v2701_v24 = vpop.permute.xlu0 %2700  ;;  %v3214_v12 = vsel %vm10809_vm13, %v3205_v56, %v11881_v3 }
 0x2e5   : > { %2309 = vst.msk [vmem:[#allocation3 + $0x4] sm:$0xf] %vm1899_vm1, %v2235_v9  ;;  %v14750_v60 = vrot.slane %v10804_v10, 5  ;;  %v11947_v34 = vrot.slane %v2540_v18, 7  ;;  %v11949_v59 = vld [vmem:[#allocation2 + $0x68] sm:$0xf]  ;;  %v2905_v58 = vsel %vm10861_vm5, %v2903_v33, %v2904_v23 }
 0x2e6   : > { %v2206_v52 = vsel %vm10695_vm15, %v11530_v63, %v14749_v0  ;;  %v2910_v15 = vrot.slane %v11935_v37, 6  ;;  %v11954_v38 = vrot.slane %v3220_v2, 7  ;;  %v9513_v63 = vld [vmem:[%s14518_s3 + $0x100] sm:$0xff]  ;;  %3510 = vst.msk [vmem:[#allocation3 + $0x88] sm:$0xf] %vm433_vm2, %v3424_v46  ;;  %v2214_v19 = vrot.slane %v11919_v50, 7 }
 0x2e7   : > { %v2039_v41 = vsel %vm10755_vm3, %v2037_v17, %v14750_v60  ;;  %2264 = vrot.lane.b32.xlu2 %v2206_v52, %s9731_s17  ;;  %v2355_v10 = vld [vmem:[#allocation2 + $0x58] sm:$0xf]  ;;  %v2661_v44 = vld [vmem:[#allocation2 + $0x54] sm:$0xf]  ;;  %3511 = vst.msk [vmem:[#allocation3 + $0x9c] sm:$0xf] %vm433_vm2, %v3427_v4  ;;  %v2545_v27 = vor.u32 %v2543_v51, %v11947_v34  ;;  %v3872_v17 = vunpack.c.h.b16 %v11504_v8  ;;  %4547 = vmatpush.bf16.msrb.mxu1 %v9513_v63 }
 0x2e8   : > { %v9453_v14 = vld [vmem:[#allocation3 + $0x100] sm:$0xf0]  ;;  %v2549_v7 = vshrl.u32 %v2355_v10, 16  ;;  %v8724_v2 = vld [vmem:[#allocation3 + $0xf0] sm:$0xf]  ;;  %v2912_v46 = vrot.slane %v2910_v15, 4 }
 0x2e9   : > { %2097 = vst.msk [vmem:[#allocation3 + $0x180] sm:$0xf] %vm433_vm2, %v2039_v41  ;;  %v14751_v18 = vrot.slane %v11676_v6, 5  ;;  %v2546_v4 = vsel %vm10827_vm7, %v2538_v13, %v2545_v27  ;;  %v2913_v8 = vrot.slane %v11949_v59, 6  ;;  %v2552_v0 = vshll.u32 %v2355_v10, 16 }
 0x2ea   : > { %3332 = vst.msk [vmem:[#allocation3 + $0x84] sm:$0xf] %vm1899_vm1, %v3264_v43  ;;  %v11977_v51 = vrot.slane %v2549_v7, 7  ;;  %2730 = vrot.lane.b32.xlu1 %v2661_v44, %s9731_s17  ;;  %v8725_v54 = vor.u32 %v9453_v14, %v8724_v2  ;;  %v8606_v23 = vld [vmem:[#allocation3 + $0x14] sm:$0xf0]  ;;  %v14752_v6 = vrot.slane %v11559_v57, 4  ;;  %v3204_v13 = vsel %vm10809_vm13, %v3195_v61, %v11850_v28  ;;  %v2703_v44 = vpop.permute.xlu1 %2702  ;;  %v2245_v1 = vpop.permute.xlu2 %2244 }
 0x2eb   : > { %v2028_v9 = vrot.slane %v14751_v18, 4  ;;  %2771 = vst.msk [vmem:[#allocation3 + $0x58] sm:$0xf] %vm1899_vm1, %v2701_v24  ;;  %v8634_v33 = vld [vmem:[#allocation3 + $0x44] sm:$0xf0]  ;;  %v11993_v41 = vrot.slane %v2211_v35, 4  ;;  %v3937_v43 = vpack.c.b16 %v3872_v17, %v3872_v17  ;;  %3289 = vrot.lane.b32.xlu0 %v3204_v13, %s9731_s17 }
 0x2ec   : > { %v3360_v52 = vld [vmem:[#allocation2 + $0x30] sm:$0xf]  ;;  %v3194_v60 = vsel %vm10809_vm13, %v14752_v6, %v11846_v30  ;;  %2636 = vst.msk [vmem:[#allocation3 + $0x184] sm:$0xf] %vm433_vm2, %v2546_v4  ;;  %v2356_v10 = vld [vmem:[#allocation2 + $0x5c] sm:$0xf]  ;;  %4286 = vmatmul.bf16.gmra.mxu1 %v8725_v54  ;;  %v2914_v30 = vsel %vm10861_vm5, %v2912_v46, %v2913_v8  ;;  %v2554_v14 = vor.u32 %v2552_v0, %v11977_v51 }
 0x2ed   : > { %v3429_v63 = vrot.slane %v3360_v52, 7  ;;  %v9421_v57 = vld [vmem:[#allocation3 + $0x4] sm:$0xf]  ;;  %2963 = vst.msk [vmem:[#allocation3 + $0x188] sm:$0xf] %vm433_vm2, %v2905_v58  ;;  %v2547_v61 = vrot.slane %v11947_v34, 4  ;;  %4389 = vmatmul.bf16.gmra.mxu3 %v3937_v43 }
 0x2ee   : > { %v2558_v27 = vshrl.u32 %v2356_v10, 16  ;;  %2772 = vst.msk [vmem:[#allocation3 + $0x6c] sm:$0xf] %vm1899_vm1, %v2703_v44  ;;  %v8609_v7 = vor.u32 %v9421_v57, %v8606_v23  ;;  %v9427_v24 = vld [vmem:[#allocation3 + $0x34] sm:$0xf]  ;;  %v14753_v2 = vrot.slane %v11768_v22, 5 }
 0x2ef   : > { %v3428_v18 = vrot.slane %v3426_v45, 4  ;;  %3287 = vrot.lane.b32.xlu2 %v3194_v60, %s9731_s17  ;;  %v8637_v34 = vor.u32 %v9427_v24, %v8634_v33  ;;  %v12012_v46 = vld [vmem:[#allocation2 + $0x68] sm:$0xf]  ;;  %v12014_v4 = vld [vmem:[#allocation2 + $0x6c] sm:$0xf]  ;;  %v3431_v22 = vrot.slane %v3429_v63, 4  ;;  %v3262_v45 = vpop.permute.xlu0 %3261  ;;  %v2555_v54 = vsel %vm10827_vm7, %v2547_v61, %v2554_v14 }
 0x2f0   : > { %v2030_v58 = vsel %vm10755_vm3, %v2028_v9, %v14753_v2  ;;  %v3361_v0 = vld [vmem:[#allocation2 + $0x34] sm:$0xf]  ;;  %4329 = vmatmul.bf16.vlgmr.msra.gmra.mxu2 %v8609_v7  ;;  %2966 = vst.msk [vmem:[#allocation3 + $0x1c4] sm:$0xf] %vm433_vm2, %v2914_v30  ;;  %v2556_v17 = vrot.slane %v11977_v51, 4  ;;  %v2560_v23 = vrot.slane %v2558_v27, 7  ;;  %v2209_v51 = vsel %vm10695_vm15, %v11642_v36, %v2208_v39 }
 0x2f1   : > { %v2357_v9 = vld [vmem:[#allocation2 + $0x60] sm:$0xf]  ;;  %4480 = vmatmul.bf16.gmra.mxu0 %v8637_v34  ;;  %2094 = vst.msk [vmem:[#allocation3 + $0x144] sm:$0xf] %vm433_vm2, %v2030_v58  ;;  %v2561_v33 = vshll.u32 %v2356_v10, 16  ;;  %v3430_v6 = vsel %vm10695_vm15, %v3428_v18, %v3429_v63  ;;  %v3432_v60 = vrot.slane %v3361_v0, 7  ;;  %v2212_v61 = vsel %vm10695_vm15, %v11899_v21, %v2211_v35 }
 0x2f2   : > { %v2567_v52 = vshrl.u32 %v2357_v9, 16  ;;  %2314 = vst.msk [vmem:[#allocation3 + $0x68] sm:$0xf] %vm1899_vm1, %v2245_v1  ;;  %v2909_v13 = vrot.slane %v2907_v20, 4  ;;  %v12031_v44 = vld [vmem:[#allocation2 + $0x38] sm:$0xf]  ;;  %2266 = vrot.lane.b32.xlu1 %v2209_v51, %s9731_s17  ;;  %v2239_v14 = vpop.permute.xlu1 %2238  ;;  %v3268_v1 = vpop.permute.xlu2 %3267 }
 0x2f3   : > { %3331 = vst.msk [vmem:[#allocation3 + $0x70] sm:$0xf] %vm1899_vm1, %v3262_v45  ;;  %v12037_v29 = vrot.slane %v2214_v19, 4  ;;  %v3227_v10 = vshrl.u32 %v12012_v46, 16  ;;  %v2563_v36 = vor.u32 %v2561_v33, %v2560_v23  ;;  %v2662_v63 = vld [vmem:[#allocation2 + $0x58] sm:$0xf]  ;;  %v3433_v20 = vsel %vm10695_vm15, %v3431_v22, %v3432_v60 }
 0x2f4   : > { %v12040_v39 = vrot.slane %v2567_v52, 7  ;;  %v3230_v57 = vshll.u32 %v12012_v46, 16  ;;  %v3237_v42 = vshrl.u32 %v12014_v4, 16  ;;  %2637 = vst.msk [vmem:[#allocation3 + $0x198] sm:$0xf] %vm433_vm2, %v2555_v54  ;;  %v2570_v30 = vshll.u32 %v2357_v9, 16  ;;  %2732 = vrot.lane.b32.xlu0 %v2662_v63, %s9731_s17 }
 0x2f5   : > { %3512 = vst.msk [vmem:[#allocation3 + $0xb0] sm:$0xf] %vm433_vm2, %v3430_v6  ;;  %v2564_v27 = vsel %vm10827_vm7, %v2556_v17, %v2563_v36  ;;  %v14754_v7 = vrot.slane %v11780_v26, 5  ;;  %v3435_v24 = vrot.slane %v12031_v44, 7  ;;  %v2358_v2 = vld [vmem:[#allocation2 + $0x64] sm:$0xf]  ;;  %v2911_v25 = vsel %vm10861_vm5, %v2909_v13, %v2910_v15 }
 0x2f6   : > { %2311 = vst.msk [vmem:[#allocation3 + $0x2c] sm:$0xf] %vm1899_vm1, %v2239_v14  ;;  %v9458_v58 = vld [vmem:[#allocation3 + $0x128] sm:$0xf0]  ;;  %v2565_v35 = vrot.slane %v2560_v23, 4  ;;  %v2572_v21 = vor.u32 %v2570_v30, %v12040_v39  ;;  %v2576_v34 = vshrl.u32 %v2358_v2, 16  ;;  %v12076_v23 = vor.u32 %v11954_v38, %v11922_v40 }
 0x2f7   : > { %v2034_v43 = vrot.slane %v14754_v7, 4  ;;  %v12064_v18 = vld [vmem:[#allocation2 + $0x3c] sm:$0xf]  ;;  %2268 = vrot.lane.b32.xlu2 %v2212_v61, %s9731_s17  ;;  %3513 = vst.msk [vmem:[#allocation3 + $0xc4] sm:$0xf] %vm433_vm2, %v3433_v20  ;;  %v3434_v26 = vrot.slane %v3432_v60, 4  ;;  %v2705_v45 = vpop.permute.xlu0 %2704  ;;  %v2215_v46 = vsel %vm10695_vm15, %v11993_v41, %v2214_v19 }
 0x2f8   : > { %v2579_v0 = vshll.u32 %v2358_v2, 16  ;;  %v2359_v22 = vld [vmem:[#allocation2 + $0x68] sm:$0x3]  ;;  %v2663_v17 = vld [vmem:[#allocation2 + $0x5c] sm:$0xf]  ;;  %v12070_v37 = vrot.slane %v2576_v34, 7  ;;  %v2573_v13 = vsel %vm10827_vm7, %v2565_v35, %v2572_v21  ;;  %v3224_v59 = vsel %vm10809_vm13, %v3215_v55, %v12076_v23 }
 0x2f9   : > { %2638 = vst.msk [vmem:[#allocation3 + $0x1ac] sm:$0xf] %vm433_vm2, %v2564_v27  ;;  %v12072_v15 = vld [vmem:[#allocation2 + $0x6c] sm:$0xf]  ;;  %v2585_v9 = vshrl.u32 %v2359_v22, 16  ;;  %v2036_v33 = vsel %vm10755_vm3, %v2034_v43, %v2035_v48  ;;  %v3437_v52 = vrot.slane %v3435_v24, 4  ;;  %v3436_v28 = vsel %vm10695_vm15, %v3434_v26, %v3435_v24 }
 0x2fa   : > { %v8744_v54 = vld [vmem:[#allocation3 + $0x118] sm:$0xf]  ;;  %2965 = vst.msk [vmem:[#allocation3 + $0x1b0] sm:$0xf] %vm433_vm2, %v2911_v25  ;;  %v2574_v51 = vrot.slane %v12040_v39, 4  ;;  %v2581_v40 = vor.u32 %v2579_v0, %v12070_v37  ;;  %v2915_v38 = vrot.slane %v2913_v8, 4  ;;  %2734 = vrot.lane.b32.xlu1 %v2663_v17, %s9731_s17  ;;  %v2707_v61 = vpop.permute.xlu1 %2706  ;;  %v2249_v17 = vpop.permute.xlu2 %2248 }
 0x2fb   : > { %3334 = vst.msk [vmem:[#allocation3 + $0xac] sm:$0xf] %vm1899_vm1, %v3268_v1  ;;  %v8612_v6 = vld [vmem:[#allocation3 + $0x8] sm:$0xf]  ;;  %v9424_v60 = vld [vmem:[#allocation3 + $0x18] sm:$0xf0]  ;;  %v8745_v48 = vor.u32 %v9458_v58, %v8744_v54 }
 0x2fc   : > { %v2587_v44 = vrot.slane %v2585_v9, 7  ;;  %2773 = vst.msk [vmem:[#allocation3 + $0x80] sm:$0xf] %vm1899_vm1, %v2705_v45  ;;  %v8626_v36 = vld [vmem:[#allocation3 + $0x3c] sm:$0xf0]  ;;  %v3438_v63 = vrot.slane %v12064_v18, 7  ;;  %v8613_v27 = vor.u32 %v9424_v60, %v8612_v6  ;;  %v2582_v55 = vsel %vm10827_vm7, %v2574_v51, %v2581_v40  ;;  %3293 = vrot.lane.b32.xlu0 %v3224_v59, %s9731_s17 }
 0x2fd   : > { %v8654_v39 = vld [vmem:[#allocation3 + $0x6c] sm:$0xf0]  ;;  %v2916_v20 = vrot.slane %v12072_v15, 6  ;;  %2096 = vst.msk [vmem:[#allocation3 + $0x16c] sm:$0xf] %vm433_vm2, %v2036_v33  ;;  %v2583_v56 = vrot.slane %v12070_v37, 4  ;;  %4291 = vmatmul.bf16.gmra.mxu1 %v8745_v48 }
 0x2fe   : > { %v2588_v8 = vshll.u32 %v2359_v22, 16  ;;  %v3364_v30 = vld [vmem:[#allocation2 + $0x40] sm:$0xf]  ;;  %2639 = vst.msk [vmem:[#allocation3 + $0x1c0] sm:$0xf] %vm433_vm2, %v2573_v13  ;;  %v3439_v3 = vsel %vm10695_vm15, %v3437_v52, %v3438_v63  ;;  %4402 = vmatmul.bf16.vlgmr.msrb.gmra.mxu3 %v8613_v27  ;;  %v3229_v34 = vrot.slane %v3227_v10, 6 }
 0x2ff   : > { %v9426_v14 = vld [vmem:[#allocation3 + $0x2c] sm:$0xf]  ;;  %v3365_v7 = vld [vmem:[#allocation2 + $0x44] sm:$0xf]  ;;  %2774 = vst.msk [vmem:[#allocation3 + $0x94] sm:$0xf] %vm1899_vm1, %v2707_v61  ;;  %3291 = vrot.lane.b32.xlu2 %v3214_v12, %s9731_s17  ;;  %v3266_v37 = vpop.permute.xlu0 %3265  ;;  %v2917_v9 = vsel %vm10861_vm5, %v2915_v38, %v2916_v20 }
 0x300   : > { %v8629_v43 = vor.u32 %v9426_v14, %v8626_v36  ;;  %v9432_v24 = vld [vmem:[#allocation3 + $0x5c] sm:$0xf]  ;;  %v2590_v2 = vor.u32 %v2588_v8, %v2587_v44  ;;  %v3441_v58 = vrot.slane %v3364_v30, 7  ;;  %v3444_v25 = vrot.slane %v3365_v7, 7  ;;  %3514 = vst.msk [vmem:[#allocation3 + $0xd8] sm:$0xf] %vm433_vm2, %v3436_v28 }
 0x301   : > { %v8657_v35 = vor.u32 %v9432_v24, %v8654_v39  ;;  %v3366_v21 = vld [vmem:[#allocation2 + $0x48] sm:$0xf]  ;;  %v3367_v18 = vld [vmem:[#allocation2 + $0x4c] sm:$0xf]  ;;  %v3232_v26 = vrot.slane %v3230_v57, 7  ;;  %v3240_v0 = vshll.u32 %v12014_v4, 16 }
 0x302   : > { %4334 = vmatmul.bf16.gmra.mxu2 %v8629_v43  ;;  %3515 = vst.msk [vmem:[#allocation3 + $0xec] sm:$0xf] %vm433_vm2, %v3439_v3  ;;  %v3440_v22 = vrot.slane %v3438_v63, 4  ;;  %v3443_v1 = vrot.slane %v3441_v58, 4  ;;  %v3447_v10 = vrot.slane %v3366_v21, 7  ;;  %v2591_v57 = vsel %vm10827_vm7, %v2583_v56, %v2590_v2  ;;  %2270 = vrot.lane.b32.xlu1 %v2215_v46, %s9731_s17  ;;  %v2243_v38 = vpop.permute.xlu1 %2242  ;;  %v3272_v30 = vpop.permute.xlu2 %3271 }
 0x303   : > { %4485 = vmatmul.bf16.gmra.mxu0 %v8657_v35  ;;  %2640 = vst.msk [vmem:[#allocation3 + $0x1d4] sm:$0xf] %vm433_vm2, %v2582_v55  ;;  %v3368_v45 = vld [vmem:[#allocation2 + $0x50] sm:$0xf]  ;;  %v3446_v54 = vrot.slane %v3444_v25, 4  ;;  %v3450_v33 = vrot.slane %v3367_v18, 7  ;;  %v3233_v6 = vor.u32 %v3232_v26, %v3229_v34  ;;  %v12165_v43 = vpop.f32.mrf.mxu1 }
 0x304   : > { %2316 = vst.msk [vmem:[#allocation3 + $0x90] sm:$0xf] %vm1899_vm1, %v2249_v17  ;;  %v3239_v52 = vrot.slane %v3237_v42, 6  ;;  %v2664_v51 = vld [vmem:[#allocation2 + $0x60] sm:$0xf]  ;;  %v3242_v60 = vrot.slane %v3240_v0, 7  ;;  %v3442_v50 = vsel %vm10695_vm15, %v3440_v22, %v3441_v58  ;;  %v3445_v4 = vsel %vm10695_vm15, %v3443_v1, %v3444_v25 }
 0x305   : > { %3333 = vst.msk [vmem:[#allocation3 + $0x98] sm:$0xf] %vm1899_vm1, %v3266_v37  ;;  %v3369_v19 = vld [vmem:[#allocation2 + $0x54] sm:$0xf]  ;;  %v3453_v41 = vrot.slane %v3368_v45, 7  ;;  %v14755_v13 = vrot.slane %v10688_v31, 7  ;;  %v3448_v31 = vsel %vm10695_vm15, %v3446_v54, %v3447_v10  ;;  %2736 = vrot.lane.b32.xlu0 %v2664_v51, %s9731_s17 }
 0x306   : > { %2967 = vst.msk [vmem:[#allocation3 + $0x1d8] sm:$0xf] %vm433_vm2, %v2917_v9  ;;  %v3449_v42 = vrot.slane %v3447_v10, 4  ;;  %v3456_v44 = vrot.slane %v3369_v19, 7  ;;  %v3370_v12 = vld [vmem:[#allocation2 + $0x58] sm:$0xf]  ;;  %v12159_v14 = vor.u32 %v3242_v60, %v3239_v52 }
 0x307   : > { %v2218_v40 = vsel %vm10695_vm15, %v12037_v29, %v14755_v13  ;;  %2641 = vst.msk [vmem:[#allocation3 + $0x1e8] sm:$0x3] %vm1493_vm6, %v2591_v57  ;;  %v3225_v48 = vrot.slane %v12076_v23, 4  ;;  %v3452_v36 = vrot.slane %v3450_v33, 4  ;;  %v3459_v39 = vrot.slane %v3370_v12, 7  ;;  %v2709_v61 = vpop.permute.xlu0 %2708 }
 0x308   : > { %2313 = vst.msk [vmem:[#allocation3 + $0x54] sm:$0xf] %vm1899_vm1, %v2243_v38  ;;  %2272 = vrot.lane.b32.xlu2 %v2218_v40, %s9731_s17  ;;  %v8764_v29 = vld [vmem:[#allocation3 + $0x140] sm:$0xf]  ;;  %v3371_v63 = vld [vmem:[#allocation2 + $0x5c] sm:$0xf]  ;;  %v3451_v3 = vsel %vm10695_vm15, %v3449_v42, %v3450_v33 }
 0x309   : > { %3516 = vst.msk [vmem:[#allocation3 + $0x100] sm:$0xf] %vm433_vm2, %v3442_v50  ;;  %v2665_v59 = vld [vmem:[#allocation2 + $0x64] sm:$0xf]  ;;  %v9463_v28 = vld [vmem:[#allocation3 + $0x150] sm:$0xf0]  ;;  %v3454_v24 = vsel %vm10695_vm15, %v3452_v36, %v3453_v41  ;;  %v3234_v9 = vsel %vm10809_vm13, %v3225_v48, %v3233_v6 }
 0x30a   : > { %v3235_v56 = vrot.slane %v3233_v6, 4  ;;  %3517 = vst.msk [vmem:[#allocation3 + $0x114] sm:$0xf] %vm433_vm2, %v3445_v4  ;;  %v3455_v8 = vrot.slane %v3453_v41, 4  ;;  %v3372_v23 = vld [vmem:[#allocation2 + $0x60] sm:$0xf]  ;;  %2738 = vrot.lane.b32.xlu1 %v2665_v59, %s9731_s17  ;;  %v8765_v35 = vor.u32 %v9463_v28, %v8764_v29  ;;  %v2711_v1 = vpop.permute.xlu1 %2710  ;;  %v2253_v38 = vpop.permute.xlu2 %2252 }
 0x30b   : > { %v9429_v27 = vld [vmem:[#allocation3 + $0x40] sm:$0xf0]  ;;  %3518 = vst.msk [vmem:[#allocation3 + $0x128] sm:$0xf] %vm433_vm2, %v3448_v31  ;;  %v3458_v55 = vrot.slane %v3456_v44, 4  ;;  %v3462_v7 = vrot.slane %v3371_v63, 7 }
 0x30c   : > { %3336 = vst.msk [vmem:[#allocation3 + $0xd4] sm:$0xf] %vm1899_vm1, %v3272_v30  ;;  %v3461_v2 = vrot.slane %v3459_v39, 4  ;;  %v3373_v58 = vld [vmem:[#allocation2 + $0x64] sm:$0xf]  ;;  %v3465_v25 = vrot.slane %v3372_v23, 7  ;;  %v3457_v22 = vsel %vm10695_vm15, %v3455_v8, %v3456_v44  ;;  %v3244_v10 = vsel %vm10809_vm13, %v3235_v56, %v12159_v14  ;;  %v12196_v44 = vpop.f32.mrf.mxu1 }
 0x30d   : > { %2775 = vst.msk [vmem:[#allocation3 + $0xa8] sm:$0xf] %vm1899_vm1, %v2709_v61  ;;  %v8646_v21 = vld [vmem:[#allocation3 + $0x64] sm:$0xf0]  ;;  %v8632_v18 = vld [vmem:[#allocation3 + $0x30] sm:$0xf]  ;;  %4296 = vmatmul.bf16.gmra.mxu1 %v8765_v35  ;;  %v3460_v46 = vsel %vm10695_vm15, %v3458_v55, %v3459_v39  ;;  %3297 = vrot.lane.b32.xlu0 %v3244_v10, %s9731_s17 }
 0x30e   : > { %v8674_v34 = vld [vmem:[#allocation3 + $0x94] sm:$0xf0]  ;;  %v2994_v26 = vld [vmem:[#allocation2 + $0x70] sm:$0x1]  ;;  %3519 = vst.msk [vmem:[#allocation3 + $0x13c] sm:$0xf] %vm433_vm2, %v3451_v3  ;;  %v8633_v33 = vor.u32 %v9429_v27, %v8632_v18  ;;  %v3463_v51 = vsel %vm10695_vm15, %v3461_v2, %v3462_v7 }
 0x30f   : > { %v3247_v0 = vshll.u32 %v2994_v26, 16  ;;  %v3464_v17 = vrot.slane %v3462_v7, 4  ;;  %v3468_v37 = vrot.slane %v3373_v58, 7  ;;  %v9431_v45 = vld [vmem:[#allocation3 + $0x54] sm:$0xf]  ;;  %v3467_v6 = vrot.slane %v3465_v25, 4  ;;  %v3270_v4 = vpop.permute.xlu0 %3269 }
 0x310   : > { %3520 = vst.msk [vmem:[#allocation3 + $0x150] sm:$0xf] %vm433_vm2, %v3454_v24  ;;  %v3374_v57 = vld [vmem:[#allocation2 + $0x68] sm:$0xf]  ;;  %v8649_v54 = vor.u32 %v9431_v45, %v8646_v21  ;;  %v9437_v52 = vld [vmem:[#allocation3 + $0x84] sm:$0xf]  ;;  %3295 = vrot.lane.b32.xlu2 %v3234_v9, %s9731_s17  ;;  %4407 = vmatmul.bf16.gmra.mxu3 %v8633_v33 }
 0x311   : > { %2776 = vst.msk [vmem:[#allocation3 + $0xbc] sm:$0xf] %vm1899_vm1, %v2711_v1  ;;  %v8677_v60 = vor.u32 %v9437_v52, %v8674_v34  ;;  %v12188_v50 = vld [vmem:[#allocation2 + $0x6c] sm:$0xf]  ;;  %v3245_v19 = vrot.slane %v12159_v14, 4  ;;  %v3249_v41 = vrot.slane %v3247_v0, 7  ;;  %v3466_v42 = vsel %vm10695_vm15, %v3464_v17, %v3465_v25 }
 0x312   : > { %3521 = vst.msk [vmem:[#allocation3 + $0x164] sm:$0xf] %vm433_vm2, %v3457_v22  ;;  %4339 = vmatmul.bf16.gmra.mxu2 %v8649_v54  ;;  %v3470_v13 = vrot.slane %v3468_v37, 4  ;;  %v3471_v40 = vrot.slane %v3374_v57, 7  ;;  %v2666_v12 = vld [vmem:[#allocation2 + $0x68] sm:$0x3]  ;;  %v3469_v48 = vsel %vm10695_vm15, %v3467_v6, %v3468_v37  ;;  %v2247_v63 = vpop.permute.xlu1 %2246  ;;  %v3276_v56 = vpop.permute.xlu2 %3275 }
 0x313   : > { %3522 = vst.msk [vmem:[#allocation3 + $0x178] sm:$0xf] %vm433_vm2, %v3460_v46  ;;  %4490 = vmatmul.bf16.gmra.mxu0 %v8677_v60  ;;  %v14611_v31 = vrot.slane %v12188_v50, 7  ;;  %2740 = vrot.lane.b32.xlu1 %v2666_v12, %s9731_s17  ;;  %v3250_v36 = vsel %vm10809_vm13, %v3245_v19, %v3249_v41  ;;  %v9468_v28 = vld [vmem:[#allocation3 + $0x178] sm:$0xf0] }
 0x314   : > { %3523 = vst.msk [vmem:[#allocation3 + $0x18c] sm:$0xf] %vm433_vm2, %v3463_v51  ;;  %v3472_v39 = vsel %vm10695_vm15, %v3470_v13, %v3471_v40  ;;  %v3473_v29 = vrot.slane %v3471_v40, 4  ;;  %v12218_v23 = vpop.f32.mrf.mxu1  ;;  %v8784_v30 = vld [vmem:[#allocation3 + $0x168] sm:$0xf] }
 0x315   : > { %2318 = vst.msk [vmem:[#allocation3 + $0xb8] sm:$0xf] %vm1899_vm1, %v2253_v38  ;;  %v8785_v61 = vor.u32 %v9468_v28, %v8784_v30  ;;  %v9434_v14 = vld [vmem:[#allocation3 + $0x68] sm:$0xf0]  ;;  %v8666_v7 = vld [vmem:[#allocation3 + $0x8c] sm:$0xf0] }
 0x316   : > { %3335 = vst.msk [vmem:[#allocation3 + $0xc0] sm:$0xf] %vm1899_vm1, %v3270_v4  ;;  %v3475_v59 = vsel %vm10695_vm15, %v3473_v29, %v14611_v31  ;;  %v8652_v24 = vld [vmem:[#allocation3 + $0x58] sm:$0xf]  ;;  %v9442_v25 = vld [vmem:[#allocation3 + $0xac] sm:$0xf] }
 0x317   : > { %3524 = vst.msk [vmem:[#allocation3 + $0x1a0] sm:$0xf] %vm433_vm2, %v3466_v42  ;;  %v2713_v8 = vpop.permute.xlu0 %2712  ;;  %v8653_v58 = vor.u32 %v9434_v14, %v8652_v24  ;;  %v9425_v22 = vld [vmem:[#allocation3 + $0x20] sm:$0xf0]  ;;  %v8620_v1 = vld [vmem:[#allocation3 + $0x10] sm:$0xf] }
 0x318   : > { %3525 = vst.msk [vmem:[#allocation3 + $0x1b4] sm:$0xf] %vm433_vm2, %v3469_v48  ;;  %3299 = vrot.lane.b32.xlu2 %v3250_v36, %s9731_s17  ;;  %v8621_v45 = vor.u32 %v9425_v22, %v8620_v1  ;;  %v9439_v46 = vld [vmem:[#allocation3 + $0x90] sm:$0xf0]  ;;  %v8672_v51 = vld [vmem:[#allocation3 + $0x80] sm:$0xf] }
 0x319   : > { %2315 = vst.msk [vmem:[#allocation3 + $0x7c] sm:$0xf] %vm1899_vm1, %v2247_v63  ;;  %v12226_v26 = vpop.f32.mrf.mxu3  ;;  %v8673_v60 = vor.u32 %v9439_v46, %v8672_v51  ;;  %v9447_v19 = vld [vmem:[#allocation3 + $0xd4] sm:$0xf]  ;;  %v8640_v12 = vld [vmem:[#allocation3 + $0x38] sm:$0xf] }
 0x31a   : > { %3526 = vst.msk [vmem:[#allocation3 + $0x1c8] sm:$0xf] %vm433_vm2, %v3472_v39  ;;  %v2715_v3 = vpop.permute.xlu1 %2714  ;;  %v2257_v21 = vpop.permute.xlu2 %2256  ;;  %v9430_v48 = vld [vmem:[#allocation3 + $0x48] sm:$0xf0]  ;;  %v9444_v28 = vld [vmem:[#allocation3 + $0xb8] sm:$0xf0] }
 0x31b   : > { %3527 = vst.msk [vmem:[#allocation3 + $0x1dc] sm:$0xf] %vm433_vm2, %v3475_v59  ;;  %v8641_v59 = vor.u32 %v9430_v48, %v8640_v12  ;;  %v8692_v14 = vld [vmem:[#allocation3 + $0xa8] sm:$0xf] }
 0x31c   : > { %3338 = vst.msk [vmem:[#allocation3 + $0xfc] sm:$0xf] %vm1899_vm1, %v3276_v56  ;;  %v12223_v34 = vpop.f32.mrf.mxu1  ;;  %v8686_v52 = vld [vmem:[#allocation3 + $0xb4] sm:$0xf0] }
 0x31d   : > { %2777 = vst.msk [vmem:[#allocation3 + $0xd0] sm:$0xf] %vm1899_vm1, %v2713_v8  ;;  %v8694_v27 = vld [vmem:[#allocation3 + $0xbc] sm:$0xf0]  ;;  %4301 = vmatmul.bf16.gmra.mxu1 %v8785_v61 }
 0x31e   : > { %2778 = vst.msk [vmem:[#allocation3 + $0xe4] sm:$0xf] %vm1899_vm1, %v2715_v3  ;;  %v8697_v35 = vor.u32 %v9442_v25, %v8694_v27  ;;  %v8693_v3 = vor.u32 %v9444_v28, %v8692_v14 }
 0x31f   : > { %v3274_v18 = vpop.permute.xlu0 %3273  ;;  %2320 = vst.msk [vmem:[#allocation3 + $0xe0] sm:$0xf] %vm1899_vm1, %v2257_v21  ;;  %v8660_v21 = vld [vmem:[#allocation3 + $0x60] sm:$0xf] }
 0x320   : > { %v9436_v55 = vld [vmem:[#allocation3 + $0x7c] sm:$0xf]  ;;  %4412 = vmatmul.bf16.gmra.mxu3 %v8653_v58  ;;  %3337 = vst.msk [vmem:[#allocation3 + $0xe8] sm:$0xf] %vm1899_vm1, %v3274_v18  ;;  %v9435_v18 = vld [vmem:[#allocation3 + $0x70] sm:$0xf0] }
 0x321   : > { %v8669_v2 = vor.u32 %v9436_v55, %v8666_v7  ;;  %v12233_v10 = vpop.f32.mrf.mxu3  ;;  %v8661_v1 = vor.u32 %v9435_v18, %v8660_v21 }
 0x322   : > { %v2251_v0 = vpop.permute.xlu1 %2250 }
 0x323   : > { %4344 = vmatmul.bf16.gmra.mxu2 %v8669_v2  ;;  %4495 = vmatmul.bf16.gmra.mxu0 %v8697_v35  ;;  %2317 = vst.msk [vmem:[#allocation3 + $0xa4] sm:$0xf] %vm1899_vm1, %v2251_v0  ;;  %v3280_v17 = vpop.permute.xlu2 %3279  ;;  %v9452_v55 = vld [vmem:[#allocation3 + $0xfc] sm:$0xf] }
 0x324   : > { %3340 = vst.msk [vmem:[#allocation3 + $0x124] sm:$0xf] %vm1899_vm1, %v3280_v17  ;;  %v12230_v9 = vpop.f32.mrf.mxu1 }
 0x326   : > { %v8706_v61 = vld [vmem:[#allocation3 + $0xdc] sm:$0xf0] }
 0x327   : > { %v2717_v37 = vpop.permute.xlu0 %2716  ;;  %v8714_v57 = vld [vmem:[#allocation3 + $0xe4] sm:$0xf0] }
 0x328   : > { %2779 = vst.msk [vmem:[#allocation3 + $0xf8] sm:$0xf] %vm1899_vm1, %v2717_v37  ;;  %v8717_v41 = vor.u32 %v9447_v19, %v8714_v57 }
 0x329   : > { %v12241_v4 = vpop.f32.mrf.mxu3 }
 0x32a   : > { %v2719_v54 = vpop.permute.xlu1 %2718  ;;  %v9441_v33 = vld [vmem:[#allocation3 + $0xa4] sm:$0xf] }
 0x32b   : > { %2780 = vst.msk [vmem:[#allocation3 + $0x10c] sm:$0xf] %vm1899_vm1, %v2719_v54  ;;  %v8689_v6 = vor.u32 %v9441_v33, %v8686_v52  ;;  %v8712_v52 = vld [vmem:[#allocation3 + $0xd0] sm:$0xf] }
 0x32c   : > { %v12238_v38 = vpop.f32.mrf.mxu1 }
 0x32d   : > { %8986 = vmatmul.msk.bf16.vlgmr.msrb.gmra.mxu1 %vm854_vm10, %v8621_v45  ;;  %v9449_v45 = vld [vmem:[#allocation3 + $0xe0] sm:$0xf0] }
 0x32e   : > { %v2261_v13 = vpop.permute.xlu2 %2260 }
 0x32f   : > { %v3278_v40 = vpop.permute.xlu0 %3277  ;;  %2322 = vst.msk [vmem:[#allocation3 + $0x108] sm:$0xf] %vm1899_vm1, %v2261_v13 }
 0x330   : > { %4417 = vmatmul.bf16.gmra.mxu3 %v8673_v60  ;;  %3339 = vst.msk [vmem:[#allocation3 + $0x110] sm:$0xf] %vm1899_vm1, %v3278_v40  ;;  %v9457_v60 = vld [vmem:[#allocation3 + $0x124] sm:$0xf] }
 0x331   : > { %v12248_v63 = vpop.f32.mrf.mxu3 }
 0x332   : > { %v2255_v42 = vpop.permute.xlu1 %2254 }
 0x333   : > { %4349 = vmatmul.bf16.gmra.mxu2 %v8689_v6  ;;  %4500 = vmatmul.bf16.gmra.mxu0 %v8717_v41  ;;  %2319 = vst.msk [vmem:[#allocation3 + $0xcc] sm:$0xf] %vm1899_vm1, %v2255_v42  ;;  %v8713_v6 = vor.u32 %v9449_v45, %v8712_v52  ;;  %v2918_v45 = vrot.slane %v2916_v20, 4 }
 0x334   : > { %v12245_v29 = vpop.f32.mrf.mxu1 }
 0x335   : > { %2968 = vst.msk [vmem:[#allocation3 + $0x1ec] sm:$0x3] %vm1493_vm6, %v2918_v45 }
 0x336   : > { %v3284_v36 = vpop.permute.xlu2 %3283  ;;  %v8726_v33 = vld [vmem:[#allocation3 + $0x104] sm:$0xf0] }
 0x337   : > { %v2721_v39 = vpop.permute.xlu0 %2720  ;;  %3342 = vst.msk [vmem:[#allocation3 + $0x14c] sm:$0xf] %vm1899_vm1, %v3284_v36  ;;  %v8734_v56 = vld [vmem:[#allocation3 + $0x10c] sm:$0xf0]  ;;  %v8680_v36 = vld [vmem:[#allocation3 + $0x88] sm:$0xf] }
 0x338   : > { %2781 = vst.msk [vmem:[#allocation3 + $0x120] sm:$0xf] %vm1899_vm1, %v2721_v39  ;;  %v8737_v7 = vor.u32 %v9452_v55, %v8734_v56  ;;  %v9440_v39 = vld [vmem:[#allocation3 + $0x98] sm:$0xf0] }
 0x339   : > { %v12256_v25 = vpop.f32.mrf.mxu3 }
 0x33a   : > { %v2723_v8 = vpop.permute.xlu1 %2722  ;;  %v9446_v30 = vld [vmem:[#allocation3 + $0xcc] sm:$0xf] }
 0x33b   : > { %2782 = vst.msk [vmem:[#allocation3 + $0x134] sm:$0xf] %vm1899_vm1, %v2723_v8  ;;  %v8709_v27 = vor.u32 %v9446_v30, %v8706_v61  ;;  %v8681_v30 = vor.u32 %v9440_v39, %v8680_v36  ;;  %v9454_v61 = vld [vmem:[#allocation3 + $0x108] sm:$0xf0] }
 0x33c   : > { %v12253_v58 = vpop.f32.mrf.mxu1 }
 0x33d   : > { %8987 = vmatmul.msk.bf16.gmra.mxu1 %vm854_vm10, %v8641_v59 }
 0x33e   : > { %v9462_v21 = vld [vmem:[#allocation3 + $0x14c] sm:$0xf] }
 0x33f   : > { %v3282_v2 = vpop.permute.xlu0 %3281 }
 0x340   : > { %4422 = vmatmul.bf16.gmra.mxu3 %v8693_v3  ;;  %3341 = vst.msk [vmem:[#allocation3 + $0x138] sm:$0xf] %vm1899_vm1, %v3282_v2 }
 0x341   : > { %v2265_v24 = vpop.permute.xlu2 %2264  ;;  %v4319_v37 = vpop.f32.mrf.mxu3 }
 0x342   : > { %2324 = vst.msk [vmem:[#allocation3 + $0x130] sm:$0xf] %vm1899_vm1, %v2265_v24  ;;  %v2259_v35 = vpop.permute.xlu1 %2258  ;;  %v8732_v24 = vld [vmem:[#allocation3 + $0xf8] sm:$0xf]  ;;  %v9459_v20 = vld [vmem:[#allocation3 + $0x130] sm:$0xf0] }
 0x343   : > { %4354 = vmatmul.bf16.gmra.mxu2 %v8709_v27  ;;  %4505 = vmatmul.bf16.gmra.mxu0 %v8737_v7  ;;  %2321 = vst.msk [vmem:[#allocation3 + $0xf4] sm:$0xf] %vm1899_vm1, %v2259_v35  ;;  %v8733_v35 = vor.u32 %v9454_v61, %v8732_v24 }
 0x344   : > { %v12260_v17 = vpop.f32.mrf.mxu1 }
 0x347   : > { %v2725_v22 = vpop.permute.xlu0 %2724  ;;  %v8754_v46 = vld [vmem:[#allocation3 + $0x134] sm:$0xf0] }
 0x348   : > { %2783 = vst.msk [vmem:[#allocation3 + $0x148] sm:$0xf] %vm1899_vm1, %v2725_v22  ;;  %v8757_v19 = vor.u32 %v9457_v60, %v8754_v46 }
 0x349   : > { %v3288_v0 = vpop.permute.xlu2 %3287  ;;  %v8746_v7 = vld [vmem:[#allocation3 + $0x12c] sm:$0xf0] }
 0x34a   : > { %3344 = vst.msk [vmem:[#allocation3 + $0x174] sm:$0xf] %vm1899_vm1, %v3288_v0  ;;  %v2727_v57 = vpop.permute.xlu1 %2726  ;;  %v9451_v54 = vld [vmem:[#allocation3 + $0xf4] sm:$0xf] }
 0x34b   : > { %2784 = vst.msk [vmem:[#allocation3 + $0x15c] sm:$0xf] %vm1899_vm1, %v2727_v57  ;;  %v8729_v51 = vor.u32 %v9451_v54, %v8726_v33  ;;  %v8700_v54 = vld [vmem:[#allocation3 + $0xb0] sm:$0xf]  ;;  %v9445_v33 = vld [vmem:[#allocation3 + $0xc0] sm:$0xf0] }
 0x34c   : > { %v12266_v40 = vpop.f32.mrf.mxu1  ;;  %v4380_v42 = vpop.f32.mrf.mxu3  ;;  %v8701_v15 = vor.u32 %v9445_v33, %v8700_v54 }
 0x34d   : > { %8988 = vmatmul.msk.bf16.gmra.mxu1 %vm854_vm10, %v8661_v1  ;;  %v12270_v12 = vadd.f32 %v4380_v42, %v12226_v26 }
 0x34f   : > { %v3286_v13 = vpop.permute.xlu0 %3285 }
 0x350   : > { %4427 = vmatmul.bf16.gmra.mxu3 %v8713_v6  ;;  %3343 = vst.msk [vmem:[#allocation3 + $0x160] sm:$0xf] %vm1899_vm1, %v3286_v13 }
 0x351   : > { %v2269_v41 = vpop.permute.xlu2 %2268 }
 0x352   : > { %2326 = vst.msk [vmem:[#allocation3 + $0x158] sm:$0xf] %vm1899_vm1, %v2269_v41  ;;  %v9464_v45 = vld [vmem:[#allocation3 + $0x158] sm:$0xf0] }
 0x353   : > { %4359 = vmatmul.bf16.gmra.mxu2 %v8729_v51  ;;  %4510 = vmatmul.bf16.gmra.mxu0 %v8757_v19 }
 0x354   : > { %v2263_v48 = vpop.permute.xlu1 %2262  ;;  %v4382_v8 = vpop.f32.mrf.mxu3 }
 0x355   : > { %2323 = vst.msk [vmem:[#allocation3 + $0x11c] sm:$0xf] %vm1899_vm1, %v2263_v48  ;;  %v12278_v14 = vadd.f32 %v4382_v8, %v12233_v10  ;;  %v8752_v48 = vld [vmem:[#allocation3 + $0x120] sm:$0xf] }
 0x357   : > { %v2729_v28 = vpop.permute.xlu0 %2728  ;;  %v12274_v56 = vpop.f32.mrf.mxu1  ;;  %14756 = vst [vmem:[#allocation38_spill] sm:$0xff] %v12278_v14  ;;  %v8774_v26 = vld [vmem:[#allocation3 + $0x15c] sm:$0xf0] }
 0x358   : > { %2785 = vst.msk [vmem:[#allocation3 + $0x170] sm:$0xf] %vm1899_vm1, %v2729_v28  ;;  %v8777_v18 = vor.u32 %v9462_v21, %v8774_v26  ;;  %v9467_v28 = vld [vmem:[#allocation3 + $0x174] sm:$0xf] }
 0x359   : > { %v3292_v59 = vpop.permute.xlu2 %3291  ;;  %v8766_v42 = vld [vmem:[#allocation3 + $0x154] sm:$0xf0] }
 0x35a   : > { %3346 = vst.msk [vmem:[#allocation3 + $0x19c] sm:$0xf] %vm1899_vm1, %v3292_v59  ;;  %v8753_v59 = vor.u32 %v9459_v20, %v8752_v48 }
 0x35b   : > { %v12281_v27 = vpop.f32.mrf.mxu0 }
 0x35c   : > { %v2731_v3 = vpop.permute.xlu1 %2730  ;;  %v9456_v55 = vld [vmem:[#allocation3 + $0x11c] sm:$0xf] }
 0x35d   : > { %8989 = vmatmul.msk.bf16.gmra.mxu1 %vm854_vm10, %v8681_v30  ;;  %2786 = vst.msk [vmem:[#allocation3 + $0x184] sm:$0xf] %vm1899_vm1, %v2731_v3  ;;  %v8749_v2 = vor.u32 %v9456_v55, %v8746_v7 }
 0x35e   : > { %v4385_v37 = vpop.f32.mrf.mxu3 }
 0x35f   : > { %v3290_v10 = vpop.permute.xlu0 %3289  ;;  %v12285_v22 = vpop.f32.mrf.mxu1  ;;  %v12289_v1 = vadd.f32 %v4385_v37, %v12241_v4 }
 0x360   : > { %4432 = vmatmul.bf16.gmra.mxu3 %v8733_v35  ;;  %3345 = vst.msk [vmem:[#allocation3 + $0x188] sm:$0xf] %vm1899_vm1, %v3290_v10  ;;  %v9450_v35 = vld [vmem:[#allocation3 + $0xe8] sm:$0xf0] }
 0x361   : > { %v9472_v20 = vld [vmem:[#allocation3 + $0x19c] sm:$0xf] }
 0x362   : > { %v2273_v0 = vpop.permute.xlu2 %2272 }
 0x363   : > { %4364 = vmatmul.bf16.gmra.mxu2 %v8749_v2  ;;  %4515 = vmatmul.bf16.gmra.mxu0 %v8777_v18  ;;  %2328 = vst.msk [vmem:[#allocation3 + $0x180] sm:$0xf] %vm1899_vm1, %v2273_v0  ;;  %v12293_v46 = vpop.f32.mrf.mxu0  ;;  %v8720_v2 = vld [vmem:[#allocation3 + $0xd8] sm:$0xf] }
 0x364   : > { %v2267_v57 = vpop.permute.xlu1 %2266  ;;  %v8721_v37 = vor.u32 %v9450_v35, %v8720_v2 }
 0x365   : > { %2325 = vst.msk [vmem:[#allocation3 + $0x144] sm:$0xf] %vm1899_vm1, %v2267_v57 }
 0x366   : > { %v4387_v4 = vpop.f32.mrf.mxu3 }
 0x367   : > { %v2733_v51 = vpop.permute.xlu0 %2732  ;;  %v12302_v60 = vadd.f32 %v4387_v4, %v12248_v63  ;;  %v8794_v19 = vld [vmem:[#allocation3 + $0x184] sm:$0xf0] }
 0x368   : > { %2787 = vst.msk [vmem:[#allocation3 + $0x198] sm:$0xf] %vm1899_vm1, %v2733_v51  ;;  %v8797_v8 = vor.u32 %v9467_v28, %v8794_v19 }
 0x369   : > { %v12298_v6 = vpop.f32.mrf.mxu1  ;;  %14757 = vst [vmem:[#allocation41_spill] sm:$0xff] %v12302_v60 }
 0x36a   : > { %v3296_v52 = vpop.permute.xlu2 %3295  ;;  %v8786_v33 = vld [vmem:[#allocation3 + $0x17c] sm:$0xf0] }
 0x36b   : > { %3348 = vst.msk [vmem:[#allocation3 + $0x1c4] sm:$0xf] %vm1899_vm1, %v3296_v52  ;;  %v8772_v52 = vld [vmem:[#allocation3 + $0x148] sm:$0xf] }
 0x36c   : > { %v2735_v41 = vpop.permute.xlu1 %2734  ;;  %v9461_v13 = vld [vmem:[#allocation3 + $0x144] sm:$0xf] }
 0x36d   : > { %8990 = vmatmul.msk.bf16.gmra.mxu1 %vm854_vm10, %v8701_v15  ;;  %2788 = vst.msk [vmem:[#allocation3 + $0x1ac] sm:$0xf] %vm1899_vm1, %v2735_v41  ;;  %v8769_v39 = vor.u32 %v9461_v13, %v8766_v42  ;;  %v8773_v15 = vor.u32 %v9464_v45, %v8772_v52  ;;  %v8792_v45 = vld [vmem:[#allocation3 + $0x170] sm:$0xf] }
 0x36e   : > { %v12306_v36 = vpop.f32.mrf.mxu0 }
 0x36f   : > { %v3294_v63 = vpop.permute.xlu0 %3293 }
 0x370   : > { %4437 = vmatmul.bf16.gmra.mxu3 %v8753_v59  ;;  %3347 = vst.msk [vmem:[#allocation3 + $0x1b0] sm:$0xf] %vm1899_vm1, %v3294_v63  ;;  %v4390_v3 = vpop.f32.mrf.mxu3 }
 0x371   : > { %v12309_v61 = vpop.f32.mrf.mxu1  ;;  %v12313_v55 = vadd.f32 %v4390_v3, %v12256_v25  ;;  %v9455_v3 = vld [vmem:[#allocation3 + $0x110] sm:$0xf0] }
 0x372   : > { %v3300_v30 = vpop.permute.xlu2 %3299 }
 0x373   : > { %4369 = vmatmul.bf16.gmra.mxu2 %v8769_v39  ;;  %4520 = vmatmul.bf16.gmra.mxu0 %v8797_v8  ;;  %v4330_v26 = vpop.f32.mrf.mxu2  ;;  %3350 = vst.msk [vmem:[#allocation3 + $0x1ec] sm:$0x3] %vm1924_vm8, %v3300_v30  ;;  %v8740_v30 = vld [vmem:[#allocation3 + $0x100] sm:$0xf] }
 0x374   : > { %14758 = vst [vmem:[#allocation39_spill] sm:$0xff] %v12313_v55  ;;  %v2271_v7 = vpop.permute.xlu1 %2270  ;;  %v4331_v13 = vadd.f32 %v4330_v26, %v12165_v43  ;;  %v8741_v35 = vor.u32 %v9455_v3, %v8740_v30  ;;  %v8812_v3 = vld [vmem:[#allocation3 + $0x198] sm:$0xf] }
 0x375   : > { %2327 = vst.msk [vmem:[#allocation3 + $0x16c] sm:$0xf] %vm1899_vm1, %v2271_v7 }
 0x376   : > { %v12316_v24 = vpop.f32.mrf.mxu0 }
 0x377   : > { %v2737_v21 = vpop.permute.xlu0 %2736  ;;  %v8814_v57 = vld [vmem:[#allocation3 + $0x1ac] sm:$0xf0] }
 0x378   : > { %2789 = vst.msk [vmem:[#allocation3 + $0x1c0] sm:$0xf] %vm1899_vm1, %v2737_v21  ;;  %v4392_v10 = vpop.f32.mrf.mxu3  ;;  %v8817_v19 = vor.u32 %v9472_v20, %v8814_v57  ;;  %v9469_v21 = vld [vmem:[#allocation3 + $0x180] sm:$0xf0] }
 0x37a   : > { %v12319_v18 = vpop.f32.mrf.mxu1 }
 0x37b   : > { %v4332_v0 = vpop.f32.mrf.mxu2 }
 0x37c   : > { %v2739_v25 = vpop.permute.xlu1 %2738  ;;  %v9466_v54 = vld [vmem:[#allocation3 + $0x16c] sm:$0xf]  ;;  %v4333_v7 = vadd.f32 %v4332_v0, %v12196_v44 }
 0x37d   : > { %8991 = vmatmul.msk.bf16.gmra.mxu1 %vm854_vm10, %v8721_v37  ;;  %2790 = vst.msk [vmem:[#allocation3 + $0x1d4] sm:$0xf] %vm1899_vm1, %v2739_v25  ;;  %v8789_v4 = vor.u32 %v9466_v54, %v8786_v33  ;;  %v8793_v25 = vor.u32 %v9469_v21, %v8792_v45  ;;  %v9477_v54 = vld [vmem:[#allocation3 + $0x1c4] sm:$0xf] }
 0x37f   : > { %v3298_v41 = vpop.permute.xlu0 %3297 }
 0x380   : > { %v12323_v51 = vpop.f32.mrf.mxu0  ;;  %4442 = vmatmul.bf16.gmra.mxu3 %v8773_v15  ;;  %3349 = vst.msk [vmem:[#allocation3 + $0x1d8] sm:$0xf] %vm1899_vm1, %v3298_v41  ;;  %v9460_v41 = vld [vmem:[#allocation3 + $0x138] sm:$0xf0] }
 0x381   : > { %v4403_v39 = vpop.f32.mrf.mxu3 }
 0x382   : > { %v12327_v42 = vpop.f32.mrf.mxu1  ;;  %v4404_v59 = vadd.f32 %v4403_v39, %v4331_v13 }
 0x383   : > { %4374 = vmatmul.bf16.gmra.mxu2 %v8789_v4  ;;  %4525 = vmatmul.bf16.gmra.mxu0 %v8817_v19  ;;  %v8760_v19 = vld [vmem:[#allocation3 + $0x128] sm:$0xf] }
 0x384   : > { %v4477_v63 = vadd.f32 %v12281_v27, %v4404_v59  ;;  %v8761_v30 = vor.u32 %v9460_v41, %v8760_v19 }
 0x385   : > { %v4335_v48 = vpop.f32.mrf.mxu2  ;;  %v2741_v28 = vpop.permute.xlu1 %2740 }
 0x386   : > { %2791 = vst.msk [vmem:[#allocation3 + $0x1e8] sm:$0x3] %vm1924_vm8, %v2741_v28  ;;  %v4336_v44 = vadd.f32 %v4335_v48, %v12218_v23  ;;  %v9474_v23 = vld [vmem:[#allocation3 + $0x1a8] sm:$0xf0] }
 0x387   : > { %v8834_v37 = vld [vmem:[#allocation3 + $0x1d4] sm:$0xf0] }
 0x388   : > { %v12330_v8 = vpop.f32.mrf.mxu0  ;;  %v8837_v27 = vor.u32 %v9477_v54, %v8834_v37  ;;  %v8780_v54 = vld [vmem:[#allocation3 + $0x150] sm:$0xf] }
 0x389   : > { %v4405_v26 = vpop.f32.mrf.mxu3 }
 0x38a   : > { %v12334_v2 = vpop.f32.mrf.mxu1  ;;  %v4406_v10 = vadd.f32 %v4405_v26, %v4333_v7  ;;  %v8813_v26 = vor.u32 %v9474_v23, %v8812_v3 }
 0x38c   : > { %v4479_v33 = vadd.f32 %v12293_v46, %v4406_v10 }
 0x38d   : > { %v12336_v43 = vpop.f32.mrf.mxu2  ;;  %8992 = vmatmul.msk.bf16.gmra.mxu1 %vm854_vm10, %v8741_v35  ;;  %v3602_v13 = vld [vmem:[#allocation3 + $0x1e8] sm:$0x33] }
 0x38e   : > { %v3874_v48 = vunpack.c.h.b16 %v3602_v13  ;;  %v3873_v31 = vunpack.c.l.b16 %v3602_v13 }
 0x390   : > { %v4491_v57 = vpop.f32.mrf.mxu0  ;;  %4447 = vmatmul.bf16.gmra.mxu3 %v8793_v25  ;;  %v3939_v35 = vpack.c.b16 %v3874_v48, %v3874_v48 }
 0x392   : > { %v12341_v0 = vpop.f32.mrf.mxu1 }
 0x393   : > { %4530 = vmatmul.bf16.gmra.mxu0 %v8837_v27  ;;  %v4408_v4 = vpop.f32.mrf.mxu3  ;;  %v9465_v27 = vld [vmem:[#allocation3 + $0x160] sm:$0xf0] }
 0x394   : > { %v4409_v15 = vadd.f32 %v4408_v4, %v4336_v44 }
 0x395   : > { %v4340_v52 = vpop.f32.mrf.mxu2 }
 0x396   : > { %v4482_v39 = vadd.f32 %v12306_v36, %v4409_v15  ;;  %v4341_v21 = vadd.f32 %v4340_v52, %v12230_v9  ;;  %v9479_v9 = vld [vmem:[#allocation3 + $0x1d0] sm:$0xf0]  ;;  %v8832_v52 = vld [vmem:[#allocation3 + $0x1c0] sm:$0xf] }
 0x397   : > { %v8833_v48 = vor.u32 %v9479_v9, %v8832_v52 }
 0x398   : > { %v12343_v20 = vpop.f32.mrf.mxu0 }
 0x39a   : > { %v12346_v59 = vpop.f32.mrf.mxu1 }
 0x39b   : > { %v12350_v46 = vpop.f32.mrf.mxu3 }
 0x39d   : > { %v12348_v28 = vpop.f32.mrf.mxu2  ;;  %8993 = vmatmul.msk.bf16.gmra.mxu1 %vm854_vm10, %v8761_v30  ;;  %v8781_v30 = vor.u32 %v9465_v27, %v8780_v54 }
 0x3a0   : > { %v4496_v7 = vpop.f32.mrf.mxu0  ;;  %4452 = vmatmul.bf16.gmra.mxu3 %v8813_v26 }
 0x3a2   : > { %v12354_v36 = vpop.f32.mrf.mxu1 }
 0x3a3   : > { %4535 = vmatmul.bf16.gmra.mxu0 %v3939_v35  ;;  %14759 = vst [vmem:[#allocation37_spill] sm:$0xff] %v12354_v36  ;;  %v4413_v37 = vpop.f32.mrf.mxu3 }
 0x3a4   : > { %v4414_v45 = vadd.f32 %v4413_v37, %v4341_v21 }
 0x3a6   : > { %v4345_v10 = vpop.f32.mrf.mxu2  ;;  %v4487_v44 = vadd.f32 %v12323_v51, %v4414_v45  ;;  %v8800_v45 = vld [vmem:[#allocation3 + $0x178] sm:$0xf] }
 0x3a7   : > { %v4346_v3 = vadd.f32 %v4345_v10, %v12245_v29  ;;  %v3938_v10 = vpack.c.b16 %v3873_v31, %v3873_v31 }
 0x3a8   : > { %v12356_v25 = vpop.f32.mrf.mxu0 }
 0x3aa   : > { %v4549_v4 = vpop.f32.mrf.mxu1 }
 0x3ab   : > { %v12359_v15 = vadd.f32 %v4549_v4, %v4477_v63  ;;  %v12363_v41 = vpop.f32.mrf.mxu3  ;;  %v9470_v4 = vld [vmem:[#allocation3 + $0x188] sm:$0xf0] }
 0x3ac   : > { %v8801_v29 = vor.u32 %v9470_v4, %v8800_v45 }
 0x3ad   : > { %8994 = vmatmul.msk.bf16.gmra.mxu1 %vm854_vm10, %v8781_v30 }
 0x3ae   : > { %v12361_v19 = vpop.f32.mrf.mxu2 }
 0x3b0   : > { %v4501_v23 = vpop.f32.mrf.mxu0  ;;  %4457 = vmatmul.bf16.gmra.mxu3 %v8833_v48 }
 0x3b2   : > { %v4551_v26 = vpop.f32.mrf.mxu1 }
 0x3b3   : > { %v12367_v35 = vadd.f32 %v4551_v26, %v4479_v33  ;;  %v4418_v63 = vpop.f32.mrf.mxu3 }
 0x3b4   : > { %v4419_v21 = vadd.f32 %v4418_v63, %v4346_v3  ;;  %v9475_v63 = vld [vmem:[#allocation3 + $0x1b0] sm:$0xf0] }
 0x3b6   : > { %v4350_v51 = vpop.f32.mrf.mxu2  ;;  %v4492_v54 = vadd.f32 %v4491_v57, %v4419_v21 }
 0x3b7   : > { %v4351_v52 = vadd.f32 %v4350_v51, %v12260_v17  ;;  %v3376_v51 = vld [vmem:[#allocation2 + $0x70] sm:$0x1] }
 0x3b8   : > { %v12369_v37 = vpop.f32.mrf.mxu0 }
 0x3ba   : > { %v4554_v27 = vpop.f32.mrf.mxu1 }
 0x3bb   : > { %v12371_v30 = vadd.f32 %v4554_v27, %v4482_v39  ;;  %v12375_v9 = vpop.f32.mrf.mxu3  ;;  %v8820_v39 = vld [vmem:[#allocation3 + $0x1a0] sm:$0xf] }
 0x3bc   : > { %v8821_v31 = vor.u32 %v9475_v63, %v8820_v39 }
 0x3bd   : > { %8995 = vmatmul.msk.bf16.gmra.mxu1 %vm854_vm10, %v8801_v29  ;;  %v14760_v29 = vrot.slane %v12188_v50, 7 }
 0x3be   : > { %v12373_v11 = vpop.f32.mrf.mxu2 }
 0x3c0   : > { %v4506_v33 = vpop.f32.mrf.mxu0  ;;  %4462 = vmatmul.bf16.gmra.mxu3 %v3938_v10  ;;  %v3476_v10 = vrot.slane %v14760_v29, 4 }
 0x3c2   : > { %v12379_v48 = vpop.f32.mrf.mxu1 }
 0x3c3   : > { %v4423_v57 = vpop.f32.mrf.mxu3 }
 0x3c4   : > { %v4424_v26 = vadd.f32 %v4423_v57, %v4351_v52  ;;  %v12392_v52 = vld [vmem:[#allocation2 + $0x6c] sm:$0xf]  ;;  %v3477_v57 = vrot.slane %v3376_v51, 7 }
 0x3c5   : > { %14761 = vst [vmem:[#allocation42_spill] sm:$0xff] %v12392_v52  ;;  %v14624_v63 = vrot.slane %v12392_v52, 7 }
 0x3c6   : > { %v4355_v3 = vpop.f32.mrf.mxu2  ;;  %v4497_v21 = vadd.f32 %v4496_v7, %v4424_v26  ;;  %v3478_v39 = vsel %vm10695_vm15, %v3476_v10, %v3477_v57 }
 0x3c7   : > { %v4356_v7 = vadd.f32 %v4355_v3, %v12274_v56  ;;  %3528 = vst.msk [vmem:[#allocation3 + $0x1f0] sm:$0x3] %vm1493_vm6, %v3478_v39  ;;  %v7229_v50 = vrot.slane %v14624_v63, 4  ;;  %v8840_v56 = vld [vmem:[#allocation3 + $0x1c8] sm:$0xf] }
 0x3c8   : > { %v12381_v13 = vpop.f32.mrf.mxu0  ;;  %v9480_v3 = vld [vmem:[#allocation3 + $0x1d8] sm:$0xf0] }
 0x3ca   : > { %v4559_v27 = vpop.f32.mrf.mxu1 }
 0x3cb   : > { %v12383_v47 = vadd.f32 %v4559_v27, %v4487_v44  ;;  %v12387_v4 = vpop.f32.mrf.mxu3  ;;  %v7129_v44 = vld [vmem:[#allocation2 + $0x70] sm:$0x1] }
 0x3cc   : > { %v7230_v29 = vrot.slane %v7129_v44, 7 }
 0x3cd   : > { %8996 = vmatmul.msk.bf16.gmra.mxu1 %vm854_vm10, %v8821_v31 }
 0x3ce   : > { %v12385_v45 = vpop.f32.mrf.mxu2  ;;  %v7231_v49 = vsel %vm10695_vm15, %v7229_v50, %v7230_v29  ;;  %v3603_v57 = vld [vmem:[#allocation3 + $0x1f0] sm:$0x3] }
 0x3cf   : > { %7281 = vst.msk [vmem:[#allocation3 + $0x1f0] sm:$0x3] %vm1493_vm6, %v7231_v49  ;;  %v3875_v29 = vunpack.c.l.b16 %v3603_v57 }
 0x3d0   : > { %v4511_v17 = vpop.f32.mrf.mxu0 }
 0x3d2   : > { %v12395_v26 = vpop.f32.mrf.mxu1 }
 0x3d3   : > { %v4428_v16 = vpop.f32.mrf.mxu3 }
 0x3d4   : > { %v4429_v31 = vadd.f32 %v4428_v16, %v4356_v7  ;;  %v8841_v16 = vor.u32 %v9480_v3, %v8840_v56  ;;  %v3940_v56 = vpack.c.b16 %v3875_v29, %v3875_v29 }
 0x3d6   : > { %v4360_v27 = vpop.f32.mrf.mxu2  ;;  %v4502_v5 = vadd.f32 %v4501_v23, %v4429_v31 }
 0x3d7   : > { %v4361_v39 = vadd.f32 %v4360_v27, %v12298_v6 }
 0x3d8   : > { %v12403_v51 = vpop.f32.mrf.mxu0 }
 0x3d9   : > { %14762 = vst [vmem:[#allocation43_spill] sm:$0xff] %v12403_v51 }
 0x3da   : > { %v4564_v62 = vpop.f32.mrf.mxu1 }
 0x3db   : > { %v12407_v32 = vadd.f32 %v4564_v62, %v4492_v54  ;;  %v12409_v10 = vpop.f32.mrf.mxu3 }
 0x3dd   : > { %8997 = vmatmul.msk.bf16.gmra.mxu1 %vm854_vm10, %v8841_v16 }
 0x3de   : > { %v12412_v7 = vpop.f32.mrf.mxu2 }
 0x3e0   : > { %v4516_v44 = vpop.f32.mrf.mxu0 }
 0x3e2   : > { %v12416_v23 = vpop.f32.mrf.mxu1 }
 0x3e3   : > { %v4433_v31 = vpop.f32.mrf.mxu3 }
 0x3e4   : > { %v4434_v50 = vadd.f32 %v4433_v31, %v4361_v39 }
 0x3e6   : > { %v4365_v54 = vpop.f32.mrf.mxu2  ;;  %v4507_v63 = vadd.f32 %v4506_v33, %v4434_v50 }
 0x3e7   : > { %v4366_v6 = vadd.f32 %v4365_v54, %v12319_v18 }
 0x3e8   : > { %v12418_v62 = vpop.f32.mrf.mxu0 }
 0x3e9   : > { %14763 = vst [vmem:[#allocation44_spill] sm:$0xff] %v12418_v62 }
 0x3ea   : > { %v4569_v3 = vpop.f32.mrf.mxu1 }
 0x3eb   : > { %v12420_v52 = vadd.f32 %v4569_v3, %v4497_v21  ;;  %v12422_v49 = vpop.f32.mrf.mxu3 }
 0x3ed   : > { %8998 = vmatmul.msk.bf16.gmra.mxu1 %vm854_vm10, %v3940_v56 }
 0x3ee   : > { %v12425_v53 = vpop.f32.mrf.mxu2 }
 0x3f0   : > { %v4521_v16 = vpop.f32.mrf.mxu0 }
 0x3f2   : > { %v12428_v27 = vpop.f32.mrf.mxu1 }
 0x3f3   : > { %v4438_v57 = vpop.f32.mrf.mxu3 }
 0x3f4   : > { %v4439_v39 = vadd.f32 %v4438_v57, %v4366_v6 }
 0x3f6   : > { %v4512_v33 = vadd.f32 %v4511_v17, %v4439_v39  ;;  %v4370_v29 = vpop.f32.mrf.mxu2 }
 0x3f7   : > { %v4371_v56 = vadd.f32 %v4370_v29, %v12334_v2 }
 0x3f8   : > { %v12430_v31 = vpop.f32.mrf.mxu0 }
 0x3f9   : > { %14764 = vst [vmem:[#allocation45_spill] sm:$0xff] %v12430_v31 }
 0x3fa   : > { %v4574_v50 = vpop.f32.mrf.mxu1 }
 0x3fb   : > { %v12432_v21 = vadd.f32 %v4574_v50, %v4502_v5  ;;  %v12434_v3 = vpop.f32.mrf.mxu3 }
 0x3fe   : > { %v12439_v54 = vpop.f32.mrf.mxu2 }
 0x400   : > { %v4526_v60 = vpop.f32.mrf.mxu0 }
 0x402   : > { %v12437_v14 = vpop.f32.mrf.mxu1 }
 0x403   : > { %v4443_v55 = vpop.f32.mrf.mxu3 }
 0x404   : > { %v4444_v18 = vadd.f32 %v4443_v55, %v4371_v56 }
 0x406   : > { %v4517_v6 = vadd.f32 %v4516_v44, %v4444_v18  ;;  %v4375_v50 = vpop.f32.mrf.mxu2 }
 0x407   : > { %v4376_v31 = vadd.f32 %v4375_v50, %v12346_v59 }
 0x408   : > { %v12441_v62 = vpop.f32.mrf.mxu0 }
 0x409   : > { %14765 = vst [vmem:[#allocation46_spill] sm:$0xff] %v12441_v62 }
 0x40a   : > { %v4579_v57 = vpop.f32.mrf.mxu1 }
 0x40b   : > { %v12443_v17 = vadd.f32 %v4579_v57, %v4507_v63  ;;  %v12445_v39 = vpop.f32.mrf.mxu3  ;;  %v4338_v57 = vadd.f32 %v12336_v43, %v12223_v34  ;;  %v4348_v34 = vadd.f32 %v12361_v19, %v12253_v58  ;;  %v14767_v43 = vld [vmem:[#allocation8_spill] sm:$0xff] }
 0x40d   : > { %v4411_v59 = vadd.f32 %v12350_v46, %v4338_v57 }
 0x410   : > { %v12447_v5 = vpop.f32.mrf.mxu0 }
 0x412   : > { %v12450_v2 = vpop.f32.mrf.mxu1 }
 0x413   : > { %v4448_v29 = vpop.f32.mrf.mxu3 }
 0x414   : > { %v4449_v36 = vadd.f32 %v4448_v29, %v4376_v31 }
 0x416   : > { %v12454_v56 = vadd.f32 %v4521_v16, %v4449_v36  ;;  %v4343_v36 = vadd.f32 %v12348_v28, %v12238_v38  ;;  %v14769_v28 = vld [vmem:[#allocation6_spill] sm:$0xff] }
 0x418   : > { %v12452_v55 = vpop.f32.mrf.mxu0 }
 0x419   : > { %14766 = vst [vmem:[#allocation47_spill] sm:$0xff] %v12452_v55  ;;  %v4614_v55 = vmul.f32 %v12367_v35, %v14767_v43 }
 0x41a   : > { %v4584_v62 = vpop.f32.mrf.mxu1 }
 0x41b   : > { %v12456_v44 = vadd.f32 %v4584_v62, %v4512_v33  ;;  %v12458_v63 = vpop.f32.mrf.mxu3  ;;  %v4416_v62 = vadd.f32 %v12363_v41, %v4343_v36  ;;  %v4484_v33 = vadd.f32 %v12316_v24, %v4411_v59  ;;  %v4615_v41 = vmul.f32 %v12371_v30, %v14769_v28 }
 0x41c   : > { %v4421_v24 = vadd.f32 %v12375_v9, %v4348_v34  ;;  %v4639_v19 = vsel %vm854_vm10, %v4614_v55, 0.0  ;;  %v14772_v34 = vld [vmem:[#allocation10_spill] sm:$0xff] }
 0x41d   : > { %v12479_v46 = vadd.f32 %v12379_v48, %v4484_v33  ;;  %v4353_v48 = vadd.f32 %v12373_v11, %v12266_v40  ;;  %v4641_v9 = vsel %vm854_vm10, %v4615_v41, 0.0  ;;  %v4358_v40 = vadd.f32 %v12385_v45, %v12285_v22 }
 0x41e   : > { %v4494_v55 = vadd.f32 %v12343_v20, %v4421_v24 }
 0x41f   : > { %v4431_v20 = vadd.f32 %v12409_v10, %v4358_v40 }
 0x420   : > { %v12460_v18 = vpop.f32.mrf.mxu0 }
 0x422   : > { %v12464_v51 = vpop.f32.mrf.mxu1 }
 0x423   : > { %v4453_v50 = vpop.f32.mrf.mxu3 }
 0x424   : > { %v4454_v31 = vadd.f32 %v4453_v50, %v12270_v12  ;;  %v14768_v12 = vld [vmem:[#allocation5_spill] sm:$0xff] }
 0x425   : > { %v4613_v57 = vmul.f32 %v12359_v15, %v14768_v12  ;;  %v14770_v50 = vld [vmem:[#allocation9_spill] sm:$0xff] }
 0x426   : > { %v12472_v29 = vadd.f32 %v4526_v60, %v4454_v31  ;;  %v4489_v60 = vadd.f32 %v12330_v8, %v4416_v62  ;;  %v4616_v31 = vmul.f32 %v12479_v46, %v14770_v50  ;;  %v14771_v8 = vld [vmem:[#allocation7_spill] sm:$0xff]  ;;  %v4426_v62 = vadd.f32 %v12387_v4, %v4353_v48 }
 0x428   : > { %v4538_v16 = vpop.f32.mrf.mxu0  ;;  %v12497_v36 = vadd.f32 %v12395_v26, %v4489_v60  ;;  %v4643_v11 = vsel %vm854_vm10, %v4616_v31, 0.0  ;;  %v4499_v24 = vadd.f32 %v12356_v25, %v4426_v62  ;;  %v14774_v31 = vld [vmem:[#allocation12_spill] sm:$0xff] }
 0x429   : > { %v4638_v16 = vsel %vm854_vm10, %v4613_v57, 0.0  ;;  %v12511_v57 = vadd.f32 %v12416_v23, %v4494_v55  ;;  %v4363_v23 = vadd.f32 %v12412_v7, %v12309_v61  ;;  %v14775_v55 = vld [vmem:[#allocation13_spill] sm:$0xff]  ;;  %v4368_v7 = vadd.f32 %v12425_v53, %v12327_v42 }
 0x42a   : > { %v4589_v38 = vpop.f32.mrf.mxu1  ;;  %v4640_v33 = vadd.f32 %v4639_v19, %v4638_v16  ;;  %v4618_v26 = vmul.f32 %v12497_v36, %v14772_v34  ;;  %v4621_v10 = vmul.f32 %v12420_v52, %v14775_v55 }
 0x42b   : > { %v12487_v59 = vadd.f32 %v4589_v38, %v4517_v6  ;;  %v12489_v58 = vpop.f32.mrf.mxu3  ;;  %v4617_v6 = vmul.f32 %v12383_v47, %v14771_v8  ;;  %v14773_v8 = vld [vmem:[#allocation11_spill] sm:$0xff]  ;;  %v4620_v16 = vmul.f32 %v12511_v57, %v14774_v31  ;;  %v4436_v62 = vadd.f32 %v12422_v49, %v4363_v23  ;;  %v4377_v23 = vpop.f32.mrf.mxu2 }
 0x42c   : > { %v4642_v38 = vadd.f32 %v4641_v9, %v4640_v33  ;;  %v4619_v4 = vmul.f32 %v12407_v32, %v14773_v8  ;;  %v4647_v45 = vsel %vm854_vm10, %v4618_v26, 0.0  ;;  %v12525_v9 = vadd.f32 %v12428_v27, %v4499_v24  ;;  %v14776_v27 = vld [vmem:[#allocation14_spill] sm:$0xff] }
 0x42d   : > { %v4645_v60 = vsel %vm854_vm10, %v4617_v6, 0.0  ;;  %v4651_v61 = vsel %vm854_vm10, %v4620_v16, 0.0  ;;  %v4653_v49 = vsel %vm854_vm10, %v4621_v10, 0.0  ;;  %v14780_v10 = vld [vmem:[#allocation43_spill] sm:$0xff] }
 0x42e   : > { %v4644_v48 = vadd.f32 %v4643_v11, %v4642_v38  ;;  %v4649_v25 = vsel %vm854_vm10, %v4619_v4, 0.0  ;;  %v4622_v40 = vmul.f32 %v12525_v9, %v14776_v27 }
 0x430   : > { %v4646_v6 = vadd.f32 %v4645_v60, %v4644_v48  ;;  %v14778_v48 = vld [vmem:[#allocation16_spill] sm:$0xff] }
 0x432   : > { %v4591_v41 = vpop.f32.mrf.mxu1  ;;  %v4648_v33 = vadd.f32 %v4647_v45, %v4646_v6 }
 0x433   : > { %v4458_v19 = vpop.f32.mrf.mxu3 }
 0x434   : > { %v4459_v22 = vadd.f32 %v4458_v19, %v12289_v1  ;;  %v4504_v1 = vadd.f32 %v12369_v37, %v4431_v20  ;;  %v4650_v38 = vadd.f32 %v4649_v25, %v4648_v33  ;;  %v14777_v37 = vld [vmem:[#allocation15_spill] sm:$0xff]  ;;  %v4509_v20 = vadd.f32 %v12381_v13, %v4436_v62  ;;  %v14782_v33 = vld [vmem:[#allocation18_spill] sm:$0xff] }
 0x435   : > { %v4623_v4 = vmul.f32 %v12432_v21, %v14777_v37  ;;  %v4373_v19 = vadd.f32 %v12439_v54, %v12341_v0  ;;  %v14781_v54 = vld [vmem:[#allocation37_spill] sm:$0xff] }
 0x436   : > { %v12533_v11 = vadd.f32 %v12447_v5, %v4459_v22  ;;  %v12541_v26 = vadd.f32 %v12437_v14, %v4504_v1  ;;  %v4441_v5 = vadd.f32 %v12434_v3, %v4368_v7  ;;  %v4652_v42 = vadd.f32 %v4651_v61, %v4650_v38 }
 0x437   : > { %v4655_v14 = vsel %vm854_vm10, %v4622_v40, 0.0  ;;  %v12559_v45 = vadd.f32 %v12450_v2, %v4509_v20  ;;  %v4657_v13 = vsel %vm854_vm10, %v4623_v4, 0.0  ;;  %v4446_v6 = vadd.f32 %v12445_v39, %v4373_v19  ;;  %v14784_v4 = vld [vmem:[#allocation44_spill] sm:$0xff] }
 0x438   : > { %v4624_v22 = vmul.f32 %v12541_v26, %v14778_v48  ;;  %v4654_v3 = vadd.f32 %v4653_v49, %v4652_v42  ;;  %v4514_v25 = vadd.f32 %v14780_v10, %v4441_v5  ;;  %v4378_v1 = vadd.f32 %v4377_v23, %v14781_v54  ;;  %v14783_v49 = vld [vmem:[#allocation19_spill] sm:$0xff]  ;;  %v14787_v10 = vld [vmem:[#allocation21_spill] sm:$0xff] }
 0x439   : > { %v4626_v2 = vmul.f32 %v12559_v45, %v14782_v33  ;;  %v4627_v39 = vmul.f32 %v12456_v44, %v14783_v49  ;;  %v4519_v5 = vadd.f32 %v14784_v4, %v4446_v6 }
 0x43a   : > { %v4594_v60 = vpop.f32.mrf.mxu1  ;;  %v4656_v62 = vadd.f32 %v4655_v14, %v4654_v3  ;;  %v4659_v0 = vsel %vm854_vm10, %v4624_v22, 0.0  ;;  %v12571_v61 = vadd.f32 %v12464_v51, %v4514_v25  ;;  %v14785_v14 = vld [vmem:[#allocation39_spill] sm:$0xff]  ;;  %v14786_v3 = vld [vmem:[#allocation20_spill] sm:$0xff]  ;;  %v4629_v25 = vmul.f32 %v12487_v59, %v14787_v10 }
 0x43b   : > { %v12549_v24 = vadd.f32 %v4594_v60, %v12454_v56  ;;  %v12551_v53 = vpop.f32.mrf.mxu3  ;;  %v14779_v56 = vld [vmem:[#allocation17_spill] sm:$0xff]  ;;  %v4451_v60 = vadd.f32 %v12458_v63, %v4378_v1  ;;  %v4663_v22 = vsel %vm854_vm10, %v4626_v2, 0.0  ;;  %v12582_v23 = vadd.f32 %v4591_v41, %v4519_v5  ;;  %v14789_v1 = vld [vmem:[#allocation22_spill] sm:$0xff] }
 0x43c   : > { %v4625_v16 = vmul.f32 %v12443_v17, %v14779_v56  ;;  %v4658_v7 = vadd.f32 %v4657_v13, %v4656_v62  ;;  %v4628_v51 = vmul.f32 %v12571_v61, %v14786_v3  ;;  %v14788_v63 = vld [vmem:[#allocation45_spill] sm:$0xff] }
 0x43d   : > { %v4524_v62 = vadd.f32 %v14788_v63, %v4451_v60  ;;  %v4630_v2 = vmul.f32 %v12582_v23, %v14789_v1 }
 0x43e   : > { %v4661_v38 = vsel %vm854_vm10, %v4625_v16, 0.0  ;;  %v4660_v42 = vadd.f32 %v4659_v0, %v4658_v7  ;;  %v4665_v16 = vsel %vm854_vm10, %v4627_v39, 0.0  ;;  %v4667_v54 = vsel %vm854_vm10, %v4628_v51, 0.0  ;;  %v14790_v39 = vld [vmem:[#allocation23_spill] sm:$0xff] }
 0x43f   : > { %v4631_v5 = vmul.f32 %v12549_v24, %v14790_v39 }
 0x440   : > { %v4662_v13 = vadd.f32 %v4661_v38, %v4660_v42  ;;  %v4669_v38 = vsel %vm854_vm10, %v4629_v25, 0.0 }
 0x442   : > { %v4596_v40 = vpop.f32.mrf.mxu1  ;;  %v4664_v6 = vadd.f32 %v4663_v22, %v4662_v13  ;;  %v14792_v22 = vld [vmem:[#allocation24_spill] sm:$0xff]  ;;  %v4673_v13 = vsel %vm854_vm10, %v4631_v5, 0.0 }
 0x443   : > { %v4463_v20 = vpop.f32.mrf.mxu3  ;;  %v12592_v7 = vadd.f32 %v4596_v40, %v4524_v62  ;;  %v14794_v62 = vld [vmem:[#allocation46_spill] sm:$0xff] }
 0x444   : > { %v4464_v19 = vadd.f32 %v4463_v20, %v14785_v14  ;;  %v4666_v41 = vadd.f32 %v4665_v16, %v4664_v6  ;;  %v14793_v16 = vld [vmem:[#allocation25_spill] sm:$0xff] }
 0x445   : > { %v4632_v40 = vmul.f32 %v12592_v7, %v14792_v22 }
 0x446   : > { %v4537_v0 = vadd.f32 %v12460_v18, %v4464_v19  ;;  %v4668_v42 = vadd.f32 %v4667_v54, %v4666_v41  ;;  %v14791_v18 = vld [vmem:[#allocation38_spill] sm:$0xff]  ;;  %v4671_v19 = vsel %vm854_vm10, %v4630_v2, 0.0 }
 0x447   : > { %v4456_v14 = vadd.f32 %v12489_v58, %v14791_v18 }
 0x448   : > { %v4670_v51 = vadd.f32 %v4669_v38, %v4668_v42 }
 0x449   : > { %v4529_v6 = vadd.f32 %v14794_v62, %v4456_v14 }
 0x44a   : > { %v4599_v4 = vpop.f32.mrf.mxu1  ;;  %v4672_v63 = vadd.f32 %v4671_v19, %v4670_v51  ;;  %v14797_v51 = vld [vmem:[#allocation27_spill] sm:$0xff] }
 0x44b   : > { %v12598_v20 = vadd.f32 %v4599_v4, %v12472_v29  ;;  %v4465_v60 = vpop.f32.mrf.mxu3  ;;  %v4675_v29 = vsel %vm854_vm10, %v4632_v40, 0.0  ;;  %v14796_v40 = vld [vmem:[#allocation41_spill] sm:$0xff] }
 0x44c   : > { %v4674_v54 = vadd.f32 %v4673_v13, %v4672_v63  ;;  %v14795_v60 = vld [vmem:[#allocation26_spill] sm:$0xff]  ;;  %v4461_v14 = vadd.f32 %v12551_v53, %v14796_v40  ;;  %v14800_v53 = vld [vmem:[#allocation29_spill] sm:$0xff] }
 0x44d   : > { %v4633_v25 = vmul.f32 %v12598_v20, %v14793_v16 }
 0x44e   : > { %v4676_v2 = vadd.f32 %v4675_v29, %v4674_v54  ;;  %v14798_v29 = vld [vmem:[#allocation47_spill] sm:$0xff] }
 0x44f   : > { %v4677_v58 = vsel %vm854_vm10, %v4633_v25, 0.0  ;;  %v4534_v62 = vadd.f32 %v14798_v29, %v4461_v14 }
 0x450   : > { %v4678_v42 = vadd.f32 %v4677_v58, %v4676_v2 }
 0x452   : > { %v4601_v41 = vpop.f32.mrf.mxu1 }
 0x453   : > { %v12611_v4 = vadd.f32 %v4601_v41, %v4529_v6  ;;  %v14799_v41 = vld [vmem:[#allocation28_spill] sm:$0xff] }
 0x455   : > { %v4634_v38 = vmul.f32 %v12611_v4, %v14795_v60 }
 0x457   : > { %v4679_v5 = vsel %vm854_vm10, %v4634_v38, 0.0 }
 0x458   : > { %v4680_v18 = vadd.f32 %v4679_v5, %v4678_v42 }
 0x45a   : > { %v4604_v16 = vpop.f32.mrf.mxu1 }
 0x45b   : > { %v12617_v19 = vadd.f32 %v4604_v16, %v12533_v11 }
 0x45d   : > { %v4635_v13 = vmul.f32 %v12617_v19, %v14797_v51 }
 0x45f   : > { %v4681_v25 = vsel %vm854_vm10, %v4635_v13, 0.0 }
 0x460   : > { %v4682_v63 = vadd.f32 %v4681_v25, %v4680_v18 }
 0x462   : > { %v4606_v6 = vpop.f32.mrf.mxu1 }
 0x463   : > { %v12625_v54 = vadd.f32 %v4606_v6, %v4534_v62 }
 0x465   : > { %v4636_v58 = vmul.f32 %v12625_v54, %v14799_v41  ;;  %v14801_v41 = vld [vmem:[#allocation30_spill] sm:$0xff] }
 0x467   : > { %v4683_v11 = vsel %vm854_vm10, %v4636_v58, 0.0 }
 0x468   : > { %v4684_v16 = vadd.f32 %v4683_v11, %v4682_v63 }
 0x46a   : > { %v4609_v2 = vpop.f32.mrf.mxu1 }
 0x46b   : > { %v12630_v38 = vadd.f32 %v4609_v2, %v4537_v0 }
 0x46d   : > { %v4637_v42 = vmul.f32 %v12630_v38, %v14800_v53 }
 0x46f   : > { %v4685_v5 = vsel %vm433_vm2, %v4637_v42, 0.0 }
 0x470   : > { %v4686_v18 = vadd.f32 %v4685_v5, %v4684_v16 }
 0x472   : > { %v4687_v40 = vrot.slane %v4686_v18, 4  ;;  %v4611_v14 = vpop.f32.mrf.mxu1 }
 0x474   : > { %v4688_v13 = vadd.f32 %v4687_v40, %v4686_v18 }
 0x476   : > { %v4689_v25 = vrot.slane %v4688_v13, 2 }
 0x478   : > { %v4690_v29 = vadd.f32 %v4689_v25, %v4688_v13 }
 0x47a   : > { %v4691_v62 = vrot.slane %v4690_v29, 1 }
 0x47c   : > { %v4692_v6 = vadd.f32 %v4691_v62, %v4690_v29 }
 0x47e   : > { %v12636_v51 = vmul.f32 %v4692_v6, %v14801_v41  ;;  %v14802_v6 = vld [vmem:[#allocation7_spill] sm:$0xff] }
 0x480   : > { %v4713_v0 = vsub.f32 %v12592_v7, %v12636_v51  ;;  %v4694_v2 = vsub.f32 %v12359_v15, %v12636_v51  ;;  %v4695_v5 = vsub.f32 %v12367_v35, %v12636_v51  ;;  %v4696_v18 = vsub.f32 %v12371_v30, %v12636_v51 }
 0x481   : > { %v4697_v14 = vsub.f32 %v12479_v46, %v12636_v51  ;;  %v4698_v15 = vsub.f32 %v12383_v47, %v12636_v51  ;;  %v4699_v30 = vsub.f32 %v12497_v36, %v12636_v51  ;;  %v4700_v62 = vsub.f32 %v12407_v32, %v12636_v51 }
 0x482   : > { %v12657_v40 = vmul.f32 %v4694_v2, %v14768_v12  ;;  %v12662_v13 = vmul.f32 %v4695_v5, %v14767_v43  ;;  %v12667_v25 = vmul.f32 %v4696_v18, %v14769_v28  ;;  %v4701_v36 = vsub.f32 %v12511_v57, %v12636_v51 }
 0x483   : > { %v12674_v29 = vmul.f32 %v4697_v14, %v14770_v50  ;;  %v12681_v47 = vmul.f32 %v4698_v15, %v14802_v6  ;;  %v12689_v18 = vmul.f32 %v4699_v30, %v14772_v34  ;;  %v4702_v15 = vsub.f32 %v12420_v52, %v12636_v51 }
 0x484   : > { %v4744_v35 = vmul.f32 %v12657_v40, %v12657_v40  ;;  %v4745_v46 = vmul.f32 %v12662_v13, %v12662_v13  ;;  %v4746_v2 = vmul.f32 %v12667_v25, %v12667_v25  ;;  %v12697_v16 = vmul.f32 %v4700_v62, %v14773_v8 }
 0x485   : > { %v4747_v14 = vmul.f32 %v12674_v29, %v12674_v29  ;;  %v4703_v30 = vsub.f32 %v12525_v9, %v12636_v51  ;;  %v12705_v58 = vmul.f32 %v4701_v36, %v14774_v31  ;;  %v4704_v62 = vsub.f32 %v12432_v21, %v12636_v51 }
 0x486   : > { %v4769_v5 = vsel %vm854_vm10, %v4744_v35, 0.0  ;;  %v4770_v42 = vsel %vm854_vm10, %v4745_v46, 0.0  ;;  %v4748_v35 = vmul.f32 %v12681_v47, %v12681_v47  ;;  %v4772_v57 = vsel %vm854_vm10, %v4746_v2, 0.0 }
 0x487   : > { %v4771_v32 = vadd.f32 %v4770_v42, %v4769_v5  ;;  %v4749_v42 = vmul.f32 %v12689_v18, %v12689_v18  ;;  %v4774_v52 = vsel %vm854_vm10, %v4747_v14, 0.0  ;;  %v12713_v5 = vmul.f32 %v4702_v15, %v14775_v55 }
 0x488   : > { %v4750_v2 = vmul.f32 %v12697_v16, %v12697_v16  ;;  %v4776_v9 = vsel %vm854_vm10, %v4748_v35, 0.0  ;;  %v4705_v36 = vsub.f32 %v12541_v26, %v12636_v51  ;;  %v4706_v15 = vsub.f32 %v12443_v17, %v12636_v51 }
 0x489   : > { %v4773_v11 = vadd.f32 %v4772_v57, %v4771_v32  ;;  %v12721_v57 = vmul.f32 %v4703_v30, %v14776_v27  ;;  %v4778_v21 = vsel %vm854_vm10, %v4749_v42, 0.0  ;;  %v4752_v35 = vmul.f32 %v12713_v5, %v12713_v5 }
 0x48a   : > { %v4780_v26 = vsel %vm854_vm10, %v4750_v2, 0.0  ;;  %v4707_v30 = vsub.f32 %v12559_v45, %v12636_v51 }
 0x48b   : > { %v4775_v46 = vadd.f32 %v4774_v52, %v4773_v11  ;;  %v4751_v11 = vmul.f32 %v12705_v58, %v12705_v58  ;;  %v12729_v52 = vmul.f32 %v4704_v62, %v14777_v37  ;;  %v4753_v42 = vmul.f32 %v12721_v57, %v12721_v57 }
 0x48c   : > { %v4708_v62 = vsub.f32 %v12456_v44, %v12636_v51  ;;  %v4784_v45 = vsel %vm854_vm10, %v4752_v35, 0.0 }
 0x48d   : > { %v4777_v32 = vadd.f32 %v4776_v9, %v4775_v46  ;;  %v12737_v9 = vmul.f32 %v4705_v36, %v14778_v48  ;;  %v4782_v17 = vsel %vm854_vm10, %v4751_v11, 0.0  ;;  %v4754_v2 = vmul.f32 %v12729_v52, %v12729_v52 }
 0x48e   : > { %v4709_v36 = vsub.f32 %v12571_v61, %v12636_v51  ;;  %v4786_v44 = vsel %vm854_vm10, %v4753_v42, 0.0 }
 0x48f   : > { %v4779_v14 = vadd.f32 %v4778_v21, %v4777_v32  ;;  %v12745_v21 = vmul.f32 %v4706_v15, %v14779_v56  ;;  %v4755_v11 = vmul.f32 %v12737_v9, %v12737_v9  ;;  %v4710_v15 = vsub.f32 %v12487_v59, %v12636_v51 }
 0x490   : > { %v4788_v61 = vsel %vm854_vm10, %v4754_v2, 0.0 }
 0x491   : > { %v4781_v46 = vadd.f32 %v4780_v26, %v4779_v14  ;;  %v12753_v26 = vmul.f32 %v4707_v30, %v14782_v33  ;;  %v4756_v35 = vmul.f32 %v12745_v21, %v12745_v21  ;;  %v4711_v30 = vsub.f32 %v12582_v23, %v12636_v51 }
 0x492   : > { %v4790_v59 = vsel %vm854_vm10, %v4755_v11, 0.0 }
 0x493   : > { %v4783_v32 = vadd.f32 %v4782_v17, %v4781_v46  ;;  %v12761_v17 = vmul.f32 %v4708_v62, %v14783_v49  ;;  %v4757_v42 = vmul.f32 %v12753_v26, %v12753_v26  ;;  %v4712_v62 = vsub.f32 %v12549_v24, %v12636_v51 }
 0x494   : > { %v4792_v23 = vsel %vm854_vm10, %v4756_v35, 0.0  ;;  %v12798_v35 = vmul.f32 %v4713_v0, %v14792_v22  ;;  %v14808_v0 = vsub.f32 %v12611_v4, %v12636_v51 }
 0x495   : > { %v4785_v14 = vadd.f32 %v4784_v45, %v4783_v32  ;;  %v12769_v45 = vmul.f32 %v4709_v36, %v14786_v3  ;;  %v4758_v2 = vmul.f32 %v12761_v17, %v12761_v17  ;;  %v12783_v36 = vmul.f32 %v4711_v30, %v14789_v1 }
 0x496   : > { %v4794_v11 = vsel %vm854_vm10, %v4757_v42, 0.0  ;;  %v12789_v24 = vmul.f32 %v4712_v62, %v14790_v39  ;;  %14804 = vst [vmem:[#allocation5_spill] sm:$0xff] %v12798_v35  ;;  %v14805_v62 = vld [vmem:[#allocation25_spill] sm:$0xff] }
 0x497   : > { %v4787_v46 = vadd.f32 %v4786_v44, %v4785_v14  ;;  %v12777_v44 = vmul.f32 %v4710_v15, %v14787_v10  ;;  %v4761_v30 = vmul.f32 %v12783_v36, %v12783_v36 }
 0x498   : > { %14803 = vst [vmem:[#allocation8_spill] sm:$0xff] %v12789_v24 }
 0x499   : > { %v4789_v32 = vadd.f32 %v4788_v61, %v4787_v46  ;;  %v4759_v61 = vmul.f32 %v12769_v45, %v12769_v45  ;;  %v4760_v15 = vmul.f32 %v12777_v44, %v12777_v44 }
 0x49b   : > { %v4791_v14 = vadd.f32 %v4790_v59, %v4789_v32  ;;  %v4796_v59 = vsel %vm854_vm10, %v4758_v2, 0.0  ;;  %v4798_v42 = vsel %vm854_vm10, %v4759_v61, 0.0  ;;  %v4762_v2 = vmul.f32 %v12789_v24, %v12789_v24 }
 0x49c   : > { %v4802_v61 = vsel %vm854_vm10, %v4761_v30, 0.0 }
 0x49d   : > { %v4793_v46 = vadd.f32 %v4792_v23, %v4791_v14  ;;  %v14806_v23 = vsub.f32 %v12598_v20, %v12636_v51 }
 0x49f   : > { %v4795_v32 = vadd.f32 %v4794_v11, %v4793_v46  ;;  %v12807_v46 = vmul.f32 %v14806_v23, %v14805_v62  ;;  %v4800_v11 = vsel %vm854_vm10, %v4760_v15, 0.0 }
 0x4a1   : > { %v4797_v63 = vadd.f32 %v4796_v59, %v4795_v32  ;;  %14807 = vst [vmem:[#allocation6_spill] sm:$0xff] %v12807_v46  ;;  %v12816_v32 = vmul.f32 %v14808_v0, %v14795_v60  ;;  %v14810_v59 = vld [vmem:[#allocation27_spill] sm:$0xff]  ;;  %v4764_v15 = vmul.f32 %v12807_v46, %v12807_v46  ;;  %v14814_v0 = vsub.f32 %v12625_v54, %v12636_v51 }
 0x4a3   : > { %v4799_v14 = vadd.f32 %v4798_v42, %v4797_v63  ;;  %14809 = vst [vmem:[#allocation9_spill] sm:$0xff] %v12816_v32  ;;  %v4763_v63 = vmul.f32 %v12798_v35, %v12798_v35  ;;  %v14811_v42 = vsub.f32 %v12617_v19, %v12636_v51  ;;  %v4765_v30 = vmul.f32 %v12816_v32, %v12816_v32 }
 0x4a5   : > { %v4801_v7 = vadd.f32 %v4800_v11, %v4799_v14  ;;  %v12825_v23 = vmul.f32 %v14811_v42, %v14810_v59  ;;  %v4804_v14 = vsel %vm854_vm10, %v4762_v2, 0.0  ;;  %v14813_v11 = vld [vmem:[#allocation28_spill] sm:$0xff] }
 0x4a6   : > { %v12834_v35 = vmul.f32 %v14814_v0, %v14813_v11  ;;  %v4810_v0 = vsel %vm854_vm10, %v4765_v30, 0.0 }
 0x4a7   : > { %v4803_v20 = vadd.f32 %v4802_v61, %v4801_v7  ;;  %14812 = vst [vmem:[#allocation10_spill] sm:$0xff] %v12825_v23  ;;  %v4806_v7 = vsel %vm854_vm10, %v4763_v63, 0.0  ;;  %v14816_v61 = vsub.f32 %v12630_v38, %v12636_v51  ;;  %v4766_v2 = vmul.f32 %v12825_v23, %v12825_v23 }
 0x4a8   : > { %14815 = vst [vmem:[#allocation11_spill] sm:$0xff] %v12834_v35 }
 0x4a9   : > { %v4805_v4 = vadd.f32 %v4804_v14, %v4803_v20  ;;  %v12843_v42 = vmul.f32 %v14816_v61, %v14800_v53  ;;  %v4808_v20 = vsel %vm854_vm10, %v4764_v15, 0.0  ;;  %v4767_v14 = vmul.f32 %v12834_v35, %v12834_v35 }
 0x4ab   : > { %v4807_v19 = vadd.f32 %v4806_v7, %v4805_v4  ;;  %v4768_v63 = vmul.f32 %v12843_v42, %v12843_v42  ;;  %v4812_v4 = vsel %vm854_vm10, %v4766_v2, 0.0  ;;  %v4814_v38 = vsel %vm854_vm10, %v4767_v14, 0.0 }
 0x4ad   : > { %v4809_v54 = vadd.f32 %v4808_v20, %v4807_v19  ;;  %v4816_v61 = vsel %vm433_vm2, %v4768_v63, 0.0 }
 0x4af   : > { %v4811_v32 = vadd.f32 %v4810_v0, %v4809_v54 }
 0x4b1   : > { %v4813_v51 = vadd.f32 %v4812_v4, %v4811_v32  ;;  %v451_v32 = vld [vmem:[%s14519_s4 + $0x2] sm:$0x3] }
 0x4b2   : > { %v4863_v4 = vperm.slane %v451_v32, 1 }
 0x4b3   : > { %v4815_v7 = vadd.f32 %v4814_v38, %v4813_v51 }
 0x4b4   : > { %v4866_v38 = vmul.f32 %v4863_v4, %v14769_v28  ;;  %v4872_v28 = vmul.f32 %v4863_v4, %v14775_v55  ;;  %v4881_v55 = vmul.f32 %v4863_v4, %v14789_v1 }
 0x4b5   : > { %v4817_v23 = vadd.f32 %v4816_v61, %v4815_v7  ;;  %v4869_v7 = vmul.f32 %v4863_v4, %v14772_v34  ;;  %v4870_v61 = vmul.f32 %v4863_v4, %v14773_v8  ;;  %v4879_v34 = vmul.f32 %v4863_v4, %v14786_v3 }
 0x4b6   : > { %v4880_v8 = vmul.f32 %v4863_v4, %v14787_v10  ;;  %v4888_v3 = vmul.f32 %v4863_v4, %v14800_v53 }
 0x4b7   : > { %v4818_v15 = vrot.slane %v4817_v23, 4 }
 0x4b9   : > { %v4819_v19 = vadd.f32 %v4818_v15, %v4817_v23  ;;  %v4864_v23 = vmul.f32 %v4863_v4, %v14768_v12  ;;  %v4871_v15 = vmul.f32 %v4863_v4, %v14774_v31  ;;  %v4874_v12 = vmul.f32 %v4863_v4, %v14777_v37 }
 0x4ba   : > { %v4878_v31 = vmul.f32 %v4863_v4, %v14783_v49  ;;  %v4883_v37 = vmul.f32 %v4863_v4, %v14792_v22 }
 0x4bb   : > { %v4820_v20 = vrot.slane %v4819_v19, 2 }
 0x4bd   : > { %v4821_v46 = vadd.f32 %v4820_v20, %v4819_v19  ;;  %v4873_v19 = vmul.f32 %v4863_v4, %v14776_v27  ;;  %v4877_v20 = vmul.f32 %v4863_v4, %v14782_v33  ;;  %v4882_v27 = vmul.f32 %v4863_v4, %v14790_v39 }
 0x4be   : > { %v4886_v33 = vmul.f32 %v4863_v4, %v14810_v59 }
 0x4bf   : > { %v4822_v35 = vrot.slane %v4821_v46, 1 }
 0x4c1   : > { %v4823_v24 = vadd.f32 %v4822_v35, %v4821_v46  ;;  %v4865_v35 = vmul.f32 %v4863_v4, %v14767_v43  ;;  %v4868_v46 = vmul.f32 %v4863_v4, %v14802_v6  ;;  %v4875_v6 = vmul.f32 %v4863_v4, %v14778_v48 }
 0x4c2   : > { %v4884_v48 = vmul.f32 %v4863_v4, %v14805_v62 }
 0x4c3   : > { %v4824_v30 = vmul.f32 %v4823_v24, %v14801_v41  ;;  %v4867_v41 = vmul.f32 %v4863_v4, %v14770_v50  ;;  %v4876_v50 = vmul.f32 %v4863_v4, %v14779_v56 }
 0x4c5   : > { %v4825_v54 = vadd.f32 1e-05, %v4824_v30 }
 0x4c7   : > { %9688 = vrsqrt.f32 %v4825_v54  ;;  %vm4832_vm14 = vweird.f32 %v4825_v54 }
 0x4cd   : > { %v9689_v0 = vpop.eup %9688 }
 0x4ce   : > { %v4827_v2 = vmul.f32 %v9689_v0, %v4825_v54  ;;  %vm4833_vm11 = vweird.f32 %v9689_v0  ;;  %v4885_v54 = vmul.f32 %v4863_v4, %v14795_v60 }
 0x4cf   : > { %vm4834_vm0 = vmor %vm4832_vm14, %vm4833_vm11 }
 0x4d0   : > { %v4828_v14 = vmul.f32 %v9689_v0, %v4827_v2  ;;  %v14818_v2 = vld [vmem:[#allocation5_spill] sm:$0xff] }
 0x4d2   : > { %v4829_v63 = vmul.f32 0.5, %v4828_v14  ;;  %v14819_v14 = vld [vmem:[#allocation6_spill] sm:$0xff] }
 0x4d4   : > { %v4830_v51 = vsub.f32 1.5, %v4829_v63  ;;  %v14821_v63 = vld [vmem:[#allocation10_spill] sm:$0xff] }
 0x4d6   : > { %v4831_v24 = vmul.f32 %v9689_v0, %v4830_v51  ;;  %v14822_v51 = vld [vmem:[#allocation11_spill] sm:$0xff] }
 0x4d8   : > { %v4835_v43 = vsel %vm4834_vm0, %v9689_v0, %v4831_v24  ;;  %v4887_v0 = vmul.f32 %v4863_v4, %v14813_v11  ;;  %v14820_v4 = vld [vmem:[#allocation9_spill] sm:$0xff] }
 0x4d9   : > { %v4836_v30 = vmul.f32 %v4835_v43, %v451_v32  ;;  %v14817_v32 = vld [vmem:[#allocation8_spill] sm:$0xff] }
 0x4db   : > { %v4837_v56 = vperm.slane %v4836_v30, 0 }
 0x4dd   : > { %v4838_v10 = vmul.f32 %v4837_v56, %v12657_v40  ;;  %v4839_v49 = vmul.f32 %v4837_v56, %v12662_v13  ;;  %v4840_v39 = vmul.f32 %v4837_v56, %v12667_v25  ;;  %v4841_v22 = vmul.f32 %v4837_v56, %v12674_v29 }
 0x4de   : > { %v4842_v1 = vmul.f32 %v4837_v56, %v12681_v47  ;;  %v4843_v60 = vmul.f32 %v4837_v56, %v12689_v18  ;;  %v4844_v59 = vmul.f32 %v4837_v56, %v12697_v16  ;;  %v4845_v62 = vmul.f32 %v4837_v56, %v12705_v58 }
 0x4df   : > { %v4846_v11 = vmul.f32 %v4837_v56, %v12713_v5  ;;  %v4847_v53 = vmul.f32 %v4837_v56, %v12721_v57  ;;  %v4848_v40 = vmul.f32 %v4837_v56, %v12729_v52  ;;  %v4849_v13 = vmul.f32 %v4837_v56, %v12737_v9 }
 0x4e0   : > { %v4850_v25 = vmul.f32 %v4837_v56, %v12745_v21  ;;  %v4851_v29 = vmul.f32 %v4837_v56, %v12753_v26  ;;  %v4852_v47 = vmul.f32 %v4837_v56, %v12761_v17  ;;  %v4853_v18 = vmul.f32 %v4837_v56, %v12769_v45 }
 0x4e1   : > { %v4854_v16 = vmul.f32 %v4837_v56, %v12777_v44  ;;  %v4855_v58 = vmul.f32 %v4837_v56, %v12783_v36  ;;  %v4856_v5 = vmul.f32 %v4837_v56, %v14817_v32  ;;  %v4857_v57 = vmul.f32 %v4837_v56, %v14818_v2 }
 0x4e2   : > { %v4858_v52 = vmul.f32 %v4837_v56, %v14819_v14  ;;  %v4859_v9 = vmul.f32 %v4837_v56, %v14820_v4  ;;  %v4860_v21 = vmul.f32 %v4837_v56, %v14821_v63  ;;  %v4861_v26 = vmul.f32 %v4837_v56, %v14822_v51 }
 0x4e3   : > { %v4862_v17 = vmul.f32 %v4837_v56, %v12843_v42  ;;  %v4889_v24 = vadd.f32 %v4864_v23, %v4838_v10  ;;  %v4890_v45 = vadd.f32 %v4865_v35, %v4839_v49  ;;  %v4891_v43 = vadd.f32 %v4866_v38, %v4840_v39 }
 0x4e4   : > { %v4892_v44 = vadd.f32 %v4867_v41, %v4841_v22  ;;  %v4893_v30 = vadd.f32 %v4868_v46, %v4842_v1  ;;  %v4894_v36 = vadd.f32 %v4869_v7, %v4843_v60  ;;  %v4895_v32 = vadd.f32 %v4870_v61, %v4844_v59 }
 0x4e5   : > { %v4896_v2 = vadd.f32 %v4871_v15, %v4845_v62  ;;  %v4897_v14 = vadd.f32 %v4872_v28, %v4846_v11  ;;  %v4898_v4 = vadd.f32 %v4873_v19, %v4847_v53  ;;  %v4899_v63 = vadd.f32 %v4874_v12, %v4848_v40 }
 0x4e6   : > { %v4900_v51 = vadd.f32 %v4875_v6, %v4849_v13  ;;  %v4901_v42 = vadd.f32 %v4876_v50, %v4850_v25  ;;  %v4902_v56 = vadd.f32 %v4877_v20, %v4851_v29  ;;  %v4903_v10 = vadd.f32 %v4878_v31, %v4852_v47 }
 0x4e7   : > { %v4904_v23 = vadd.f32 %v4879_v34, %v4853_v18  ;;  %v4905_v35 = vadd.f32 %v4880_v8, %v4854_v16  ;;  %v4906_v49 = vadd.f32 %v4881_v55, %v4855_v58  ;;  %v4907_v38 = vadd.f32 %v4882_v27, %v4856_v5 }
 0x4e8   : > { %v4908_v39 = vadd.f32 %v4883_v37, %v4857_v57  ;;  %v4909_v22 = vadd.f32 %v4884_v48, %v4858_v52  ;;  %v4910_v41 = vadd.f32 %v4885_v54, %v4859_v9  ;;  %v4911_v1 = vadd.f32 %v4886_v33, %v4860_v21 }
 0x4e9   : > { %v4912_v46 = vadd.f32 %v4887_v0, %v4861_v26  ;;  %v4913_v7 = vadd.f32 %v4888_v3, %v4862_v17  ;;  %v4914_v60 = vmax.f32 %v4889_v24, 0.0  ;;  %v4915_v61 = vmax.f32 %v4890_v45, 0.0 }
 0x4ea   : > { %v4916_v15 = vmax.f32 %v4891_v43, 0.0  ;;  %v4917_v28 = vmax.f32 %v4892_v44, 0.0  ;;  %v4918_v19 = vmax.f32 %v4893_v30, 0.0  ;;  %v4919_v12 = vmax.f32 %v4894_v36, 0.0 }
 0x4eb   : > { %v4920_v6 = vmax.f32 %v4895_v32, 0.0  ;;  %v4921_v50 = vmax.f32 %v4896_v2, 0.0  ;;  %v4922_v20 = vmax.f32 %v4897_v14, 0.0  ;;  %v4923_v31 = vmax.f32 %v4898_v4, 0.0 }
 0x4ec   : > { %v4924_v34 = vmax.f32 %v4899_v63, 0.0  ;;  %v4925_v8 = vmax.f32 %v4900_v51, 0.0  ;;  %v4926_v55 = vmax.f32 %v4901_v42, 0.0  ;;  %v4927_v27 = vmax.f32 %v4902_v56, 0.0 }
 0x4ed   : > { %v4928_v37 = vmax.f32 %v4903_v10, 0.0  ;;  %v4929_v48 = vmax.f32 %v4904_v23, 0.0  ;;  %v4930_v54 = vmax.f32 %v4905_v35, 0.0  ;;  %v4931_v33 = vmax.f32 %v4906_v49, 0.0 }
 0x4ee   : > { %v4932_v0 = vmax.f32 %v4907_v38, 0.0  ;;  %v4933_v3 = vmax.f32 %v4908_v39, 0.0  ;;  %v4934_v59 = vmax.f32 %v4909_v22, 0.0  ;;  %v4935_v62 = vmax.f32 %v4910_v41, 0.0 }
 0x4ef   : > { %v4936_v11 = vmax.f32 %v4911_v1, 0.0  ;;  %v4937_v53 = vmax.f32 %v4912_v46, 0.0  ;;  %v4938_v40 = vmax.f32 %v4913_v7, 0.0  ;;  %v12910_v13 = vpack.c.bf16 %v4914_v60, %v4914_v60 }
 0x4f0   : > { %v12912_v25 = vpack.c.bf16 %v4915_v61, %v4915_v61  ;;  %v4941_v29 = vpack.c.bf16 %v4916_v15, %v4916_v15  ;;  %v4942_v47 = vpack.c.bf16 %v4917_v28, %v4917_v28  ;;  %v4943_v18 = vpack.c.bf16 %v4918_v19, %v4918_v19 }
 0x4f1   : > { %v4944_v16 = vpack.c.bf16 %v4919_v12, %v4919_v12  ;;  %v4945_v58 = vpack.c.bf16 %v4920_v6, %v4920_v6  ;;  %v4946_v5 = vpack.c.bf16 %v4921_v50, %v4921_v50  ;;  %v12914_v57 = vpack.c.bf16 %v4922_v20, %v4922_v20 }
 0x4f2   : > { %v12916_v52 = vpack.c.bf16 %v4923_v31, %v4923_v31  ;;  %v12918_v9 = vpack.c.bf16 %v4924_v34, %v4924_v34  ;;  %v12920_v21 = vpack.c.bf16 %v4925_v8, %v4925_v8  ;;  %v12922_v26 = vpack.c.bf16 %v4926_v55, %v4926_v55 }
 0x4f3   : > { %v12924_v17 = vpack.c.bf16 %v4927_v27, %v4927_v27  ;;  %v12926_v24 = vpack.c.bf16 %v4928_v37, %v4928_v37  ;;  %v12928_v45 = vpack.c.bf16 %v4929_v48, %v4929_v48  ;;  %v12930_v43 = vpack.c.bf16 %v4930_v54, %v4930_v54 }
 0x4f4   : > { %v12932_v44 = vpack.c.bf16 %v4931_v33, %v4931_v33  ;;  %v12934_v30 = vpack.c.bf16 %v4932_v0, %v4932_v0  ;;  %v12936_v36 = vpack.c.bf16 %v4933_v3, %v4933_v3  ;;  %v12938_v32 = vpack.c.bf16 %v4934_v59, %v4934_v59 }
 0x4f5   : > { %v12940_v2 = vpack.c.bf16 %v4935_v62, %v4935_v62  ;;  %v12942_v14 = vpack.c.bf16 %v4936_v11, %v4936_v11  ;;  %v12944_v4 = vpack.c.bf16 %v4937_v53, %v4937_v53  ;;  %v12946_v63 = vpack.c.bf16 %v4938_v40, %v4938_v40 }
 0x4f6   : > { %v4965_v51 = vshll.u32 %v12910_v13, 16  ;;  %v4978_v42 = vshrl.u32 %v12912_v25, 16  ;;  %v4984_v56 = vshll.u32 %v4941_v29, 16  ;;  %v4988_v10 = vshrl.u32 %v4941_v29, 16 }
 0x4f7   : > { %v4994_v23 = vshll.u32 %v4942_v47, 16  ;;  %v4998_v35 = vshrl.u32 %v4942_v47, 16  ;;  %v5004_v49 = vshll.u32 %v4943_v18, 16  ;;  %v5008_v38 = vshrl.u32 %v4943_v18, 16 }
 0x4f8   : > { %v12950_v39 = vrot.slane %v4965_v51, 5  ;;  %v12952_v22 = vrot.slane %v4978_v42, 4  ;;  %v12954_v41 = vrot.slane %v4984_v56, 5  ;;  %v4990_v1 = vrot.slane %v4988_v10, 4 }
 0x4f9   : > { %v4996_v46 = vrot.slane %v4994_v23, 5  ;;  %v5000_v7 = vrot.slane %v4998_v35, 4  ;;  %v5006_v60 = vrot.slane %v5004_v49, 5  ;;  %v5010_v61 = vrot.slane %v5008_v38, 4 }
 0x4fa   : > { %v4991_v15 = vor.u32 %v4990_v1, %v12954_v41  ;;  %v5014_v28 = vshll.u32 %v4944_v16, 16  ;;  %v5018_v19 = vshrl.u32 %v4944_v16, 16  ;;  %v5024_v12 = vshll.u32 %v4945_v58, 16 }
 0x4fb   : > { %v5001_v6 = vor.u32 %v5000_v7, %v4996_v46  ;;  %v5011_v50 = vor.u32 %v5010_v61, %v5006_v60  ;;  %v5028_v20 = vshrl.u32 %v4945_v58, 16  ;;  %v5034_v31 = vshll.u32 %v4946_v5, 16 }
 0x4fc   : > { %v4992_v34 = vrot.slane %v4991_v15, 4  ;;  %v5016_v8 = vrot.slane %v5014_v28, 5  ;;  %v5020_v55 = vrot.slane %v5018_v19, 4  ;;  %v5026_v27 = vrot.slane %v5024_v12, 5 }
 0x4fd   : > { %v5002_v37 = vrot.slane %v5001_v6, 4  ;;  %v5012_v48 = vrot.slane %v5011_v50, 4  ;;  %v5030_v54 = vrot.slane %v5028_v20, 4  ;;  %v5036_v33 = vrot.slane %v5034_v31, 5  ;;  %v9584_v6 = vld [vmem:[%s14520_s5 + $0x38] sm:$0xff] }
 0x4fe   : > { %v4997_v3 = vsel %vm10438_vm4, %v4992_v34, %v4996_v46  ;;  %v5021_v59 = vor.u32 %v5020_v55, %v5016_v8  ;;  %v5038_v62 = vshrl.u32 %v4946_v5, 16  ;;  %v5044_v11 = vshll.u32 %v12914_v57, 16  ;;  %8005 = vmatpush.bf16.msrb.mxu2 %v9584_v6 }
 0x4ff   : > { %v5007_v53 = vsel %vm10438_vm4, %v5002_v37, %v5006_v60  ;;  %v5017_v40 = vsel %vm10438_vm4, %v5012_v48, %v5016_v8  ;;  %v5031_v29 = vor.u32 %v5030_v54, %v5026_v27  ;;  %v5048_v47 = vshrl.u32 %v12914_v57, 16  ;;  %5244 = vst.msk [vmem:[#allocation2 + $0x10] sm:$0xf] %vm433_vm2, %v4997_v3 }
 0x500   : > { %v5022_v18 = vrot.slane %v5021_v59, 4  ;;  %v5040_v16 = vrot.slane %v5038_v62, 4  ;;  %v5046_v58 = vrot.slane %v5044_v11, 5  ;;  %v5054_v51 = vshll.u32 %v12916_v52, 16  ;;  %5245 = vst.msk [vmem:[#allocation2 + $0x14] sm:$0xf] %vm433_vm2, %v5007_v53 }
 0x501   : > { %v5032_v5 = vrot.slane %v5031_v29, 4  ;;  %v5050_v42 = vrot.slane %v5048_v47, 4  ;;  %v5058_v56 = vshrl.u32 %v12916_v52, 16  ;;  %v5064_v10 = vshll.u32 %v12918_v9, 16  ;;  %5246 = vst.msk [vmem:[#allocation2 + $0x18] sm:$0xf] %vm433_vm2, %v5017_v40 }
 0x502   : > { %v5027_v57 = vsel %vm10438_vm4, %v5022_v18, %v5026_v27  ;;  %v5041_v23 = vor.u32 %v5040_v16, %v5036_v33  ;;  %v5056_v35 = vrot.slane %v5054_v51, 5  ;;  %v5068_v49 = vshrl.u32 %v12918_v9, 16 }
 0x503   : > { %v5037_v38 = vsel %vm10438_vm4, %v5032_v5, %v5036_v33  ;;  %v5051_v1 = vor.u32 %v5050_v42, %v5046_v58  ;;  %v5060_v46 = vrot.slane %v5058_v56, 4  ;;  %v5066_v7 = vrot.slane %v5064_v10, 5  ;;  %5247 = vst.msk [vmem:[#allocation2 + $0x1c] sm:$0xf] %vm433_vm2, %v5027_v57 }
 0x504   : > { %v5042_v52 = vrot.slane %v5041_v23, 4  ;;  %v5070_v60 = vrot.slane %v5068_v49, 4  ;;  %v5074_v61 = vshll.u32 %v12920_v21, 16  ;;  %v5078_v15 = vshrl.u32 %v12920_v21, 16  ;;  %5248 = vst.msk [vmem:[#allocation2 + $0x20] sm:$0xf] %vm433_vm2, %v5037_v38 }
 0x505   : > { %v5052_v28 = vrot.slane %v5051_v1, 4  ;;  %v5061_v19 = vor.u32 %v5060_v46, %v5056_v35  ;;  %v5084_v9 = vshll.u32 %v12922_v26, 16  ;;  %v5088_v12 = vshrl.u32 %v12922_v26, 16  ;;  %v9583_v26 = vld [vmem:[%s14520_s5 + $0x30] sm:$0xff] }
 0x506   : > { %v5047_v50 = vsel %vm10438_vm4, %v5042_v52, %v5046_v58  ;;  %v5071_v20 = vor.u32 %v5070_v60, %v5066_v7  ;;  %v5076_v31 = vrot.slane %v5074_v61, 5  ;;  %v5080_v34 = vrot.slane %v5078_v15, 4  ;;  %8006 = vmatpush.bf16.msrb.mxu2 %v9583_v26 }
 0x507   : > { %v5057_v21 = vsel %vm10438_vm4, %v5052_v28, %v5056_v35  ;;  %v5062_v8 = vrot.slane %v5061_v19, 4  ;;  %v5086_v55 = vrot.slane %v5084_v9, 5  ;;  %v5090_v27 = vrot.slane %v5088_v12, 4  ;;  %5249 = vst.msk [vmem:[#allocation2 + $0x24] sm:$0xf] %vm433_vm2, %v5047_v50 }
 0x508   : > { %v5072_v37 = vrot.slane %v5071_v20, 4  ;;  %v5081_v48 = vor.u32 %v5080_v34, %v5076_v31  ;;  %v5094_v54 = vshll.u32 %v12924_v17, 16  ;;  %v5098_v33 = vshrl.u32 %v12924_v17, 16  ;;  %5250 = vst.msk [vmem:[#allocation2 + $0x28] sm:$0xf] %vm433_vm2, %v5057_v21 }
 0x509   : > { %v5067_v3 = vsel %vm10438_vm4, %v5062_v8, %v5066_v7  ;;  %v5091_v59 = vor.u32 %v5090_v27, %v5086_v55  ;;  %v5104_v62 = vshll.u32 %v12926_v24, 16  ;;  %v5108_v11 = vshrl.u32 %v12926_v24, 16 }
 0x50a   : > { %v5077_v53 = vsel %vm10438_vm4, %v5072_v37, %v5076_v31  ;;  %v5082_v40 = vrot.slane %v5081_v48, 4  ;;  %v5096_v29 = vrot.slane %v5094_v54, 5  ;;  %v5100_v47 = vrot.slane %v5098_v33, 4  ;;  %5251 = vst.msk [vmem:[#allocation2 + $0x2c] sm:$0xf] %vm433_vm2, %v5067_v3 }
 0x50b   : > { %v5092_v18 = vrot.slane %v5091_v59, 4  ;;  %v5106_v17 = vrot.slane %v5104_v62, 5  ;;  %v5110_v16 = vrot.slane %v5108_v11, 4  ;;  %v5114_v58 = vshll.u32 %v12928_v45, 16  ;;  %5252 = vst.msk [vmem:[#allocation2 + $0x30] sm:$0xf] %vm433_vm2, %v5077_v53 }
 0x50c   : > { %v5087_v51 = vsel %vm10438_vm4, %v5082_v40, %v5086_v55  ;;  %v5101_v24 = vor.u32 %v5100_v47, %v5096_v29  ;;  %v5118_v5 = vshrl.u32 %v12928_v45, 16  ;;  %v5124_v42 = vshll.u32 %v12930_v43, 16 }
 0x50d   : > { %v5097_v56 = vsel %vm10438_vm4, %v5092_v18, %v5096_v29  ;;  %v5111_v10 = vor.u32 %v5110_v16, %v5106_v17  ;;  %v5116_v57 = vrot.slane %v5114_v58, 5  ;;  %v5128_v23 = vshrl.u32 %v12930_v43, 16  ;;  %5253 = vst.msk [vmem:[#allocation2 + $0x34] sm:$0xf] %vm433_vm2, %v5087_v51 }
 0x50e   : > { %v5102_v35 = vrot.slane %v5101_v24, 4  ;;  %v5120_v49 = vrot.slane %v5118_v5, 4  ;;  %v5126_v38 = vrot.slane %v5124_v42, 5  ;;  %v5134_v1 = vshll.u32 %v12932_v44, 16  ;;  %5254 = vst.msk [vmem:[#allocation2 + $0x38] sm:$0xf] %vm433_vm2, %v5097_v56 }
 0x50f   : > { %v5112_v46 = vrot.slane %v5111_v10, 4  ;;  %v5130_v45 = vrot.slane %v5128_v23, 4  ;;  %v5138_v7 = vshrl.u32 %v12932_v44, 16  ;;  %v5144_v52 = vshll.u32 %v12934_v30, 16  ;;  %v5319_v56 = vld [vmem:[#allocation2] sm:$0xf] }
 0x510   : > { %v5107_v60 = vsel %vm10438_vm4, %v5102_v35, %v5106_v17  ;;  %v5121_v61 = vor.u32 %v5120_v49, %v5116_v57  ;;  %v5136_v43 = vrot.slane %v5134_v1, 5  ;;  %v5148_v15 = vshrl.u32 %v12934_v30, 16  ;;  %v9582_v10 = vld [vmem:[%s14520_s5 + $0x28] sm:$0xff] }
 0x511   : > { %v5117_v28 = vsel %vm10438_vm4, %v5112_v46, %v5116_v57  ;;  %v5131_v19 = vor.u32 %v5130_v45, %v5126_v38  ;;  %v5140_v9 = vrot.slane %v5138_v7, 4  ;;  %v5146_v12 = vrot.slane %v5144_v52, 5  ;;  %5255 = vst.msk [vmem:[#allocation2 + $0x3c] sm:$0xf] %vm433_vm2, %v5107_v60  ;;  %8007 = vmatpush.bf16.msrb.mxu2 %v9582_v10 }
 0x512   : > { %v5122_v6 = vrot.slane %v5121_v61, 4  ;;  %v5150_v50 = vrot.slane %v5148_v15, 4  ;;  %v5154_v44 = vshll.u32 %v12936_v36, 16  ;;  %v5158_v20 = vshrl.u32 %v12936_v36, 16  ;;  %5256 = vst.msk [vmem:[#allocation2 + $0x40] sm:$0xf] %vm433_vm2, %v5117_v28 }
 0x513   : > { %v5132_v31 = vrot.slane %v5131_v19, 4  ;;  %v5141_v34 = vor.u32 %v5140_v9, %v5136_v43  ;;  %v5164_v30 = vshll.u32 %v12938_v32, 16  ;;  %v5168_v21 = vshrl.u32 %v12938_v32, 16 }
 0x514   : > { %v5127_v8 = vsel %vm10438_vm4, %v5122_v6, %v5126_v38  ;;  %v5151_v55 = vor.u32 %v5150_v50, %v5146_v12  ;;  %v5156_v27 = vrot.slane %v5154_v44, 5  ;;  %v5160_v26 = vrot.slane %v5158_v20, 4  ;;  %v5239_v38 = vld [vmem:[#allocation2 + $0x4] sm:$0x8] }
 0x515   : > { %v5137_v37 = vsel %vm10438_vm4, %v5132_v31, %v5136_v43  ;;  %v5142_v48 = vrot.slane %v5141_v34, 4  ;;  %v5166_v54 = vrot.slane %v5164_v30, 5  ;;  %v5170_v36 = vrot.slane %v5168_v21, 4  ;;  %5257 = vst.msk [vmem:[#allocation2 + $0x44] sm:$0xf] %vm433_vm2, %v5127_v8 }
 0x516   : > { %v5152_v33 = vrot.slane %v5151_v55, 4  ;;  %v5161_v3 = vor.u32 %v5160_v26, %v5156_v27  ;;  %v5174_v59 = vshll.u32 %v12940_v2, 16  ;;  %v5178_v32 = vshrl.u32 %v12940_v2, 16  ;;  %5258 = vst.msk [vmem:[#allocation2 + $0x48] sm:$0xf] %vm433_vm2, %v5137_v37 }
 0x517   : > { %v5147_v62 = vsel %vm10438_vm4, %v5142_v48, %v5146_v12  ;;  %v5171_v11 = vor.u32 %v5170_v36, %v5166_v54  ;;  %v5184_v53 = vshll.u32 %v12942_v14, 16  ;;  %v5188_v40 = vshrl.u32 %v12942_v14, 16  ;;  %v5266_v21 = vld [vmem:[#allocation2 + $0x68] sm:$0x3] }
 0x518   : > { %v5157_v29 = vsel %vm10438_vm4, %v5152_v33, %v5156_v27  ;;  %v5162_v47 = vrot.slane %v5161_v3, 4  ;;  %v5176_v18 = vrot.slane %v5174_v59, 5  ;;  %v5180_v17 = vrot.slane %v5178_v32, 4  ;;  %5259 = vst.msk [vmem:[#allocation2 + $0x4c] sm:$0xf] %vm433_vm2, %v5147_v62 }
 0x519   : > { %v5172_v16 = vrot.slane %v5171_v11, 4  ;;  %v5186_v2 = vrot.slane %v5184_v53, 5  ;;  %v5190_v58 = vrot.slane %v5188_v40, 4  ;;  %v5194_v51 = vshll.u32 %v12944_v4, 16  ;;  %5260 = vst.msk [vmem:[#allocation2 + $0x50] sm:$0xf] %vm433_vm2, %v5157_v29 }
 0x51a   : > { %v5167_v24 = vsel %vm10438_vm4, %v5162_v47, %v5166_v54  ;;  %v5181_v5 = vor.u32 %v5180_v17, %v5176_v18  ;;  %v5198_v14 = vshrl.u32 %v12944_v4, 16  ;;  %v5204_v42 = vshll.u32 %v12946_v63, 16  ;;  %v5323_v32 = vld [vmem:[#allocation2 + $0x10] sm:$0xf]  ;;  %v5324_v40 = vld [vmem:[#allocation2 + $0x14] sm:$0xf] }
 0x51b   : > { %v5177_v57 = vsel %vm10438_vm4, %v5172_v16, %v5176_v18  ;;  %v5191_v23 = vor.u32 %v5190_v58, %v5186_v2  ;;  %v5196_v35 = vrot.slane %v5194_v51, 5  ;;  %v5208_v49 = vshrl.u32 %v12946_v63, 16  ;;  %5261 = vst.msk [vmem:[#allocation2 + $0x54] sm:$0xf] %vm433_vm2, %v5167_v24  ;;  %v5325_v18 = vld [vmem:[#allocation2 + $0x18] sm:$0xf] }
 0x51c   : > { %v5182_v1 = vrot.slane %v5181_v5, 4  ;;  %v5200_v46 = vrot.slane %v5198_v14, 4  ;;  %v5206_v4 = vrot.slane %v5204_v42, 5  ;;  %5262 = vst.msk [vmem:[#allocation2 + $0x58] sm:$0xf] %vm433_vm2, %v5177_v57  ;;  %v5240_v7 = vsel %vm10530_vm12, %v12950_v39, %v5239_v38 }
 0x51d   : > { %v5192_v52 = vrot.slane %v5191_v23, 4  ;;  %v5210_v60 = vrot.slane %v5208_v49, 4  ;;  %5241 = vst [vmem:[#allocation2 + $0x4] sm:$0x8] %v5240_v7  ;;  %v5345_v61 = vshrl.u32 %v5319_v56, 16  ;;  %v5348_v43 = vshll.u32 %v5319_v56, 16 }
 0x51e   : > { %v5187_v63 = vsel %vm10438_vm4, %v5182_v1, %v5186_v2  ;;  %v5201_v15 = vor.u32 %v5200_v46, %v5196_v35  ;;  %v4968_v28 = vshrl.u32 %v12910_v13, 16  ;;  %v4974_v19 = vshll.u32 %v12912_v25, 16  ;;  %v5326_v58 = vld [vmem:[#allocation2 + $0x1c] sm:$0xf] }
 0x51f   : > { %v5197_v9 = vsel %vm10438_vm4, %v5192_v52, %v5196_v35  ;;  %v5211_v12 = vor.u32 %v5210_v60, %v5206_v4  ;;  %5263 = vst.msk [vmem:[#allocation2 + $0x5c] sm:$0xf] %vm433_vm2, %v5187_v63  ;;  %v5347_v6 = vrot.slane %v5345_v61, 4  ;;  %v5350_v50 = vrot.slane %v5348_v43, 5  ;;  %v5327_v43 = vld [vmem:[#allocation2 + $0x20] sm:$0xf] }
 0x520   : > { %v5202_v44 = vrot.slane %v5201_v15, 4  ;;  %5264 = vst.msk [vmem:[#allocation2 + $0x60] sm:$0xf] %vm433_vm2, %v5197_v9  ;;  %v4970_v20 = vrot.slane %v4968_v28, 4  ;;  %v4976_v31 = vrot.slane %v4974_v19, 5  ;;  %v5384_v11 = vshll.u32 %v5323_v32, 16 }
 0x521   : > { %v5212_v34 = vrot.slane %v5211_v12, 4  ;;  %v5351_v30 = vor.u32 %v5350_v50, %v5347_v6  ;;  %v5388_v53 = vshrl.u32 %v5323_v32, 16  ;;  %v5394_v47 = vshll.u32 %v5324_v40, 16  ;;  %v5328_v9 = vld [vmem:[#allocation2 + $0x24] sm:$0xf] }
 0x522   : > { %v5207_v13 = vsel %vm10438_vm4, %v5202_v44, %v5206_v4  ;;  %v4971_v25 = vor.u32 %v4970_v20, %v12950_v39  ;;  %v4981_v8 = vor.u32 %v12952_v22, %v4976_v31  ;;  %v5386_v16 = vrot.slane %v5384_v11, 5  ;;  %v5329_v20 = vld [vmem:[#allocation2 + $0x28] sm:$0xf] }
 0x523   : > { %5265 = vst.msk [vmem:[#allocation2 + $0x64] sm:$0xf] %vm433_vm2, %v5207_v13  ;;  %v5267_v27 = vsel %vm10506_vm9, %v5212_v34, %v5266_v21  ;;  %v5352_v54 = vrot.slane %v5351_v30, 4  ;;  %v5390_v2 = vrot.slane %v5388_v53, 4  ;;  %v5398_v42 = vshrl.u32 %v5324_v40, 16 }
 0x524   : > { %5268 = vst [vmem:[#allocation2 + $0x68] sm:$0x3] %v5267_v27  ;;  %v5320_v26 = vld [vmem:[#allocation2 + $0x4] sm:$0xf]  ;;  %v4972_v37 = vrot.slane %v4971_v25, 4  ;;  %v4982_v48 = vrot.slane %v4981_v8, 4 }
 0x525   : > { %v5354_v36 = vshll.u32 %v5320_v26, 16  ;;  %v5358_v33 = vshrl.u32 %v5320_v26, 16  ;;  %v5404_v57 = vshll.u32 %v5325_v18, 16  ;;  %v5408_v23 = vshrl.u32 %v5325_v18, 16 }
 0x526   : > { %v4977_v3 = vsel %vm10438_vm4, %v4972_v37, %v4976_v31  ;;  %v4987_v39 = vsel %vm10438_vm4, %v4982_v48, %v12954_v41  ;;  %v9581_v41 = vld [vmem:[%s14520_s5 + $0x20] sm:$0xff]  ;;  %v5396_v38 = vrot.slane %v5394_v47, 5  ;;  %v5391_v4 = vor.u32 %v5390_v2, %v5386_v16 }
 0x527   : > { %v5356_v22 = vrot.slane %v5354_v36, 5  ;;  %5242 = vst.msk [vmem:[#allocation2 + $0x8] sm:$0xf] %vm433_vm2, %v4977_v3  ;;  %v5360_v59 = vrot.slane %v5358_v33, 4  ;;  %8008 = vmatpush.bf16.msrb.mxu2 %v9581_v41  ;;  %v5414_v45 = vshll.u32 %v5326_v58, 16  ;;  %v5418_v60 = vshrl.u32 %v5326_v58, 16 }
 0x528   : > { %5243 = vst.msk [vmem:[#allocation2 + $0xc] sm:$0xf] %vm433_vm2, %v4987_v39  ;;  %v5400_v61 = vrot.slane %v5398_v42, 4  ;;  %v5406_v15 = vrot.slane %v5404_v57, 5  ;;  %v5410_v28 = vrot.slane %v5408_v23, 4  ;;  %v5392_v6 = vrot.slane %v5391_v4, 4 }
 0x529   : > { %v5357_v62 = vsel %vm10438_vm4, %v5352_v54, %v5356_v22  ;;  %v5361_v29 = vor.u32 %v5360_v59, %v5356_v22  ;;  %v5424_v50 = vshll.u32 %v5327_v43, 16  ;;  %v5428_v44 = vshrl.u32 %v5327_v43, 16  ;;  %v5330_v3 = vld [vmem:[#allocation2 + $0x2c] sm:$0xf]  ;;  %v5335_v43 = vld [vmem:[#allocation2 + $0x40] sm:$0xf] }
 0x52a   : > { %5593 = vrot.lane.b32.xlu0 %v5357_v62, %s9731_s17  ;;  %v5416_v34 = vrot.slane %v5414_v45, 5  ;;  %v5401_v30 = vor.u32 %v5400_v61, %v5396_v38  ;;  %v5420_v13 = vrot.slane %v5418_v60, 4  ;;  %v5411_v25 = vor.u32 %v5410_v28, %v5406_v15  ;;  %v5331_v62 = vld [vmem:[#allocation2 + $0x30] sm:$0xf] }
 0x52b   : > { %v5362_v51 = vrot.slane %v5361_v29, 4  ;;  %v5434_v8 = vshll.u32 %v5328_v9, 16  ;;  %v5438_v55 = vshrl.u32 %v5328_v9, 16  ;;  %v5444_v27 = vshll.u32 %v5329_v20, 16 }
 0x52c   : > { %v5426_v26 = vrot.slane %v5424_v50, 5  ;;  %v5448_v37 = vshrl.u32 %v5329_v20, 16  ;;  %v5430_v48 = vrot.slane %v5428_v44, 4  ;;  %v5397_v54 = vsel %vm10438_vm4, %v5392_v6, %v5396_v38  ;;  %v5333_v38 = vld [vmem:[#allocation2 + $0x38] sm:$0xf] }
 0x52d   : > { %v5402_v36 = vrot.slane %v5401_v30, 4  ;;  %v5421_v33 = vor.u32 %v5420_v13, %v5416_v34  ;;  %v5412_v39 = vrot.slane %v5411_v25, 4  ;;  %v5436_v22 = vrot.slane %v5434_v8, 5  ;;  %v5337_v25 = vld [vmem:[#allocation2 + $0x48] sm:$0xf] }
 0x52e   : > { %v5321_v17 = vld [vmem:[#allocation2 + $0x8] sm:$0xf]  ;;  %v5440_v59 = vrot.slane %v5438_v55, 4  ;;  %v5446_v32 = vrot.slane %v5444_v27, 5  ;;  %v5431_v11 = vor.u32 %v5430_v48, %v5426_v26  ;;  %v5450_v53 = vrot.slane %v5448_v37, 4 }
 0x52f   : > { %v5364_v24 = vshll.u32 %v5321_v17, 16  ;;  %v5368_v5 = vshrl.u32 %v5321_v17, 16  ;;  %v5322_v14 = vld [vmem:[#allocation2 + $0xc] sm:$0xf]  ;;  %v5454_v40 = vshll.u32 %v5330_v3, 16  ;;  %v5458_v29 = vshrl.u32 %v5330_v3, 16 }
 0x530   : > { %v5374_v56 = vshll.u32 %v5322_v14, 16  ;;  %v5378_v10 = vshrl.u32 %v5322_v14, 16  ;;  %v5407_v41 = vsel %vm10438_vm4, %v5402_v36, %v5406_v15  ;;  %v5422_v47 = vrot.slane %v5421_v33, 4  ;;  %v5338_v36 = vld [vmem:[#allocation2 + $0x4c] sm:$0xf] }
 0x531   : > { %v5366_v35 = vrot.slane %v5364_v24, 5  ;;  %v5370_v49 = vrot.slane %v5368_v5, 4  ;;  %v5417_v18 = vsel %vm10438_vm4, %v5412_v39, %v5416_v34  ;;  %v5441_v17 = vor.u32 %v5440_v59, %v5436_v22 }
 0x532   : > { %v5376_v1 = vrot.slane %v5374_v56, 5  ;;  %v5380_v46 = vrot.slane %v5378_v10, 4  ;;  %v5464_v2 = vshll.u32 %v5331_v62, 16  ;;  %v5468_v58 = vshrl.u32 %v5331_v62, 16 }
 0x533   : > { %v5367_v7 = vsel %vm10438_vm4, %v5362_v51, %v5366_v35  ;;  %v5371_v52 = vor.u32 %v5370_v49, %v5366_v35  ;;  %v9580_v51 = vld [vmem:[%s14520_s5 + $0x18] sm:$0xff]  ;;  %v5432_v24 = vrot.slane %v5431_v11, 4  ;;  %v5451_v5 = vor.u32 %v5450_v53, %v5446_v32 }
 0x534   : > { %5595 = vrot.lane.b32.xlu1 %v5367_v7, %s9731_s17  ;;  %v5381_v63 = vor.u32 %v5380_v46, %v5376_v1  ;;  %v5456_v14 = vrot.slane %v5454_v40, 5  ;;  %v5460_v42 = vrot.slane %v5458_v29, 4  ;;  %v5427_v56 = vsel %vm10438_vm4, %v5422_v47, %v5426_v26  ;;  %8009 = vmatpush.bf16.msrb.mxu2 %v9580_v51 }
 0x535   : > { %v5372_v19 = vrot.slane %v5371_v52, 4  ;;  %v5442_v23 = vrot.slane %v5441_v17, 4  ;;  %v5466_v35 = vrot.slane %v5464_v2, 5  ;;  %v5470_v49 = vrot.slane %v5468_v58, 4  ;;  %v5339_v17 = vld [vmem:[#allocation2 + $0x50] sm:$0xf] }
 0x536   : > { %v5382_v12 = vrot.slane %v5381_v63, 4  ;;  %v5437_v46 = vsel %vm10438_vm4, %v5432_v24, %v5436_v22  ;;  %v5452_v4 = vrot.slane %v5451_v5, 4  ;;  %v5461_v45 = vor.u32 %v5460_v42, %v5456_v14  ;;  %v5340_v2 = vld [vmem:[#allocation2 + $0x54] sm:$0xf] }
 0x537   : > { %v5377_v31 = vsel %vm10438_vm4, %v5372_v19, %v5376_v1  ;;  %v5334_v1 = vld [vmem:[#allocation2 + $0x3c] sm:$0xf]  ;;  %v5484_v60 = vshll.u32 %v5333_v38, 16  ;;  %v5488_v61 = vshrl.u32 %v5333_v38, 16  ;;  %v5447_v63 = vsel %vm10438_vm4, %v5442_v23, %v5446_v32 }
 0x538   : > { %v5387_v21 = vsel %vm10438_vm4, %v5382_v12, %v5386_v16  ;;  %5597 = vrot.lane.b32.xlu2 %v5377_v31, %s9731_s17  ;;  %v5332_v16 = vld [vmem:[#allocation2 + $0x34] sm:$0xf]  ;;  %v5471_v15 = vor.u32 %v5470_v49, %v5466_v35  ;;  %v5494_v28 = vshll.u32 %v5334_v1, 16  ;;  %v5498_v19 = vshrl.u32 %v5334_v1, 16 }
 0x539   : > { %5599 = vrot.lane.b32.xlu0 %v5387_v21, %s9731_s17  ;;  %v5474_v10 = vshll.u32 %v5332_v16, 16  ;;  %v5478_v57 = vshrl.u32 %v5332_v16, 16  ;;  %v5462_v9 = vrot.slane %v5461_v45, 4  ;;  %v5504_v12 = vshll.u32 %v5335_v43, 16  ;;  %v5336_v21 = vld [vmem:[#allocation2 + $0x44] sm:$0xf] }
 0x53a   : > { %v5508_v6 = vshrl.u32 %v5335_v43, 16  ;;  %v5457_v50 = vsel %vm10438_vm4, %v5452_v4, %v5456_v14  ;;  %v5486_v20 = vrot.slane %v5484_v60, 5  ;;  %v5490_v31 = vrot.slane %v5488_v61, 4  ;;  %v9579_v16 = vld [vmem:[%s14520_s5 + $0x10] sm:$0xff]  ;;  %v5342_v60 = vld [vmem:[#allocation2 + $0x5c] sm:$0xf] }
 0x53b   : > { %v5476_v7 = vrot.slane %v5474_v10, 5  ;;  %v5480_v52 = vrot.slane %v5478_v57, 4  ;;  %v5472_v34 = vrot.slane %v5471_v15, 4  ;;  %v5496_v30 = vrot.slane %v5494_v28, 5  ;;  %8010 = vmatpush.bf16.msrb.mxu2 %v9579_v16  ;;  %v5341_v10 = vld [vmem:[#allocation2 + $0x58] sm:$0xf] }
 0x53c   : > { %5601 = vrot.lane.b32.xlu1 %v5397_v54, %s9731_s17  ;;  %v5500_v13 = vrot.slane %v5498_v19, 4  ;;  %v5467_v8 = vsel %vm10438_vm4, %v5462_v9, %v5466_v35  ;;  %v5506_v55 = vrot.slane %v5504_v12, 5  ;;  %v5510_v27 = vrot.slane %v5508_v6, 4 }
 0x53d   : > { %v5481_v44 = vor.u32 %v5480_v52, %v5476_v7  ;;  %v5491_v37 = vor.u32 %v5490_v31, %v5486_v20  ;;  %v5514_v48 = vshll.u32 %v5336_v21, 16  ;;  %v5518_v54 = vshrl.u32 %v5336_v21, 16  ;;  %v5343_v31 = vld [vmem:[#allocation2 + $0x60] sm:$0x7] }
 0x53e   : > { %v5477_v33 = vsel %vm10438_vm4, %v5472_v34, %v5476_v7  ;;  %v5501_v3 = vor.u32 %v5500_v13, %v5496_v30  ;;  %v5524_v39 = vshll.u32 %v5337_v25, 16  ;;  %v5528_v22 = vshrl.u32 %v5337_v25, 16 }
 0x53f   : > { %v5482_v26 = vrot.slane %v5481_v44, 4  ;;  %v5511_v59 = vor.u32 %v5510_v27, %v5506_v55  ;;  %v5534_v32 = vshll.u32 %v5338_v36, 16  ;;  %v5538_v62 = vshrl.u32 %v5338_v36, 16 }
 0x540   : > { %5603 = vrot.lane.b32.xlu2 %v5407_v41, %s9731_s17  ;;  %v5492_v53 = vrot.slane %v5491_v37, 4  ;;  %v5516_v40 = vrot.slane %v5514_v48, 5  ;;  %v5520_v29 = vrot.slane %v5518_v54, 4  ;;  %v5502_v41 = vrot.slane %v5501_v3, 4  ;;  %v13156_v3 = vld [vmem:[#allocation2 + $0x64] sm:$0xf] }
 0x541   : > { %5605 = vrot.lane.b32.xlu0 %v5417_v18, %s9731_s17  ;;  %v5487_v11 = vsel %vm10438_vm4, %v5482_v26, %v5486_v20  ;;  %v5526_v47 = vrot.slane %v5524_v39, 5  ;;  %v5530_v18 = vrot.slane %v5528_v22, 4  ;;  %v5512_v58 = vrot.slane %v5511_v59, 4  ;;  %v9578_v39 = vld [vmem:[%s14520_s5 + $0x8] sm:$0xff] }
 0x542   : > { %v5536_v51 = vrot.slane %v5534_v32, 5  ;;  %v5540_v24 = vrot.slane %v5538_v62, 4  ;;  %v5497_v5 = vsel %vm10438_vm4, %v5492_v53, %v5496_v30  ;;  %v5521_v14 = vor.u32 %v5520_v29, %v5516_v40  ;;  %8011 = vmatpush.bf16.msrb.mxu2 %v9578_v39  ;;  %v6724_v53 = vld [vmem:[#allocation2 + $0xc] sm:$0xc] }
 0x543   : > { %v5544_v42 = vshll.u32 %v5339_v17, 16  ;;  %v5507_v57 = vsel %vm10438_vm4, %v5502_v41, %v5506_v55  ;;  %v5531_v23 = vor.u32 %v5530_v18, %v5526_v47  ;;  %v5554_v35 = vshll.u32 %v5340_v2, 16 }
 0x544   : > { %5607 = vrot.lane.b32.xlu1 %v5427_v56, %s9731_s17  ;;  %v5548_v56 = vshrl.u32 %v5339_v17, 16  ;;  %v5558_v49 = vshrl.u32 %v5340_v2, 16  ;;  %v5541_v38 = vor.u32 %v5540_v24, %v5536_v51  ;;  %v5564_v1 = vshll.u32 %v5341_v10, 16  ;;  %v6725_v17 = vld [vmem:[#allocation2 + $0x10] sm:$0xf] }
 0x545   : > { %v5517_v4 = vsel %vm10438_vm4, %v5512_v58, %v5516_v40  ;;  %v5522_v45 = vrot.slane %v5521_v14, 4  ;;  %v5546_v7 = vrot.slane %v5544_v42, 5  ;;  %v5532_v61 = vrot.slane %v5531_v23, 4  ;;  %v5892_v40 = vld [vmem:[#allocation2 + $0x68] sm:$0x1] }
 0x546   : > { %v5550_v52 = vrot.slane %v5548_v56, 4  ;;  %v5556_v43 = vrot.slane %v5554_v35, 5  ;;  %v5542_v15 = vrot.slane %v5541_v38, 4  ;;  %v5566_v28 = vrot.slane %v5564_v1, 5  ;;  %v5271_v24 = vld [vmem:[#allocation2 + $0x8] sm:$0xf] }
 0x547   : > { %v5574_v9 = vshll.u32 %v5342_v60, 16  ;;  %v5527_v12 = vsel %vm10438_vm4, %v5522_v45, %v5526_v47  ;;  %v5537_v44 = vsel %vm10438_vm4, %v5532_v61, %v5536_v51  ;;  %v5584_v25 = vshll.u32 %v5343_v31, 16  ;;  %v5867_v51 = vld [vmem:[#allocation2 + $0x4] sm:$0x8]  ;;  %v5869_v42 = vld [vmem:[#allocation2 + $0xc] sm:$0xf] }
 0x548   : > { %5609 = vrot.lane.b32.xlu2 %v5437_v46, %s9731_s17  ;;  %v5568_v46 = vshrl.u32 %v5341_v10, 16  ;;  %v5551_v6 = vor.u32 %v5550_v52, %v5546_v7  ;;  %v5547_v34 = vsel %vm10438_vm4, %v5542_v15, %v5546_v7  ;;  %v5990_v62 = vrot.slane %v13156_v3, 7  ;;  %5296 = vst.msk [vmem:[#allocation3 + $0x28] sm:$0xf] %vm433_vm2, %v5271_v24  ;;  %v6726_v38 = vld [vmem:[#allocation2 + $0x14] sm:$0xf] }
 0x549   : > { %5611 = vrot.lane.b32.xlu0 %v5447_v63, %s9731_s17  ;;  %v5560_v63 = vrot.slane %v5558_v49, 4  ;;  %v5576_v13 = vrot.slane %v5574_v9, 5  ;;  %v5586_v48 = vrot.slane %v5584_v25, 5  ;;  %v6751_v16 = vshrl.u32 %v6724_v53, 16  ;;  %v5274_v61 = vld [vmem:[#allocation2 + $0x14] sm:$0xf] }
 0x54a   : > { %v5570_v19 = vrot.slane %v5568_v46, 4  ;;  %v5552_v21 = vrot.slane %v5551_v6, 4  ;;  %v5992_v47 = vrot.slane %v5990_v62, 4  ;;  %v6754_v2 = vshll.u32 %v6724_v53, 16  ;;  %5299 = vst.msk [vmem:[#allocation3 + $0x64] sm:$0xf] %vm433_vm2, %v5274_v61 }
 0x54b   : > { %v5561_v20 = vor.u32 %v5560_v63, %v5556_v43  ;;  %v5993_v58 = vrot.slane %v5892_v40, 7  ;;  %v6760_v0 = vshrl.u32 %v6725_v17, 16  ;;  %v6763_v56 = vshll.u32 %v6725_v17, 16  ;;  %v6401_v6 = vld [vmem:[#allocation2 + $0xc] sm:$0xf]  ;;  %v9592_v24 = vld [vmem:[%s14520_s5 + $0x78] sm:$0xff] }
 0x54c   : > { %5613 = vrot.lane.b32.xlu1 %v5457_v50, %s9731_s17  ;;  %v5578_v50 = vshrl.u32 %v5342_v60, 16  ;;  %v5571_v30 = vor.u32 %v5570_v19, %v5566_v28  ;;  %v5557_v37 = vsel %vm10438_vm4, %v5552_v21, %v5556_v43  ;;  %v6756_v23 = vrot.slane %v6754_v2, 7  ;;  %v6400_v43 = vld [vmem:[#allocation2 + $0x8] sm:$0xf]  ;;  %v5277_v21 = vld [vmem:[#allocation2 + $0x20] sm:$0xf]  ;;  %8078 = vmatpush.bf16.msra.mxu3 %v9592_v24 }
 0x54d   : > { %v5562_v27 = vrot.slane %v5561_v20, 4  ;;  %v5994_v14 = vsel %vm10695_vm15, %v5992_v47, %v5993_v58  ;;  %v9000_v35 = vrot.slane %v5867_v51, 11  ;;  %v5924_v49 = vrot.slane %v5869_v42, 7  ;;  %v5871_v25 = vld [vmem:[#allocation2 + $0x14] sm:$0xf] }
 0x54e   : > { %v5580_v55 = vrot.slane %v5578_v50, 4  ;;  %v5572_v26 = vrot.slane %v5571_v30, 4  ;;  %v6762_v46 = vrot.slane %v6760_v0, 6  ;;  %v6770_v52 = vshrl.u32 %v6726_v38, 16  ;;  %5302 = vst.msk [vmem:[#allocation3 + $0xa0] sm:$0xf] %vm433_vm2, %v5277_v21 }
 0x54f   : > { %v6773_v60 = vshll.u32 %v6726_v38, 16  ;;  %v5272_v53 = vld [vmem:[#allocation2 + $0xc] sm:$0xf]  ;;  %v6402_v40 = vld [vmem:[#allocation2 + $0x10] sm:$0xf] }
 0x550   : > { %5615 = vrot.lane.b32.xlu2 %v5467_v8, %s9731_s17  ;;  %v5588_v8 = vshrl.u32 %v5343_v31, 16  ;;  %v5581_v36 = vor.u32 %v5580_v55, %v5576_v13  ;;  %v5577_v22 = vsel %vm10438_vm4, %v5572_v26, %v5576_v13  ;;  %v6772_v19 = vrot.slane %v6770_v52, 6  ;;  %v5269_v13 = vld [vmem:[#allocation2] sm:$0xf]  ;;  %5297 = vst.msk [vmem:[#allocation3 + $0x3c] sm:$0xf] %vm433_vm2, %v5272_v53 }
 0x551   : > { %5617 = vrot.lane.b32.xlu0 %v5477_v33, %s9731_s17  ;;  %v5567_v33 = vsel %vm10438_vm4, %v5562_v27, %v5566_v28  ;;  %v9577_v28 = vld [vmem:[%s14520_s5] sm:$0xff]  ;;  %v6775_v9 = vrot.slane %v6773_v60, 7  ;;  %5294 = vst.msk [vmem:[#allocation3] sm:$0xf] %vm433_vm2, %v5269_v13  ;;  %v5926_v55 = vrot.slane %v5924_v49, 4 }
 0x552   : > { %v5590_v54 = vrot.slane %v5588_v8, 4  ;;  %v5582_v32 = vrot.slane %v5581_v36, 4  ;;  %8012 = vmatpush.bf16.msrb.mxu2 %v9577_v28  ;;  %v6728_v36 = vld [vmem:[#allocation2 + $0x1c] sm:$0xf]  ;;  %v5280_v47 = vld [vmem:[#allocation2 + $0x2c] sm:$0xf] }
 0x553   : > { %v6776_v30 = vor.u32 %v6775_v9, %v6772_v19  ;;  %v5872_v2 = vld [vmem:[#allocation2 + $0x18] sm:$0xf]  ;;  %5305 = vst.msk [vmem:[#allocation3 + $0xdc] sm:$0xf] %vm433_vm2, %v5280_v47  ;;  %v6403_v58 = vld [vmem:[#allocation2 + $0x14] sm:$0xf] }
 0x554   : > { %5619 = vrot.lane.b32.xlu1 %v5487_v11, %s9731_s17  ;;  %v5591_v59 = vor.u32 %v5590_v54, %v5586_v48  ;;  %v5868_v11 = vld [vmem:[#allocation2 + $0x8] sm:$0xf]  ;;  %v5587_v41 = vsel %vm10438_vm4, %v5582_v32, %v5586_v48  ;;  %v5270_v48 = vld [vmem:[#allocation2 + $0x4] sm:$0xf]  ;;  %v5930_v54 = vrot.slane %v5871_v25, 7  ;;  %v6790_v32 = vshrl.u32 %v6728_v36, 16 }
 0x555   : > { %v5921_v18 = vrot.slane %v5868_v11, 7  ;;  %5295 = vst.msk [vmem:[#allocation3 + $0x14] sm:$0xf] %vm433_vm2, %v5270_v48  ;;  %v6793_v11 = vshll.u32 %v6728_v36, 16  ;;  %v5933_v42 = vrot.slane %v5872_v2, 7  ;;  %v9608_v28 = vld [vmem:[%s14520_s5 + $0xf8] sm:$0xff] }
 0x556   : > { %v5592_v29 = vrot.slane %v5591_v59, 4  ;;  %v6792_v17 = vrot.slane %v6790_v32, 6  ;;  %v6729_v0 = vld [vmem:[#allocation2 + $0x20] sm:$0xf]  ;;  %v5932_v38 = vrot.slane %v5930_v54, 4  ;;  %8224 = vmatpush.bf16.msra.mxu1 %v9608_v28 }
 0x557   : > { %v5923_v10 = vrot.slane %v5921_v18, 4  ;;  %v5922_v1 = vsel %vm10695_vm15, %v9000_v35, %v5921_v18  ;;  %v5273_v18 = vld [vmem:[#allocation2 + $0x10] sm:$0xf]  ;;  %v5873_v35 = vld [vmem:[#allocation2 + $0x1c] sm:$0xf] }
 0x558   : > { %5621 = vrot.lane.b32.xlu2 %v5497_v5, %s9731_s17  ;;  %5298 = vst.msk [vmem:[#allocation3 + $0x50] sm:$0xf] %vm433_vm2, %v5273_v18  ;;  %v5936_v52 = vrot.slane %v5873_v35, 7  ;;  %v6730_v60 = vld [vmem:[#allocation2 + $0x24] sm:$0xf]  ;;  %v5934_v61 = vsel %vm10695_vm15, %v5932_v38, %v5933_v42 }
 0x559   : > { %5623 = vrot.lane.b32.xlu0 %v5507_v57, %s9731_s17  ;;  %v6753_v57 = vrot.slane %v6751_v16, 6  ;;  %v5925_v45 = vsel %vm10695_vm15, %v5923_v10, %v5924_v49  ;;  %v6795_v16 = vrot.slane %v6793_v11, 7  ;;  %v9612_v10 = vld [vmem:[%s14520_s5 + $0x118] sm:$0xff]  ;;  %v6810_v9 = vshrl.u32 %v6730_v60, 16  ;;  %v5286_v13 = vld [vmem:[#allocation2 + $0x44] sm:$0xf] }
 0x55a   : > { %8301 = vmatpush.bf16.msra.mxu2 %v9612_v10  ;;  %v5279_v21 = vld [vmem:[#allocation2 + $0x28] sm:$0xf]  ;;  %5311 = vst.msk [vmem:[#allocation3 + $0x154] sm:$0xf] %vm433_vm2, %v5286_v13  ;;  %v5938_v32 = vrot.slane %v5936_v52, 4 }
 0x55b   : > { %v6757_v7 = vor.u32 %v6756_v23, %v6753_v57  ;;  %v5275_v57 = vld [vmem:[#allocation2 + $0x18] sm:$0xf]  ;;  %v6812_v25 = vrot.slane %v6810_v9, 6  ;;  %5304 = vst.msk [vmem:[#allocation3 + $0xc8] sm:$0xf] %vm433_vm2, %v5279_v21 }
 0x55c   : > { %5625 = vrot.lane.b32.xlu1 %v5517_v4, %s9731_s17  ;;  %v6765_v4 = vrot.slane %v6763_v56, 7  ;;  %v6796_v56 = vor.u32 %v6795_v16, %v6792_v17  ;;  %5300 = vst.msk [vmem:[#allocation3 + $0x78] sm:$0xf] %vm433_vm2, %v5275_v57  ;;  %v6732_v17 = vld [vmem:[#allocation2 + $0x2c] sm:$0xf] }
 0x55d   : > { %v6758_v15 = vrot.slane %v6757_v7, 4  ;;  %v5276_v7 = vld [vmem:[#allocation2 + $0x1c] sm:$0xf]  ;;  %v6830_v24 = vshrl.u32 %v6732_v17, 16  ;;  %v6406_v57 = vld [vmem:[#allocation2 + $0x20] sm:$0xf] }
 0x55e   : > { %v6766_v63 = vor.u32 %v6765_v4, %v6762_v46  ;;  %v6803_v46 = vshll.u32 %v6729_v0, 16  ;;  %v5935_v4 = vrot.slane %v5933_v42, 4  ;;  %5301 = vst.msk [vmem:[#allocation3 + $0x8c] sm:$0xf] %vm433_vm2, %v5276_v7  ;;  %v9591_v42 = vld [vmem:[%s14520_s5 + $0x70] sm:$0xff] }
 0x55f   : > { %8079 = vmatpush.bf16.msra.mxu3 %v9591_v42  ;;  %v5292_v38 = vld [vmem:[#allocation2 + $0x5c] sm:$0xf]  ;;  %v13279_v9 = vld [vmem:[#allocation2 + $0x2c] sm:$0xf] }
 0x560   : > { %5627 = vrot.lane.b32.xlu2 %v5527_v12, %s9731_s17  ;;  %v5870_v12 = vld [vmem:[#allocation2 + $0x10] sm:$0xf]  ;;  %v6768_v50 = vrot.slane %v6766_v63, 4  ;;  %v6767_v20 = vsel %vm10809_vm13, %v6758_v15, %v6766_v63  ;;  %v6805_v63 = vrot.slane %v6803_v46, 7  ;;  %v9600_v15 = vld [vmem:[%s14520_s5 + $0xb8] sm:$0xff]  ;;  %v5937_v19 = vsel %vm10695_vm15, %v5935_v4, %v5936_v52 }
 0x561   : > { %5629 = vrot.lane.b32.xlu0 %v5537_v44, %s9731_s17  ;;  %v5927_v31 = vrot.slane %v5870_v12, 7  ;;  %v6813_v12 = vshll.u32 %v6730_v60, 16  ;;  %8151 = vmatpush.bf16.msra.mxu0 %v9600_v15  ;;  %v6832_v46 = vrot.slane %v6830_v24, 6  ;;  %5317 = vst.msk [vmem:[#allocation3 + $0x1cc] sm:$0xf] %vm433_vm2, %v5292_v38 }
 0x562   : > { %v6777_v8 = vsel %vm10809_vm13, %v6768_v50, %v6776_v30  ;;  %v6733_v15 = vld [vmem:[#allocation2 + $0x30] sm:$0xf] }
 0x564   : > { %5631 = vrot.lane.b32.xlu1 %v5547_v34, %s9731_s17  ;;  %v6727_v34 = vld [vmem:[#allocation2 + $0x18] sm:$0xf] }
 0x565   : > { %v6780_v27 = vshrl.u32 %v6727_v34, 16  ;;  %v6783_v26 = vshll.u32 %v6727_v34, 16  ;;  %v6798_v34 = vrot.slane %v6796_v56, 4 }
 0x567   : > { %v6782_v39 = vrot.slane %v6780_v27, 6  ;;  %v6405_v27 = vld [vmem:[#allocation2 + $0x1c] sm:$0xf] }
 0x568   : > { %5633 = vrot.lane.b32.xlu2 %v5557_v37, %s9731_s17  ;;  %v5929_v37 = vrot.slane %v5927_v31, 4 }
 0x569   : > { %5635 = vrot.lane.b32.xlu0 %v5567_v33, %s9731_s17  ;;  %v5928_v33 = vsel %vm10695_vm15, %v5926_v55, %v5927_v31  ;;  %v5874_v55 = vld [vmem:[#allocation2 + $0x20] sm:$0xf] }
 0x56a   : > { %v5931_v59 = vsel %vm10695_vm15, %v5929_v37, %v5930_v54  ;;  %v5939_v48 = vrot.slane %v5874_v55, 7  ;;  %v6731_v54 = vld [vmem:[#allocation2 + $0x28] sm:$0xf]  ;;  %v5693_v55 = vld [vmem:[#allocation2] sm:$0xe] }
 0x56b   : > { %v6820_v11 = vshrl.u32 %v6731_v54, 16  ;;  %v6823_v53 = vshll.u32 %v6731_v54, 16  ;;  %v5948_v54 = vrot.slane %v13279_v9, 7 }
 0x56c   : > { %5637 = vrot.lane.b32.xlu1 %v5577_v22, %s9731_s17  ;;  %v6785_v22 = vrot.slane %v6783_v26, 7  ;;  %v5940_v16 = vsel %vm10695_vm15, %v5938_v32, %v5939_v48 }
 0x56d   : > { %v6822_v2 = vrot.slane %v6820_v11, 6 }
 0x570   : > { %5639 = vrot.lane.b32.xlu2 %v5587_v41, %s9731_s17  ;;  %v6778_v41 = vrot.slane %v6776_v30, 4 }
 0x571   : > { %5641 = vrot.lane.b32.xlu0 %v5592_v29, %s9731_s17  ;;  %v6786_v29 = vor.u32 %v6785_v22, %v6782_v39  ;;  %v13246_v22 = vld [vmem:[#allocation2 + $0x24] sm:$0xf] }
 0x572   : > { %v5942_v18 = vrot.slane %v13246_v22, 7 }
 0x573   : > { %v6788_v51 = vrot.slane %v6786_v29, 4 }
 0x574   : > { %6043 = vrot.lane.b32.xlu1 %v5994_v14, %s9731_s17  ;;  %v6787_v14 = vsel %vm10809_vm13, %v6778_v41, %v6786_v29  ;;  %v5289_v29 = vld [vmem:[#allocation2 + $0x50] sm:$0xf]  ;;  %v5282_v41 = vld [vmem:[#allocation2 + $0x34] sm:$0xf] }
 0x575   : > { %v6797_v49 = vsel %vm10809_vm13, %v6788_v51, %v6796_v56  ;;  %5314 = vst.msk [vmem:[#allocation3 + $0x190] sm:$0xf] %vm433_vm2, %v5289_v29  ;;  %v6735_v29 = vld [vmem:[#allocation2 + $0x38] sm:$0xf] }
 0x576   : > { %5307 = vst.msk [vmem:[#allocation3 + $0x104] sm:$0xf] %vm433_vm2, %v5282_v41  ;;  %v6408_v41 = vld [vmem:[#allocation2 + $0x28] sm:$0xf]  ;;  %v6860_v42 = vshrl.u32 %v6735_v29, 16 }
 0x578   : > { %5995 = vrot.lane.b32.xlu2 %v5922_v1, %s9731_s17  ;;  %v6800_v1 = vshrl.u32 %v6729_v0, 16  ;;  %v5284_v0 = vld [vmem:[#allocation2 + $0x3c] sm:$0xf] }
 0x579   : > { %5997 = vrot.lane.b32.xlu0 %v5925_v45, %s9731_s17  ;;  %v5283_v45 = vld [vmem:[#allocation2 + $0x38] sm:$0xf]  ;;  %5309 = vst.msk [vmem:[#allocation3 + $0x12c] sm:$0xf] %vm433_vm2, %v5284_v0  ;;  %v13319_v0 = vld [vmem:[#allocation2 + $0x8] sm:$0xf] }
 0x57a   : > { %5308 = vst.msk [vmem:[#allocation3 + $0x118] sm:$0xf] %vm433_vm2, %v5283_v45  ;;  %v5285_v45 = vld [vmem:[#allocation2 + $0x40] sm:$0xf] }
 0x57b   : > { %5310 = vst.msk [vmem:[#allocation3 + $0x140] sm:$0xf] %vm433_vm2, %v5285_v45  ;;  %v5291_v45 = vld [vmem:[#allocation2 + $0x58] sm:$0xf] }
 0x57c   : > { %6450 = vrot.lane.b32.xlu1 %v6400_v43, %s9731_s17  ;;  %v6802_v43 = vrot.slane %v6800_v1, 6  ;;  %v6407_v1 = vld [vmem:[#allocation2 + $0x24] sm:$0xf]  ;;  %5316 = vst.msk [vmem:[#allocation3 + $0x1b8] sm:$0xf] %vm433_vm2, %v5291_v45 }
 0x57e   : > { %v6806_v31 = vor.u32 %v6805_v63, %v6802_v43 }
 0x580   : > { %6452 = vrot.lane.b32.xlu2 %v6401_v6, %s9731_s17  ;;  %v5278_v6 = vld [vmem:[#allocation2 + $0x24] sm:$0xf]  ;;  %v6808_v26 = vrot.slane %v6806_v31, 4  ;;  %v6807_v37 = vsel %vm10809_vm13, %v6798_v34, %v6806_v31  ;;  %v9607_v31 = vld [vmem:[%s14520_s5 + $0xf0] sm:$0xff]  ;;  %v5287_v34 = vld [vmem:[#allocation2 + $0x48] sm:$0xf] }
 0x581   : > { %7004 = vrot.lane.b32.xlu0 %v6767_v20, %s9731_s17  ;;  %5303 = vst.msk [vmem:[#allocation3 + $0xb4] sm:$0xf] %vm433_vm2, %v5278_v6  ;;  %v6404_v20 = vld [vmem:[#allocation2 + $0x18] sm:$0xf]  ;;  %8225 = vmatpush.bf16.msra.mxu1 %v9607_v31  ;;  %v6736_v31 = vld [vmem:[#allocation2 + $0x3c] sm:$0xf] }
 0x582   : > { %5312 = vst.msk [vmem:[#allocation3 + $0x168] sm:$0xf] %vm433_vm2, %v5287_v34  ;;  %v9598_v34 = vld [vmem:[%s14520_s5 + $0xa8] sm:$0xff] }
 0x584   : > { %7006 = vrot.lane.b32.xlu1 %v6777_v8, %s9731_s17  ;;  %v6815_v8 = vrot.slane %v6813_v12, 7  ;;  %v9599_v12 = vld [vmem:[%s14520_s5 + $0xb0] sm:$0xff] }
 0x585   : > { %8152 = vmatpush.bf16.msra.mxu0 %v9599_v12 }
 0x586   : > { %v6816_v36 = vor.u32 %v6815_v8, %v6812_v25  ;;  %v5944_v25 = vrot.slane %v5942_v18, 4  ;;  %v6734_v8 = vld [vmem:[#allocation2 + $0x34] sm:$0xf] }
 0x588   : > { %5999 = vrot.lane.b32.xlu2 %v5928_v33, %s9731_s17  ;;  %v5281_v33 = vld [vmem:[#allocation2 + $0x30] sm:$0xf] }
 0x589   : > { %6001 = vrot.lane.b32.xlu0 %v5931_v59, %s9731_s17  ;;  %5306 = vst.msk [vmem:[#allocation3 + $0xf0] sm:$0xf] %vm433_vm2, %v5281_v33  ;;  %v6817_v59 = vsel %vm10809_vm13, %v6808_v26, %v6816_v36  ;;  %v8999_v26 = vrot.slane %v5693_v55, 9  ;;  %8153 = vmatpush.bf16.msra.mxu0 %v9598_v34 }
 0x58c   : > { %6454 = vrot.lane.b32.xlu1 %v6402_v40, %s9731_s17  ;;  %v5941_v40 = vrot.slane %v5939_v48, 4 }
 0x58e   : > { %v5943_v51 = vsel %vm10695_vm15, %v5941_v40, %v5942_v18 }
 0x590   : > { %6456 = vrot.lane.b32.xlu2 %v6403_v58, %s9731_s17  ;;  %v6825_v58 = vrot.slane %v6823_v53, 7  ;;  %v5288_v53 = vld [vmem:[#allocation2 + $0x4c] sm:$0xf] }
 0x591   : > { %7008 = vrot.lane.b32.xlu0 %v6787_v14, %s9731_s17  ;;  %v6833_v14 = vshll.u32 %v6732_v17, 16  ;;  %5313 = vst.msk [vmem:[#allocation3 + $0x17c] sm:$0xf] %vm433_vm2, %v5288_v53 }
 0x592   : > { %v5598_v23 = vpop.permute.xlu2 %5597  ;;  %v6826_v35 = vor.u32 %v6825_v58, %v6822_v2  ;;  %v13314_v2 = vld [vmem:[#allocation2 + $0x30] sm:$0xf]  ;;  %v5290_v58 = vld [vmem:[#allocation2 + $0x54] sm:$0xf] }
 0x593   : > { %5670 = vst.msk [vmem:[#allocation3 + $0x28] sm:$0xf] %vm1899_vm1, %v5598_v23  ;;  %v6818_v23 = vrot.slane %v6816_v36, 4  ;;  %v6835_v4 = vrot.slane %v6833_v14, 7 }
 0x594   : > { %7010 = vrot.lane.b32.xlu1 %v6797_v49, %s9731_s17  ;;  %v5876_v49 = vld [vmem:[#allocation2 + $0x28] sm:$0xf]  ;;  %v6828_v43 = vrot.slane %v6826_v35, 4  ;;  %5315 = vst.msk [vmem:[#allocation3 + $0x1a4] sm:$0xf] %vm433_vm2, %v5290_v58 }
 0x595   : > { %v5945_v63 = vrot.slane %v5876_v49, 7  ;;  %v6827_v28 = vsel %vm10809_vm13, %v6818_v23, %v6826_v35  ;;  %v6127_v23 = vshrl.u32 %v13319_v0, 16  ;;  %v9590_v49 = vld [vmem:[%s14520_s5 + $0x68] sm:$0xff]  ;;  %v6410_v58 = vld [vmem:[#allocation2 + $0x30] sm:$0xf] }
 0x596   : > { %8080 = vmatpush.bf16.msra.mxu3 %v9590_v49  ;;  %v9606_v49 = vld [vmem:[%s14520_s5 + $0xe8] sm:$0xff] }
 0x597   : > { %v5947_v21 = vrot.slane %v5945_v63, 4  ;;  %v5946_v22 = vsel %vm10695_vm15, %v5944_v25, %v5945_v63  ;;  %v5950_v25 = vrot.slane %v5948_v54, 4  ;;  %8226 = vmatpush.bf16.msra.mxu1 %v9606_v49  ;;  %v13484_v49 = vld [vmem:[#allocation2 + $0x14] sm:$0xf] }
 0x598   : > { %6003 = vrot.lane.b32.xlu2 %v5934_v61, %s9731_s17 }
 0x599   : > { %6005 = vrot.lane.b32.xlu0 %v5937_v19, %s9731_s17  ;;  %v13277_v19 = vor.u32 %v6835_v4, %v6832_v46  ;;  %v5949_v40 = vsel %vm10695_vm15, %v5947_v21, %v5948_v54  ;;  %v5951_v4 = vrot.slane %v13314_v2, 7  ;;  %v13387_v2 = vld [vmem:[#allocation2 + $0x60] sm:$0x7] }
 0x59a   : > { %v5604_v50 = vpop.permute.xlu2 %5603 }
 0x59b   : > { %5673 = vst.msk [vmem:[#allocation3 + $0x64] sm:$0xf] %vm1899_vm1, %v5604_v50  ;;  %v6840_v50 = vshrl.u32 %v6733_v15, 16  ;;  %v6837_v13 = vsel %vm10809_vm13, %v6828_v43, %v13277_v19  ;;  %v6838_v18 = vrot.slane %v13277_v19, 4  ;;  %v5953_v21 = vrot.slane %v5951_v4, 4 }
 0x59c   : > { %6458 = vrot.lane.b32.xlu1 %v6404_v20, %s9731_s17  ;;  %v5594_v30 = vpop.permute.xlu0 %5593  ;;  %v6843_v20 = vshll.u32 %v6733_v15, 16  ;;  %v6862_v15 = vrot.slane %v6860_v42, 6  ;;  %v5952_v53 = vsel %vm10695_vm15, %v5950_v25, %v5951_v4  ;;  %v5814_v42 = vrot.slane %v13387_v2, 5  ;;  %v7112_v2 = vld [vmem:[#allocation2 + $0x2c] sm:$0xf] }
 0x59d   : > { %5668 = vst.msk [vmem:[#allocation3] sm:$0xf] %vm1899_vm1, %v5594_v30  ;;  %v6842_v36 = vrot.slane %v6840_v50, 6 }
 0x59e   : > { %v6845_v33 = vrot.slane %v6843_v20, 7  ;;  %v13344_v20 = vld [vmem:[#allocation2 + $0x34] sm:$0xf]  ;;  %v5816_v45 = vrot.slane %v5814_v42, 4 }
 0x5a0   : > { %6460 = vrot.lane.b32.xlu2 %v6405_v27, %s9731_s17  ;;  %v13293_v27 = vld [vmem:[#allocation2 + $0x4] sm:$0xf]  ;;  %v6846_v17 = vor.u32 %v6845_v33, %v6842_v36  ;;  %v13359_v36 = vld [vmem:[#allocation2 + $0xc] sm:$0xf]  ;;  %5866 = vst.msk [vmem:[#allocation3 + $0x1e4] sm:$0x3] %vm1493_vm6, %v5816_v45 }
 0x5a1   : > { %7012 = vrot.lane.b32.xlu0 %v6807_v37, %s9731_s17  ;;  %v5745_v37 = vrot.slane %v13293_v27, 5 }
 0x5a2   : > { %v5610_v39 = vpop.permute.xlu2 %5609  ;;  %v6848_v46 = vrot.slane %v6846_v17, 4  ;;  %v6847_v43 = vsel %vm10809_vm13, %v6838_v18, %v6846_v17 }
 0x5a3   : > { %5676 = vst.msk [vmem:[#allocation3 + $0xa0] sm:$0xf] %vm1899_vm1, %v5610_v39  ;;  %v6850_v39 = vshrl.u32 %v6734_v8, 16  ;;  %v5746_v11 = vsel %vm10755_vm3, %v8999_v26, %v5745_v37  ;;  %v5293_v26 = vld [vmem:[#allocation2 + $0x60] sm:$0x3] }
 0x5a4   : > { %7014 = vrot.lane.b32.xlu1 %v6817_v59, %s9731_s17  ;;  %v9006_v52 = vld [vmem:[#allocation3] sm:$0xf]  ;;  %v6853_v59 = vshll.u32 %v6734_v8, 16  ;;  %5842 = vst.msk [vmem:[#allocation3 + $0x4] sm:$0xf] %vm433_vm2, %v5746_v11 }
 0x5a5   : > { %5318 = vst.msk [vmem:[#allocation3 + $0x1e0] sm:$0x3] %vm1493_vm6, %v5293_v26  ;;  %v9611_v11 = vld [vmem:[%s14520_s5 + $0x110] sm:$0xff] }
 0x5a6   : > { %v5596_v47 = vpop.permute.xlu1 %5595  ;;  %v6855_v14 = vrot.slane %v6853_v59, 7  ;;  %v6873_v59 = vshll.u32 %v6736_v31, 16  ;;  %8302 = vmatpush.bf16.msra.mxu2 %v9611_v11 }
 0x5a7   : > { %5669 = vst.msk [vmem:[#allocation3 + $0x14] sm:$0xf] %vm1899_vm1, %v5596_v47 }
 0x5a8   : > { %6007 = vrot.lane.b32.xlu2 %v5940_v16, %s9731_s17  ;;  %v6852_v16 = vrot.slane %v6850_v39, 6  ;;  %v6870_v39 = vshrl.u32 %v6736_v31, 16  ;;  %v9605_v31 = vld [vmem:[%s14520_s5 + $0xe0] sm:$0xff] }
 0x5a9   : > { %6009 = vrot.lane.b32.xlu0 %v5943_v51, %s9731_s17  ;;  %8227 = vmatpush.bf16.msra.mxu1 %v9605_v31  ;;  %v13505_v31 = vld [vmem:[#allocation2 + $0x40] sm:$0xf] }
 0x5aa   : > { %v5616_v56 = vpop.permute.xlu2 %5615  ;;  %v13335_v63 = vor.u32 %v6855_v14, %v6852_v16  ;;  %v13385_v16 = vld [vmem:[#allocation2 + $0x38] sm:$0xf] }
 0x5ab   : > { %v5600_v10 = vpop.permute.xlu0 %5599  ;;  %5679 = vst.msk [vmem:[#allocation3 + $0xdc] sm:$0xf] %vm1899_vm1, %v5616_v56  ;;  %v6097_v56 = vld [vmem:[#allocation2 + $0xc] sm:$0xf]  ;;  %v5957_v4 = vrot.slane %v13385_v16, 7 }
 0x5ac   : > { %5671 = vst.msk [vmem:[#allocation3 + $0x3c] sm:$0xf] %vm1899_vm1, %v5600_v10  ;;  %6462 = vrot.lane.b32.xlu1 %v6406_v57, %s9731_s17  ;;  %v6409_v10 = vld [vmem:[#allocation2 + $0x2c] sm:$0xf]  ;;  %v6863_v57 = vshll.u32 %v6735_v29, 16  ;;  %v6136_v35 = vshrl.u32 %v6097_v56, 16 }
 0x5ad   : > { %v5751_v29 = vrot.slane %v13359_v36, 5  ;;  %v6858_v17 = vrot.slane %v13335_v63, 4 }
 0x5ae   : > { %v5602_v7 = vpop.permute.xlu1 %5601  ;;  %v9519_v60 = vld [vmem:[#allocation3 + $0x10] sm:$0xf0] }
 0x5af   : > { %5672 = vst.msk [vmem:[#allocation3 + $0x50] sm:$0xf] %vm1899_vm1, %v5602_v7  ;;  %v9007_v61 = vor.u32 %v9519_v60, %v9006_v52  ;;  %v13328_v52 = vrot.slane %v6127_v23, 7  ;;  %v13330_v60 = vrot.slane %v6136_v35, 7  ;;  %v6875_v23 = vrot.slane %v6873_v59, 7  ;;  %v9596_v35 = vld [vmem:[%s14520_s5 + $0x98] sm:$0xff] }
 0x5b0   : > { %6464 = vrot.lane.b32.xlu2 %v6407_v1, %s9731_s17  ;;  %v9026_v1 = vld [vmem:[#allocation3 + $0x28] sm:$0xf] }
 0x5b1   : > { %7016 = vrot.lane.b32.xlu0 %v6827_v28, %s9731_s17  ;;  %8013 = vmatmul.bf16.vlgmr.msrb.gmra.mxu2 %v9007_v61  ;;  %v6139_v61 = vshll.u32 %v6097_v56, 16  ;;  %v6865_v28 = vrot.slane %v6863_v57, 7  ;;  %v6134_v19 = vrot.slane %v13328_v52, 4  ;;  %v9587_v56 = vld [vmem:[%s14520_s5 + $0x50] sm:$0xff] }
 0x5b2   : > { %v5622_v6 = vpop.permute.xlu2 %5621 }
 0x5b3   : > { %v5606_v30 = vpop.permute.xlu0 %5605  ;;  %5682 = vst.msk [vmem:[#allocation3 + $0x118] sm:$0xf] %vm1899_vm1, %v5622_v6  ;;  %v9524_v24 = vld [vmem:[#allocation3 + $0x38] sm:$0xf0]  ;;  %v6141_v12 = vor.u32 %v6139_v61, %v13330_v60  ;;  %v9589_v6 = vld [vmem:[%s14520_s5 + $0x60] sm:$0xff]  ;;  %v13361_v33 = vor.u32 %v6865_v28, %v6862_v15 }
 0x5b4   : > { %5674 = vst.msk [vmem:[#allocation3 + $0x78] sm:$0xf] %vm1899_vm1, %v5606_v30  ;;  %7018 = vrot.lane.b32.xlu1 %v6837_v13, %s9731_s17  ;;  %v9027_v7 = vor.u32 %v9524_v24, %v9026_v1  ;;  %v6857_v13 = vsel %vm10809_vm13, %v6848_v46, %v13335_v63  ;;  %8081 = vmatpush.bf16.msra.mxu3 %v9589_v6  ;;  %v6872_v24 = vrot.slane %v6870_v39, 6  ;;  %v13409_v46 = vld [vmem:[#allocation2 + $0x3c] sm:$0xf]  ;;  %v9586_v6 = vld [vmem:[%s14520_s5 + $0x48] sm:$0xff] }
 0x5b5   : > { %v6142_v55 = vsel %vm10827_vm7, %v6134_v19, %v6141_v12  ;;  %v6099_v61 = vld [vmem:[#allocation2 + $0x14] sm:$0xf]  ;;  %v13420_v63 = vld [vmem:[#allocation2 + $0x40] sm:$0xf]  ;;  %v6867_v25 = vsel %vm10809_vm13, %v6858_v17, %v13361_v33 }
 0x5b6   : > { %v5608_v48 = vpop.permute.xlu1 %5607  ;;  %6376 = vst.msk [vmem:[#allocation3 + $0x1c] sm:$0xf] %vm433_vm2, %v6142_v55  ;;  %v9046_v57 = vld [vmem:[#allocation3 + $0x50] sm:$0xf]  ;;  %v6154_v28 = vshrl.u32 %v6099_v61, 16  ;;  %v6157_v12 = vshll.u32 %v6099_v61, 16  ;;  %v13446_v39 = vor.u32 %v6875_v23, %v6872_v24 }
 0x5b7   : > { %5675 = vst.msk [vmem:[#allocation3 + $0x8c] sm:$0xf] %vm1899_vm1, %v5608_v48  ;;  %v5695_v48 = vld [vmem:[#allocation2 + $0x8] sm:$0xf]  ;;  %v5960_v55 = vrot.slane %v13409_v46, 7  ;;  %v6883_v17 = vshll.u32 %v13420_v63, 16 }
 0x5b8   : > { %6011 = vrot.lane.b32.xlu2 %v5946_v22, %s9731_s17  ;;  %v5748_v9 = vrot.slane %v5695_v48, 5  ;;  %v5954_v22 = vrot.slane %v13344_v20, 7  ;;  %v6130_v48 = vshll.u32 %v13319_v0, 16  ;;  %v9585_v20 = vld [vmem:[%s14520_s5 + $0x40] sm:$0xff]  ;;  %v9604_v24 = vld [vmem:[%s14520_s5 + $0xd8] sm:$0xff] }
 0x5b9   : > { %6013 = vrot.lane.b32.xlu0 %v5949_v40, %s9731_s17  ;;  %8228 = vmatpush.bf16.msra.mxu1 %v9604_v24 }
 0x5ba   : > { %v5628_v47 = vpop.permute.xlu2 %5627  ;;  %v5750_v40 = vrot.slane %v5748_v9, 4  ;;  %v5955_v18 = vsel %vm10695_vm15, %v5953_v21, %v5954_v22  ;;  %v6095_v21 = vld [vmem:[#allocation2 + $0x4] sm:$0x8] }
 0x5bb   : > { %v5612_v51 = vpop.permute.xlu0 %5611  ;;  %5685 = vst.msk [vmem:[#allocation3 + $0x154] sm:$0xf] %vm1899_vm1, %v5628_v47  ;;  %v9597_v47 = vld [vmem:[%s14520_s5 + $0xa0] sm:$0xff]  ;;  %v6122_v26 = vshrl.u32 %v6095_v21, 16 }
 0x5bc   : > { %5677 = vst.msk [vmem:[#allocation3 + $0xb4] sm:$0xf] %vm1899_vm1, %v5612_v51  ;;  %6466 = vrot.lane.b32.xlu1 %v6408_v41, %s9731_s17  ;;  %v9588_v41 = vld [vmem:[%s14520_s5 + $0x58] sm:$0xff]  ;;  %v6868_v51 = vrot.slane %v13361_v33, 4  ;;  %v5752_v14 = vsel %vm10755_vm3, %v5750_v40, %v5751_v29  ;;  %8154 = vmatpush.bf16.msra.mxu0 %v9597_v47  ;;  %v6880_v40 = vshrl.u32 %v13420_v63, 16 }
 0x5bd   : > { %8082 = vmatpush.bf16.msra.mxu3 %v9588_v41  ;;  %5844 = vst.msk [vmem:[#allocation3 + $0x2c] sm:$0xf] %vm433_vm2, %v5752_v14  ;;  %v9001_v0 = vrot.slane %v6122_v26, 11  ;;  %v6132_v41 = vor.u32 %v6130_v48, %v13328_v52  ;;  %v6738_v52 = vld [vmem:[#allocation2 + $0x44] sm:$0xf]  ;;  %v6878_v48 = vrot.slane %v13446_v39, 4 }
 0x5be   : > { %v5614_v38 = vpop.permute.xlu1 %5613  ;;  %v6550_v14 = vld [vmem:[#allocation2 + $0xc] sm:$0xc]  ;;  %v6882_v45 = vrot.slane %v6880_v40, 6 }
 0x5bf   : > { %5678 = vst.msk [vmem:[#allocation3 + $0xc8] sm:$0xf] %vm1899_vm1, %v5614_v38  ;;  %v5747_v38 = vrot.slane %v5745_v37, 4  ;;  %v13418_v37 = vld [vmem:[#allocation2 + $0x10] sm:$0xf]  ;;  %v6133_v33 = vsel %vm10827_vm7, %v9001_v0, %v6132_v41 }
 0x5c0   : > { %6468 = vrot.lane.b32.xlu2 %v6409_v10, %s9731_s17  ;;  %v6145_v15 = vshrl.u32 %v13418_v37, 16  ;;  %8155 = vmatpush.bf16.msra.mxu0 %v9596_v35  ;;  %6375 = vst.msk [vmem:[#allocation3 + $0x8] sm:$0xf] %vm433_vm2, %v6133_v33  ;;  %v13523_v41 = vld [vmem:[#allocation2 + $0x18] sm:$0xf] }
 0x5c1   : > { %7020 = vrot.lane.b32.xlu0 %v6847_v43, %s9731_s17  ;;  %8018 = vmatmul.bf16.gmra.mxu2 %v9027_v7  ;;  %v9529_v7 = vld [vmem:[#allocation3 + $0x60] sm:$0xf0]  ;;  %v5749_v27 = vsel %vm10755_vm3, %v5747_v38, %v5748_v9  ;;  %v6411_v43 = vld [vmem:[#allocation2 + $0x34] sm:$0xf]  ;;  %v5956_v9 = vrot.slane %v5954_v22, 4  ;;  %v9594_v22 = vld [vmem:[%s14520_s5 + $0x88] sm:$0xff] }
 0x5c2   : > { %v5634_v50 = vpop.permute.xlu2 %5633  ;;  %8083 = vmatpush.bf16.msra.mxu3 %v9587_v56  ;;  %5843 = vst.msk [vmem:[#allocation3 + $0x18] sm:$0xf] %vm433_vm2, %v5749_v27  ;;  %v9047_v34 = vor.u32 %v9529_v7, %v9046_v57  ;;  %v6551_v56 = vld [vmem:[#allocation2 + $0x10] sm:$0xf]  ;;  %v6885_v7 = vrot.slane %v6883_v17, 7  ;;  %v6890_v27 = vshrl.u32 %v6738_v52, 16 }
 0x5c3   : > { %v5618_v30 = vpop.permute.xlu0 %5617  ;;  %5688 = vst.msk [vmem:[#allocation3 + $0x190] sm:$0xf] %vm1899_vm1, %v5634_v50  ;;  %v9595_v50 = vld [vmem:[%s14520_s5 + $0x90] sm:$0xff]  ;;  %v5958_v35 = vsel %vm10695_vm15, %v5956_v9, %v5957_v4  ;;  %v6739_v17 = vld [vmem:[#allocation2 + $0x48] sm:$0xf] }
 0x5c4   : > { %5680 = vst.msk [vmem:[#allocation3 + $0xf0] sm:$0xf] %vm1899_vm1, %v5618_v30  ;;  %7022 = vrot.lane.b32.xlu1 %v6857_v13, %s9731_s17  ;;  %v13435_v30 = vrot.slane %v6145_v15, 7  ;;  %v13437_v13 = vrot.slane %v6154_v28, 7  ;;  %8156 = vmatpush.bf16.msra.mxu0 %v9595_v50  ;;  %v5697_v57 = vld [vmem:[#allocation2 + $0x10] sm:$0xf]  ;;  %v6886_v9 = vor.u32 %v6885_v7, %v6882_v45 }
 0x5c5   : > { %v5754_v38 = vrot.slane %v5697_v57, 5  ;;  %v5757_v15 = vrot.slane %v13484_v49, 5  ;;  %v9603_v28 = vld [vmem:[%s14520_s5 + $0xd0] sm:$0xff]  ;;  %v6412_v50 = vld [vmem:[#allocation2 + $0x38] sm:$0xf]  ;;  %v6900_v7 = vshrl.u32 %v6739_v17, 16 }
 0x5c6   : > { %v5620_v54 = vpop.permute.xlu1 %5619  ;;  %v6159_v59 = vor.u32 %v6157_v12, %v13437_v13  ;;  %8084 = vmatpush.bf16.msra.mxu3 %v9586_v6  ;;  %8229 = vmatpush.bf16.msra.mxu1 %v9603_v28  ;;  %v6888_v24 = vrot.slane %v6886_v9, 4 }
 0x5c7   : > { %5681 = vst.msk [vmem:[#allocation3 + $0x104] sm:$0xf] %vm1899_vm1, %v5620_v54  ;;  %v6152_v54 = vrot.slane %v13435_v30, 4  ;;  %v5756_v63 = vrot.slane %v5754_v38, 4 }
 0x5c8   : > { %6015 = vrot.lane.b32.xlu2 %v5952_v53, %s9731_s17  ;;  %v5959_v53 = vrot.slane %v5957_v4, 4  ;;  %8157 = vmatpush.bf16.msra.mxu0 %v9594_v22  ;;  %v6163_v22 = vshrl.u32 %v13523_v41, 16 }
 0x5c9   : > { %6017 = vrot.lane.b32.xlu0 %v5955_v18, %s9731_s17  ;;  %v6877_v18 = vsel %vm10809_vm13, %v6868_v51, %v13446_v39  ;;  %v9002_v51 = vrot.slane %v6550_v14, 10  ;;  %v5963_v39 = vrot.slane %v13505_v31, 7  ;;  %v6143_v14 = vrot.slane %v13330_v60, 4 }
 0x5ca   : > { %v5640_v10 = vpop.permute.xlu2 %5639  ;;  %8085 = vmatpush.bf16.msra.mxu3 %v9585_v20  ;;  %v5961_v4 = vsel %vm10695_vm15, %v5959_v53, %v5960_v55  ;;  %v6892_v53 = vrot.slane %v6890_v27, 6  ;;  %v6413_v20 = vld [vmem:[#allocation2 + $0x3c] sm:$0xf]  ;;  %v13535_v33 = vrot.slane %v6163_v22, 7  ;;  %v5962_v60 = vrot.slane %v5960_v55, 4 }
 0x5cb   : > { %v5624_v1 = vpop.permute.xlu0 %5623  ;;  %5691 = vst.msk [vmem:[#allocation3 + $0x1cc] sm:$0xf] %vm1899_vm1, %v5640_v10  ;;  %v6602_v10 = vrot.slane %v6551_v56, 6  ;;  %v6148_v56 = vshll.u32 %v13418_v37, 16  ;;  %v5965_v45 = vrot.slane %v5963_v39, 4  ;;  %v6903_v27 = vshll.u32 %v6739_v17, 16 }
 0x5cc   : > { %5683 = vst.msk [vmem:[#allocation3 + $0x12c] sm:$0xf] %vm1899_vm1, %v5624_v1  ;;  %6470 = vrot.lane.b32.xlu1 %v6410_v58, %s9731_s17  ;;  %v6160_v58 = vsel %vm10827_vm7, %v6152_v54, %v6159_v59  ;;  %v9593_v1 = vld [vmem:[%s14520_s5 + $0x80] sm:$0xff]  ;;  %v9066_v54 = vld [vmem:[#allocation3 + $0x78] sm:$0xf]  ;;  %v6170_v37 = vrot.slane %v13535_v33, 4 }
 0x5cd   : > { %6378 = vst.msk [vmem:[#allocation3 + $0x44] sm:$0xf] %vm433_vm2, %v6160_v58  ;;  %v6603_v61 = vsel %vm10861_vm5, %v9002_v51, %v6602_v10  ;;  %v6604_v12 = vrot.slane %v6602_v10, 4  ;;  %8158 = vmatpush.bf16.msra.mxu0 %v9593_v1  ;;  %v9534_v59 = vld [vmem:[#allocation3 + $0x88] sm:$0xf0]  ;;  %v6887_v51 = vsel %vm10809_vm13, %v6878_v48, %v6886_v9  ;;  %v6905_v48 = vrot.slane %v6903_v27, 7 }
 0x5ce   : > { %v5626_v19 = vpop.permute.xlu1 %5625  ;;  %6699 = vst.msk [vmem:[#allocation3 + $0xc] sm:$0xf] %vm433_vm2, %v6603_v61  ;;  %v9601_v58 = vld [vmem:[%s14520_s5 + $0xc0] sm:$0xff]  ;;  %v6740_v55 = vld [vmem:[#allocation2 + $0x4c] sm:$0xf] }
 0x5cf   : > { %5684 = vst.msk [vmem:[#allocation3 + $0x140] sm:$0xf] %vm1899_vm1, %v5626_v19  ;;  %v13503_v19 = vld [vmem:[#allocation2 + $0x14] sm:$0xf]  ;;  %v13552_v1 = vld [vmem:[#allocation2 + $0x44] sm:$0xf] }
 0x5d0   : > { %6472 = vrot.lane.b32.xlu2 %v6411_v43, %s9731_s17  ;;  %v6893_v43 = vshll.u32 %v6738_v52, 16  ;;  %v6605_v21 = vrot.slane %v13503_v19, 6  ;;  %v6910_v9 = vshrl.u32 %v6740_v55, 16  ;;  %v9086_v17 = vld [vmem:[#allocation3 + $0xa0] sm:$0xf] }
 0x5d1   : > { %7024 = vrot.lane.b32.xlu0 %v6867_v25, %s9731_s17  ;;  %8023 = vmatmul.bf16.gmra.mxu2 %v9047_v34  ;;  %v5758_v34 = vsel %vm10755_vm3, %v5756_v63, %v5757_v15  ;;  %v9602_v25 = vld [vmem:[%s14520_s5 + $0xc8] sm:$0xff] }
 0x5d2   : > { %v5996_v11 = vpop.permute.xlu2 %5995  ;;  %v6895_v40 = vrot.slane %v6893_v43, 7  ;;  %v6606_v0 = vsel %vm10861_vm5, %v6604_v12, %v6605_v21  ;;  %5846 = vst.msk [vmem:[#allocation3 + $0x54] sm:$0xf] %vm433_vm2, %v5758_v34  ;;  %8230 = vmatpush.bf16.msra.mxu1 %v9602_v25  ;;  %v6553_v43 = vld [vmem:[#allocation2 + $0x18] sm:$0xf]  ;;  %v6607_v28 = vrot.slane %v6605_v21, 4  ;;  %v5964_v25 = vsel %vm10695_vm15, %v5962_v60, %v5963_v39 }
 0x5d3   : > { %v5630_v47 = vpop.permute.xlu0 %5629  ;;  %6070 = vst.msk [vmem:[#allocation3 + $0x4] sm:$0xf] %vm1899_vm1, %v5996_v11  ;;  %v5753_v11 = vrot.slane %v5751_v29, 4  ;;  %v6101_v29 = vld [vmem:[#allocation2 + $0x1c] sm:$0xf]  ;;  %v6608_v19 = vrot.slane %v6553_v43, 6 }
 0x5d4   : > { %5686 = vst.msk [vmem:[#allocation3 + $0x168] sm:$0xf] %vm1899_vm1, %v5630_v47  ;;  %7026 = vrot.lane.b32.xlu1 %v6877_v18, %s9731_s17  ;;  %v9067_v18 = vor.u32 %v9534_v59, %v9066_v54  ;;  %v6172_v52 = vshrl.u32 %v6101_v29, 16  ;;  %v6175_v57 = vshll.u32 %v6101_v29, 16  ;;  %v5699_v12 = vld [vmem:[#allocation2 + $0x18] sm:$0xf] }
 0x5d5   : > { %v5755_v36 = vsel %vm10755_vm3, %v5753_v11, %v5754_v38  ;;  %6700 = vst.msk [vmem:[#allocation3 + $0x20] sm:$0xf] %vm433_vm2, %v6606_v0  ;;  %v5760_v31 = vrot.slane %v5699_v12, 5  ;;  %v6609_v21 = vsel %vm10861_vm5, %v6607_v28, %v6608_v19  ;;  %v6610_v11 = vrot.slane %v6608_v19, 4  ;;  %v6554_v0 = vld [vmem:[#allocation2 + $0x1c] sm:$0xf] }
 0x5d6   : > { %v5632_v23 = vpop.permute.xlu1 %5631  ;;  %5845 = vst.msk [vmem:[#allocation3 + $0x40] sm:$0xf] %vm433_vm2, %v5755_v36  ;;  %v13543_v10 = vrot.slane %v6172_v52, 7  ;;  %8231 = vmatpush.bf16.msra.mxu1 %v9601_v58  ;;  %v6414_v39 = vld [vmem:[#allocation2 + $0x40] sm:$0xf]  ;;  %v6611_v22 = vrot.slane %v6554_v0, 6 }
 0x5d7   : > { %5687 = vst.msk [vmem:[#allocation3 + $0x17c] sm:$0xf] %vm1899_vm1, %v5632_v23  ;;  %v13546_v23 = vor.u32 %v6895_v40, %v6892_v53  ;;  %v5762_v54 = vrot.slane %v5760_v31, 4  ;;  %v6913_v40 = vshll.u32 %v6740_v55, 16  ;;  %v9539_v52 = vld [vmem:[#allocation3 + $0xb0] sm:$0xf0] }
 0x5d8   : > { %6019 = vrot.lane.b32.xlu2 %v5958_v35, %s9731_s17  ;;  %v6150_v35 = vor.u32 %v6148_v56, %v13435_v30  ;;  %v6177_v61 = vor.u32 %v6175_v57, %v13543_v10  ;;  %6701 = vst.msk [vmem:[#allocation3 + $0x34] sm:$0xf] %vm433_vm2, %v6609_v21  ;;  %v6741_v58 = vld [vmem:[#allocation2 + $0x50] sm:$0xf]  ;;  %v6166_v55 = vshll.u32 %v13523_v41, 16  ;;  %v6161_v28 = vrot.slane %v13437_v13, 4 }
 0x5d9   : > { %6021 = vrot.lane.b32.xlu0 %v5961_v4, %s9731_s17  ;;  %v6897_v46 = vsel %vm10809_vm13, %v6888_v24, %v13546_v23  ;;  %v6898_v36 = vrot.slane %v13546_v23, 4  ;;  %v13590_v24 = vld [vmem:[#allocation2 + $0x48] sm:$0xf]  ;;  %v6915_v57 = vrot.slane %v6913_v40, 7  ;;  %v6103_v23 = vld [vmem:[#allocation2 + $0x24] sm:$0xf] }
 0x5da   : > { %v6453_v6 = vpop.permute.xlu2 %6452  ;;  %v6151_v30 = vsel %vm10827_vm7, %v6143_v14, %v6150_v35  ;;  %v6178_v63 = vsel %vm10827_vm7, %v6170_v37, %v6177_v61  ;;  %v6612_v14 = vsel %vm10861_vm5, %v6610_v11, %v6611_v22  ;;  %v6415_v35 = vld [vmem:[#allocation2 + $0x44] sm:$0xf]  ;;  %v5969_v12 = vrot.slane %v13590_v24, 7  ;;  %v9517_v41 = vld [vmem:[#allocation3 + $0x4] sm:$0xf] }
 0x5db   : > { %v5636_v26 = vpop.permute.xlu0 %5635  ;;  %6526 = vst.msk [vmem:[#allocation3 + $0x1c] sm:$0xf] %vm1899_vm1, %v6453_v6  ;;  %v5966_v6 = vrot.slane %v13552_v1, 7  ;;  %v13603_v1 = vld [vmem:[#allocation2 + $0x4c] sm:$0xf] }
 0x5dc   : > { %5689 = vst.msk [vmem:[#allocation3 + $0x1a4] sm:$0xf] %vm1899_vm1, %v5636_v26  ;;  %6474 = vrot.lane.b32.xlu1 %v6412_v50, %s9731_s17  ;;  %v13567_v50 = vld [vmem:[#allocation2 + $0x1c] sm:$0xf]  ;;  %v6902_v26 = vrot.slane %v6900_v7, 6  ;;  %v6190_v7 = vshrl.u32 %v6103_v23, 16 }
 0x5dd   : > { %6380 = vst.msk [vmem:[#allocation3 + $0x6c] sm:$0xf] %vm433_vm2, %v6178_v63  ;;  %v5763_v59 = vrot.slane %v13567_v50, 5  ;;  %v5967_v53 = vsel %vm10695_vm15, %v5965_v45, %v5966_v6  ;;  %v6920_v45 = vshrl.u32 %v6741_v58, 16  ;;  %v6193_v63 = vshll.u32 %v6103_v23, 16 }
 0x5de   : > { %v5638_v47 = vpop.permute.xlu1 %5637  ;;  %6377 = vst.msk [vmem:[#allocation3 + $0x30] sm:$0xf] %vm433_vm2, %v6151_v30  ;;  %v5968_v30 = vrot.slane %v5966_v6, 4  ;;  %v13611_v43 = vrot.slane %v6190_v7, 7  ;;  %v5972_v6 = vrot.slane %v13603_v1, 7 }
 0x5df   : > { %5690 = vst.msk [vmem:[#allocation3 + $0x1b8] sm:$0xf] %vm1899_vm1, %v5638_v47  ;;  %v5764_v29 = vsel %vm10755_vm3, %v5762_v54, %v5763_v59  ;;  %v6742_v54 = vld [vmem:[#allocation2 + $0x54] sm:$0xf] }
 0x5e0   : > { %6476 = vrot.lane.b32.xlu2 %v6413_v20, %s9731_s17  ;;  %v5759_v20 = vrot.slane %v5757_v15, 4  ;;  %5848 = vst.msk [vmem:[#allocation3 + $0x7c] sm:$0xf] %vm433_vm2, %v5764_v29  ;;  %v6912_v15 = vrot.slane %v6910_v9, 6  ;;  %v6195_v13 = vor.u32 %v6193_v63, %v13611_v43 }
 0x5e1   : > { %7028 = vrot.lane.b32.xlu0 %v6887_v51, %s9731_s17  ;;  %8028 = vmatmul.bf16.gmra.mxu2 %v9067_v18  ;;  %v6906_v18 = vor.u32 %v6905_v48, %v6902_v26  ;;  %v13596_v51 = vld [vmem:[#allocation2 + $0x20] sm:$0xf]  ;;  %6702 = vst.msk [vmem:[#allocation3 + $0x48] sm:$0xf] %vm433_vm2, %v6612_v14  ;;  %v6922_v26 = vrot.slane %v6920_v45, 6  ;;  %v6613_v48 = vrot.slane %v6611_v22, 4 }
 0x5e2   : > { %v6000_v38 = vpop.permute.xlu2 %5999  ;;  %v5761_v56 = vsel %vm10755_vm3, %v5759_v20, %v5760_v31  ;;  %v6181_v60 = vshrl.u32 %v13596_v51, 16  ;;  %v13615_v19 = vor.u32 %v6915_v57, %v6912_v15  ;;  %v5971_v22 = vrot.slane %v5969_v12, 4 }
 0x5e3   : > { %v5642_v4 = vpop.permute.xlu0 %5641  ;;  %6072 = vst.msk [vmem:[#allocation3 + $0x2c] sm:$0xf] %vm1899_vm1, %v6000_v38  ;;  %v6907_v37 = vsel %vm10809_vm13, %v6898_v36, %v6906_v18  ;;  %v9087_v38 = vor.u32 %v9539_v52, %v9086_v17  ;;  %v6908_v61 = vrot.slane %v6906_v18, 4  ;;  %v13631_v36 = vld [vmem:[#allocation2 + $0x24] sm:$0xf]  ;;  %v6930_v17 = vshrl.u32 %v6742_v54, 16 }
 0x5e4   : > { %5692 = vst.msk [vmem:[#allocation3 + $0x1e0] sm:$0x3] %vm1924_vm8, %v5642_v4  ;;  %7030 = vrot.lane.b32.xlu1 %v6897_v46, %s9731_s17  ;;  %v6923_v4 = vshll.u32 %v6741_v58, 16  ;;  %v13607_v46 = vrot.slane %v6181_v60, 7  ;;  %v6933_v52 = vshll.u32 %v6742_v54, 16  ;;  %v5970_v57 = vsel %vm10695_vm15, %v5968_v30, %v5969_v12  ;;  %v9610_v30 = vld [vmem:[%s14520_s5 + $0x108] sm:$0xff] }
 0x5e5   : > { %5847 = vst.msk [vmem:[#allocation3 + $0x68] sm:$0xf] %vm433_vm2, %v5761_v56  ;;  %v6932_v12 = vrot.slane %v6930_v17, 6  ;;  %8303 = vmatpush.bf16.msra.mxu2 %v9610_v30  ;;  %v6105_v54 = vld [vmem:[#allocation2 + $0x2c] sm:$0xf] }
 0x5e6   : > { %v6044_v34 = vpop.permute.xlu1 %6043  ;;  %v6188_v31 = vrot.slane %v13607_v46, 4  ;;  %v6925_v9 = vrot.slane %v6923_v4, 7  ;;  %v6918_v4 = vrot.slane %v13615_v19, 4 }
 0x5e7   : > { %6094 = vst.msk [vmem:[#allocation3 + $0x1e4] sm:$0x3] %vm1924_vm8, %v6044_v34  ;;  %v6168_v34 = vor.u32 %v6166_v55, %v13535_v33  ;;  %v6917_v33 = vsel %vm10809_vm13, %v6908_v61, %v13615_v19  ;;  %v6416_v61 = vld [vmem:[#allocation2 + $0x48] sm:$0xf]  ;;  %v6743_v55 = vld [vmem:[#allocation2 + $0x58] sm:$0xf] }
 0x5e8   : > { %6023 = vrot.lane.b32.xlu2 %v5964_v25, %s9731_s17  ;;  %v6555_v25 = vld [vmem:[#allocation2 + $0x20] sm:$0xf]  ;;  %v6196_v20 = vsel %vm10827_vm7, %v6188_v31, %v6195_v13  ;;  %v13643_v60 = vor.u32 %v6925_v9, %v6922_v26  ;;  %v6935_v31 = vrot.slane %v6933_v52, 7  ;;  %v9544_v19 = vld [vmem:[#allocation3 + $0xd8] sm:$0xf0]  ;;  %v6943_v9 = vshll.u32 %v6743_v55, 16 }
 0x5e9   : > { %6025 = vrot.lane.b32.xlu0 %v5967_v53, %s9731_s17  ;;  %v6614_v11 = vrot.slane %v6555_v25, 6  ;;  %v5701_v53 = vld [vmem:[#allocation2 + $0x20] sm:$0xf]  ;;  %6382 = vst.msk [vmem:[#allocation3 + $0x94] sm:$0xf] %vm433_vm2, %v6196_v20 }
 0x5ea   : > { %v6457_v47 = vpop.permute.xlu2 %6456  ;;  %v5766_v18 = vrot.slane %v5701_v53, 5  ;;  %v6928_v25 = vrot.slane %v13643_v60, 4 }
 0x5eb   : > { %v5998_v49 = vpop.permute.xlu0 %5997  ;;  %6528 = vst.msk [vmem:[#allocation3 + $0x44] sm:$0xf] %vm1899_vm1, %v6457_v47  ;;  %v9520_v47 = vld [vmem:[#allocation3 + $0x18] sm:$0xf0]  ;;  %v6615_v58 = vsel %vm10861_vm5, %v6613_v48, %v6614_v11  ;;  %v6616_v56 = vrot.slane %v6614_v11, 4 }
 0x5ec   : > { %6071 = vst.msk [vmem:[#allocation3 + $0x18] sm:$0xf] %vm1899_vm1, %v5998_v49  ;;  %6478 = vrot.lane.b32.xlu1 %v6414_v39, %s9731_s17  ;;  %v6169_v39 = vsel %vm10827_vm7, %v6161_v28, %v6168_v34  ;;  %v5769_v49 = vrot.slane %v13631_v36, 5  ;;  %v5768_v14 = vrot.slane %v5766_v18, 4  ;;  %v9106_v28 = vld [vmem:[#allocation3 + $0xc8] sm:$0xf] }
 0x5ed   : > { %6379 = vst.msk [vmem:[#allocation3 + $0x58] sm:$0xf] %vm433_vm2, %v6169_v39  ;;  %v13680_v48 = vld [vmem:[#allocation2 + $0x54] sm:$0xf]  ;;  %v6417_v11 = vld [vmem:[#allocation2 + $0x4c] sm:$0xf]  ;;  %v9107_v20 = vor.u32 %v9544_v19, %v9106_v28 }
 0x5ee   : > { %v6451_v27 = vpop.permute.xlu1 %6450  ;;  %6703 = vst.msk [vmem:[#allocation3 + $0x5c] sm:$0xf] %vm433_vm2, %v6615_v58  ;;  %v5770_v45 = vsel %vm10755_vm3, %v5768_v14, %v5769_v49  ;;  %v6211_v58 = vshll.u32 %v6105_v54, 16  ;;  %v9522_v14 = vld [vmem:[#allocation3 + $0x2c] sm:$0xf] }
 0x5ef   : > { %6525 = vst.msk [vmem:[#allocation3 + $0x8] sm:$0xf] %vm1899_vm1, %v6451_v27  ;;  %v5765_v27 = vrot.slane %v5763_v59, 4  ;;  %v13670_v59 = vld [vmem:[#allocation2 + $0x28] sm:$0xf] }
 0x5f0   : > { %6480 = vrot.lane.b32.xlu2 %v6415_v35, %s9731_s17  ;;  %v5973_v35 = vsel %vm10695_vm15, %v5971_v22, %v5972_v6  ;;  %5850 = vst.msk [vmem:[#allocation3 + $0xa4] sm:$0xf] %vm433_vm2, %v5770_v45  ;;  %v6199_v13 = vshrl.u32 %v13670_v59, 16  ;;  %v6179_v22 = vrot.slane %v13543_v10, 4  ;;  %v13719_v19 = vld [vmem:[#allocation2 + $0x58] sm:$0xf] }
 0x5f1   : > { %7032 = vrot.lane.b32.xlu0 %v6907_v37, %s9731_s17  ;;  %8033 = vmatmul.bf16.gmra.mxu2 %v9087_v38  ;;  %v13645_v37 = vld [vmem:[#allocation2 + $0x24] sm:$0xf]  ;;  %v13652_v38 = vld [vmem:[#allocation2 + $0x50] sm:$0xf]  ;;  %v5767_v26 = vsel %vm10755_vm3, %v5765_v27, %v5766_v18  ;;  %v5703_v27 = vld [vmem:[#allocation2 + $0x28] sm:$0xf] }
 0x5f2   : > { %v6004_v21 = vpop.permute.xlu2 %6003  ;;  %v6617_v7 = vrot.slane %v13645_v37, 6  ;;  %5849 = vst.msk [vmem:[#allocation3 + $0x90] sm:$0xf] %vm433_vm2, %v5767_v26  ;;  %v13724_v26 = vld [vmem:[#allocation2 + $0x2c] sm:$0xf] }
 0x5f3   : > { %v7005_v40 = vpop.permute.xlu0 %7004  ;;  %6074 = vst.msk [vmem:[#allocation3 + $0x54] sm:$0xf] %vm1899_vm1, %v6004_v21  ;;  %v9008_v0 = vld [vmem:[#allocation3 + $0x14] sm:$0xf0]  ;;  %v6940_v21 = vshrl.u32 %v6743_v55, 16 }
 0x5f4   : > { %7079 = vst.msk [vmem:[#allocation3 + $0xc] sm:$0xf] %vm1899_vm1, %v7005_v40  ;;  %7034 = vrot.lane.b32.xlu1 %v6917_v33, %s9731_s17  ;;  %v9011_v29 = vor.u32 %v9517_v41, %v9008_v0  ;;  %v6618_v50 = vsel %vm10861_vm5, %v6616_v56, %v6617_v7  ;;  %v5975_v41 = vrot.slane %v13652_v38, 7  ;;  %v13683_v40 = vrot.slane %v6199_v13, 7 }
 0x5f5   : > { %6704 = vst.msk [vmem:[#allocation3 + $0x70] sm:$0xf] %vm433_vm2, %v6618_v50  ;;  %v6208_v33 = vshrl.u32 %v6105_v54, 16  ;;  %v6619_v37 = vrot.slane %v6617_v7, 4 }
 0x5f6   : > { %8086 = vmatmul.bf16.vlgmr.msra.gmra.mxu3 %v9011_v29  ;;  %v7007_v15 = vpop.permute.xlu1 %7006  ;;  %v9014_v24 = vld [vmem:[#allocation3 + $0x8] sm:$0xf]  ;;  %v13685_v29 = vor.u32 %v6935_v31, %v6932_v12  ;;  %v6206_v17 = vrot.slane %v13683_v40, 4  ;;  %v5977_v56 = vrot.slane %v5975_v41, 4  ;;  %v9525_v12 = vld [vmem:[#allocation3 + $0x40] sm:$0xf0] }
 0x5f7   : > { %7080 = vst.msk [vmem:[#allocation3 + $0x20] sm:$0xf] %vm1899_vm1, %v7007_v15  ;;  %v9015_v23 = vor.u32 %v9520_v47, %v9014_v24  ;;  %v6184_v47 = vshll.u32 %v13596_v51, 16  ;;  %v13692_v52 = vrot.slane %v6208_v33, 7  ;;  %v6927_v15 = vsel %vm10809_vm13, %v6918_v4, %v13643_v60  ;;  %v6557_v51 = vld [vmem:[#allocation2 + $0x28] sm:$0xf] }
 0x5f8   : > { %6027 = vrot.lane.b32.xlu2 %v5970_v57, %s9731_s17  ;;  %v5974_v24 = vrot.slane %v5972_v6, 4  ;;  %v5978_v57 = vrot.slane %v13680_v48, 7  ;;  %v6938_v1 = vrot.slane %v13685_v29, 4  ;;  %v6942_v6 = vrot.slane %v6940_v21, 6  ;;  %v13735_v33 = vld [vmem:[#allocation2 + $0x60] sm:$0xf] }
 0x5f9   : > { %6029 = vrot.lane.b32.xlu0 %v5973_v35, %s9731_s17  ;;  %8159 = vmatmul.bf16.vlgmr.msra.gmra.mxu0 %v9015_v23  ;;  %v6186_v10 = vor.u32 %v6184_v47, %v13607_v46  ;;  %v6744_v23 = vld [vmem:[#allocation2 + $0x5c] sm:$0xf]  ;;  %v6213_v60 = vor.u32 %v6211_v58, %v13692_v52  ;;  %v6945_v46 = vrot.slane %v6943_v9, 7  ;;  %v6620_v45 = vrot.slane %v6557_v51, 6  ;;  %v9126_v51 = vld [vmem:[#allocation3 + $0xf0] sm:$0xf] }
 0x5fa   : > { %v6461_v63 = vpop.permute.xlu2 %6460  ;;  %v6937_v4 = vsel %vm10809_vm13, %v6928_v25, %v13685_v29  ;;  %v6950_v31 = vshrl.u32 %v6744_v23, 16  ;;  %v6953_v50 = vshll.u32 %v6744_v23, 16  ;;  %v5976_v54 = vsel %vm10695_vm15, %v5974_v24, %v5975_v41  ;;  %v6746_v41 = vld [vmem:[#allocation2 + $0x64] sm:$0xf]  ;;  %v6107_v23 = vld [vmem:[#allocation2 + $0x34] sm:$0xf] }
 0x5fb   : > { %v6002_v34 = vpop.permute.xlu0 %6001  ;;  %6530 = vst.msk [vmem:[#allocation3 + $0x6c] sm:$0xf] %vm1899_vm1, %v6461_v63  ;;  %v9518_v53 = vld [vmem:[#allocation3 + $0xc] sm:$0xf]  ;;  %v6214_v30 = vsel %vm10827_vm7, %v6206_v17, %v6213_v60  ;;  %v6187_v7 = vsel %vm10827_vm7, %v6179_v22, %v6186_v10  ;;  %v13715_v63 = vld [vmem:[#allocation2 + $0x2c] sm:$0xf]  ;;  %v6621_v25 = vsel %vm10861_vm5, %v6619_v37, %v6620_v45  ;;  %v13752_v10 = vor.u32 %v6945_v46, %v6942_v6 }
 0x5fc   : > { %6073 = vst.msk [vmem:[#allocation3 + $0x40] sm:$0xf] %vm1899_vm1, %v6002_v34  ;;  %6482 = vrot.lane.b32.xlu1 %v6416_v61, %s9731_s17  ;;  %v5772_v34 = vrot.slane %v5703_v27, 5  ;;  %v5775_v9 = vrot.slane %v13715_v63, 5  ;;  %v6952_v22 = vrot.slane %v6950_v31, 6  ;;  %v6623_v47 = vrot.slane %v13724_v26, 6 }
 0x5fd   : > { %6384 = vst.msk [vmem:[#allocation3 + $0xbc] sm:$0xf] %vm433_vm2, %v6214_v30  ;;  %v6955_v17 = vrot.slane %v6953_v50, 7  ;;  %v5771_v58 = vrot.slane %v5769_v49, 4  ;;  %v6960_v36 = vshrl.u32 %v13735_v33, 16  ;;  %v6963_v49 = vshll.u32 %v13735_v33, 16 }
 0x5fe   : > { %v6455_v0 = vpop.permute.xlu1 %6454  ;;  %v9016_v39 = vld [vmem:[#allocation3 + $0x1c] sm:$0xf0]  ;;  %6381 = vst.msk [vmem:[#allocation3 + $0x80] sm:$0xf] %vm433_vm2, %v6187_v7  ;;  %v5774_v21 = vrot.slane %v5772_v34, 4  ;;  %v6197_v27 = vrot.slane %v13611_v43, 4  ;;  %v6947_v31 = vsel %vm10809_vm13, %v6938_v1, %v13752_v10 }
 0x5ff   : > { %6527 = vst.msk [vmem:[#allocation3 + $0x30] sm:$0xf] %vm1899_vm1, %v6455_v0  ;;  %v9019_v18 = vor.u32 %v9518_v53, %v9016_v39  ;;  %v13733_v53 = vrot.slane %v5978_v57, 4  ;;  %v6622_v0 = vrot.slane %v6620_v45, 4  ;;  %v9549_v39 = vld [vmem:[#allocation3 + $0x100] sm:$0xf0]  ;;  %v5773_v6 = vsel %vm10755_vm3, %v5771_v58, %v5772_v34 }
 0x600   : > { %6484 = vrot.lane.b32.xlu2 %v6417_v11, %s9731_s17  ;;  %6705 = vst.msk [vmem:[#allocation3 + $0x84] sm:$0xf] %vm433_vm2, %v6621_v25  ;;  %v5776_v38 = vsel %vm10755_vm3, %v5774_v21, %v5775_v9  ;;  %v6226_v45 = vshrl.u32 %v6107_v23, 16  ;;  %v6973_v7 = vshll.u32 %v6746_v41, 16  ;;  %v6948_v26 = vrot.slane %v13752_v10, 4 }
 0x601   : > { %7036 = vrot.lane.b32.xlu0 %v6927_v15, %s9731_s17  ;;  %8038 = vmatmul.bf16.gmra.mxu2 %v9107_v20  ;;  %v5979_v20 = vsel %vm10695_vm15, %v5977_v56, %v5978_v57  ;;  %5852 = vst.msk [vmem:[#allocation3 + $0xcc] sm:$0xf] %vm433_vm2, %v5776_v38  ;;  %v13750_v15 = vld [vmem:[#allocation2 + $0x30] sm:$0xf]  ;;  %v5981_v56 = vrot.slane %v13719_v19, 7  ;;  %v6624_v57 = vsel %vm10861_vm5, %v6622_v0, %v6623_v47  ;;  %v6962_v0 = vrot.slane %v6960_v36, 6 }
 0x602   : > { %8232 = vmatmul.bf16.vlgmr.msra.gmra.mxu1 %v9019_v18  ;;  %v6008_v35 = vpop.permute.xlu2 %6007  ;;  %v6418_v18 = vld [vmem:[#allocation2 + $0x50] sm:$0xf]  ;;  %v6217_v60 = vshrl.u32 %v13750_v15, 16  ;;  %6706 = vst.msk [vmem:[#allocation3 + $0x98] sm:$0xf] %vm433_vm2, %v6624_v57 }
 0x603   : > { %v7009_v61 = vpop.permute.xlu0 %7008  ;;  %6076 = vst.msk [vmem:[#allocation3 + $0x7c] sm:$0xf] %vm1899_vm1, %v6008_v35  ;;  %v9028_v55 = vld [vmem:[#allocation3 + $0x3c] sm:$0xf0]  ;;  %v6970_v35 = vshrl.u32 %v6746_v41, 16  ;;  %v5983_v1 = vrot.slane %v5981_v56, 4  ;;  %v5982_v36 = vsel %vm10695_vm15, %v13733_v53, %v5981_v56 }
 0x604   : > { %7081 = vst.msk [vmem:[#allocation3 + $0x34] sm:$0xf] %vm1899_vm1, %v7009_v61  ;;  %7038 = vrot.lane.b32.xlu1 %v6937_v4, %s9731_s17  ;;  %v9031_v28 = vor.u32 %v9522_v14, %v9028_v55  ;;  %v13754_v14 = vld [vmem:[#allocation2 + $0x5c] sm:$0xf]  ;;  %v13767_v46 = vrot.slane %v6217_v60, 7  ;;  %v6202_v61 = vshll.u32 %v13670_v59, 16  ;;  %v9127_v55 = vor.u32 %v9549_v39, %v9126_v51 }
 0x605   : > { %v6419_v4 = vld [vmem:[#allocation2 + $0x54] sm:$0xf]  ;;  %5851 = vst.msk [vmem:[#allocation3 + $0xb8] sm:$0xf] %vm433_vm2, %v5773_v6  ;;  %v13779_v59 = vrot.slane %v6226_v45, 7  ;;  %v5984_v29 = vrot.slane %v13754_v14, 7 }
 0x606   : > { %8091 = vmatmul.bf16.gmra.mxu3 %v9031_v28  ;;  %v7011_v13 = vpop.permute.xlu1 %7010  ;;  %v9034_v48 = vld [vmem:[#allocation3 + $0x30] sm:$0xf]  ;;  %v6229_v28 = vshll.u32 %v6107_v23, 16  ;;  %v6224_v43 = vrot.slane %v13767_v46, 4  ;;  %v6204_v34 = vor.u32 %v6202_v61, %v13683_v40  ;;  %v9527_v33 = vld [vmem:[#allocation3 + $0x54] sm:$0xf] }
 0x607   : > { %7082 = vst.msk [vmem:[#allocation3 + $0x48] sm:$0xf] %vm1899_vm1, %v7011_v13  ;;  %v9035_v11 = vor.u32 %v9525_v12, %v9034_v48  ;;  %v13784_v13 = vor.u32 %v6955_v17, %v6952_v22  ;;  %v6747_v48 = vld [vmem:[#allocation2 + $0x68] sm:$0xf]  ;;  %v6972_v39 = vrot.slane %v6970_v35, 6  ;;  %v6975_v22 = vrot.slane %v6973_v7, 7 }
 0x608   : > { %6031 = vrot.lane.b32.xlu2 %v5976_v54, %s9731_s17  ;;  %v6231_v21 = vor.u32 %v6229_v28, %v13779_v59  ;;  %v6205_v40 = vsel %vm10827_vm7, %v6197_v27, %v6204_v34  ;;  %v6559_v54 = vld [vmem:[#allocation2 + $0x30] sm:$0xf]  ;;  %v13795_v41 = vld [vmem:[#allocation2 + $0x60] sm:$0xf]  ;;  %v6980_v17 = vshrl.u32 %v6747_v48, 16  ;;  %v6983_v60 = vshll.u32 %v6747_v48, 16 }
 0x609   : > { %6033 = vrot.lane.b32.xlu0 %v5979_v20, %s9731_s17  ;;  %8164 = vmatmul.bf16.gmra.mxu0 %v9035_v11  ;;  %v6625_v11 = vrot.slane %v6623_v47, 4  ;;  %v6965_v20 = vrot.slane %v6963_v49, 7  ;;  %6383 = vst.msk [vmem:[#allocation3 + $0xa8] sm:$0xf] %vm433_vm2, %v6205_v40  ;;  %v6626_v58 = vrot.slane %v6559_v54, 6  ;;  %v5777_v47 = vrot.slane %v5775_v9, 4 }
 0x60a   : > { %v6465_v24 = vpop.permute.xlu2 %6464  ;;  %v6957_v10 = vsel %vm10809_vm13, %v6948_v26, %v13784_v13  ;;  %v5705_v57 = vld [vmem:[#allocation2 + $0x30] sm:$0xf]  ;;  %v13809_v63 = vld [vmem:[#allocation2 + $0x34] sm:$0xf]  ;;  %v9530_v49 = vld [vmem:[#allocation3 + $0x68] sm:$0xf0]  ;;  %v5985_v7 = vsel %vm10695_vm15, %v5983_v1, %v5984_v29 }
 0x60b   : > { %v6006_v37 = vpop.permute.xlu0 %6005  ;;  %6532 = vst.msk [vmem:[#allocation3 + $0x94] sm:$0xf] %vm1899_vm1, %v6465_v24  ;;  %v9523_v30 = vld [vmem:[#allocation3 + $0x34] sm:$0xf]  ;;  %v5778_v9 = vrot.slane %v5705_v57, 5  ;;  %v5987_v35 = vrot.slane %v13795_v41, 7  ;;  %v13819_v61 = vor.u32 %v6965_v20, %v6962_v0 }
 0x60c   : > { %6075 = vst.msk [vmem:[#allocation3 + $0x68] sm:$0xf] %vm1899_vm1, %v6006_v37  ;;  %6486 = vrot.lane.b32.xlu1 %v6418_v18, %s9731_s17  ;;  %v6232_v18 = vsel %vm10827_vm7, %v6224_v43, %v6231_v21  ;;  %v6627_v37 = vsel %vm10861_vm5, %v6625_v11, %v6626_v58  ;;  %v6215_v6 = vrot.slane %v13692_v52, 4  ;;  %v6628_v56 = vrot.slane %v6626_v58, 4  ;;  %v6420_v43 = vld [vmem:[#allocation2 + $0x58] sm:$0xf] }
 0x60d   : > { %6386 = vst.msk [vmem:[#allocation3 + $0xe4] sm:$0xf] %vm433_vm2, %v6232_v18  ;;  %v5780_v19 = vrot.slane %v5778_v9, 4  ;;  %v6220_v52 = vshll.u32 %v13750_v15, 16  ;;  %v6982_v28 = vrot.slane %v6980_v17, 6  ;;  %v6958_v34 = vrot.slane %v13784_v13, 4 }
 0x60e   : > { %v6459_v12 = vpop.permute.xlu1 %6458  ;;  %v9036_v50 = vld [vmem:[#allocation3 + $0x44] sm:$0xf0]  ;;  %6707 = vst.msk [vmem:[#allocation3 + $0xac] sm:$0xf] %vm433_vm2, %v6627_v37  ;;  %v9554_v48 = vld [vmem:[#allocation3 + $0x128] sm:$0xf0] }
 0x60f   : > { %6529 = vst.msk [vmem:[#allocation3 + $0x58] sm:$0xf] %vm1899_vm1, %v6459_v12  ;;  %v9039_v25 = vor.u32 %v9523_v30, %v9036_v50  ;;  %v5779_v30 = vsel %vm10755_vm3, %v5777_v47, %v5778_v9  ;;  %v6985_v12 = vrot.slane %v6983_v60, 7  ;;  %v6560_v50 = vld [vmem:[#allocation2 + $0x34] sm:$0xf]  ;;  %v6968_v1 = vrot.slane %v13819_v61, 4 }
 0x610   : > { %6488 = vrot.lane.b32.xlu2 %v6419_v4, %s9731_s17  ;;  %v13821_v4 = vor.u32 %v6975_v22, %v6972_v39  ;;  %v6629_v15 = vrot.slane %v6560_v50, 6  ;;  %v13843_v21 = vrot.slane %v5984_v29, 4  ;;  %5853 = vst.msk [vmem:[#allocation3 + $0xe0] sm:$0xf] %vm433_vm2, %v5779_v30  ;;  %v9146_v54 = vld [vmem:[#allocation3 + $0x118] sm:$0xf]  ;;  %v6967_v37 = vsel %vm10809_vm13, %v6958_v34, %v13819_v61 }
 0x611   : > { %7040 = vrot.lane.b32.xlu0 %v6947_v31, %s9731_s17  ;;  %8043 = vmatmul.bf16.gmra.mxu2 %v9127_v55  ;;  %v5781_v55 = vrot.slane %v13809_v63, 5  ;;  %v13849_v13 = vrot.slane %v5987_v35, 4  ;;  %v13852_v11 = vld [vmem:[#allocation2 + $0x6c] sm:$0xf]  ;;  %v13860_v29 = vor.u32 %v6985_v12, %v6982_v28  ;;  %v13862_v0 = vld [vmem:[#allocation2 + $0x38] sm:$0xf]  ;;  %v9147_v58 = vor.u32 %v9554_v48, %v9146_v54 }
 0x612   : > { %8237 = vmatmul.bf16.gmra.mxu1 %v9039_v25  ;;  %v6012_v38 = vpop.permute.xlu2 %6011  ;;  %v6222_v25 = vor.u32 %v6220_v52, %v13767_v46  ;;  %v6978_v46 = vrot.slane %v13821_v4, 4  ;;  %v6109_v20 = vld [vmem:[#allocation2 + $0x3c] sm:$0xf]  ;;  %v6631_v60 = vrot.slane %v6629_v15, 4  ;;  %v6561_v9 = vld [vmem:[#allocation2 + $0x38] sm:$0xf]  ;;  %v5988_v54 = vsel %vm10695_vm15, %v13843_v21, %v5987_v35 }
 0x613   : > { %v7013_v24 = vpop.permute.xlu0 %7012  ;;  %6078 = vst.msk [vmem:[#allocation3 + $0xa4] sm:$0xf] %vm1899_vm1, %v6012_v38  ;;  %v9048_v51 = vld [vmem:[#allocation3 + $0x64] sm:$0xf0]  ;;  %v5782_v31 = vsel %vm10755_vm3, %v5780_v19, %v5781_v55  ;;  %v6235_v38 = vshrl.u32 %v13862_v0, 16  ;;  %v6244_v18 = vshrl.u32 %v6109_v20, 16 }
 0x614   : > { %7083 = vst.msk [vmem:[#allocation3 + $0x5c] sm:$0xf] %vm1899_vm1, %v7013_v24  ;;  %7042 = vrot.lane.b32.xlu1 %v6957_v10, %s9731_s17  ;;  %v9051_v23 = vor.u32 %v9527_v33, %v9048_v51  ;;  %v6630_v33 = vsel %vm10861_vm5, %v6628_v56, %v6629_v15  ;;  %v6223_v14 = vsel %vm10827_vm7, %v6215_v6, %v6222_v25  ;;  %v6421_v39 = vld [vmem:[#allocation2 + $0x5c] sm:$0xf]  ;;  %v6990_v24 = vshrl.u32 %v13852_v11, 16 }
 0x615   : > { %5854 = vst.msk [vmem:[#allocation3 + $0xf4] sm:$0xf] %vm433_vm2, %v5782_v31  ;;  %v6247_v10 = vshll.u32 %v6109_v20, 16  ;;  %v6237_v57 = vrot.slane %v6235_v38, 7  ;;  %v6988_v63 = vrot.slane %v13860_v29, 4  ;;  %v6977_v6 = vsel %vm10809_vm13, %v6968_v1, %v13821_v4 }
 0x616   : > { %8096 = vmatmul.bf16.gmra.mxu3 %v9051_v23  ;;  %v7015_v45 = vpop.permute.xlu1 %7014  ;;  %v9054_v27 = vld [vmem:[#allocation3 + $0x58] sm:$0xf]  ;;  %6708 = vst.msk [vmem:[#allocation3 + $0xc0] sm:$0xf] %vm433_vm2, %v6630_v33  ;;  %v13869_v23 = vrot.slane %v6244_v18, 7  ;;  %v6632_v19 = vrot.slane %v6561_v9, 6 }
 0x617   : > { %7084 = vst.msk [vmem:[#allocation3 + $0x70] sm:$0xf] %vm1899_vm1, %v7015_v45  ;;  %v9055_v53 = vor.u32 %v9530_v49, %v9054_v27  ;;  %v5783_v49 = vrot.slane %v5781_v55, 4  ;;  %v6242_v45 = vrot.slane %v6237_v57, 4  ;;  %v6562_v61 = vld [vmem:[#allocation2 + $0x3c] sm:$0xf] }
 0x618   : > { %6035 = vrot.lane.b32.xlu2 %v5982_v36, %s9731_s17  ;;  %6385 = vst.msk [vmem:[#allocation3 + $0xd0] sm:$0xf] %vm433_vm2, %v6223_v14  ;;  %v5707_v36 = vld [vmem:[#allocation2 + $0x38] sm:$0xf]  ;;  %v6249_v27 = vor.u32 %v6247_v10, %v13869_v23  ;;  %v9532_v30 = vld [vmem:[#allocation3 + $0x7c] sm:$0xf] }
 0x619   : > { %6037 = vrot.lane.b32.xlu0 %v5985_v7, %s9731_s17  ;;  %8169 = vmatmul.bf16.gmra.mxu0 %v9055_v53  ;;  %v13881_v53 = vld [vmem:[#allocation2 + $0x3c] sm:$0xf]  ;;  %v13883_v52 = vrot.slane %v6990_v24, 6  ;;  %v6993_v55 = vshll.u32 %v13852_v11, 16  ;;  %v5784_v7 = vrot.slane %v5707_v36, 5  ;;  %v6635_v28 = vrot.slane %v6562_v61, 6 }
 0x61a   : > { %v6469_v26 = vpop.permute.xlu2 %6468  ;;  %v6250_v50 = vsel %vm10827_vm7, %v6242_v45, %v6249_v27  ;;  %v5787_v34 = vrot.slane %v13881_v53, 5  ;;  %v6634_v15 = vrot.slane %v6632_v19, 4  ;;  %v13894_v1 = vld [vmem:[#allocation2 + $0x40] sm:$0xf]  ;;  %v13902_v11 = vld [vmem:[#allocation2 + $0x70] sm:$0x1]  ;;  %v5991_v24 = vsel %vm10695_vm15, %v13849_v13, %v5990_v62 }
 0x61b   : > { %v6010_v40 = vpop.permute.xlu0 %6009  ;;  %6534 = vst.msk [vmem:[#allocation3 + $0xbc] sm:$0xf] %vm1899_vm1, %v6469_v26  ;;  %v9528_v22 = vld [vmem:[#allocation3 + $0x5c] sm:$0xf]  ;;  %v9535_v26 = vld [vmem:[#allocation3 + $0x90] sm:$0xf0]  ;;  %v5785_v33 = vsel %vm10755_vm3, %v5783_v49, %v5784_v7 }
 0x61c   : > { %6077 = vst.msk [vmem:[#allocation3 + $0x90] sm:$0xf] %vm1899_vm1, %v6010_v40  ;;  %6490 = vrot.lane.b32.xlu1 %v6420_v43, %s9731_s17  ;;  %v6633_v43 = vsel %vm10861_vm5, %v6631_v60, %v6632_v19  ;;  %v5786_v48 = vrot.slane %v5784_v7, 4  ;;  %v6233_v40 = vrot.slane %v13779_v59, 4  ;;  %v6111_v14 = vld [vmem:[#allocation2 + $0x44] sm:$0xf]  ;;  %v6636_v35 = vsel %vm10861_vm5, %v6634_v15, %v6635_v28 }
 0x61d   : > { %6388 = vst.msk [vmem:[#allocation3 + $0x10c] sm:$0xf] %vm433_vm2, %v6250_v50  ;;  %v6253_v20 = vshrl.u32 %v13894_v1, 16  ;;  %v6262_v21 = vshrl.u32 %v6111_v14, 16  ;;  %v6637_v38 = vrot.slane %v6635_v28, 4  ;;  %v6995_v49 = vrot.slane %v6993_v55, 7 }
 0x61e   : > { %v6463_v17 = vpop.permute.xlu1 %6462  ;;  %v9056_v47 = vld [vmem:[#allocation3 + $0x6c] sm:$0xf0]  ;;  %6709 = vst.msk [vmem:[#allocation3 + $0xd4] sm:$0xf] %vm433_vm2, %v6633_v43  ;;  %v5788_v41 = vsel %vm10755_vm3, %v5786_v48, %v5787_v34  ;;  %v9166_v10 = vld [vmem:[#allocation3 + $0x140] sm:$0xf] }
 0x61f   : > { %6531 = vst.msk [vmem:[#allocation3 + $0x80] sm:$0xf] %vm1899_vm1, %v6463_v17  ;;  %v9059_v51 = vor.u32 %v9528_v22, %v9056_v47  ;;  %v13915_v17 = vrot.slane %v6253_v20, 7  ;;  %v6563_v47 = vld [vmem:[#allocation2 + $0x40] sm:$0xf]  ;;  %v5789_v27 = vrot.slane %v5787_v34, 4  ;;  %v6996_v20 = vor.u32 %v6995_v49, %v13883_v52 }
 0x620   : > { %6492 = vrot.lane.b32.xlu2 %v6421_v39, %s9731_s17  ;;  %v6238_v39 = vshll.u32 %v13862_v0, 16  ;;  %5856 = vst.msk [vmem:[#allocation3 + $0x11c] sm:$0xf] %vm433_vm2, %v5788_v41  ;;  %v6638_v60 = vrot.slane %v6563_v47, 6  ;;  %v13929_v9 = vld [vmem:[#allocation2 + $0x44] sm:$0xf] }
 0x621   : > { %7044 = vrot.lane.b32.xlu0 %v6967_v37, %s9731_s17  ;;  %8048 = vmatmul.bf16.gmra.mxu2 %v9147_v58  ;;  %v6265_v58 = vshll.u32 %v6111_v14, 16  ;;  %v5709_v37 = vld [vmem:[#allocation2 + $0x40] sm:$0xf]  ;;  %6710 = vst.msk [vmem:[#allocation3 + $0xe8] sm:$0xf] %vm433_vm2, %v6636_v35  ;;  %v6260_v3 = vrot.slane %v13915_v17, 4 }
 0x622   : > { %8242 = vmatmul.bf16.gmra.mxu1 %v9059_v51  ;;  %v6016_v56 = vpop.permute.xlu2 %6015  ;;  %v6240_v0 = vor.u32 %v6238_v39, %v6237_v57  ;;  %v13924_v51 = vrot.slane %v6262_v21, 7  ;;  %v6422_v57 = vld [vmem:[#allocation2 + $0x60] sm:$0xf]  ;;  %v5790_v62 = vrot.slane %v5709_v37, 5  ;;  %v9559_v36 = vld [vmem:[#allocation3 + $0x150] sm:$0xf0]  ;;  %v6639_v43 = vsel %vm10861_vm5, %v6637_v38, %v6638_v60 }
 0x623   : > { %v7017_v12 = vpop.permute.xlu0 %7016  ;;  %6080 = vst.msk [vmem:[#allocation3 + $0xcc] sm:$0xf] %vm1899_vm1, %v6016_v56  ;;  %v9068_v31 = vld [vmem:[#allocation3 + $0x8c] sm:$0xf0]  ;;  %v5793_v56 = vrot.slane %v13929_v9, 5  ;;  %v6998_v35 = vrot.slane %v6996_v20, 4 }
 0x624   : > { %7085 = vst.msk [vmem:[#allocation3 + $0x84] sm:$0xf] %vm1899_vm1, %v7017_v12  ;;  %7046 = vrot.lane.b32.xlu1 %v6977_v6, %s9731_s17  ;;  %v9071_v25 = vor.u32 %v9532_v30, %v9068_v31  ;;  %v7000_v6 = vshll.u32 %v13902_v11, 16  ;;  %v6267_v45 = vor.u32 %v6265_v58, %v13924_v51  ;;  %v6241_v53 = vsel %vm10827_vm7, %v6233_v40, %v6240_v0  ;;  %v6564_v28 = vld [vmem:[#allocation2 + $0x44] sm:$0xf] }
 0x625   : > { %5855 = vst.msk [vmem:[#allocation3 + $0x108] sm:$0xf] %vm433_vm2, %v5785_v33  ;;  %v5792_v61 = vrot.slane %v5790_v62, 4  ;;  %v6640_v30 = vrot.slane %v6638_v60, 4  ;;  %v13942_v12 = vld [vmem:[#allocation2 + $0x48] sm:$0xf]  ;;  %v9167_v31 = vor.u32 %v9559_v36, %v9166_v10 }
 0x626   : > { %8101 = vmatmul.bf16.gmra.mxu3 %v9071_v25  ;;  %v7019_v59 = vpop.permute.xlu1 %7018  ;;  %v9074_v22 = vld [vmem:[#allocation3 + $0x80] sm:$0xf]  ;;  %v6268_v7 = vsel %vm10827_vm7, %v6260_v3, %v6267_v45  ;;  %v9609_v50 = vld [vmem:[%s14520_s5 + $0x100] sm:$0xff]  ;;  %v6641_v34 = vrot.slane %v6564_v28, 6  ;;  %v6113_v15 = vld [vmem:[#allocation2 + $0x4c] sm:$0xf] }
 0x627   : > { %7086 = vst.msk [vmem:[#allocation3 + $0x98] sm:$0xf] %vm1899_vm1, %v7019_v59  ;;  %v9075_v18 = vor.u32 %v9535_v26, %v9074_v22  ;;  %v6987_v26 = vsel %vm10809_vm13, %v6978_v46, %v13860_v29  ;;  %v5794_v40 = vsel %vm10755_vm3, %v5792_v61, %v5793_v56  ;;  %v6280_v11 = vshrl.u32 %v6113_v15, 16  ;;  %v6423_v33 = vld [vmem:[#allocation2 + $0x64] sm:$0xf]  ;;  %8304 = vmatpush.bf16.msra.mxu2 %v9609_v50 }
 0x628   : > { %6039 = vrot.lane.b32.xlu2 %v5988_v54, %s9731_s17  ;;  %6390 = vst.msk [vmem:[#allocation3 + $0x134] sm:$0xf] %vm433_vm2, %v6268_v7  ;;  %v6271_v54 = vshrl.u32 %v13942_v12, 16  ;;  %v6642_v4 = vsel %vm10861_vm5, %v6640_v30, %v6641_v34  ;;  %v6256_v46 = vshll.u32 %v13894_v1, 16  ;;  %v7002_v39 = vrot.slane %v7000_v6, 7 }
 0x629   : > { %6041 = vrot.lane.b32.xlu0 %v5991_v24, %s9731_s17  ;;  %8174 = vmatmul.bf16.gmra.mxu0 %v9075_v18  ;;  %6387 = vst.msk [vmem:[#allocation3 + $0xf8] sm:$0xf] %vm433_vm2, %v6241_v53  ;;  %v13968_v22 = vrot.slane %v6280_v11, 7  ;;  %v6283_v41 = vshll.u32 %v6113_v15, 16  ;;  %v9537_v52 = vld [vmem:[#allocation3 + $0xa4] sm:$0xf]  ;;  %v5791_v1 = vsel %vm10755_vm3, %v5789_v27, %v5790_v62 }
 0x62a   : > { %v6473_v13 = vpop.permute.xlu2 %6472  ;;  %6711 = vst.msk [vmem:[#allocation3 + $0xfc] sm:$0xf] %vm433_vm2, %v6639_v43  ;;  %v13966_v59 = vrot.slane %v6271_v54, 7  ;;  %v6251_v21 = vrot.slane %v13869_v23, 4  ;;  %v6258_v38 = vor.u32 %v6256_v46, %v13915_v17  ;;  %v6565_v18 = vld [vmem:[#allocation2 + $0x48] sm:$0xf]  ;;  %v6997_v23 = vsel %vm10809_vm13, %v6988_v63, %v6996_v20 }
 0x62b   : > { %v6014_v19 = vpop.permute.xlu0 %6013  ;;  %6536 = vst.msk [vmem:[#allocation3 + $0xe4] sm:$0xf] %vm1899_vm1, %v6473_v13  ;;  %v9533_v55 = vld [vmem:[#allocation3 + $0x84] sm:$0xf]  ;;  %v6285_v47 = vor.u32 %v6283_v41, %v13968_v22  ;;  %v6643_v24 = vrot.slane %v6641_v34, 4  ;;  %v6644_v10 = vrot.slane %v6565_v18, 6  ;;  %v7003_v53 = vsel %vm10809_vm13, %v6998_v35, %v7002_v39 }
 0x62c   : > { %6079 = vst.msk [vmem:[#allocation3 + $0xb8] sm:$0xf] %vm1899_vm1, %v6014_v19  ;;  %6494 = vrot.lane.b32.xlu1 %v6422_v57, %s9731_s17  ;;  %v6278_v0 = vrot.slane %v13966_v59, 4  ;;  %v5711_v37 = vld [vmem:[#allocation2 + $0x48] sm:$0xf]  ;;  %v5795_v29 = vrot.slane %v5793_v56, 4  ;;  %v6259_v63 = vsel %vm10827_vm7, %v6251_v21, %v6258_v38 }
 0x62d   : > { %5858 = vst.msk [vmem:[#allocation3 + $0x144] sm:$0xf] %vm433_vm2, %v5794_v40  ;;  %v9540_v9 = vld [vmem:[#allocation3 + $0xb8] sm:$0xf0]  ;;  %v13990_v13 = vld [vmem:[#allocation2 + $0x4c] sm:$0xf]  ;;  %v6645_v56 = vsel %vm10861_vm5, %v6643_v24, %v6644_v10 }
 0x62e   : > { %v6467_v25 = vpop.permute.xlu1 %6466  ;;  %v9076_v48 = vld [vmem:[#allocation3 + $0x94] sm:$0xf0]  ;;  %6712 = vst.msk [vmem:[#allocation3 + $0x110] sm:$0xf] %vm433_vm2, %v6642_v4  ;;  %v6286_v62 = vsel %vm10827_vm7, %v6278_v0, %v6285_v47  ;;  %v5796_v36 = vrot.slane %v5711_v37, 5  ;;  %v5799_v6 = vrot.slane %v13990_v13, 5 }
 0x62f   : > { %6533 = vst.msk [vmem:[#allocation3 + $0xa8] sm:$0xf] %vm1899_vm1, %v6467_v25  ;;  %v9079_v14 = vor.u32 %v9533_v55, %v9076_v48  ;;  %v6424_v49 = vld [vmem:[#allocation2 + $0x68] sm:$0x3]  ;;  %v6566_v45 = vld [vmem:[#allocation2 + $0x4c] sm:$0xf] }
 0x630   : > { %6496 = vrot.lane.b32.xlu2 %v6423_v33, %s9731_s17  ;;  %5857 = vst.msk [vmem:[#allocation3 + $0x130] sm:$0xf] %vm433_vm2, %v5791_v1  ;;  %v6646_v27 = vrot.slane %v6644_v10, 4  ;;  %v5798_v30 = vrot.slane %v5796_v36, 4  ;;  %v6647_v55 = vrot.slane %v6566_v45, 6  ;;  %v6274_v25 = vshll.u32 %v13942_v12, 16 }
 0x631   : > { %7048 = vrot.lane.b32.xlu0 %v6987_v26, %s9731_s17  ;;  %8053 = vmatmul.bf16.gmra.mxu2 %v9167_v31  ;;  %6392 = vst.msk [vmem:[#allocation3 + $0x15c] sm:$0xf] %vm433_vm2, %v6286_v62  ;;  %v14002_v28 = vld [vmem:[#allocation2 + $0x50] sm:$0xf]  ;;  %v6115_v31 = vld [vmem:[#allocation2 + $0x54] sm:$0xf]  ;;  %v5797_v4 = vsel %vm10755_vm3, %v5795_v29, %v5796_v36 }
 0x632   : > { %8247 = vmatmul.bf16.gmra.mxu1 %v9079_v14  ;;  %v6020_v58 = vpop.permute.xlu2 %6019  ;;  %6389 = vst.msk [vmem:[#allocation3 + $0x120] sm:$0xf] %vm433_vm2, %v6259_v63  ;;  %v5800_v44 = vsel %vm10755_vm3, %v5798_v30, %v5799_v6  ;;  %v6289_v50 = vshrl.u32 %v14002_v28, 16  ;;  %v6298_v43 = vshrl.u32 %v6115_v31, 16  ;;  %v6567_v34 = vld [vmem:[#allocation2 + $0x50] sm:$0xf]  ;;  %v6648_v15 = vsel %vm10861_vm5, %v6646_v27, %v6647_v55 }
 0x633   : > { %v7021_v60 = vpop.permute.xlu0 %7020  ;;  %6082 = vst.msk [vmem:[#allocation3 + $0xf4] sm:$0xf] %vm1899_vm1, %v6020_v58  ;;  %v9088_v17 = vld [vmem:[#allocation3 + $0xb4] sm:$0xf0]  ;;  %v6301_v54 = vshll.u32 %v6115_v31, 16  ;;  %v6269_v11 = vrot.slane %v13924_v51, 4  ;;  %v6276_v46 = vor.u32 %v6274_v25, %v13966_v59 }
 0x634   : > { %7087 = vst.msk [vmem:[#allocation3 + $0xac] sm:$0xf] %vm1899_vm1, %v7021_v60  ;;  %7050 = vrot.lane.b32.xlu1 %v6997_v23, %s9731_s17  ;;  %v13986_v57 = vpop.f32.mrf.mxu2  ;;  %v9091_v3 = vor.u32 %v9537_v52, %v9088_v17  ;;  %v6291_v48 = vrot.slane %v6289_v50, 7  ;;  %v14017_v40 = vrot.slane %v6298_v43, 7  ;;  %v9186_v14 = vld [vmem:[#allocation3 + $0x168] sm:$0xf] }
 0x635   : > { %6713 = vst.msk [vmem:[#allocation3 + $0x124] sm:$0xf] %vm433_vm2, %v6645_v56  ;;  %v9564_v20 = vld [vmem:[#allocation3 + $0x178] sm:$0xf0]  ;;  %v6649_v12 = vrot.slane %v6647_v55, 4  ;;  %v6650_v39 = vrot.slane %v6567_v34, 6  ;;  %v6277_v47 = vsel %vm10827_vm7, %v6269_v11, %v6276_v46 }
 0x636   : > { %8106 = vmatmul.bf16.gmra.mxu3 %v9091_v3  ;;  %v7023_v19 = vpop.permute.xlu1 %7022  ;;  %v9094_v61 = vld [vmem:[#allocation3 + $0xa8] sm:$0xf]  ;;  %5860 = vst.msk [vmem:[#allocation3 + $0x16c] sm:$0xf] %vm433_vm2, %v5800_v44  ;;  %v6296_v52 = vrot.slane %v6291_v48, 4  ;;  %v6303_v35 = vor.u32 %v6301_v54, %v14017_v40  ;;  %v9187_v18 = vor.u32 %v9564_v20, %v9186_v14  ;;  %v6292_v3 = vshll.u32 %v14002_v28, 16 }
 0x637   : > { %7088 = vst.msk [vmem:[#allocation3 + $0xc0] sm:$0xf] %vm1899_vm1, %v7023_v19  ;;  %v9095_v7 = vor.u32 %v9540_v9, %v9094_v61  ;;  %v5713_v51 = vld [vmem:[#allocation2 + $0x50] sm:$0xf]  ;;  %v14029_v1 = vld [vmem:[#allocation2 + $0x54] sm:$0xf]  ;;  %v6651_v10 = vsel %vm10861_vm5, %v6649_v12, %v6650_v39 }
 0x638   : > { %6498 = vrot.lane.b32.xlu2 %v6424_v49, %s9731_s17  ;;  %6714 = vst.msk [vmem:[#allocation3 + $0x138] sm:$0xf] %vm433_vm2, %v6648_v15  ;;  %v5802_v21 = vrot.slane %v5713_v51, 5  ;;  %v6304_v59 = vsel %vm10827_vm7, %v6296_v52, %v6303_v35  ;;  %v5805_v60 = vrot.slane %v14029_v1, 5  ;;  %v6652_v23 = vrot.slane %v6650_v39, 4 }
 0x639   : > { %7052 = vrot.lane.b32.xlu0 %v7003_v53, %s9731_s17  ;;  %8179 = vmatmul.bf16.gmra.mxu0 %v9095_v7  ;;  %5859 = vst.msk [vmem:[#allocation3 + $0x158] sm:$0xf] %vm433_vm2, %v5797_v4  ;;  %v6568_v37 = vld [vmem:[#allocation2 + $0x54] sm:$0xf]  ;;  %v9542_v9 = vld [vmem:[#allocation3 + $0xcc] sm:$0xf]  ;;  %v6294_v19 = vor.u32 %v6292_v3, %v6291_v48 }
 0x63a   : > { %v6477_v26 = vpop.permute.xlu2 %6476  ;;  %6394 = vst.msk [vmem:[#allocation3 + $0x184] sm:$0xf] %vm433_vm2, %v6304_v59  ;;  %v5804_v17 = vrot.slane %v5802_v21, 4  ;;  %v6653_v62 = vrot.slane %v6568_v37, 6  ;;  %v5801_v36 = vrot.slane %v5799_v6, 4  ;;  %v6287_v27 = vrot.slane %v13968_v22, 4 }
 0x63b   : > { %v6018_v33 = vpop.permute.xlu0 %6017  ;;  %6538 = vst.msk [vmem:[#allocation3 + $0x10c] sm:$0xf] %vm1899_vm1, %v6477_v26  ;;  %v9538_v58 = vld [vmem:[#allocation3 + $0xac] sm:$0xf]  ;;  %v14045_v29 = vld [vmem:[#allocation2 + $0x58] sm:$0xf] }
 0x63c   : > { %6081 = vst.msk [vmem:[#allocation3 + $0xe0] sm:$0xf] %vm1899_vm1, %v6018_v33  ;;  %v14025_v41 = vpop.f32.mrf.mxu2  ;;  %v5806_v63 = vsel %vm10755_vm3, %v5804_v17, %v5805_v60  ;;  %v6117_v45 = vld [vmem:[#allocation2 + $0x5c] sm:$0xf]  ;;  %v6654_v6 = vsel %vm10861_vm5, %v6652_v23, %v6653_v62  ;;  %v6307_v61 = vshrl.u32 %v14045_v29, 16  ;;  %v5803_v22 = vsel %vm10755_vm3, %v5801_v36, %v5802_v21 }
 0x63d   : > { %6391 = vst.msk [vmem:[#allocation3 + $0x148] sm:$0xf] %vm433_vm2, %v6277_v47  ;;  %v6316_v56 = vshrl.u32 %v6117_v45, 16  ;;  %v9545_v7 = vld [vmem:[#allocation3 + $0xe0] sm:$0xf0]  ;;  %v6319_v28 = vshll.u32 %v6117_v45, 16  ;;  %v6295_v25 = vsel %vm10827_vm7, %v6287_v27, %v6294_v19 }
 0x63e   : > { %v6471_v38 = vpop.permute.xlu1 %6470  ;;  %v9096_v0 = vld [vmem:[#allocation3 + $0xbc] sm:$0xf0]  ;;  %6715 = vst.msk [vmem:[#allocation3 + $0x14c] sm:$0xf] %vm433_vm2, %v6651_v10  ;;  %v7104_v31 = vld [vmem:[#allocation2 + $0xc] sm:$0x8] }
 0x63f   : > { %6535 = vst.msk [vmem:[#allocation3 + $0xd0] sm:$0xf] %vm1899_vm1, %v6471_v38  ;;  %v9099_v24 = vor.u32 %v9538_v58, %v9096_v0  ;;  %v14063_v44 = vrot.slane %v6307_v61, 7  ;;  %v14065_v50 = vrot.slane %v6316_v56, 7  ;;  %v7105_v43 = vld [vmem:[#allocation2 + $0x10] sm:$0xf] }
 0x640   : > { %5862 = vst.msk [vmem:[#allocation3 + $0x194] sm:$0xf] %vm433_vm2, %v5806_v63  ;;  %v14070_v26 = vld [vmem:[#allocation2 + $0x14] sm:$0xf]  ;;  %v9003_v33 = vrot.slane %v7104_v31, 11  ;;  %v7158_v20 = vrot.slane %v7105_v43, 7 }
 0x641   : > { %8058 = vmatmul.bf16.gmra.mxu2 %v9187_v18  ;;  %6716 = vst.msk [vmem:[#allocation3 + $0x160] sm:$0xf] %vm433_vm2, %v6654_v6  ;;  %v6314_v54 = vrot.slane %v14063_v44, 4  ;;  %v6321_v11 = vor.u32 %v6319_v28, %v14065_v50  ;;  %v6569_v14 = vld [vmem:[#allocation2 + $0x58] sm:$0xf]  ;;  %v6655_v4 = vrot.slane %v6653_v62, 4 }
 0x642   : > { %8252 = vmatmul.bf16.gmra.mxu1 %v9099_v24  ;;  %v6024_v49 = vpop.permute.xlu2 %6023  ;;  %5861 = vst.msk [vmem:[#allocation3 + $0x180] sm:$0xf] %vm433_vm2, %v5803_v22  ;;  %v6656_v46 = vrot.slane %v6569_v14, 6  ;;  %v5715_v39 = vld [vmem:[#allocation2 + $0x58] sm:$0xf]  ;;  %v7159_v51 = vsel %vm10695_vm15, %v9003_v33, %v7158_v20  ;;  %v7160_v21 = vrot.slane %v7158_v20, 4 }
 0x643   : > { %v7025_v53 = vpop.permute.xlu0 %7024  ;;  %6084 = vst.msk [vmem:[#allocation3 + $0x11c] sm:$0xf] %vm1899_vm1, %v6024_v49  ;;  %v9108_v13 = vld [vmem:[#allocation3 + $0xdc] sm:$0xf0]  ;;  %v6322_v12 = vsel %vm10827_vm7, %v6314_v54, %v6321_v11  ;;  %v14079_v52 = vld [vmem:[#allocation2 + $0x5c] sm:$0xf] }
 0x644   : > { %7089 = vst.msk [vmem:[#allocation3 + $0xd4] sm:$0xf] %vm1899_vm1, %v7025_v53  ;;  %v14058_v30 = vpop.f32.mrf.mxu2  ;;  %v9111_v55 = vor.u32 %v9542_v9, %v9108_v13  ;;  %v7161_v38 = vrot.slane %v14070_v26, 7  ;;  %v5808_v18 = vrot.slane %v5715_v39, 5  ;;  %v9206_v0 = vld [vmem:[#allocation3 + $0x190] sm:$0xf]  ;;  %v6657_v62 = vsel %vm10861_vm5, %v6655_v4, %v6656_v46 }
 0x645   : > { %6393 = vst.msk [vmem:[#allocation3 + $0x170] sm:$0xf] %vm433_vm2, %v6295_v25  ;;  %v9569_v59 = vld [vmem:[#allocation3 + $0x1a0] sm:$0xf0]  ;;  %v6658_v47 = vrot.slane %v6656_v46, 4  ;;  %v5807_v24 = vrot.slane %v5805_v60, 4 }
 0x646   : > { %8111 = vmatmul.bf16.gmra.mxu3 %v9111_v55  ;;  %v7027_v34 = vpop.permute.xlu1 %7026  ;;  %v9114_v15 = vld [vmem:[#allocation3 + $0xd0] sm:$0xf]  ;;  %6396 = vst.msk [vmem:[#allocation3 + $0x1ac] sm:$0xf] %vm433_vm2, %v6322_v12  ;;  %v7162_v17 = vsel %vm10695_vm15, %v7160_v21, %v7161_v38  ;;  %v5810_v37 = vrot.slane %v5808_v18, 4  ;;  %v5811_v3 = vrot.slane %v14079_v52, 5  ;;  %v9207_v63 = vor.u32 %v9569_v59, %v9206_v0 }
 0x647   : > { %7090 = vst.msk [vmem:[#allocation3 + $0xe8] sm:$0xf] %vm1899_vm1, %v7027_v34  ;;  %v9115_v48 = vor.u32 %v9545_v7, %v9114_v15  ;;  %v6570_v9 = vld [vmem:[#allocation2 + $0x5c] sm:$0xf]  ;;  %v14097_v1 = vld [vmem:[#allocation2 + $0x60] sm:$0xf]  ;;  %v5809_v34 = vsel %vm10755_vm3, %v5807_v24, %v5808_v18 }
 0x648   : > { %7257 = vst.msk [vmem:[#allocation3 + $0x10] sm:$0xf] %vm433_vm2, %v7159_v51  ;;  %v6659_v36 = vrot.slane %v6570_v9, 6  ;;  %v6310_v60 = vshll.u32 %v14045_v29, 16  ;;  %v5812_v27 = vsel %vm10755_vm3, %v5810_v37, %v5811_v3  ;;  %v6119_v19 = vld [vmem:[#allocation2 + $0x64] sm:$0xf] }
 0x649   : > { %8184 = vmatmul.bf16.gmra.mxu0 %v9115_v48  ;;  %7258 = vst.msk [vmem:[#allocation3 + $0x24] sm:$0xf] %vm433_vm2, %v7162_v17  ;;  %v6325_v6 = vshrl.u32 %v14097_v1, 16  ;;  %v6334_v29 = vshrl.u32 %v6119_v19, 16  ;;  %v6305_v61 = vrot.slane %v14017_v40, 4  ;;  %v6337_v31 = vshll.u32 %v6119_v19, 16 }
 0x64a   : > { %v6481_v35 = vpop.permute.xlu2 %6480  ;;  %v6660_v13 = vsel %vm10861_vm5, %v6658_v47, %v6659_v36  ;;  %6717 = vst.msk [vmem:[#allocation3 + $0x174] sm:$0xf] %vm433_vm2, %v6657_v62  ;;  %v7107_v56 = vld [vmem:[#allocation2 + $0x18] sm:$0xf]  ;;  %v9547_v55 = vld [vmem:[#allocation3 + $0xf4] sm:$0xf]  ;;  %v6312_v22 = vor.u32 %v6310_v60, %v14063_v44 }
 0x64b   : > { %v6022_v58 = vpop.permute.xlu0 %6021  ;;  %6540 = vst.msk [vmem:[#allocation3 + $0x134] sm:$0xf] %vm1899_vm1, %v6481_v35  ;;  %v9543_v23 = vld [vmem:[#allocation3 + $0xd4] sm:$0xf]  ;;  %v6327_v7 = vrot.slane %v6325_v6, 7  ;;  %v14112_v28 = vrot.slane %v6334_v29, 7 }
 0x64c   : > { %6083 = vst.msk [vmem:[#allocation3 + $0x108] sm:$0xf] %vm1899_vm1, %v6022_v58  ;;  %v14089_v10 = vpop.f32.mrf.mxu2  ;;  %v7108_v15 = vld [vmem:[#allocation2 + $0x1c] sm:$0xf]  ;;  %v7163_v40 = vrot.slane %v7161_v38, 4  ;;  %v7164_v25 = vrot.slane %v7107_v56, 7  ;;  %v6313_v46 = vsel %vm10827_vm7, %v6305_v61, %v6312_v22 }
 0x64d   : > { %5864 = vst.msk [vmem:[#allocation3 + $0x1bc] sm:$0xf] %vm433_vm2, %v5812_v27  ;;  %v6332_v54 = vrot.slane %v6327_v7, 4  ;;  %v6339_v11 = vor.u32 %v6337_v31, %v14112_v28  ;;  %v9550_v14 = vld [vmem:[#allocation3 + $0x108] sm:$0xf0]  ;;  %v7167_v12 = vrot.slane %v7108_v15, 7 }
 0x64e   : > { %v6475_v49 = vpop.permute.xlu1 %6474  ;;  %v9116_v45 = vld [vmem:[#allocation3 + $0xe4] sm:$0xf0]  ;;  %6718 = vst.msk [vmem:[#allocation3 + $0x188] sm:$0xf] %vm433_vm2, %v6660_v13  ;;  %v7166_v20 = vrot.slane %v7164_v25, 4  ;;  %v7165_v21 = vsel %vm10695_vm15, %v7163_v40, %v7164_v25  ;;  %v6661_v38 = vrot.slane %v6659_v36, 4 }
 0x64f   : > { %6537 = vst.msk [vmem:[#allocation3 + $0xf8] sm:$0xf] %vm1899_vm1, %v6475_v49  ;;  %v9119_v53 = vor.u32 %v9543_v23, %v9116_v45  ;;  %v6340_v4 = vsel %vm10827_vm7, %v6332_v54, %v6339_v11  ;;  %v6571_v39 = vld [vmem:[#allocation2 + $0x60] sm:$0xf]  ;;  %v6120_v59 = vld [vmem:[#allocation2 + $0x68] sm:$0x3] }
 0x650   : > { %5863 = vst.msk [vmem:[#allocation3 + $0x1a8] sm:$0xf] %vm433_vm2, %v5809_v34  ;;  %v6662_v18 = vrot.slane %v6571_v39, 6  ;;  %v7168_v0 = vsel %vm10695_vm15, %v7166_v20, %v7167_v12  ;;  %v6572_v47 = vld [vmem:[#allocation2 + $0x64] sm:$0xf]  ;;  %v6343_v24 = vshrl.u32 %v6120_v59, 16 }
 0x651   : > { %8063 = vmatmul.bf16.gmra.mxu2 %v9207_v63  ;;  %6398 = vst.msk [vmem:[#allocation3 + $0x1d4] sm:$0xf] %vm433_vm2, %v6340_v4  ;;  %v6341_v17 = vrot.slane %v14112_v28, 4  ;;  %v6665_v37 = vrot.slane %v6572_v47, 6  ;;  %v6328_v9 = vshll.u32 %v14097_v1, 16  ;;  %v6346_v63 = vshll.u32 %v6120_v59, 16 }
 0x652   : > { %8257 = vmatmul.bf16.gmra.mxu1 %v9119_v53  ;;  %v6028_v43 = vpop.permute.xlu2 %6027  ;;  %6395 = vst.msk [vmem:[#allocation3 + $0x198] sm:$0xf] %vm433_vm2, %v6313_v46  ;;  %v6664_v23 = vrot.slane %v6662_v18, 4  ;;  %v9226_v36 = vld [vmem:[#allocation3 + $0x1b8] sm:$0xf]  ;;  %v6663_v60 = vsel %vm10861_vm5, %v6661_v38, %v6662_v18  ;;  %v6345_v49 = vrot.slane %v6343_v24, 7 }
 0x653   : > { %v7029_v26 = vpop.permute.xlu0 %7028  ;;  %6086 = vst.msk [vmem:[#allocation3 + $0x144] sm:$0xf] %vm1899_vm1, %v6028_v43  ;;  %v9128_v48 = vld [vmem:[#allocation3 + $0x104] sm:$0xf0]  ;;  %v5813_v45 = vrot.slane %v5811_v3, 4  ;;  %v6323_v1 = vrot.slane %v14065_v50, 4  ;;  %v6330_v53 = vor.u32 %v6328_v9, %v6327_v7 }
 0x654   : > { %7091 = vst.msk [vmem:[#allocation3 + $0xfc] sm:$0xf] %vm1899_vm1, %v7029_v26  ;;  %v14121_v44 = vpop.f32.mrf.mxu2  ;;  %v9131_v33 = vor.u32 %v9547_v55, %v9128_v48  ;;  %v6666_v19 = vsel %vm10861_vm5, %v6664_v23, %v6665_v37  ;;  %v7109_v13 = vld [vmem:[#allocation2 + $0x20] sm:$0xf]  ;;  %v6348_v56 = vor.u32 %v6346_v63, %v6345_v49  ;;  %v7110_v55 = vld [vmem:[#allocation2 + $0x24] sm:$0xf] }
 0x655   : > { %7259 = vst.msk [vmem:[#allocation3 + $0x38] sm:$0xf] %vm433_vm2, %v7165_v21  ;;  %v9574_v29 = vld [vmem:[#allocation3 + $0x1c8] sm:$0xf0]  ;;  %v7170_v52 = vrot.slane %v7109_v13, 7  ;;  %v7169_v3 = vrot.slane %v7167_v12, 4  ;;  %v5815_v7 = vsel %vm10755_vm3, %v5813_v45, %v5814_v42  ;;  %v6331_v26 = vsel %vm10827_vm7, %v6323_v1, %v6330_v53 }
 0x656   : > { %8116 = vmatmul.bf16.gmra.mxu3 %v9131_v33  ;;  %v7031_v35 = vpop.permute.xlu1 %7030  ;;  %v9134_v51 = vld [vmem:[#allocation3 + $0xf8] sm:$0xf]  ;;  %7260 = vst.msk [vmem:[#allocation3 + $0x4c] sm:$0xf] %vm433_vm2, %v7168_v0  ;;  %v7173_v28 = vrot.slane %v7110_v55, 7  ;;  %v6349_v50 = vsel %vm10827_vm7, %v6341_v17, %v6348_v56  ;;  %v9227_v40 = vor.u32 %v9574_v29, %v9226_v36  ;;  %v6667_v32 = vrot.slane %v6665_v37, 4 }
 0x657   : > { %7092 = vst.msk [vmem:[#allocation3 + $0x110] sm:$0xf] %vm1899_vm1, %v7031_v35  ;;  %v9135_v58 = vor.u32 %v9550_v14, %v9134_v51  ;;  %v6573_v31 = vld [vmem:[#allocation2 + $0x68] sm:$0xf]  ;;  %v7172_v34 = vrot.slane %v7170_v52, 4  ;;  %v7171_v33 = vsel %vm10695_vm15, %v7169_v3, %v7170_v52  ;;  %v7179_v35 = vrot.slane %v7112_v2, 7 }
 0x658   : > { %6719 = vst.msk [vmem:[#allocation3 + $0x19c] sm:$0xf] %vm433_vm2, %v6663_v60  ;;  %v6668_v15 = vrot.slane %v6573_v31, 6  ;;  %v14161_v48 = vld [vmem:[#allocation2 + $0x6c] sm:$0xf]  ;;  %v7175_v39 = vrot.slane %v7173_v28, 4 }
 0x659   : > { %8189 = vmatmul.bf16.gmra.mxu0 %v9135_v58  ;;  %6720 = vst.msk [vmem:[#allocation3 + $0x1b0] sm:$0xf] %vm433_vm2, %v6666_v19  ;;  %v7111_v54 = vld [vmem:[#allocation2 + $0x28] sm:$0xf]  ;;  %v9552_v11 = vld [vmem:[#allocation3 + $0x11c] sm:$0xf]  ;;  %v7174_v12 = vsel %vm10695_vm15, %v7172_v34, %v7173_v28 }
 0x65a   : > { %v6485_v62 = vpop.permute.xlu2 %6484  ;;  %6399 = vst.msk [vmem:[#allocation3 + $0x1e8] sm:$0x3] %vm1493_vm6, %v6349_v50  ;;  %v6670_v8 = vrot.slane %v6668_v15, 4  ;;  %v6671_v14 = vrot.slane %v14161_v48, 6  ;;  %v7176_v20 = vrot.slane %v7111_v54, 7  ;;  %v6669_v0 = vsel %vm10861_vm5, %v6667_v32, %v6668_v15 }
 0x65b   : > { %v6026_v27 = vpop.permute.xlu0 %6025  ;;  %6542 = vst.msk [vmem:[#allocation3 + $0x15c] sm:$0xf] %vm1899_vm1, %v6485_v62  ;;  %v9548_v61 = vld [vmem:[#allocation3 + $0xfc] sm:$0xf]  ;;  %v9555_v38 = vld [vmem:[#allocation3 + $0x130] sm:$0xf0] }
 0x65c   : > { %6085 = vst.msk [vmem:[#allocation3 + $0x130] sm:$0xf] %vm1899_vm1, %v6026_v27  ;;  %v14148_v6 = vpop.f32.mrf.mxu2  ;;  %v7113_v18 = vld [vmem:[#allocation2 + $0x30] sm:$0xf]  ;;  %v14175_v58 = vld [vmem:[#allocation3 + $0x1e0] sm:$0x33]  ;;  %v6672_v17 = vsel %vm10861_vm5, %v6670_v8, %v6671_v14  ;;  %v7177_v36 = vsel %vm10695_vm15, %v7175_v39, %v7176_v20 }
 0x65d   : > { %5865 = vst.msk [vmem:[#allocation3 + $0x1d0] sm:$0xf] %vm433_vm2, %v5815_v7  ;;  %v7114_v59 = vld [vmem:[#allocation2 + $0x34] sm:$0xf]  ;;  %v7182_v47 = vrot.slane %v7113_v18, 7  ;;  %v7178_v37 = vrot.slane %v7176_v20, 4  ;;  %v7628_v53 = vunpack.c.l.b16 %v14175_v58 }
 0x65e   : > { %v6479_v22 = vpop.permute.xlu1 %6478  ;;  %v9136_v43 = vld [vmem:[#allocation3 + $0x10c] sm:$0xf0]  ;;  %6397 = vst.msk [vmem:[#allocation3 + $0x1c0] sm:$0xf] %vm433_vm2, %v6331_v26  ;;  %v7185_v9 = vrot.slane %v7114_v59, 7  ;;  %v7181_v60 = vrot.slane %v7179_v35, 4 }
 0x65f   : > { %6539 = vst.msk [vmem:[#allocation3 + $0x120] sm:$0xf] %vm1899_vm1, %v6479_v22  ;;  %v9139_v25 = vor.u32 %v9548_v61, %v9136_v43  ;;  %v7115_v49 = vld [vmem:[#allocation2 + $0x38] sm:$0xf]  ;;  %v7116_v63 = vld [vmem:[#allocation2 + $0x3c] sm:$0xf]  ;;  %v7180_v13 = vsel %vm10695_vm15, %v7178_v37, %v7179_v35  ;;  %v7693_v34 = vpack.c.b16 %v7628_v53, %v7628_v53 }
 0x660   : > { %7261 = vst.msk [vmem:[#allocation3 + $0x60] sm:$0xf] %vm433_vm2, %v7171_v33  ;;  %v7188_v45 = vrot.slane %v7115_v49, 7  ;;  %v7184_v27 = vrot.slane %v7182_v47, 4  ;;  %v7191_v16 = vrot.slane %v7116_v63, 7  ;;  %v7187_v29 = vrot.slane %v7185_v9, 4 }
 0x661   : > { %8068 = vmatmul.bf16.gmra.mxu2 %v9227_v40  ;;  %7262 = vst.msk [vmem:[#allocation3 + $0x74] sm:$0xf] %vm433_vm2, %v7174_v12  ;;  %v7117_v19 = vld [vmem:[#allocation2 + $0x40] sm:$0xf]  ;;  %v7183_v56 = vsel %vm10695_vm15, %v7181_v60, %v7182_v47  ;;  %v7118_v52 = vld [vmem:[#allocation2 + $0x44] sm:$0xf] }
 0x662   : > { %8262 = vmatmul.bf16.gmra.mxu1 %v9139_v25  ;;  %v6032_v42 = vpop.permute.xlu2 %6031  ;;  %6721 = vst.msk [vmem:[#allocation3 + $0x1c4] sm:$0xf] %vm433_vm2, %v6669_v0  ;;  %v7190_v55 = vrot.slane %v7188_v45, 4  ;;  %v7194_v3 = vrot.slane %v7117_v19, 7  ;;  %v7186_v22 = vsel %vm10695_vm15, %v7184_v27, %v7185_v9  ;;  %v7193_v43 = vrot.slane %v7191_v16, 4 }
 0x663   : > { %v7033_v4 = vpop.permute.xlu0 %7032  ;;  %6088 = vst.msk [vmem:[#allocation3 + $0x16c] sm:$0xf] %vm1899_vm1, %v6032_v42  ;;  %v9148_v46 = vld [vmem:[#allocation3 + $0x12c] sm:$0xf0]  ;;  %v7197_v50 = vrot.slane %v7118_v52, 7  ;;  %v7189_v40 = vsel %vm10695_vm15, %v7187_v29, %v7188_v45 }
 0x664   : > { %7093 = vst.msk [vmem:[#allocation3 + $0x124] sm:$0xf] %vm1899_vm1, %v7033_v4  ;;  %v14173_v51 = vpop.f32.mrf.mxu2  ;;  %v9151_v21 = vor.u32 %v9552_v11, %v9148_v46  ;;  %v7119_v25 = vld [vmem:[#allocation2 + $0x48] sm:$0xf]  ;;  %v7192_v54 = vsel %vm10695_vm15, %v7190_v55, %v7191_v16  ;;  %v7196_v11 = vrot.slane %v7194_v3, 4  ;;  %v7195_v39 = vsel %vm10695_vm15, %v7193_v43, %v7194_v3 }
 0x665   : > { %6722 = vst.msk [vmem:[#allocation3 + $0x1d8] sm:$0xf] %vm433_vm2, %v6672_v17  ;;  %v7120_v32 = vld [vmem:[#allocation2 + $0x4c] sm:$0xf]  ;;  %v7200_v2 = vrot.slane %v7119_v25, 7  ;;  %v7199_v20 = vrot.slane %v7197_v50, 4 }
 0x666   : > { %8121 = vmatmul.bf16.gmra.mxu3 %v9151_v21  ;;  %v7035_v24 = vpop.permute.xlu1 %7034  ;;  %v9154_v23 = vld [vmem:[#allocation3 + $0x120] sm:$0xf]  ;;  %7263 = vst.msk [vmem:[#allocation3 + $0x88] sm:$0xf] %vm433_vm2, %v7177_v36  ;;  %v7203_v42 = vrot.slane %v7120_v32, 7  ;;  %v7198_v0 = vsel %vm10695_vm15, %v7196_v11, %v7197_v50 }
 0x667   : > { %7094 = vst.msk [vmem:[#allocation3 + $0x138] sm:$0xf] %vm1899_vm1, %v7035_v24  ;;  %v9155_v62 = vor.u32 %v9555_v38, %v9154_v23  ;;  %v7121_v33 = vld [vmem:[#allocation2 + $0x50] sm:$0xf]  ;;  %v9557_v8 = vld [vmem:[#allocation3 + $0x144] sm:$0xf]  ;;  %v7201_v37 = vsel %vm10695_vm15, %v7199_v20, %v7200_v2 }
 0x668   : > { %7264 = vst.msk [vmem:[#allocation3 + $0x9c] sm:$0xf] %vm433_vm2, %v7180_v13  ;;  %v7206_v4 = vrot.slane %v7121_v33, 7  ;;  %v14214_v46 = vld [vmem:[%s14521_s6] ss:$0 sm:$0xff]  ;;  %v7202_v35 = vrot.slane %v7200_v2, 4 }
 0x669   : > { %8194 = vmatmul.bf16.gmra.mxu0 %v9155_v62  ;;  %7265 = vst.msk [vmem:[#allocation3 + $0xb0] sm:$0xf] %vm433_vm2, %v7183_v56  ;;  %v7122_v21 = vld [vmem:[#allocation2 + $0x54] sm:$0xf]  ;;  %v7205_v59 = vrot.slane %v7203_v42, 4  ;;  %v8015_v53 = vadd.f32 %v14214_v46, %v13986_v57 }
 0x66a   : > { %v6489_v1 = vpop.permute.xlu2 %6488  ;;  %7266 = vst.msk [vmem:[#allocation3 + $0xc4] sm:$0xf] %vm433_vm2, %v7186_v22  ;;  %v9560_v23 = vld [vmem:[#allocation3 + $0x158] sm:$0xf0]  ;;  %v7209_v17 = vrot.slane %v7122_v21, 7  ;;  %v7208_v9 = vrot.slane %v7206_v4, 4  ;;  %v7204_v63 = vsel %vm10695_vm15, %v7202_v35, %v7203_v42 }
 0x66b   : > { %v6030_v61 = vpop.permute.xlu0 %6029  ;;  %6544 = vst.msk [vmem:[#allocation3 + $0x184] sm:$0xf] %vm1899_vm1, %v6489_v1  ;;  %v9553_v31 = vld [vmem:[#allocation3 + $0x124] sm:$0xf]  ;;  %v7124_v45 = vld [vmem:[#allocation2 + $0x5c] sm:$0xf]  ;;  %v7207_v16 = vsel %vm10695_vm15, %v7205_v59, %v7206_v4 }
 0x66c   : > { %6087 = vst.msk [vmem:[#allocation3 + $0x158] sm:$0xf] %vm1899_vm1, %v6030_v61  ;;  %v14198_v28 = vpop.f32.mrf.mxu2  ;;  %v7123_v62 = vld [vmem:[#allocation2 + $0x58] sm:$0xf]  ;;  %v7211_v19 = vrot.slane %v7209_v17, 4  ;;  %v7215_v13 = vrot.slane %v7124_v45, 7  ;;  %v7210_v52 = vsel %vm10695_vm15, %v7208_v9, %v7209_v17 }
 0x66d   : > { %7267 = vst.msk [vmem:[#allocation3 + $0xd8] sm:$0xf] %vm433_vm2, %v7189_v40  ;;  %v7212_v1 = vrot.slane %v7123_v62, 7  ;;  %v7125_v3 = vld [vmem:[#allocation2 + $0x60] sm:$0xf] }
 0x66e   : > { %v6483_v7 = vpop.permute.xlu1 %6482  ;;  %v9156_v15 = vld [vmem:[#allocation3 + $0x134] sm:$0xf0]  ;;  %7268 = vst.msk [vmem:[#allocation3 + $0xec] sm:$0xf] %vm433_vm2, %v7192_v54  ;;  %v7126_v22 = vld [vmem:[#allocation2 + $0x64] sm:$0xf] }
 0x66f   : > { %6541 = vst.msk [vmem:[#allocation3 + $0x148] sm:$0xf] %vm1899_vm1, %v6483_v7  ;;  %v9159_v26 = vor.u32 %v9553_v31, %v9156_v15  ;;  %v7214_v61 = vrot.slane %v7212_v1, 4  ;;  %v7213_v57 = vsel %vm10695_vm15, %v7211_v19, %v7212_v1  ;;  %v9022_v7 = vld [vmem:[#allocation3 + $0x10] sm:$0xf]  ;;  %v7217_v15 = vrot.slane %v7215_v13, 4 }
 0x670   : > { %7269 = vst.msk [vmem:[#allocation3 + $0x100] sm:$0xf] %vm433_vm2, %v7195_v39  ;;  %v7218_v40 = vrot.slane %v7125_v3, 7  ;;  %v7221_v54 = vrot.slane %v7126_v22, 7  ;;  %v7127_v39 = vld [vmem:[#allocation2 + $0x68] sm:$0xf] }
 0x671   : > { %8073 = vmatmul.bf16.gmra.mxu2 %v7693_v34  ;;  %7270 = vst.msk [vmem:[#allocation3 + $0x114] sm:$0xf] %vm433_vm2, %v7198_v0  ;;  %v9521_v34 = vld [vmem:[#allocation3 + $0x20] sm:$0xf0]  ;;  %v9042_v22 = vld [vmem:[#allocation3 + $0x38] sm:$0xf] }
 0x672   : > { %8267 = vmatmul.bf16.gmra.mxu1 %v9159_v26  ;;  %v6036_v12 = vpop.permute.xlu2 %6035  ;;  %7271 = vst.msk [vmem:[#allocation3 + $0x128] sm:$0xf] %vm433_vm2, %v7201_v37  ;;  %v7216_v26 = vsel %vm10695_vm15, %v7214_v61, %v7215_v13  ;;  %v7219_v42 = vsel %vm10695_vm15, %v7217_v15, %v7218_v40  ;;  %v7220_v33 = vrot.slane %v7218_v40, 4  ;;  %v9562_v37 = vld [vmem:[#allocation3 + $0x16c] sm:$0xf] }
 0x673   : > { %v7037_v38 = vpop.permute.xlu0 %7036  ;;  %6090 = vst.msk [vmem:[#allocation3 + $0x194] sm:$0xf] %vm1899_vm1, %v6036_v12  ;;  %v9168_v18 = vld [vmem:[#allocation3 + $0x154] sm:$0xf0]  ;;  %v9023_v12 = vor.u32 %v9521_v34, %v9022_v7  ;;  %v9565_v1 = vld [vmem:[#allocation3 + $0x180] sm:$0xf0] }
 0x674   : > { %7095 = vst.msk [vmem:[#allocation3 + $0x14c] sm:$0xf] %vm1899_vm1, %v7037_v38  ;;  %v14223_v47 = vpop.f32.mrf.mxu2  ;;  %v9171_v24 = vor.u32 %v9557_v8, %v9168_v18  ;;  %v8017_v8 = vadd.f32 %v14214_v46, %v14025_v41  ;;  %v7222_v21 = vsel %vm10695_vm15, %v7220_v33, %v7221_v54  ;;  %v7223_v38 = vrot.slane %v7221_v54, 4 }
 0x675   : > { %7272 = vst.msk [vmem:[#allocation3 + $0x13c] sm:$0xf] %vm433_vm2, %v7204_v63  ;;  %v7224_v18 = vrot.slane %v7127_v39, 7 }
 0x676   : > { %8126 = vmatmul.bf16.gmra.mxu3 %v9171_v24  ;;  %v8160_v36 = vpop.f32.mrf.mxu0  ;;  %v7039_v60 = vpop.permute.xlu1 %7038  ;;  %v9174_v49 = vld [vmem:[#allocation3 + $0x148] sm:$0xf]  ;;  %7273 = vst.msk [vmem:[#allocation3 + $0x150] sm:$0xf] %vm433_vm2, %v7207_v16 }
 0x677   : > { %7096 = vst.msk [vmem:[#allocation3 + $0x160] sm:$0xf] %vm1899_vm1, %v7039_v60  ;;  %v9175_v27 = vor.u32 %v9560_v23, %v9174_v49  ;;  %v7225_v24 = vsel %vm10695_vm15, %v7223_v38, %v7224_v18  ;;  %v7226_v23 = vrot.slane %v7224_v18, 4  ;;  %v14831_v49 = vld [vmem:[#allocation42_spill] sm:$0xff] }
 0x678   : > { %7274 = vst.msk [vmem:[#allocation3 + $0x164] sm:$0xf] %vm433_vm2, %v7210_v52  ;;  %v14832_v63 = vrot.slane %v14831_v49, 7  ;;  %v6673_v52 = vrot.slane %v6671_v14, 4 }
 0x679   : > { %v8087_v29 = vpop.f32.mrf.mxu3  ;;  %8199 = vmatmul.bf16.gmra.mxu0 %v9175_v27  ;;  %7275 = vst.msk [vmem:[#allocation3 + $0x178] sm:$0xf] %vm433_vm2, %v7213_v57 }
 0x67a   : > { %v8088_v56 = vadd.f32 %v8087_v29, %v8015_v53  ;;  %v6493_v55 = vpop.permute.xlu2 %6492  ;;  %7276 = vst.msk [vmem:[#allocation3 + $0x18c] sm:$0xf] %vm433_vm2, %v7216_v26  ;;  %v7228_v45 = vsel %vm10695_vm15, %v7226_v23, %v14832_v63  ;;  %v8020_v29 = vadd.f32 %v14214_v46, %v14058_v30 }
 0x67b   : > { %v6034_v31 = vpop.permute.xlu0 %6033  ;;  %6546 = vst.msk [vmem:[#allocation3 + $0x1ac] sm:$0xf] %vm1899_vm1, %v6493_v55  ;;  %v9558_v25 = vld [vmem:[#allocation3 + $0x14c] sm:$0xf] }
 0x67c   : > { %6089 = vst.msk [vmem:[#allocation3 + $0x180] sm:$0xf] %vm1899_vm1, %v6034_v31  ;;  %v14245_v43 = vpop.f32.mrf.mxu2  ;;  %v8161_v50 = vadd.f32 %v8160_v36, %v8088_v56 }
 0x67d   : > { %7277 = vst.msk [vmem:[#allocation3 + $0x1a0] sm:$0xf] %vm433_vm2, %v7219_v42  ;;  %v9567_v42 = vld [vmem:[#allocation3 + $0x194] sm:$0xf] }
 0x67e   : > { %v8162_v11 = vpop.f32.mrf.mxu0  ;;  %v6487_v32 = vpop.permute.xlu1 %6486  ;;  %v9176_v2 = vld [vmem:[#allocation3 + $0x15c] sm:$0xf0]  ;;  %7278 = vst.msk [vmem:[#allocation3 + $0x1b4] sm:$0xf] %vm433_vm2, %v7222_v21 }
 0x67f   : > { %v8233_v20 = vpop.f32.mrf.mxu1  ;;  %6543 = vst.msk [vmem:[#allocation3 + $0x170] sm:$0xf] %vm1899_vm1, %v6487_v32  ;;  %v9179_v4 = vor.u32 %v9558_v25, %v9176_v2  ;;  %v8022_v25 = vadd.f32 %v14214_v46, %v14089_v10 }
 0x680   : > { %v14256_v35 = vadd.f32 %v8233_v20, %v8161_v50  ;;  %7279 = vst.msk [vmem:[#allocation3 + $0x1c8] sm:$0xf] %vm433_vm2, %v7225_v24  ;;  %v9526_v50 = vld [vmem:[#allocation3 + $0x48] sm:$0xf0] }
 0x681   : > { %v8089_v0 = vpop.f32.mrf.mxu3  ;;  %9388 = vmatmul.msk.bf16.vlgmr.msra.gmra.mxu2 %vm854_vm10, %v9023_v12  ;;  %7280 = vst.msk [vmem:[#allocation3 + $0x1dc] sm:$0xf] %vm433_vm2, %v7228_v45  ;;  %v9043_v14 = vor.u32 %v9526_v50, %v9042_v22  ;;  %vm8370_vm2 = vcmask 261120  }
 0x682   : > { %v8090_v41 = vadd.f32 %v8089_v0, %v8017_v8  ;;  %8272 = vmatmul.bf16.gmra.mxu1 %v9179_v4  ;;  %v6040_v59 = vpop.permute.xlu2 %6039  ;;  %6723 = vst.msk [vmem:[#allocation3 + $0x1ec] sm:$0x3] %vm1493_vm6, %v6673_v52  ;;  %v9570_v21 = vld [vmem:[#allocation3 + $0x1a8] sm:$0xf0]  ;;  %v8025_v0 = vadd.f32 %v14214_v46, %v14121_v44 }
 0x683   : > { %v7041_v17 = vpop.permute.xlu0 %7040  ;;  %6092 = vst.msk [vmem:[#allocation3 + $0x1bc] sm:$0xf] %vm1899_vm1, %v6040_v59  ;;  %v9188_v9 = vld [vmem:[#allocation3 + $0x17c] sm:$0xf0] }
 0x684   : > { %7097 = vst.msk [vmem:[#allocation3 + $0x174] sm:$0xf] %vm1899_vm1, %v7041_v17  ;;  %v14268_v62 = vpop.f32.mrf.mxu2  ;;  %v9191_v36 = vor.u32 %v9562_v37, %v9188_v9  ;;  %v8163_v60 = vadd.f32 %v8162_v11, %v8090_v41  ;;  %v9062_v9 = vld [vmem:[#allocation3 + $0x60] sm:$0xf] }
 0x686   : > { %8131 = vmatmul.bf16.gmra.mxu3 %v9191_v36  ;;  %v8165_v27 = vpop.f32.mrf.mxu0  ;;  %v7043_v16 = vpop.permute.xlu1 %7042  ;;  %v9194_v19 = vld [vmem:[#allocation3 + $0x170] sm:$0xf]  ;;  %v9531_v36 = vld [vmem:[#allocation3 + $0x70] sm:$0xf0] }
 0x687   : > { %v8235_v53 = vpop.f32.mrf.mxu1  ;;  %7098 = vst.msk [vmem:[#allocation3 + $0x188] sm:$0xf] %vm1899_vm1, %v7043_v16  ;;  %v9195_v13 = vor.u32 %v9565_v1, %v9194_v19  ;;  %v9063_v16 = vor.u32 %v9531_v36, %v9062_v9  ;;  %v8027_v19 = vadd.f32 %v14214_v46, %v14148_v6 }
 0x688   : > { %v14279_v61 = vadd.f32 %v8235_v53, %v8163_v60 }
 0x689   : > { %v8092_v5 = vpop.f32.mrf.mxu3  ;;  %8204 = vmatmul.bf16.gmra.mxu0 %v9195_v13 }
 0x68a   : > { %v8093_v56 = vadd.f32 %v8092_v5, %v8020_v29  ;;  %v6497_v55 = vpop.permute.xlu2 %6496  ;;  %v9572_v5 = vld [vmem:[#allocation3 + $0x1bc] sm:$0xf] }
 0x68b   : > { %v6038_v3 = vpop.permute.xlu0 %6037  ;;  %6548 = vst.msk [vmem:[#allocation3 + $0x1d4] sm:$0xf] %vm1899_vm1, %v6497_v55  ;;  %v9563_v34 = vld [vmem:[#allocation3 + $0x174] sm:$0xf] }
 0x68c   : > { %6091 = vst.msk [vmem:[#allocation3 + $0x1a8] sm:$0xf] %vm1899_vm1, %v6038_v3  ;;  %v14285_v31 = vpop.f32.mrf.mxu2  ;;  %v8166_v57 = vadd.f32 %v8165_v27, %v8093_v56 }
 0x68e   : > { %v8167_v30 = vpop.f32.mrf.mxu0  ;;  %v6491_v7 = vpop.permute.xlu1 %6490  ;;  %v9196_v15 = vld [vmem:[#allocation3 + $0x184] sm:$0xf0] }
 0x68f   : > { %v8238_v40 = vpop.f32.mrf.mxu1  ;;  %6545 = vst.msk [vmem:[#allocation3 + $0x198] sm:$0xf] %vm1899_vm1, %v6491_v7  ;;  %v9199_v48 = vor.u32 %v9563_v34, %v9196_v15  ;;  %v8030_v34 = vadd.f32 %v14214_v46, %v14173_v51  ;;  %v8032_v51 = vadd.f32 %v14214_v46, %v14198_v28  ;;  %v8035_v28 = vadd.f32 %v14214_v46, %v14223_v47 }
 0x690   : > { %v14291_v26 = vadd.f32 %v8238_v40, %v8166_v57 }
 0x691   : > { %v8094_v54 = vpop.f32.mrf.mxu3  ;;  %9389 = vmatmul.msk.bf16.gmra.mxu2 %vm854_vm10, %v9043_v14 }
 0x692   : > { %v8095_v11 = vadd.f32 %v8094_v54, %v8022_v25  ;;  %8277 = vmatmul.bf16.gmra.mxu1 %v9199_v48  ;;  %v6499_v32 = vpop.permute.xlu2 %6498  ;;  %v9575_v50 = vld [vmem:[#allocation3 + $0x1d0] sm:$0xf0] }
 0x693   : > { %v7045_v2 = vpop.permute.xlu0 %7044  ;;  %6549 = vst.msk [vmem:[#allocation3 + $0x1e8] sm:$0x3] %vm1924_vm8, %v6499_v32  ;;  %v9208_v33 = vld [vmem:[#allocation3 + $0x1a4] sm:$0xf0]  ;;  %v9536_v32 = vld [vmem:[#allocation3 + $0x98] sm:$0xf0] }
 0x694   : > { %7099 = vst.msk [vmem:[#allocation3 + $0x19c] sm:$0xf] %vm1899_vm1, %v7045_v2  ;;  %v14296_v8 = vpop.f32.mrf.mxu2  ;;  %v9211_v20 = vor.u32 %v9567_v42, %v9208_v33  ;;  %v8168_v4 = vadd.f32 %v8167_v30, %v8095_v11  ;;  %v9082_v11 = vld [vmem:[#allocation3 + $0x88] sm:$0xf] }
 0x696   : > { %8136 = vmatmul.bf16.gmra.mxu3 %v9211_v20  ;;  %v8170_v10 = vpop.f32.mrf.mxu0  ;;  %v7047_v12 = vpop.permute.xlu1 %7046  ;;  %v9214_v39 = vld [vmem:[#allocation3 + $0x198] sm:$0xf] }
 0x697   : > { %v8240_v38 = vpop.f32.mrf.mxu1  ;;  %7100 = vst.msk [vmem:[#allocation3 + $0x1b0] sm:$0xf] %vm1899_vm1, %v7047_v12  ;;  %v9215_v18 = vor.u32 %v9570_v21, %v9214_v39  ;;  %v7629_v39 = vunpack.c.h.b16 %v14175_v58 }
 0x698   : > { %v14301_v41 = vadd.f32 %v8240_v38, %v8168_v4 }
 0x699   : > { %v8097_v59 = vpop.f32.mrf.mxu3  ;;  %8209 = vmatmul.bf16.gmra.mxu0 %v9215_v18 }
 0x69a   : > { %v8098_v24 = vadd.f32 %v8097_v59, %v8025_v0  ;;  %v7694_v59 = vpack.c.b16 %v7629_v39, %v7629_v39  ;;  %v8045_v39 = vadd.f32 %v14214_v46, %v14296_v8 }
 0x69b   : > { %v6042_v23 = vpop.permute.xlu0 %6041  ;;  %v9568_v63 = vld [vmem:[#allocation3 + $0x19c] sm:$0xf] }
 0x69c   : > { %6093 = vst.msk [vmem:[#allocation3 + $0x1d0] sm:$0xf] %vm1899_vm1, %v6042_v23  ;;  %v14304_v17 = vpop.f32.mrf.mxu2  ;;  %v8171_v37 = vadd.f32 %v8170_v10, %v8098_v24  ;;  %v9083_v10 = vor.u32 %v9536_v32, %v9082_v11 }
 0x69e   : > { %v8172_v60 = vpop.f32.mrf.mxu0  ;;  %v6495_v49 = vpop.permute.xlu1 %6494  ;;  %v9216_v45 = vld [vmem:[#allocation3 + $0x1ac] sm:$0xf0] }
 0x69f   : > { %v8243_v27 = vpop.f32.mrf.mxu1  ;;  %6547 = vst.msk [vmem:[#allocation3 + $0x1c0] sm:$0xf] %vm1899_vm1, %v6495_v49  ;;  %v9219_v44 = vor.u32 %v9568_v63, %v9216_v45 }
 0x6a0   : > { %v14309_v1 = vadd.f32 %v8243_v27, %v8171_v37 }
 0x6a1   : > { %v8099_v53 = vpop.f32.mrf.mxu3  ;;  %9390 = vmatmul.msk.bf16.gmra.mxu2 %vm854_vm10, %v9063_v16  ;;  %v9541_v16 = vld [vmem:[#allocation3 + $0xc0] sm:$0xf0] }
 0x6a2   : > { %v8100_v13 = vadd.f32 %v8099_v53, %v8027_v19  ;;  %8282 = vmatmul.bf16.gmra.mxu1 %v9219_v44  ;;  %v9102_v44 = vld [vmem:[#allocation3 + $0xb0] sm:$0xf] }
 0x6a3   : > { %v7049_v29 = vpop.permute.xlu0 %7048  ;;  %v9228_v56 = vld [vmem:[#allocation3 + $0x1cc] sm:$0xf0] }
 0x6a4   : > { %7101 = vst.msk [vmem:[#allocation3 + $0x1c4] sm:$0xf] %vm1899_vm1, %v7049_v29  ;;  %v14313_v55 = vpop.f32.mrf.mxu2  ;;  %v9231_v52 = vor.u32 %v9572_v5, %v9228_v56  ;;  %v8173_v3 = vadd.f32 %v8172_v60, %v8100_v13  ;;  %v9103_v13 = vor.u32 %v9541_v16, %v9102_v44  ;;  %v8037_v29 = vadd.f32 %v14214_v46, %v14245_v43 }
 0x6a6   : > { %8141 = vmatmul.bf16.gmra.mxu3 %v9231_v52  ;;  %v8175_v57 = vpop.f32.mrf.mxu0  ;;  %v7051_v22 = vpop.permute.xlu1 %7050  ;;  %v9234_v6 = vld [vmem:[#allocation3 + $0x1c0] sm:$0xf] }
 0x6a7   : > { %v8245_v30 = vpop.f32.mrf.mxu1  ;;  %7102 = vst.msk [vmem:[#allocation3 + $0x1d8] sm:$0xf] %vm1899_vm1, %v7051_v22  ;;  %v9235_v7 = vor.u32 %v9575_v50, %v9234_v6  ;;  %v8040_v50 = vadd.f32 %v14214_v46, %v14268_v62 }
 0x6a8   : > { %v14318_v15 = vadd.f32 %v8245_v30, %v8173_v3 }
 0x6a9   : > { %v8102_v40 = vpop.f32.mrf.mxu3  ;;  %8214 = vmatmul.bf16.gmra.mxu0 %v9235_v7 }
 0x6aa   : > { %v8103_v48 = vadd.f32 %v8102_v40, %v8030_v34 }
 0x6ab   : > { %v7053_v14 = vpop.permute.xlu0 %7052  ;;  %v9573_v42 = vld [vmem:[#allocation3 + $0x1c4] sm:$0xf] }
 0x6ac   : > { %7103 = vst.msk [vmem:[#allocation3 + $0x1ec] sm:$0x3] %vm1924_vm8, %v7053_v14  ;;  %v14321_v25 = vpop.f32.mrf.mxu2  ;;  %v8176_v54 = vadd.f32 %v8175_v57, %v8103_v48  ;;  %v9122_v48 = vld [vmem:[#allocation3 + $0xd8] sm:$0xf]  ;;  %v9546_v14 = vld [vmem:[#allocation3 + $0xe8] sm:$0xf0] }
 0x6ad   : > { %v9123_v32 = vor.u32 %v9546_v14, %v9122_v48 }
 0x6ae   : > { %v8177_v2 = vpop.f32.mrf.mxu0  ;;  %v9236_v33 = vld [vmem:[#allocation3 + $0x1d4] sm:$0xf0] }
 0x6af   : > { %v8248_v20 = vpop.f32.mrf.mxu1  ;;  %v9239_v4 = vor.u32 %v9573_v42, %v9236_v33 }
 0x6b0   : > { %v14325_v12 = vadd.f32 %v8248_v20, %v8176_v54 }
 0x6b1   : > { %v8104_v21 = vpop.f32.mrf.mxu3  ;;  %9391 = vmatmul.msk.bf16.gmra.mxu2 %vm854_vm10, %v9083_v10 }
 0x6b2   : > { %v8105_v38 = vadd.f32 %v8104_v21, %v8032_v51  ;;  %8287 = vmatmul.bf16.gmra.mxu1 %v9239_v4 }
 0x6b3   : > { %v7355_v18 = vld [vmem:[#allocation3 + $0x1e8] sm:$0x33] }
 0x6b4   : > { %v14329_v0 = vpop.f32.mrf.mxu2  ;;  %v8178_v24 = vadd.f32 %v8177_v2, %v8105_v38  ;;  %v7630_v23 = vunpack.c.l.b16 %v7355_v18  ;;  %v7631_v27 = vunpack.c.h.b16 %v7355_v18  ;;  %v8042_v2 = vadd.f32 %v14214_v46, %v14285_v31 }
 0x6b6   : > { %8146 = vmatmul.bf16.gmra.mxu3 %v7694_v59  ;;  %v8180_v37 = vpop.f32.mrf.mxu0  ;;  %v7695_v36 = vpack.c.b16 %v7630_v23, %v7630_v23  ;;  %v7696_v47 = vpack.c.b16 %v7631_v27, %v7631_v27  ;;  %v9551_v23 = vld [vmem:[#allocation3 + $0x110] sm:$0xf0] }
 0x6b7   : > { %v8250_v9 = vpop.f32.mrf.mxu1 }
 0x6b8   : > { %v14333_v60 = vadd.f32 %v8250_v9, %v8178_v24  ;;  %v9142_v24 = vld [vmem:[#allocation3 + $0x100] sm:$0xf] }
 0x6b9   : > { %v8107_v58 = vpop.f32.mrf.mxu3  ;;  %8219 = vmatmul.bf16.gmra.mxu0 %v7695_v36  ;;  %v9143_v36 = vor.u32 %v9551_v23, %v9142_v24 }
 0x6ba   : > { %v8108_v49 = vadd.f32 %v8107_v58, %v8035_v28  ;;  %v8047_v28 = vadd.f32 %v14214_v46, %v14304_v17 }
 0x6bc   : > { %v14335_v63 = vpop.f32.mrf.mxu2  ;;  %v8181_v45 = vadd.f32 %v8180_v37, %v8108_v49 }
 0x6be   : > { %v8182_v19 = vpop.f32.mrf.mxu0 }
 0x6bf   : > { %v8253_v53 = vpop.f32.mrf.mxu1 }
 0x6c0   : > { %v14339_v5 = vadd.f32 %v8253_v53, %v8181_v45 }
 0x6c1   : > { %v8109_v56 = vpop.f32.mrf.mxu3  ;;  %9392 = vmatmul.msk.bf16.gmra.mxu2 %vm854_vm10, %v9103_v13 }
 0x6c2   : > { %v8110_v52 = vadd.f32 %v8109_v56, %v8037_v29  ;;  %8292 = vmatmul.bf16.gmra.mxu1 %v7696_v47  ;;  %v9162_v56 = vld [vmem:[#allocation3 + $0x128] sm:$0xf] }
 0x6c4   : > { %v14342_v3 = vpop.f32.mrf.mxu2  ;;  %v8183_v57 = vadd.f32 %v8182_v19, %v8110_v52  ;;  %v8050_v19 = vadd.f32 %v14214_v46, %v14313_v55  ;;  %v9556_v52 = vld [vmem:[#allocation3 + $0x138] sm:$0xf0] }
 0x6c6   : > { %v8185_v22 = vpop.f32.mrf.mxu0 }
 0x6c7   : > { %v8255_v6 = vpop.f32.mrf.mxu1 }
 0x6c8   : > { %v14346_v30 = vadd.f32 %v8255_v6, %v8183_v57  ;;  %v9163_v6 = vor.u32 %v9556_v52, %v9162_v56 }
 0x6c9   : > { %v8112_v7 = vpop.f32.mrf.mxu3 }
 0x6ca   : > { %v8113_v43 = vadd.f32 %v8112_v7, %v8040_v50  ;;  %v8052_v50 = vadd.f32 %v14214_v46, %v14321_v25 }
 0x6cc   : > { %v14348_v34 = vpop.f32.mrf.mxu2  ;;  %v8186_v40 = vadd.f32 %v8185_v22, %v8113_v43 }
 0x6cd   : > { %v8062_v52 = vadd.f32 %v14214_v46, %v14348_v34 }
 0x6ce   : > { %v8187_v54 = vpop.f32.mrf.mxu0 }
 0x6cf   : > { %v8258_v11 = vpop.f32.mrf.mxu1 }
 0x6d0   : > { %v14352_v42 = vadd.f32 %v8258_v11, %v8186_v40  ;;  %v8055_v11 = vadd.f32 %v14214_v46, %v14329_v0 }
 0x6d1   : > { %v8114_v33 = vpop.f32.mrf.mxu3  ;;  %9393 = vmatmul.msk.bf16.gmra.mxu2 %vm854_vm10, %v9123_v32 }
 0x6d2   : > { %v8115_v62 = vadd.f32 %v8114_v33, %v8042_v2 }
 0x6d4   : > { %v14355_v20 = vpop.f32.mrf.mxu2  ;;  %v8188_v4 = vadd.f32 %v8187_v54, %v8115_v62 }
 0x6d6   : > { %v8190_v10 = vpop.f32.mrf.mxu0 }
 0x6d7   : > { %v8260_v51 = vpop.f32.mrf.mxu1 }
 0x6d8   : > { %v14359_v21 = vadd.f32 %v8260_v51, %v8188_v4  ;;  %v9182_v4 = vld [vmem:[#allocation3 + $0x150] sm:$0xf] }
 0x6d9   : > { %v8117_v38 = vpop.f32.mrf.mxu3 }
 0x6da   : > { %v8118_v18 = vadd.f32 %v8117_v38, %v8045_v39 }
 0x6dc   : > { %v14361_v59 = vpop.f32.mrf.mxu2  ;;  %v8191_v31 = vadd.f32 %v8190_v10, %v8118_v18  ;;  %v9561_v10 = vld [vmem:[#allocation3 + $0x160] sm:$0xf0]  ;;  %v8057_v18 = vadd.f32 %v14214_v46, %v14335_v63 }
 0x6dd   : > { %v9183_v38 = vor.u32 %v9561_v10, %v9182_v4 }
 0x6de   : > { %v8192_v37 = vpop.f32.mrf.mxu0 }
 0x6df   : > { %v8263_v9 = vpop.f32.mrf.mxu1 }
 0x6e0   : > { %v14365_v58 = vadd.f32 %v8263_v9, %v8191_v31 }
 0x6e1   : > { %v8119_v49 = vpop.f32.mrf.mxu3  ;;  %9394 = vmatmul.msk.bf16.gmra.mxu2 %vm854_vm10, %v9143_v36 }
 0x6e2   : > { %v8120_v8 = vadd.f32 %v8119_v49, %v8047_v28  ;;  %v8060_v28 = vadd.f32 %v14214_v46, %v14342_v3 }
 0x6e4   : > { %v14368_v45 = vpop.f32.mrf.mxu2  ;;  %v8193_v27 = vadd.f32 %v8192_v37, %v8120_v8 }
 0x6e6   : > { %v8195_v44 = vpop.f32.mrf.mxu0 }
 0x6e7   : > { %v8265_v16 = vpop.f32.mrf.mxu1 }
 0x6e8   : > { %v14372_v53 = vadd.f32 %v8265_v16, %v8193_v27 }
 0x6e9   : > { %v8122_v13 = vpop.f32.mrf.mxu3 }
 0x6ea   : > { %v8123_v29 = vadd.f32 %v8122_v13, %v8050_v19  ;;  %v9202_v19 = vld [vmem:[#allocation3 + $0x178] sm:$0xf]  ;;  %v9566_v13 = vld [vmem:[#allocation3 + $0x188] sm:$0xf0] }
 0x6eb   : > { %v9203_v56 = vor.u32 %v9566_v13, %v9202_v19 }
 0x6ec   : > { %v14374_v47 = vpop.f32.mrf.mxu2  ;;  %v8196_v17 = vadd.f32 %v8195_v44, %v8123_v29 }
 0x6ed   : > { %v8072_v13 = vadd.f32 %v14214_v46, %v14374_v47 }
 0x6ee   : > { %v8197_v57 = vpop.f32.mrf.mxu0 }
 0x6ef   : > { %v8268_v22 = vpop.f32.mrf.mxu1 }
 0x6f0   : > { %v14378_v7 = vadd.f32 %v8268_v22, %v8196_v17 }
 0x6f1   : > { %v8124_v43 = vpop.f32.mrf.mxu3  ;;  %9395 = vmatmul.msk.bf16.gmra.mxu2 %vm854_vm10, %v9163_v6 }
 0x6f2   : > { %v8125_v55 = vadd.f32 %v8124_v43, %v8052_v50 }
 0x6f4   : > { %v14381_v40 = vpop.f32.mrf.mxu2  ;;  %v8198_v48 = vadd.f32 %v8197_v57, %v8125_v55 }
 0x6f6   : > { %v8200_v14 = vpop.f32.mrf.mxu0 }
 0x6f7   : > { %v8270_v54 = vpop.f32.mrf.mxu1 }
 0x6f8   : > { %v14385_v32 = vadd.f32 %v8270_v54, %v8198_v48  ;;  %v8065_v48 = vadd.f32 %v14214_v46, %v14355_v20 }
 0x6f9   : > { %v8127_v2 = vpop.f32.mrf.mxu3 }
 0x6fa   : > { %v8128_v33 = vadd.f32 %v8127_v2, %v8055_v11 }
 0x6fc   : > { %v8076_v25 = vpop.f32.mrf.mxu2  ;;  %v8201_v62 = vadd.f32 %v8200_v14, %v8128_v33  ;;  %v9222_v33 = vld [vmem:[#allocation3 + $0x1a0] sm:$0xf] }
 0x6fd   : > { %v9571_v25 = vld [vmem:[#allocation3 + $0x1b0] sm:$0xf0] }
 0x6fe   : > { %v8202_v51 = vpop.f32.mrf.mxu0  ;;  %v9223_v10 = vor.u32 %v9571_v25, %v9222_v33 }
 0x6ff   : > { %v8273_v39 = vpop.f32.mrf.mxu1 }
 0x700   : > { %v14389_v31 = vadd.f32 %v8273_v39, %v8201_v62 }
 0x701   : > { %v8129_v24 = vpop.f32.mrf.mxu3  ;;  %9396 = vmatmul.msk.bf16.gmra.mxu2 %vm854_vm10, %v9183_v38 }
 0x702   : > { %v8130_v0 = vadd.f32 %v8129_v24, %v8057_v18 }
 0x704   : > { %v8306_v23 = vpop.f32.mrf.mxu2  ;;  %v8203_v37 = vadd.f32 %v8202_v51, %v8130_v0  ;;  %v8067_v51 = vadd.f32 %v14214_v46, %v14361_v59 }
 0x705   : > { %v8307_v9 = vadd.f32 %v8306_v23, %v14256_v35 }
 0x706   : > { %v8205_v63 = vpop.f32.mrf.mxu0 }
 0x707   : > { %8371 = vst.msk [vmem:[%s14396_s8] sm:$0xff] %vm8370_vm2, %v8307_v9  ;;  %v8275_v36 = vpop.f32.mrf.mxu1 }
 0x708   : > { %v14403_v49 = vadd.f32 %v8275_v36, %v8203_v37  ;;  %v8070_v37 = vadd.f32 %v14214_v46, %v14368_v45 }
 0x709   : > { %v8132_v8 = vpop.f32.mrf.mxu3 }
 0x70a   : > { %v8133_v27 = vadd.f32 %v8132_v8, %v8060_v28  ;;  %v9242_v8 = vld [vmem:[#allocation3 + $0x1c8] sm:$0xf] }
 0x70c   : > { %v8308_v44 = vpop.f32.mrf.mxu2  ;;  %v8206_v16 = vadd.f32 %v8205_v63, %v8133_v27  ;;  %v9576_v27 = vld [vmem:[#allocation3 + $0x1d8] sm:$0xf0] }
 0x70d   : > { %v8309_v29 = vadd.f32 %v8308_v44, %v14279_v61  ;;  %v9243_v19 = vor.u32 %v9576_v27, %v9242_v8 }
 0x70e   : > { %v8207_v17 = vpop.f32.mrf.mxu0 }
 0x70f   : > { %8372 = vst.msk [vmem:[%s14396_s8 + $0x8] sm:$0xff] %vm8370_vm2, %v8309_v29  ;;  %v8278_v35 = vpop.f32.mrf.mxu1 }
 0x710   : > { %v14410_v3 = vadd.f32 %v8278_v35, %v8206_v16 }
 0x711   : > { %v8134_v57 = vpop.f32.mrf.mxu3  ;;  %9397 = vmatmul.msk.bf16.gmra.mxu2 %vm854_vm10, %v9203_v56 }
 0x712   : > { %v8135_v22 = vadd.f32 %v8134_v57, %v8062_v52  ;;  %v7356_v57 = vld [vmem:[#allocation3 + $0x1f0] sm:$0x3] }
 0x714   : > { %v8311_v6 = vpop.f32.mrf.mxu2  ;;  %v8208_v50 = vadd.f32 %v8207_v17, %v8135_v22 }
 0x715   : > { %v8312_v43 = vadd.f32 %v8311_v6, %v14291_v26  ;;  %v8075_v6 = vadd.f32 %v14214_v46, %v14381_v40 }
 0x716   : > { %v8210_v61 = vpop.f32.mrf.mxu0 }
 0x717   : > { %8373 = vst.msk [vmem:[%s14396_s8 + $0x10] sm:$0xff] %vm8370_vm2, %v8312_v43  ;;  %v8280_v55 = vpop.f32.mrf.mxu1  ;;  %v7632_v43 = vunpack.c.l.b16 %v7356_v57 }
 0x718   : > { %v14418_v14 = vadd.f32 %v8280_v55, %v8208_v50 }
 0x719   : > { %v8137_v34 = vpop.f32.mrf.mxu3 }
 0x71a   : > { %v8138_v54 = vadd.f32 %v8137_v34, %v8065_v48 }
 0x71c   : > { %v8313_v11 = vpop.f32.mrf.mxu2  ;;  %v8211_v2 = vadd.f32 %v8210_v61, %v8138_v54  ;;  %v7697_v54 = vpack.c.b16 %v7632_v43, %v7632_v43 }
 0x71d   : > { %v8314_v62 = vadd.f32 %v8313_v11, %v14301_v41 }
 0x71e   : > { %v8212_v4 = vpop.f32.mrf.mxu0 }
 0x71f   : > { %8374 = vst.msk [vmem:[%s14396_s8 + $0x18] sm:$0xff] %vm8370_vm2, %v8314_v62  ;;  %v8283_v26 = vpop.f32.mrf.mxu1 }
 0x720   : > { %v14425_v20 = vadd.f32 %v8283_v26, %v8211_v2 }
 0x721   : > { %v8139_v39 = vpop.f32.mrf.mxu3  ;;  %9398 = vmatmul.msk.bf16.gmra.mxu2 %vm854_vm10, %v9223_v10 }
 0x722   : > { %v8140_v38 = vadd.f32 %v8139_v39, %v8067_v51 }
 0x724   : > { %v8316_v18 = vpop.f32.mrf.mxu2  ;;  %v8213_v24 = vadd.f32 %v8212_v4, %v8140_v38 }
 0x725   : > { %v8317_v0 = vadd.f32 %v8316_v18, %v14309_v1 }
 0x726   : > { %v8215_v41 = vpop.f32.mrf.mxu0 }
 0x727   : > { %8375 = vst.msk [vmem:[%s14396_s8 + $0x20] sm:$0xff] %vm8370_vm2, %v8317_v0  ;;  %v8285_v23 = vpop.f32.mrf.mxu1 }
 0x728   : > { %v14433_v9 = vadd.f32 %v8285_v23, %v8213_v24 }
 0x729   : > { %v8142_v59 = vpop.f32.mrf.mxu3 }
 0x72a   : > { %v8143_v63 = vadd.f32 %v8142_v59, %v8070_v37 }
 0x72c   : > { %v8318_v36 = vpop.f32.mrf.mxu2  ;;  %v8216_v28 = vadd.f32 %v8215_v41, %v8143_v63 }
 0x72d   : > { %v8319_v44 = vadd.f32 %v8318_v36, %v14318_v15 }
 0x72e   : > { %v8217_v16 = vpop.f32.mrf.mxu0 }
 0x72f   : > { %8376 = vst.msk [vmem:[%s14396_s8 + $0x28] sm:$0xff] %vm8370_vm2, %v8319_v44  ;;  %v8288_v1 = vpop.f32.mrf.mxu1 }
 0x730   : > { %v14440_v45 = vadd.f32 %v8288_v1, %v8216_v28 }
 0x731   : > { %v8144_v29 = vpop.f32.mrf.mxu3  ;;  %9399 = vmatmul.msk.bf16.gmra.mxu2 %vm854_vm10, %v9243_v19 }
 0x732   : > { %v8145_v17 = vadd.f32 %v8144_v29, %v8072_v13 }
 0x734   : > { %v8321_v35 = vpop.f32.mrf.mxu2  ;;  %v8218_v56 = vadd.f32 %v8217_v16, %v8145_v17 }
 0x735   : > { %v8322_v52 = vadd.f32 %v8321_v35, %v14325_v12 }
 0x736   : > { %v8220_v15 = vpop.f32.mrf.mxu0 }
 0x737   : > { %8377 = vst.msk [vmem:[%s14396_s8 + $0x30] sm:$0xff] %vm8370_vm2, %v8322_v52  ;;  %v8290_v22 = vpop.f32.mrf.mxu1 }
 0x738   : > { %v8291_v47 = vadd.f32 %v8290_v22, %v8218_v56 }
 0x739   : > { %v8147_v50 = vpop.f32.mrf.mxu3 }
 0x73a   : > { %v8148_v61 = vadd.f32 %v8147_v50, %v8075_v6 }
 0x73c   : > { %v8323_v55 = vpop.f32.mrf.mxu2  ;;  %v8221_v48 = vadd.f32 %v8220_v15, %v8148_v61 }
 0x73d   : > { %v8324_v34 = vadd.f32 %v8323_v55, %v14333_v60 }
 0x73e   : > { %v8222_v12 = vpop.f32.mrf.mxu0 }
 0x73f   : > { %8378 = vst.msk [vmem:[%s14396_s8 + $0x38] sm:$0xff] %vm8370_vm2, %v8324_v34  ;;  %v8293_v11 = vpop.f32.mrf.mxu1 }
 0x740   : > { %v8294_v2 = vadd.f32 %v8293_v11, %v8221_v48 }
 0x741   : > { %v8149_v33 = vpop.f32.mrf.mxu3  ;;  %9400 = vmatmul.msk.bf16.gmra.mxu2 %vm854_vm10, %v7697_v54  ;;  %vm8395_vm10 = vcmask 257024  }
 0x744   : > { %v8326_v46 = vpop.f32.mrf.mxu2 }
 0x745   : > { %v8327_v40 = vadd.f32 %v8326_v46, %v14339_v5 }
 0x747   : > { %8379 = vst.msk [vmem:[%s14396_s8 + $0x40] sm:$0xff] %vm8370_vm2, %v8327_v40  ;;  %v8295_v25 = vpop.f32.mrf.mxu1 }
 0x74c   : > { %v8328_v60 = vpop.f32.mrf.mxu2 }
 0x74d   : > { %v8329_v62 = vadd.f32 %v8328_v60, %v14346_v30 }
 0x74f   : > { %8380 = vst.msk [vmem:[%s14396_s8 + $0x48] sm:$0xff] %vm8370_vm2, %v8329_v62 }
 0x754   : > { %v8331_v4 = vpop.f32.mrf.mxu2 }
 0x755   : > { %v8332_v26 = vadd.f32 %v8331_v4, %v14352_v42 }
 0x757   : > { %8381 = vst.msk [vmem:[%s14396_s8 + $0x50] sm:$0xff] %vm8370_vm2, %v8332_v26 }
 0x75c   : > { %v8333_v10 = vpop.f32.mrf.mxu2 }
 0x75d   : > { %v8334_v51 = vadd.f32 %v8333_v10, %v14359_v21 }
 0x75f   : > { %8382 = vst.msk [vmem:[%s14396_s8 + $0x58] sm:$0xff] %vm8370_vm2, %v8334_v51 }
 0x764   : > { %v8336_v5 = vpop.f32.mrf.mxu2 }
 0x765   : > { %v8337_v39 = vadd.f32 %v8336_v5, %v14365_v58 }
 0x767   : > { %8383 = vst.msk [vmem:[%s14396_s8 + $0x60] sm:$0xff] %vm8370_vm2, %v8337_v39 }
 0x76c   : > { %v8338_v30 = vpop.f32.mrf.mxu2 }
 0x76d   : > { %v8339_v38 = vadd.f32 %v8338_v30, %v14372_v53 }
 0x76f   : > { %8384 = vst.msk [vmem:[%s14396_s8 + $0x68] sm:$0xff] %vm8370_vm2, %v8339_v38 }
 0x774   : > { %v8341_v42 = vpop.f32.mrf.mxu2 }
 0x775   : > { %v8342_v18 = vadd.f32 %v8341_v42, %v14378_v7 }
 0x777   : > { %8385 = vst.msk [vmem:[%s14396_s8 + $0x70] sm:$0xff] %vm8370_vm2, %v8342_v18 }
 0x77c   : > { %v8343_v21 = vpop.f32.mrf.mxu2 }
 0x77d   : > { %v8344_v24 = vadd.f32 %v8343_v21, %v14385_v32 }
 0x77f   : > { %8386 = vst.msk [vmem:[%s14396_s8 + $0x78] sm:$0xff] %vm8370_vm2, %v8344_v24 }
 0x784   : > { %v8346_v58 = vpop.f32.mrf.mxu2 }
 0x785   : > { %v8347_v0 = vadd.f32 %v8346_v58, %v14389_v31 }
 0x787   : > { %8387 = vst.msk [vmem:[%s14396_s8 + $0x80] sm:$0xff] %vm8370_vm2, %v8347_v0 }
 0x78c   : > { %v8348_v53 = vpop.f32.mrf.mxu2 }
 0x78d   : > { %v8349_v41 = vadd.f32 %v8348_v53, %v14403_v49 }
 0x78f   : > { %8388 = vst.msk [vmem:[%s14396_s8 + $0x88] sm:$0xff] %vm8370_vm2, %v8349_v41 }
 0x794   : > { %v8351_v7 = vpop.f32.mrf.mxu2 }
 0x795   : > { %v8352_v23 = vadd.f32 %v8351_v7, %v14410_v3 }
 0x797   : > { %8389 = vst.msk [vmem:[%s14396_s8 + $0x90] sm:$0xff] %vm8370_vm2, %v8352_v23 }
 0x79c   : > { %v8353_v32 = vpop.f32.mrf.mxu2 }
 0x79d   : > { %v8354_v37 = vadd.f32 %v8353_v32, %v14418_v14 }
 0x79f   : > { %8390 = vst.msk [vmem:[%s14396_s8 + $0x98] sm:$0xff] %vm8370_vm2, %v8354_v37 }
 0x7a4   : > { %v8356_v31 = vpop.f32.mrf.mxu2 }
 0x7a5   : > { %v8357_v59 = vadd.f32 %v8356_v31, %v14425_v20 }
 0x7a7   : > { %8391 = vst.msk [vmem:[%s14396_s8 + $0xa0] sm:$0xff] %vm8370_vm2, %v8357_v59 }
 0x7ac   : > { %v8358_v49 = vpop.f32.mrf.mxu2 }
 0x7ad   : > { %v8359_v63 = vadd.f32 %v8358_v49, %v14433_v9 }
 0x7af   : > { %8392 = vst.msk [vmem:[%s14396_s8 + $0xa8] sm:$0xff] %vm8370_vm2, %v8359_v63 }
 0x7b4   : > { %v8361_v3 = vpop.f32.mrf.mxu2 }
 0x7b5   : > { %v8362_v36 = vadd.f32 %v8361_v3, %v14440_v45 }
 0x7b7   : > { %8393 = vst.msk [vmem:[%s14396_s8 + $0xb0] sm:$0xff] %vm8370_vm2, %v8362_v36 }
 0x7bc   : > { %v8363_v28 = vpop.f32.mrf.mxu2 }
 0x7bd   : > { %v8364_v14 = vadd.f32 %v8363_v28, %v8291_v47 }
 0x7bf   : > { %8394 = vst.msk [vmem:[%s14396_s8 + $0xb8] sm:$0xff] %vm8370_vm2, %v8364_v14 }
 0x7c4   : > { %v8366_v8 = vpop.f32.mrf.mxu2 }
 0x7c5   : > { %v8367_v27 = vadd.f32 %v8366_v8, %v8294_v2 }
 0x7c7   : > { %8396 = vst.msk [vmem:[%s14396_s8 + $0xc0] sm:$0xf] %vm8395_vm10, %v8367_v27 }
 0x7cc   : > { %v8368_v20 = vpop.f32.mrf.mxu2 }
 0x7cd PF: > { %s17_s28 = sadd.s32 1, %s9728_s28   ;;  %s14833_s24 = smov %s9720_s26 }
 0x7ce   : > { %p14_p7 = scmp.ge.s32.totalorder %s17_s28, 8   ;;  %s14834_s25 = smov %s9724_s27 }
 0x7cf   : > { %s14835_s26 = smov %s14838_s29  ;;  %s14836_s27 = smov %s14842_s30 }
 0x7d0   :  { %16 = sbr.rel (!%p14_p7) target bundleno = 3 (0x3), region = 81 }

</bundles_post_ra>
